<compile_context>
chip_gen: v5e
topology: v5e:2x2
jax: 0.10.0
libtpu: 0.0.40
codegen_flags: <defaults>
</compile_context>

<pallas_src>
import numpy as np
import jax
import jax.numpy as jnp
from jax import lax
from jax.experimental import pallas as pl
from jax.experimental.pallas import tpu as pltpu

BN_EPS = 1e-5
# (Cin, Cout, pool) for the 8 Conv2dBlocks of CNN.conv_stack.
CONV_CFG = [
    (12, 32, False), (32, 32, False), (32, 64, False), (64, 128, True),
    (128, 128, False), (128, 128, False), (128, 128, False), (128, 256, False),
]
GSTRIDE = 128            # lane stride of one tap group in the K-stacked layout
KSTACK = 4 * GSTRIDE     # matmul K per conv layer
SPAD = 8                 # batch rows per spatial position in the flatten gather


def _round8(n):
    return (n + 7) // 8 * 8


def _npad(cout):
    return 256 if cout > 128 else 128


def _build_constants(B):
    """Tiny masks & 0/1 selection matrices, built once on the host."""
    R8, R4 = B * 81, B * 25
    ROWS8 = _round8(R8 + 10)          # 8x8 padded-row extent (wrap-safe)
    M4 = _round8(R4 + 6)              # 4x4 padded-row extent (wrap-safe)

    vm8 = np.zeros((ROWS8, 1), np.float32)    # 1.0 on real (h<8, w<8) rows
    vm4 = np.zeros((M4, 1), np.float32)       # 1.0 on real (h<4, w<4) rows
    for b in range(B):
        for h in range(8):
            for w in range(8):
                vm8[b * 81 + h * 9 + w, 0] = 1.0
        for h in range(4):
            for w in range(4):
                vm4[b * 25 + h * 5 + w, 0] = 1.0

    # MaxPool row compaction: pooled = SP @ (pairwise-maxed rows).
    sp = np.zeros((M4, ROWS8), np.float32)
    for b in range(B):
        for ho in range(4):
            for wo in range(4):
                sp[b * 25 + ho * 5 + wo, b * 81 + 2 * ho * 9 + 2 * wo] = 1.0

    # Flatten gather, 8-row-aligned groups: T[s*8 + b] = last[row4(b, s)].
    s2m = np.zeros((16 * SPAD, M4), np.float32)
    for s in range(16):
        h, w = divmod(s, 4)
        for b in range(B):
            s2m[s * SPAD + b, b * 25 + h * 5 + w] = 1.0

    return (ROWS8, M4, jnp.asarray(vm8), jnp.asarray(vm4),
            jnp.asarray(sp), jnp.asarray(s2m))


def init_params(key):
    """Deterministic synthetic parameters, pre-packed for the fused kernel.

    conv_w[l]: (512, Npad) bf16, K-stacked: rows [t*128, t*128+cin) of group t
               hold torch conv.weight[:, :, dh, dw].T for tap t = dh*2 + dw,
               zeros elsewhere (zero rows/cols never contribute).
    gammas/betas: (8, 256) f32, layer l in row l, channels [:cout] (BN 1/0),
               zeros past cout so padded output lanes are exactly 0.
    mlp: w1x (16, 256, 128) bf16 with w1x[h*4+w, c, n] == W1[c*16 + h*4 + w, n]
         (W1 = (4099,128) first-Linear weight, already (in,out)); w1y/b1/w2/b2/
         w3/b3 in f32.
    """
    params = {}
    conv_w = []
    gammas = np.zeros((len(CONV_CFG), 256), np.float32)
    betas = np.zeros((len(CONV_CFG), 256), np.float32)
    for li, (cin, cout, _pool) in enumerate(CONV_CFG):
        key, kw = jax.random.split(key)
        fan_in = 4 * cin                                     # 2*2*Cin
        w = jax.random.normal(kw, (4, cin, cout), jnp.float32) / np.sqrt(fan_in)
        wstack = jnp.zeros((KSTACK, _npad(cout)), jnp.float32)
        for t in range(4):
            wstack = wstack.at[t * GSTRIDE:t * GSTRIDE + cin, :cout].set(w[t])
        conv_w.append(wstack.astype(jnp.bfloat16))
        gammas[li, :cout] = 1.0                              # BatchNorm2d default affine
    params["conv_w"] = conv_w
    params["gammas"] = jnp.asarray(gammas)
    params["betas"] = jnp.asarray(betas)

    dims = [(256 * 4 * 4 + 3, 128), (128, 128), (128, 1)]
    mlp = []
    for (din, dout) in dims:
        key, kw, kb = jax.random.split(key, 3)
        bound = 1.0 / np.sqrt(din)
        w = jax.random.uniform(kw, (din, dout), jnp.float32, -bound, bound)
        b = jax.random.uniform(kb, (1, dout), jnp.float32, -bound, bound)
        mlp.append((w, b))
    (w1, b1), (w2, b2), (w3, b3) = mlp
    # One-time host-side permutation: flatten index of torch.flatten(NCHW) is
    # c*16 + h*4 + w.  bf16 halves the largest weight DMA.
    w1x = jnp.transpose(w1[:4096].reshape(256, 16, 128), (1, 0, 2)).astype(jnp.bfloat16)
    w1y = w1[4096:]
    params["mlp"] = (w1x, w1y, b1, w2, b2, w3, b3)
    return params


def build_cnn_forward(B):
    assert B <= SPAD
    ROWS8, M4, vm8, vm4, sp, s2m = _build_constants(B)
    n_layers = len(CONV_CFG)

    def kernel(*refs):
        x_ref, y_ref = refs[0], refs[1]
        cw = refs[2:2 + n_layers]
        g_ref, bt_ref, vm8_ref, vm4_ref, sp_ref, s2_ref = refs[10:16]
        w1x_hbm, w1y_ref, b1_ref, w2_ref, b2_ref, w3_ref, b3_ref = refs[16:23]
        o_ref = refs[23]
        buf0, buf1, w1x_vmem, w1x_sem = refs[24:28]
        bufs = (buf0, buf1)

        # Kick off the 1 MiB w1x HBM->VMEM copy; it overlaps the conv stack.
        w1x_copy = pltpu.make_async_copy(w1x_hbm, w1x_vmem, w1x_sem)
        w1x_copy.start()

        def store_stacked(dst, val, m, wp):
            # val: (m, 128) f32 with pad rows exactly 0.  Write the four
            # row-shifted tap copies into 128-lane-aligned channel groups so
            # the next layer's matmul LHS is one contiguous aligned block.
            # (roll wrap rows only ever feed masked pad/tail outputs.)
            for t, s in enumerate((0, 1, wp, wp + 1)):
                v = val if s == 0 else jnp.roll(val, -s, axis=0)
                dst[0:m, t * GSTRIDE:(t + 1) * GSTRIDE] = v

        # Stage the (padded-row-layout, lane-zero-padded) input into buffer 0.
        store_stacked(bufs[0], x_ref[...], ROWS8, 9)

        H, M = 8, ROWS8
        src = 0
        last = None
        for li, (cin, cout, pool) in enumerate(CONV_CFG):
            npad = _npad(cout)
            # One MXU matmul per layer: K = 4 taps x 128 lanes (weight rows
            # past cin are zero), bf16 operands, f32 accumulation.
            lhs = bufs[src][0:M, :].astype(jnp.bfloat16)
            z = jnp.dot(lhs, cw[li][...], preferred_element_type=jnp.float32)
            # BatchNorm2d, training mode, biased variance, all f32.
            vm = vm8_ref[...] if H == 8 else vm4_ref[...]          # (M, 1)
            inv_n = 1.0 / float(B * H * H)
            zm = z * vm
            mean = jnp.sum(zm, axis=0, keepdims=True) * inv_n
            var = jnp.sum(zm * z, axis=0, keepdims=True) * inv_n - mean * mean
            scale = g_ref[li:li + 1, 0:npad] * lax.rsqrt(var + BN_EPS)
            shift = bt_ref[li:li + 1, 0:npad] - mean * scale
            out = (z * scale + shift) * vm     # pad rows / pad lanes -> exactly 0
            if li == n_layers - 1:
                last = out                      # (M4, 256), consumed by the head
                break
            if pool:
                # Fused MaxPool2d((2,2)): two row-shifted maxes, then a 0/1
                # selection matmul compacts to the padded 4x4 row layout.
                t1 = jnp.maximum(out, jnp.roll(out, -1, axis=0))
                t2 = jnp.maximum(t1, jnp.roll(t1, -(H + 1), axis=0))
                out = jnp.dot(sp_ref[...], t2, preferred_element_type=jnp.float32)
                H, M = H // 2, M4
            store_stacked(bufs[1 - src], out, M, H + 1)
            src = 1 - src

        # ---- torch.flatten(NCHW) + cat([., y]) + linear_output_stack ----
        # One selection matmul gathers the 16 flatten rows per batch into
        # 8-row aligned groups: T[s*8 + b] = last[row4(b, s)].
        T = jnp.dot(s2_ref[...], last, preferred_element_type=jnp.float32)
        w1x_copy.wait()                         # w1x now resident in VMEM
        Tb = T.astype(jnp.bfloat16)
        h1x = jnp.zeros((SPAD, 128), jnp.float32)
        # TODO(synk): 16 aligned (8,256)@(256,128) dots; a single K=4096
        # contraction would need an in-kernel (32,256)->(B,4096) relayout that
        # Mosaic value-reshape does not reliably support.
        for s in range(16):
            h1x = h1x + jnp.dot(Tb[s * SPAD:(s + 1) * SPAD, :], w1x_vmem[s],
                                preferred_element_type=jnp.float32)
        ypart = jnp.dot(y_ref[...], w1y_ref[...], preferred_element_type=jnp.float32)
        h1 = jnp.maximum(h1x[0:B, :] + ypart + b1_ref[...], 0.0)
        h2 = jnp.maximum(
            jnp.dot(h1, w2_ref[...], preferred_element_type=jnp.float32) + b2_ref[...],
            0.0)
        o_ref[...] = jnp.dot(h2, w3_ref[...],
                             preferred_element_type=jnp.float32) + b3_ref[...]

    vspec = pl.BlockSpec(memory_space=pltpu.MemorySpace.VMEM)
    anyspec = pl.BlockSpec(memory_space=pl.ANY)
    n_inputs = 2 + n_layers + 6 + 7
    in_specs = [vspec] * n_inputs
    in_specs[16] = anyspec                      # w1x stays in HBM, copied manually

    cost = pl.CostEstimate(
        flops=int(2 * (4 * ROWS8 * KSTACK * 128 + 3 * M4 * KSTACK * 128
                       + M4 * KSTACK * 256 + M4 * ROWS8 * 128
                       + 16 * SPAD * M4 * 256 + 16 * SPAD * 256 * 128)),
        transcendentals=8 * 256,
        bytes_accessed=8_000_000)

    fused = pl.pallas_call(
        kernel,
        out_shape=jax.ShapeDtypeStruct((B, 1), jnp.float32),
        in_specs=in_specs,
        out_specs=vspec,
        scratch_shapes=[
            pltpu.VMEM((ROWS8, KSTACK), jnp.float32),      # ping activation buffer
            pltpu.VMEM((ROWS8, KSTACK), jnp.float32),      # pong activation buffer
            pltpu.VMEM((16, 256, 128), jnp.bfloat16),      # w1x landing buffer
            pltpu.SemaphoreType.DMA(()),                   # w1x copy semaphore
        ],
        compiler_params=pltpu.CompilerParams(vmem_limit_bytes=32 * 1024 * 1024),
        cost_estimate=cost,
    )
    # TODO(synk): at real batch sizes add a 'parallel' batch grid axis so
    # v7x's second TensorCore is used; at B=2 a single program is optimal.

    @jax.jit
    def forward(params, x_nchw, y):
        # NCHW -> NHWC -> pad 0-before / 1-after on H,W ('same' for k=2) ->
        # flat padded-row layout, lanes zero-padded to one 128-lane group.
        # Tiny one-time XLA glue on the input only.
        x = jnp.transpose(x_nchw, (0, 2, 3, 1)).astype(jnp.float32)
        xp = jnp.pad(x, ((0, 0), (0, 1), (0, 1), (0, 0)))
        x2d = xp.reshape(B * 81, CONV_CFG[0][0])
        x2d = jnp.pad(x2d, ((0, ROWS8 - B * 81), (0, GSTRIDE - CONV_CFG[0][0])))
        w1x, w1y, b1, w2, b2, w3, b3 = params["mlp"]
        return fused(x2d, y.astype(jnp.float32), *params["conv_w"],
                     params["gammas"], params["betas"], vm8, vm4, sp, s2m,
                     w1x, w1y, b1, w2, b2, w3, b3)

    return forward


def reference_forward(params, x_nchw, y):
    """Pure-JAX reference of the PyTorch module (correctness cross-check)."""
    x = jnp.transpose(x_nchw, (0, 2, 3, 1)).astype(jnp.float32)   # NHWC
    for li, (cin, cout, pool) in enumerate(CONV_CFG):
        ws = params["conv_w"][li].astype(jnp.float32)
        k = ws.reshape(4, GSTRIDE, ws.shape[1])[:, :cin, :cout].reshape(2, 2, cin, cout)
        xp = jnp.pad(x, ((0, 0), (0, 1), (0, 1), (0, 0)))          # pad-after 'same'
        x = lax.conv_general_dilated(xp, k, (1, 1), "VALID",
                                     dimension_numbers=("NHWC", "HWIO", "NHWC"))
        mean = jnp.mean(x, axis=(0, 1, 2), keepdims=True)
        var = jnp.mean((x - mean) ** 2, axis=(0, 1, 2), keepdims=True)
        x = ((x - mean) * lax.rsqrt(var + BN_EPS) * params["gammas"][li, :cout]
             + params["betas"][li, :cout])
        if pool:
            x = lax.reduce_window(x, -jnp.inf, lax.max,
                                  (1, 2, 2, 1), (1, 2, 2, 1), "VALID")
    Bn = x.shape[0]
    x_flat = jnp.transpose(x, (0, 3, 1, 2)).reshape(Bn, -1)        # NCHW flatten
    feats = jnp.concatenate([x_flat, y.astype(jnp.float32)], axis=1)
    w1x, w1y, b1, w2, b2, w3, b3 = params["mlp"]
    w1 = jnp.concatenate(
        [jnp.transpose(w1x.astype(jnp.float32), (1, 0, 2)).reshape(4096, 128), w1y], 0)
    h = jnp.maximum(feats @ w1 + b1, 0.0)
    h = jnp.maximum(h @ w2 + b2, 0.0)
    return h @ w3 + b3


if __name__ == "__main__":
    key = jax.random.PRNGKey(0)
    kp, kx, ky = jax.random.split(key, 3)
    params = init_params(kp)
    B = 2
    x = jax.random.normal(kx, (B, 12, 8, 8), jnp.float32)   # NCHW, like PyTorch
    y = jax.random.normal(ky, (B, 3), jnp.float32)

    forward = build_cnn_forward(B)
    out = forward(params, x, y)
    jax.block_until_ready(out)
    assert out.shape == (B, 1) and out.dtype == jnp.float32

    # Cross-check the fused kernel against the pure-JAX (f32) reference; the
    # kernel rounds matmul operands to bf16, hence the slightly loose bound.
    ref = jax.jit(reference_forward)(params, x, y)
    np.testing.assert_allclose(np.asarray(out), np.asarray(ref), rtol=3e-2, atol=3e-2)
    print("KERNEL_OK")
</pallas_src>

<mosaic_0001>
module attributes {stable_mosaic.version = 11 : i64} {
  func.func @kernel(%arg0: memref<176x128xf32, #tpu.memory_space<vmem>>, %arg1: memref<2x3xf32, #tpu.memory_space<vmem>>, %arg2: memref<512x128xbf16, #tpu.memory_space<vmem>>, %arg3: memref<512x128xbf16, #tpu.memory_space<vmem>>, %arg4: memref<512x128xbf16, #tpu.memory_space<vmem>>, %arg5: memref<512x128xbf16, #tpu.memory_space<vmem>>, %arg6: memref<512x128xbf16, #tpu.memory_space<vmem>>, %arg7: memref<512x128xbf16, #tpu.memory_space<vmem>>, %arg8: memref<512x128xbf16, #tpu.memory_space<vmem>>, %arg9: memref<512x256xbf16, #tpu.memory_space<vmem>>, %arg10: memref<8x256xf32, #tpu.memory_space<vmem>>, %arg11: memref<8x256xf32, #tpu.memory_space<vmem>>, %arg12: memref<176x1xf32, #tpu.memory_space<vmem>>, %arg13: memref<56x1xf32, #tpu.memory_space<vmem>>, %arg14: memref<56x176xf32, #tpu.memory_space<vmem>>, %arg15: memref<128x56xf32, #tpu.memory_space<vmem>>, %arg16: memref<16x256x128xbf16, #tpu.memory_space<any>>, %arg17: memref<3x128xf32, #tpu.memory_space<vmem>>, %arg18: memref<1x128xf32, #tpu.memory_space<vmem>>, %arg19: memref<128x128xf32, #tpu.memory_space<vmem>>, %arg20: memref<1x128xf32, #tpu.memory_space<vmem>>, %arg21: memref<128x1xf32, #tpu.memory_space<vmem>>, %arg22: memref<1x1xf32, #tpu.memory_space<vmem>>, %arg23: memref<2x1xf32, #tpu.memory_space<vmem>>, %arg24: memref<176x512xf32, #tpu.memory_space<vmem>>, %arg25: memref<176x512xf32, #tpu.memory_space<vmem>>, %arg26: memref<16x256x128xbf16, #tpu.memory_space<vmem>>, %arg27: memref<!tpu.dma_semaphore, #tpu.memory_space<semaphore_mem>>) attributes {dimension_semantics = [], scalar_prefetch = 0 : i64, scratch_operands = 4 : i64, tpu.core_type = #tpu.core_type<tc>} {
    tpu.enqueue_dma source(%arg16 : memref<16x256x128xbf16, #tpu.memory_space<any>>) target(%arg26 : memref<16x256x128xbf16, #tpu.memory_space<vmem>>) target_semaphore(%arg27 : memref<!tpu.dma_semaphore, #tpu.memory_space<semaphore_mem>>)
    %c0 = arith.constant 0 : index
    %c0_0 = arith.constant 0 : index
    %0 = vector.load %arg0[%c0, %c0_0] : memref<176x128xf32, #tpu.memory_space<vmem>>, vector<176x128xf32>
    %c0_1 = arith.constant 0 : index
    %c0_2 = arith.constant 0 : index
    %1 = vector.load %arg24[%c0_1, %c0_2] : memref<176x512xf32, #tpu.memory_space<vmem>>, vector<176x128xf32>
    tpu.vector_store %arg24[%c0_1, %c0_2], %0 {strides = array<i32>} : memref<176x512xf32, #tpu.memory_space<vmem>>, vector<176x128xf32>,
    %2 = vector.extract_strided_slice %0 {offsets = [1, 0], sizes = [175, 128], strides = [1, 1]} : vector<176x128xf32> to vector<175x128xf32>
    %3 = vector.extract_strided_slice %0 {offsets = [0, 0], sizes = [1, 128], strides = [1, 1]} : vector<176x128xf32> to vector<1x128xf32>
    %4 = tpu.concatenate %2, %3 in 0 : vector<175x128xf32>, vector<1x128xf32> -> vector<176x128xf32>
    %c0_3 = arith.constant 0 : index
    %c128 = arith.constant 128 : index
    %5 = vector.load %arg24[%c0_3, %c128] : memref<176x512xf32, #tpu.memory_space<vmem>>, vector<176x128xf32>
    tpu.vector_store %arg24[%c0_3, %c128], %4 {strides = array<i32>} : memref<176x512xf32, #tpu.memory_space<vmem>>, vector<176x128xf32>,
    %6 = vector.extract_strided_slice %0 {offsets = [9, 0], sizes = [167, 128], strides = [1, 1]} : vector<176x128xf32> to vector<167x128xf32>
    %7 = vector.extract_strided_slice %0 {offsets = [0, 0], sizes = [9, 128], strides = [1, 1]} : vector<176x128xf32> to vector<9x128xf32>
    %8 = tpu.concatenate %6, %7 in 0 : vector<167x128xf32>, vector<9x128xf32> -> vector<176x128xf32>
    %c0_4 = arith.constant 0 : index
    %c256 = arith.constant 256 : index
    %9 = vector.load %arg24[%c0_4, %c256] : memref<176x512xf32, #tpu.memory_space<vmem>>, vector<176x128xf32>
    tpu.vector_store %arg24[%c0_4, %c256], %8 {strides = array<i32>} : memref<176x512xf32, #tpu.memory_space<vmem>>, vector<176x128xf32>,
    %10 = vector.extract_strided_slice %0 {offsets = [10, 0], sizes = [166, 128], strides = [1, 1]} : vector<176x128xf32> to vector<166x128xf32>
    %11 = vector.extract_strided_slice %0 {offsets = [0, 0], sizes = [10, 128], strides = [1, 1]} : vector<176x128xf32> to vector<10x128xf32>
    %12 = tpu.concatenate %10, %11 in 0 : vector<166x128xf32>, vector<10x128xf32> -> vector<176x128xf32>
    %c0_5 = arith.constant 0 : index
    %c384 = arith.constant 384 : index
    %13 = vector.load %arg24[%c0_5, %c384] : memref<176x512xf32, #tpu.memory_space<vmem>>, vector<176x128xf32>
    tpu.vector_store %arg24[%c0_5, %c384], %12 {strides = array<i32>} : memref<176x512xf32, #tpu.memory_space<vmem>>, vector<176x128xf32>,
    %c0_6 = arith.constant 0 : index
    %c0_7 = arith.constant 0 : index
    %14 = vector.load %arg24[%c0_6, %c0_7] : memref<176x512xf32, #tpu.memory_space<vmem>>, vector<176x512xf32>
    %15 = arith.truncf %14 : vector<176x512xf32> to vector<176x512xbf16>
    %c0_8 = arith.constant 0 : index
    %c0_9 = arith.constant 0 : index
    %16 = vector.load %arg2[%c0_8, %c0_9] : memref<512x128xbf16, #tpu.memory_space<vmem>>, vector<512x128xbf16>
    %cst = arith.constant dense<0.000000e+00> : vector<176x128xf32>
    %17 = tpu.matmul %15, %16, %cst {dimension_numbers = #tpu.dot_dimension_numbers<[1], [0], [0], [1], [0, 0, 1, 1], [], []>} : vector<176x512xbf16>, vector<512x128xbf16>, vector<176x128xf32> -> vector<176x128xf32>
    %c0_10 = arith.constant 0 : index
    %c0_11 = arith.constant 0 : index
    %18 = vector.load %arg12[%c0_10, %c0_11] : memref<176x1xf32, #tpu.memory_space<vmem>>, vector<176x1xf32>
    %19 = vector.broadcast %18 : vector<176x1xf32> to vector<176x128xf32>
    %20 = arith.mulf %17, %19 : vector<176x128xf32>
    %cst_12 = arith.constant dense<0.000000e+00> : vector<128xf32>
    %21 = vector.multi_reduction <add>, %20, %cst_12 [0] : vector<176x128xf32> to vector<128xf32>
    %22 = vector.shape_cast %21 : vector<128xf32> to vector<1x128xf32>
    %cst_13 = arith.constant 7.812500e-03 : f32
    %23 = vector.broadcast %cst_13 : f32 to vector<1x128xf32>
    %24 = arith.mulf %22, %23 : vector<1x128xf32>
    %25 = arith.mulf %20, %17 : vector<176x128xf32>
    %cst_14 = arith.constant dense<0.000000e+00> : vector<128xf32>
    %26 = vector.multi_reduction <add>, %25, %cst_14 [0] : vector<176x128xf32> to vector<128xf32>
    %27 = vector.shape_cast %26 : vector<128xf32> to vector<1x128xf32>
    %cst_15 = arith.constant 7.812500e-03 : f32
    %28 = vector.broadcast %cst_15 : f32 to vector<1x128xf32>
    %29 = arith.mulf %27, %28 : vector<1x128xf32>
    %30 = arith.mulf %24, %24 : vector<1x128xf32>
    %31 = arith.subf %29, %30 : vector<1x128xf32>
    %c0_16 = arith.constant 0 : index
    %c0_17 = arith.constant 0 : index
    %32 = vector.load %arg10[%c0_16, %c0_17] : memref<8x256xf32, #tpu.memory_space<vmem>>, vector<1x128xf32>
    %cst_18 = arith.constant 9.99999974E-6 : f32
    %33 = vector.broadcast %cst_18 : f32 to vector<1x128xf32>
    %34 = arith.addf %31, %33 : vector<1x128xf32>
    %35 = math.rsqrt %34 : vector<1x128xf32>
    %36 = arith.mulf %32, %35 : vector<1x128xf32>
    %c0_19 = arith.constant 0 : index
    %c0_20 = arith.constant 0 : index
    %37 = vector.load %arg11[%c0_19, %c0_20] : memref<8x256xf32, #tpu.memory_space<vmem>>, vector<1x128xf32>
    %38 = arith.mulf %24, %36 : vector<1x128xf32>
    %39 = arith.subf %37, %38 : vector<1x128xf32>
    %40 = vector.broadcast %36 : vector<1x128xf32> to vector<176x128xf32>
    %41 = arith.mulf %17, %40 : vector<176x128xf32>
    %42 = vector.broadcast %39 : vector<1x128xf32> to vector<176x128xf32>
    %43 = arith.addf %41, %42 : vector<176x128xf32>
    %44 = vector.broadcast %18 : vector<176x1xf32> to vector<176x128xf32>
    %45 = arith.mulf %43, %44 : vector<176x128xf32>
    %c0_21 = arith.constant 0 : index
    %c0_22 = arith.constant 0 : index
    %46 = vector.load %arg25[%c0_21, %c0_22] : memref<176x512xf32, #tpu.memory_space<vmem>>, vector<176x128xf32>
    tpu.vector_store %arg25[%c0_21, %c0_22], %45 {strides = array<i32>} : memref<176x512xf32, #tpu.memory_space<vmem>>, vector<176x128xf32>,
    %47 = vector.extract_strided_slice %45 {offsets = [1, 0], sizes = [175, 128], strides = [1, 1]} : vector<176x128xf32> to vector<175x128xf32>
    %48 = vector.extract_strided_slice %45 {offsets = [0, 0], sizes = [1, 128], strides = [1, 1]} : vector<176x128xf32> to vector<1x128xf32>
    %49 = tpu.concatenate %47, %48 in 0 : vector<175x128xf32>, vector<1x128xf32> -> vector<176x128xf32>
    %c0_23 = arith.constant 0 : index
    %c128_24 = arith.constant 128 : index
    %50 = vector.load %arg25[%c0_23, %c128_24] : memref<176x512xf32, #tpu.memory_space<vmem>>, vector<176x128xf32>
    tpu.vector_store %arg25[%c0_23, %c128_24], %49 {strides = array<i32>} : memref<176x512xf32, #tpu.memory_space<vmem>>, vector<176x128xf32>,
    %51 = vector.extract_strided_slice %45 {offsets = [9, 0], sizes = [167, 128], strides = [1, 1]} : vector<176x128xf32> to vector<167x128xf32>
    %52 = vector.extract_strided_slice %45 {offsets = [0, 0], sizes = [9, 128], strides = [1, 1]} : vector<176x128xf32> to vector<9x128xf32>
    %53 = tpu.concatenate %51, %52 in 0 : vector<167x128xf32>, vector<9x128xf32> -> vector<176x128xf32>
    %c0_25 = arith.constant 0 : index
    %c256_26 = arith.constant 256 : index
    %54 = vector.load %arg25[%c0_25, %c256_26] : memref<176x512xf32, #tpu.memory_space<vmem>>, vector<176x128xf32>
    tpu.vector_store %arg25[%c0_25, %c256_26], %53 {strides = array<i32>} : memref<176x512xf32, #tpu.memory_space<vmem>>, vector<176x128xf32>,
    %55 = vector.extract_strided_slice %45 {offsets = [10, 0], sizes = [166, 128], strides = [1, 1]} : vector<176x128xf32> to vector<166x128xf32>
    %56 = vector.extract_strided_slice %45 {offsets = [0, 0], sizes = [10, 128], strides = [1, 1]} : vector<176x128xf32> to vector<10x128xf32>
    %57 = tpu.concatenate %55, %56 in 0 : vector<166x128xf32>, vector<10x128xf32> -> vector<176x128xf32>
    %c0_27 = arith.constant 0 : index
    %c384_28 = arith.constant 384 : index
    %58 = vector.load %arg25[%c0_27, %c384_28] : memref<176x512xf32, #tpu.memory_space<vmem>>, vector<176x128xf32>
    tpu.vector_store %arg25[%c0_27, %c384_28], %57 {strides = array<i32>} : memref<176x512xf32, #tpu.memory_space<vmem>>, vector<176x128xf32>,
    %c0_29 = arith.constant 0 : index
    %c0_30 = arith.constant 0 : index
    %59 = vector.load %arg25[%c0_29, %c0_30] : memref<176x512xf32, #tpu.memory_space<vmem>>, vector<176x512xf32>
    %60 = arith.truncf %59 : vector<176x512xf32> to vector<176x512xbf16>
    %c0_31 = arith.constant 0 : index
    %c0_32 = arith.constant 0 : index
    %61 = vector.load %arg3[%c0_31, %c0_32] : memref<512x128xbf16, #tpu.memory_space<vmem>>, vector<512x128xbf16>
    %cst_33 = arith.constant dense<0.000000e+00> : vector<176x128xf32>
    %62 = tpu.matmul %60, %61, %cst_33 {dimension_numbers = #tpu.dot_dimension_numbers<[1], [0], [0], [1], [0, 0, 1, 1], [], []>} : vector<176x512xbf16>, vector<512x128xbf16>, vector<176x128xf32> -> vector<176x128xf32>
    %c0_34 = arith.constant 0 : index
    %c0_35 = arith.constant 0 : index
    %63 = vector.load %arg12[%c0_34, %c0_35] : memref<176x1xf32, #tpu.memory_space<vmem>>, vector<176x1xf32>
    %64 = vector.broadcast %63 : vector<176x1xf32> to vector<176x128xf32>
    %65 = arith.mulf %62, %64 : vector<176x128xf32>
    %cst_36 = arith.constant dense<0.000000e+00> : vector<128xf32>
    %66 = vector.multi_reduction <add>, %65, %cst_36 [0] : vector<176x128xf32> to vector<128xf32>
    %67 = vector.shape_cast %66 : vector<128xf32> to vector<1x128xf32>
    %cst_37 = arith.constant 7.812500e-03 : f32
    %68 = vector.broadcast %cst_37 : f32 to vector<1x128xf32>
    %69 = arith.mulf %67, %68 : vector<1x128xf32>
    %70 = arith.mulf %65, %62 : vector<176x128xf32>
    %cst_38 = arith.constant dense<0.000000e+00> : vector<128xf32>
    %71 = vector.multi_reduction <add>, %70, %cst_38 [0] : vector<176x128xf32> to vector<128xf32>
    %72 = vector.shape_cast %71 : vector<128xf32> to vector<1x128xf32>
    %cst_39 = arith.constant 7.812500e-03 : f32
    %73 = vector.broadcast %cst_39 : f32 to vector<1x128xf32>
    %74 = arith.mulf %72, %73 : vector<1x128xf32>
    %75 = arith.mulf %69, %69 : vector<1x128xf32>
    %76 = arith.subf %74, %75 : vector<1x128xf32>
    %c1 = arith.constant 1 : index
    %c0_40 = arith.constant 0 : index
    %77 = vector.load %arg10[%c1, %c0_40] : memref<8x256xf32, #tpu.memory_space<vmem>>, vector<1x128xf32>
    %cst_41 = arith.constant 9.99999974E-6 : f32
    %78 = vector.broadcast %cst_41 : f32 to vector<1x128xf32>
    %79 = arith.addf %76, %78 : vector<1x128xf32>
    %80 = math.rsqrt %79 : vector<1x128xf32>
    %81 = arith.mulf %77, %80 : vector<1x128xf32>
    %c1_42 = arith.constant 1 : index
    %c0_43 = arith.constant 0 : index
    %82 = vector.load %arg11[%c1_42, %c0_43] : memref<8x256xf32, #tpu.memory_space<vmem>>, vector<1x128xf32>
    %83 = arith.mulf %69, %81 : vector<1x128xf32>
    %84 = arith.subf %82, %83 : vector<1x128xf32>
    %85 = vector.broadcast %81 : vector<1x128xf32> to vector<176x128xf32>
    %86 = arith.mulf %62, %85 : vector<176x128xf32>
    %87 = vector.broadcast %84 : vector<1x128xf32> to vector<176x128xf32>
    %88 = arith.addf %86, %87 : vector<176x128xf32>
    %89 = vector.broadcast %63 : vector<176x1xf32> to vector<176x128xf32>
    %90 = arith.mulf %88, %89 : vector<176x128xf32>
    %c0_44 = arith.constant 0 : index
    %c0_45 = arith.constant 0 : index
    %91 = vector.load %arg24[%c0_44, %c0_45] : memref<176x512xf32, #tpu.memory_space<vmem>>, vector<176x128xf32>
    tpu.vector_store %arg24[%c0_44, %c0_45], %90 {strides = array<i32>} : memref<176x512xf32, #tpu.memory_space<vmem>>, vector<176x128xf32>,
    %92 = vector.extract_strided_slice %90 {offsets = [1, 0], sizes = [175, 128], strides = [1, 1]} : vector<176x128xf32> to vector<175x128xf32>
    %93 = vector.extract_strided_slice %90 {offsets = [0, 0], sizes = [1, 128], strides = [1, 1]} : vector<176x128xf32> to vector<1x128xf32>
    %94 = tpu.concatenate %92, %93 in 0 : vector<175x128xf32>, vector<1x128xf32> -> vector<176x128xf32>
    %c0_46 = arith.constant 0 : index
    %c128_47 = arith.constant 128 : index
    %95 = vector.load %arg24[%c0_46, %c128_47] : memref<176x512xf32, #tpu.memory_space<vmem>>, vector<176x128xf32>
    tpu.vector_store %arg24[%c0_46, %c128_47], %94 {strides = array<i32>} : memref<176x512xf32, #tpu.memory_space<vmem>>, vector<176x128xf32>,
    %96 = vector.extract_strided_slice %90 {offsets = [9, 0], sizes = [167, 128], strides = [1, 1]} : vector<176x128xf32> to vector<167x128xf32>
    %97 = vector.extract_strided_slice %90 {offsets = [0, 0], sizes = [9, 128], strides = [1, 1]} : vector<176x128xf32> to vector<9x128xf32>
    %98 = tpu.concatenate %96, %97 in 0 : vector<167x128xf32>, vector<9x128xf32> -> vector<176x128xf32>
    %c0_48 = arith.constant 0 : index
    %c256_49 = arith.constant 256 : index
    %99 = vector.load %arg24[%c0_48, %c256_49] : memref<176x512xf32, #tpu.memory_space<vmem>>, vector<176x128xf32>
    tpu.vector_store %arg24[%c0_48, %c256_49], %98 {strides = array<i32>} : memref<176x512xf32, #tpu.memory_space<vmem>>, vector<176x128xf32>,
    %100 = vector.extract_strided_slice %90 {offsets = [10, 0], sizes = [166, 128], strides = [1, 1]} : vector<176x128xf32> to vector<166x128xf32>
    %101 = vector.extract_strided_slice %90 {offsets = [0, 0], sizes = [10, 128], strides = [1, 1]} : vector<176x128xf32> to vector<10x128xf32>
    %102 = tpu.concatenate %100, %101 in 0 : vector<166x128xf32>, vector<10x128xf32> -> vector<176x128xf32>
    %c0_50 = arith.constant 0 : index
    %c384_51 = arith.constant 384 : index
    %103 = vector.load %arg24[%c0_50, %c384_51] : memref<176x512xf32, #tpu.memory_space<vmem>>, vector<176x128xf32>
    tpu.vector_store %arg24[%c0_50, %c384_51], %102 {strides = array<i32>} : memref<176x512xf32, #tpu.memory_space<vmem>>, vector<176x128xf32>,
    %c0_52 = arith.constant 0 : index
    %c0_53 = arith.constant 0 : index
    %104 = vector.load %arg24[%c0_52, %c0_53] : memref<176x512xf32, #tpu.memory_space<vmem>>, vector<176x512xf32>
    %105 = arith.truncf %104 : vector<176x512xf32> to vector<176x512xbf16>
    %c0_54 = arith.constant 0 : index
    %c0_55 = arith.constant 0 : index
    %106 = vector.load %arg4[%c0_54, %c0_55] : memref<512x128xbf16, #tpu.memory_space<vmem>>, vector<512x128xbf16>
    %cst_56 = arith.constant dense<0.000000e+00> : vector<176x128xf32>
    %107 = tpu.matmul %105, %106, %cst_56 {dimension_numbers = #tpu.dot_dimension_numbers<[1], [0], [0], [1], [0, 0, 1, 1], [], []>} : vector<176x512xbf16>, vector<512x128xbf16>, vector<176x128xf32> -> vector<176x128xf32>
    %c0_57 = arith.constant 0 : index
    %c0_58 = arith.constant 0 : index
    %108 = vector.load %arg12[%c0_57, %c0_58] : memref<176x1xf32, #tpu.memory_space<vmem>>, vector<176x1xf32>
    %109 = vector.broadcast %108 : vector<176x1xf32> to vector<176x128xf32>
    %110 = arith.mulf %107, %109 : vector<176x128xf32>
    %cst_59 = arith.constant dense<0.000000e+00> : vector<128xf32>
    %111 = vector.multi_reduction <add>, %110, %cst_59 [0] : vector<176x128xf32> to vector<128xf32>
    %112 = vector.shape_cast %111 : vector<128xf32> to vector<1x128xf32>
    %cst_60 = arith.constant 7.812500e-03 : f32
    %113 = vector.broadcast %cst_60 : f32 to vector<1x128xf32>
    %114 = arith.mulf %112, %113 : vector<1x128xf32>
    %115 = arith.mulf %110, %107 : vector<176x128xf32>
    %cst_61 = arith.constant dense<0.000000e+00> : vector<128xf32>
    %116 = vector.multi_reduction <add>, %115, %cst_61 [0] : vector<176x128xf32> to vector<128xf32>
    %117 = vector.shape_cast %116 : vector<128xf32> to vector<1x128xf32>
    %cst_62 = arith.constant 7.812500e-03 : f32
    %118 = vector.broadcast %cst_62 : f32 to vector<1x128xf32>
    %119 = arith.mulf %117, %118 : vector<1x128xf32>
    %120 = arith.mulf %114, %114 : vector<1x128xf32>
    %121 = arith.subf %119, %120 : vector<1x128xf32>
    %c2 = arith.constant 2 : index
    %c0_63 = arith.constant 0 : index
    %122 = vector.load %arg10[%c2, %c0_63] : memref<8x256xf32, #tpu.memory_space<vmem>>, vector<1x128xf32>
    %cst_64 = arith.constant 9.99999974E-6 : f32
    %123 = vector.broadcast %cst_64 : f32 to vector<1x128xf32>
    %124 = arith.addf %121, %123 : vector<1x128xf32>
    %125 = math.rsqrt %124 : vector<1x128xf32>
    %126 = arith.mulf %122, %125 : vector<1x128xf32>
    %c2_65 = arith.constant 2 : index
    %c0_66 = arith.constant 0 : index
    %127 = vector.load %arg11[%c2_65, %c0_66] : memref<8x256xf32, #tpu.memory_space<vmem>>, vector<1x128xf32>
    %128 = arith.mulf %114, %126 : vector<1x128xf32>
    %129 = arith.subf %127, %128 : vector<1x128xf32>
    %130 = vector.broadcast %126 : vector<1x128xf32> to vector<176x128xf32>
    %131 = arith.mulf %107, %130 : vector<176x128xf32>
    %132 = vector.broadcast %129 : vector<1x128xf32> to vector<176x128xf32>
    %133 = arith.addf %131, %132 : vector<176x128xf32>
    %134 = vector.broadcast %108 : vector<176x1xf32> to vector<176x128xf32>
    %135 = arith.mulf %133, %134 : vector<176x128xf32>
    %c0_67 = arith.constant 0 : index
    %c0_68 = arith.constant 0 : index
    %136 = vector.load %arg25[%c0_67, %c0_68] : memref<176x512xf32, #tpu.memory_space<vmem>>, vector<176x128xf32>
    tpu.vector_store %arg25[%c0_67, %c0_68], %135 {strides = array<i32>} : memref<176x512xf32, #tpu.memory_space<vmem>>, vector<176x128xf32>,
    %137 = vector.extract_strided_slice %135 {offsets = [1, 0], sizes = [175, 128], strides = [1, 1]} : vector<176x128xf32> to vector<175x128xf32>
    %138 = vector.extract_strided_slice %135 {offsets = [0, 0], sizes = [1, 128], strides = [1, 1]} : vector<176x128xf32> to vector<1x128xf32>
    %139 = tpu.concatenate %137, %138 in 0 : vector<175x128xf32>, vector<1x128xf32> -> vector<176x128xf32>
    %c0_69 = arith.constant 0 : index
    %c128_70 = arith.constant 128 : index
    %140 = vector.load %arg25[%c0_69, %c128_70] : memref<176x512xf32, #tpu.memory_space<vmem>>, vector<176x128xf32>
    tpu.vector_store %arg25[%c0_69, %c128_70], %139 {strides = array<i32>} : memref<176x512xf32, #tpu.memory_space<vmem>>, vector<176x128xf32>,
    %141 = vector.extract_strided_slice %135 {offsets = [9, 0], sizes = [167, 128], strides = [1, 1]} : vector<176x128xf32> to vector<167x128xf32>
    %142 = vector.extract_strided_slice %135 {offsets = [0, 0], sizes = [9, 128], strides = [1, 1]} : vector<176x128xf32> to vector<9x128xf32>
    %143 = tpu.concatenate %141, %142 in 0 : vector<167x128xf32>, vector<9x128xf32> -> vector<176x128xf32>
    %c0_71 = arith.constant 0 : index
    %c256_72 = arith.constant 256 : index
    %144 = vector.load %arg25[%c0_71, %c256_72] : memref<176x512xf32, #tpu.memory_space<vmem>>, vector<176x128xf32>
    tpu.vector_store %arg25[%c0_71, %c256_72], %143 {strides = array<i32>} : memref<176x512xf32, #tpu.memory_space<vmem>>, vector<176x128xf32>,
    %145 = vector.extract_strided_slice %135 {offsets = [10, 0], sizes = [166, 128], strides = [1, 1]} : vector<176x128xf32> to vector<166x128xf32>
    %146 = vector.extract_strided_slice %135 {offsets = [0, 0], sizes = [10, 128], strides = [1, 1]} : vector<176x128xf32> to vector<10x128xf32>
    %147 = tpu.concatenate %145, %146 in 0 : vector<166x128xf32>, vector<10x128xf32> -> vector<176x128xf32>
    %c0_73 = arith.constant 0 : index
    %c384_74 = arith.constant 384 : index
    %148 = vector.load %arg25[%c0_73, %c384_74] : memref<176x512xf32, #tpu.memory_space<vmem>>, vector<176x128xf32>
    tpu.vector_store %arg25[%c0_73, %c384_74], %147 {strides = array<i32>} : memref<176x512xf32, #tpu.memory_space<vmem>>, vector<176x128xf32>,
    %c0_75 = arith.constant 0 : index
    %c0_76 = arith.constant 0 : index
    %149 = vector.load %arg25[%c0_75, %c0_76] : memref<176x512xf32, #tpu.memory_space<vmem>>, vector<176x512xf32>
    %150 = arith.truncf %149 : vector<176x512xf32> to vector<176x512xbf16>
    %c0_77 = arith.constant 0 : index
    %c0_78 = arith.constant 0 : index
    %151 = vector.load %arg5[%c0_77, %c0_78] : memref<512x128xbf16, #tpu.memory_space<vmem>>, vector<512x128xbf16>
    %cst_79 = arith.constant dense<0.000000e+00> : vector<176x128xf32>
    %152 = tpu.matmul %150, %151, %cst_79 {dimension_numbers = #tpu.dot_dimension_numbers<[1], [0], [0], [1], [0, 0, 1, 1], [], []>} : vector<176x512xbf16>, vector<512x128xbf16>, vector<176x128xf32> -> vector<176x128xf32>
    %c0_80 = arith.constant 0 : index
    %c0_81 = arith.constant 0 : index
    %153 = vector.load %arg12[%c0_80, %c0_81] : memref<176x1xf32, #tpu.memory_space<vmem>>, vector<176x1xf32>
    %154 = vector.broadcast %153 : vector<176x1xf32> to vector<176x128xf32>
    %155 = arith.mulf %152, %154 : vector<176x128xf32>
    %cst_82 = arith.constant dense<0.000000e+00> : vector<128xf32>
    %156 = vector.multi_reduction <add>, %155, %cst_82 [0] : vector<176x128xf32> to vector<128xf32>
    %157 = vector.shape_cast %156 : vector<128xf32> to vector<1x128xf32>
    %cst_83 = arith.constant 7.812500e-03 : f32
    %158 = vector.broadcast %cst_83 : f32 to vector<1x128xf32>
    %159 = arith.mulf %157, %158 : vector<1x128xf32>
    %160 = arith.mulf %155, %152 : vector<176x128xf32>
    %cst_84 = arith.constant dense<0.000000e+00> : vector<128xf32>
    %161 = vector.multi_reduction <add>, %160, %cst_84 [0] : vector<176x128xf32> to vector<128xf32>
    %162 = vector.shape_cast %161 : vector<128xf32> to vector<1x128xf32>
    %cst_85 = arith.constant 7.812500e-03 : f32
    %163 = vector.broadcast %cst_85 : f32 to vector<1x128xf32>
    %164 = arith.mulf %162, %163 : vector<1x128xf32>
    %165 = arith.mulf %159, %159 : vector<1x128xf32>
    %166 = arith.subf %164, %165 : vector<1x128xf32>
    %c3 = arith.constant 3 : index
    %c0_86 = arith.constant 0 : index
    %167 = vector.load %arg10[%c3, %c0_86] : memref<8x256xf32, #tpu.memory_space<vmem>>, vector<1x128xf32>
    %cst_87 = arith.constant 9.99999974E-6 : f32
    %168 = vector.broadcast %cst_87 : f32 to vector<1x128xf32>
    %169 = arith.addf %166, %168 : vector<1x128xf32>
    %170 = math.rsqrt %169 : vector<1x128xf32>
    %171 = arith.mulf %167, %170 : vector<1x128xf32>
    %c3_88 = arith.constant 3 : index
    %c0_89 = arith.constant 0 : index
    %172 = vector.load %arg11[%c3_88, %c0_89] : memref<8x256xf32, #tpu.memory_space<vmem>>, vector<1x128xf32>
    %173 = arith.mulf %159, %171 : vector<1x128xf32>
    %174 = arith.subf %172, %173 : vector<1x128xf32>
    %175 = vector.broadcast %171 : vector<1x128xf32> to vector<176x128xf32>
    %176 = arith.mulf %152, %175 : vector<176x128xf32>
    %177 = vector.broadcast %174 : vector<1x128xf32> to vector<176x128xf32>
    %178 = arith.addf %176, %177 : vector<176x128xf32>
    %179 = vector.broadcast %153 : vector<176x1xf32> to vector<176x128xf32>
    %180 = arith.mulf %178, %179 : vector<176x128xf32>
    %181 = vector.extract_strided_slice %180 {offsets = [1, 0], sizes = [175, 128], strides = [1, 1]} : vector<176x128xf32> to vector<175x128xf32>
    %182 = vector.extract_strided_slice %180 {offsets = [0, 0], sizes = [1, 128], strides = [1, 1]} : vector<176x128xf32> to vector<1x128xf32>
    %183 = tpu.concatenate %181, %182 in 0 : vector<175x128xf32>, vector<1x128xf32> -> vector<176x128xf32>
    %184 = arith.maximumf %180, %183 : vector<176x128xf32>
    %185 = vector.extract_strided_slice %184 {offsets = [9, 0], sizes = [167, 128], strides = [1, 1]} : vector<176x128xf32> to vector<167x128xf32>
    %186 = vector.extract_strided_slice %184 {offsets = [0, 0], sizes = [9, 128], strides = [1, 1]} : vector<176x128xf32> to vector<9x128xf32>
    %187 = tpu.concatenate %185, %186 in 0 : vector<167x128xf32>, vector<9x128xf32> -> vector<176x128xf32>
    %188 = arith.maximumf %184, %187 : vector<176x128xf32>
    %c0_90 = arith.constant 0 : index
    %c0_91 = arith.constant 0 : index
    %189 = vector.load %arg14[%c0_90, %c0_91] : memref<56x176xf32, #tpu.memory_space<vmem>>, vector<56x176xf32>
    %cst_92 = arith.constant dense<0.000000e+00> : vector<56x128xf32>
    %190 = tpu.matmul %189, %188, %cst_92 {dimension_numbers = #tpu.dot_dimension_numbers<[1], [0], [0], [1], [0, 0, 1, 1], [], []>} : vector<56x176xf32>, vector<176x128xf32>, vector<56x128xf32> -> vector<56x128xf32>
    %c0_93 = arith.constant 0 : index
    %c0_94 = arith.constant 0 : index
    %191 = vector.load %arg24[%c0_93, %c0_94] : memref<176x512xf32, #tpu.memory_space<vmem>>, vector<56x128xf32>
    tpu.vector_store %arg24[%c0_93, %c0_94], %190 {strides = array<i32>} : memref<176x512xf32, #tpu.memory_space<vmem>>, vector<56x128xf32>,
    %192 = vector.extract_strided_slice %190 {offsets = [1, 0], sizes = [55, 128], strides = [1, 1]} : vector<56x128xf32> to vector<55x128xf32>
    %193 = vector.extract_strided_slice %190 {offsets = [0, 0], sizes = [1, 128], strides = [1, 1]} : vector<56x128xf32> to vector<1x128xf32>
    %194 = tpu.concatenate %192, %193 in 0 : vector<55x128xf32>, vector<1x128xf32> -> vector<56x128xf32>
    %c0_95 = arith.constant 0 : index
    %c128_96 = arith.constant 128 : index
    %195 = vector.load %arg24[%c0_95, %c128_96] : memref<176x512xf32, #tpu.memory_space<vmem>>, vector<56x128xf32>
    tpu.vector_store %arg24[%c0_95, %c128_96], %194 {strides = array<i32>} : memref<176x512xf32, #tpu.memory_space<vmem>>, vector<56x128xf32>,
    %196 = vector.extract_strided_slice %190 {offsets = [5, 0], sizes = [51, 128], strides = [1, 1]} : vector<56x128xf32> to vector<51x128xf32>
    %197 = vector.extract_strided_slice %190 {offsets = [0, 0], sizes = [5, 128], strides = [1, 1]} : vector<56x128xf32> to vector<5x128xf32>
    %198 = tpu.concatenate %196, %197 in 0 : vector<51x128xf32>, vector<5x128xf32> -> vector<56x128xf32>
    %c0_97 = arith.constant 0 : index
    %c256_98 = arith.constant 256 : index
    %199 = vector.load %arg24[%c0_97, %c256_98] : memref<176x512xf32, #tpu.memory_space<vmem>>, vector<56x128xf32>
    tpu.vector_store %arg24[%c0_97, %c256_98], %198 {strides = array<i32>} : memref<176x512xf32, #tpu.memory_space<vmem>>, vector<56x128xf32>,
    %200 = vector.extract_strided_slice %190 {offsets = [6, 0], sizes = [50, 128], strides = [1, 1]} : vector<56x128xf32> to vector<50x128xf32>
    %201 = vector.extract_strided_slice %190 {offsets = [0, 0], sizes = [6, 128], strides = [1, 1]} : vector<56x128xf32> to vector<6x128xf32>
    %202 = tpu.concatenate %200, %201 in 0 : vector<50x128xf32>, vector<6x128xf32> -> vector<56x128xf32>
    %c0_99 = arith.constant 0 : index
    %c384_100 = arith.constant 384 : index
    %203 = vector.load %arg24[%c0_99, %c384_100] : memref<176x512xf32, #tpu.memory_space<vmem>>, vector<56x128xf32>
    tpu.vector_store %arg24[%c0_99, %c384_100], %202 {strides = array<i32>} : memref<176x512xf32, #tpu.memory_space<vmem>>, vector<56x128xf32>,
    %c0_101 = arith.constant 0 : index
    %c0_102 = arith.constant 0 : index
    %204 = vector.load %arg24[%c0_101, %c0_102] : memref<176x512xf32, #tpu.memory_space<vmem>>, vector<56x512xf32>
    %205 = arith.truncf %204 : vector<56x512xf32> to vector<56x512xbf16>
    %c0_103 = arith.constant 0 : index
    %c0_104 = arith.constant 0 : index
    %206 = vector.load %arg6[%c0_103, %c0_104] : memref<512x128xbf16, #tpu.memory_space<vmem>>, vector<512x128xbf16>
    %cst_105 = arith.constant dense<0.000000e+00> : vector<56x128xf32>
    %207 = tpu.matmul %205, %206, %cst_105 {dimension_numbers = #tpu.dot_dimension_numbers<[1], [0], [0], [1], [0, 0, 1, 1], [], []>} : vector<56x512xbf16>, vector<512x128xbf16>, vector<56x128xf32> -> vector<56x128xf32>
    %c0_106 = arith.constant 0 : index
    %c0_107 = arith.constant 0 : index
    %208 = vector.load %arg13[%c0_106, %c0_107] : memref<56x1xf32, #tpu.memory_space<vmem>>, vector<56x1xf32>
    %209 = vector.broadcast %208 : vector<56x1xf32> to vector<56x128xf32>
    %210 = arith.mulf %207, %209 : vector<56x128xf32>
    %cst_108 = arith.constant dense<0.000000e+00> : vector<128xf32>
    %211 = vector.multi_reduction <add>, %210, %cst_108 [0] : vector<56x128xf32> to vector<128xf32>
    %212 = vector.shape_cast %211 : vector<128xf32> to vector<1x128xf32>
    %cst_109 = arith.constant 3.125000e-02 : f32
    %213 = vector.broadcast %cst_109 : f32 to vector<1x128xf32>
    %214 = arith.mulf %212, %213 : vector<1x128xf32>
    %215 = arith.mulf %210, %207 : vector<56x128xf32>
    %cst_110 = arith.constant dense<0.000000e+00> : vector<128xf32>
    %216 = vector.multi_reduction <add>, %215, %cst_110 [0] : vector<56x128xf32> to vector<128xf32>
    %217 = vector.shape_cast %216 : vector<128xf32> to vector<1x128xf32>
    %cst_111 = arith.constant 3.125000e-02 : f32
    %218 = vector.broadcast %cst_111 : f32 to vector<1x128xf32>
    %219 = arith.mulf %217, %218 : vector<1x128xf32>
    %220 = arith.mulf %214, %214 : vector<1x128xf32>
    %221 = arith.subf %219, %220 : vector<1x128xf32>
    %c4 = arith.constant 4 : index
    %c0_112 = arith.constant 0 : index
    %222 = vector.load %arg10[%c4, %c0_112] : memref<8x256xf32, #tpu.memory_space<vmem>>, vector<1x128xf32>
    %cst_113 = arith.constant 9.99999974E-6 : f32
    %223 = vector.broadcast %cst_113 : f32 to vector<1x128xf32>
    %224 = arith.addf %221, %223 : vector<1x128xf32>
    %225 = math.rsqrt %224 : vector<1x128xf32>
    %226 = arith.mulf %222, %225 : vector<1x128xf32>
    %c4_114 = arith.constant 4 : index
    %c0_115 = arith.constant 0 : index
    %227 = vector.load %arg11[%c4_114, %c0_115] : memref<8x256xf32, #tpu.memory_space<vmem>>, vector<1x128xf32>
    %228 = arith.mulf %214, %226 : vector<1x128xf32>
    %229 = arith.subf %227, %228 : vector<1x128xf32>
    %230 = vector.broadcast %226 : vector<1x128xf32> to vector<56x128xf32>
    %231 = arith.mulf %207, %230 : vector<56x128xf32>
    %232 = vector.broadcast %229 : vector<1x128xf32> to vector<56x128xf32>
    %233 = arith.addf %231, %232 : vector<56x128xf32>
    %234 = vector.broadcast %208 : vector<56x1xf32> to vector<56x128xf32>
    %235 = arith.mulf %233, %234 : vector<56x128xf32>
    %c0_116 = arith.constant 0 : index
    %c0_117 = arith.constant 0 : index
    %236 = vector.load %arg25[%c0_116, %c0_117] : memref<176x512xf32, #tpu.memory_space<vmem>>, vector<56x128xf32>
    tpu.vector_store %arg25[%c0_116, %c0_117], %235 {strides = array<i32>} : memref<176x512xf32, #tpu.memory_space<vmem>>, vector<56x128xf32>,
    %237 = vector.extract_strided_slice %235 {offsets = [1, 0], sizes = [55, 128], strides = [1, 1]} : vector<56x128xf32> to vector<55x128xf32>
    %238 = vector.extract_strided_slice %235 {offsets = [0, 0], sizes = [1, 128], strides = [1, 1]} : vector<56x128xf32> to vector<1x128xf32>
    %239 = tpu.concatenate %237, %238 in 0 : vector<55x128xf32>, vector<1x128xf32> -> vector<56x128xf32>
    %c0_118 = arith.constant 0 : index
    %c128_119 = arith.constant 128 : index
    %240 = vector.load %arg25[%c0_118, %c128_119] : memref<176x512xf32, #tpu.memory_space<vmem>>, vector<56x128xf32>
    tpu.vector_store %arg25[%c0_118, %c128_119], %239 {strides = array<i32>} : memref<176x512xf32, #tpu.memory_space<vmem>>, vector<56x128xf32>,
    %241 = vector.extract_strided_slice %235 {offsets = [5, 0], sizes = [51, 128], strides = [1, 1]} : vector<56x128xf32> to vector<51x128xf32>
    %242 = vector.extract_strided_slice %235 {offsets = [0, 0], sizes = [5, 128], strides = [1, 1]} : vector<56x128xf32> to vector<5x128xf32>
    %243 = tpu.concatenate %241, %242 in 0 : vector<51x128xf32>, vector<5x128xf32> -> vector<56x128xf32>
    %c0_120 = arith.constant 0 : index
    %c256_121 = arith.constant 256 : index
    %244 = vector.load %arg25[%c0_120, %c256_121] : memref<176x512xf32, #tpu.memory_space<vmem>>, vector<56x128xf32>
    tpu.vector_store %arg25[%c0_120, %c256_121], %243 {strides = array<i32>} : memref<176x512xf32, #tpu.memory_space<vmem>>, vector<56x128xf32>,
    %245 = vector.extract_strided_slice %235 {offsets = [6, 0], sizes = [50, 128], strides = [1, 1]} : vector<56x128xf32> to vector<50x128xf32>
    %246 = vector.extract_strided_slice %235 {offsets = [0, 0], sizes = [6, 128], strides = [1, 1]} : vector<56x128xf32> to vector<6x128xf32>
    %247 = tpu.concatenate %245, %246 in 0 : vector<50x128xf32>, vector<6x128xf32> -> vector<56x128xf32>
    %c0_122 = arith.constant 0 : index
    %c384_123 = arith.constant 384 : index
    %248 = vector.load %arg25[%c0_122, %c384_123] : memref<176x512xf32, #tpu.memory_space<vmem>>, vector<56x128xf32>
    tpu.vector_store %arg25[%c0_122, %c384_123], %247 {strides = array<i32>} : memref<176x512xf32, #tpu.memory_space<vmem>>, vector<56x128xf32>,
    %c0_124 = arith.constant 0 : index
    %c0_125 = arith.constant 0 : index
    %249 = vector.load %arg25[%c0_124, %c0_125] : memref<176x512xf32, #tpu.memory_space<vmem>>, vector<56x512xf32>
    %250 = arith.truncf %249 : vector<56x512xf32> to vector<56x512xbf16>
    %c0_126 = arith.constant 0 : index
    %c0_127 = arith.constant 0 : index
    %251 = vector.load %arg7[%c0_126, %c0_127] : memref<512x128xbf16, #tpu.memory_space<vmem>>, vector<512x128xbf16>
    %cst_128 = arith.constant dense<0.000000e+00> : vector<56x128xf32>
    %252 = tpu.matmul %250, %251, %cst_128 {dimension_numbers = #tpu.dot_dimension_numbers<[1], [0], [0], [1], [0, 0, 1, 1], [], []>} : vector<56x512xbf16>, vector<512x128xbf16>, vector<56x128xf32> -> vector<56x128xf32>
    %c0_129 = arith.constant 0 : index
    %c0_130 = arith.constant 0 : index
    %253 = vector.load %arg13[%c0_129, %c0_130] : memref<56x1xf32, #tpu.memory_space<vmem>>, vector<56x1xf32>
    %254 = vector.broadcast %253 : vector<56x1xf32> to vector<56x128xf32>
    %255 = arith.mulf %252, %254 : vector<56x128xf32>
    %cst_131 = arith.constant dense<0.000000e+00> : vector<128xf32>
    %256 = vector.multi_reduction <add>, %255, %cst_131 [0] : vector<56x128xf32> to vector<128xf32>
    %257 = vector.shape_cast %256 : vector<128xf32> to vector<1x128xf32>
    %cst_132 = arith.constant 3.125000e-02 : f32
    %258 = vector.broadcast %cst_132 : f32 to vector<1x128xf32>
    %259 = arith.mulf %257, %258 : vector<1x128xf32>
    %260 = arith.mulf %255, %252 : vector<56x128xf32>
    %cst_133 = arith.constant dense<0.000000e+00> : vector<128xf32>
    %261 = vector.multi_reduction <add>, %260, %cst_133 [0] : vector<56x128xf32> to vector<128xf32>
    %262 = vector.shape_cast %261 : vector<128xf32> to vector<1x128xf32>
    %cst_134 = arith.constant 3.125000e-02 : f32
    %263 = vector.broadcast %cst_134 : f32 to vector<1x128xf32>
    %264 = arith.mulf %262, %263 : vector<1x128xf32>
    %265 = arith.mulf %259, %259 : vector<1x128xf32>
    %266 = arith.subf %264, %265 : vector<1x128xf32>
    %c5 = arith.constant 5 : index
    %c0_135 = arith.constant 0 : index
    %267 = vector.load %arg10[%c5, %c0_135] : memref<8x256xf32, #tpu.memory_space<vmem>>, vector<1x128xf32>
    %cst_136 = arith.constant 9.99999974E-6 : f32
    %268 = vector.broadcast %cst_136 : f32 to vector<1x128xf32>
    %269 = arith.addf %266, %268 : vector<1x128xf32>
    %270 = math.rsqrt %269 : vector<1x128xf32>
    %271 = arith.mulf %267, %270 : vector<1x128xf32>
    %c5_137 = arith.constant 5 : index
    %c0_138 = arith.constant 0 : index
    %272 = vector.load %arg11[%c5_137, %c0_138] : memref<8x256xf32, #tpu.memory_space<vmem>>, vector<1x128xf32>
    %273 = arith.mulf %259, %271 : vector<1x128xf32>
    %274 = arith.subf %272, %273 : vector<1x128xf32>
    %275 = vector.broadcast %271 : vector<1x128xf32> to vector<56x128xf32>
    %276 = arith.mulf %252, %275 : vector<56x128xf32>
    %277 = vector.broadcast %274 : vector<1x128xf32> to vector<56x128xf32>
    %278 = arith.addf %276, %277 : vector<56x128xf32>
    %279 = vector.broadcast %253 : vector<56x1xf32> to vector<56x128xf32>
    %280 = arith.mulf %278, %279 : vector<56x128xf32>
    %c0_139 = arith.constant 0 : index
    %c0_140 = arith.constant 0 : index
    %281 = vector.load %arg24[%c0_139, %c0_140] : memref<176x512xf32, #tpu.memory_space<vmem>>, vector<56x128xf32>
    tpu.vector_store %arg24[%c0_139, %c0_140], %280 {strides = array<i32>} : memref<176x512xf32, #tpu.memory_space<vmem>>, vector<56x128xf32>,
    %282 = vector.extract_strided_slice %280 {offsets = [1, 0], sizes = [55, 128], strides = [1, 1]} : vector<56x128xf32> to vector<55x128xf32>
    %283 = vector.extract_strided_slice %280 {offsets = [0, 0], sizes = [1, 128], strides = [1, 1]} : vector<56x128xf32> to vector<1x128xf32>
    %284 = tpu.concatenate %282, %283 in 0 : vector<55x128xf32>, vector<1x128xf32> -> vector<56x128xf32>
    %c0_141 = arith.constant 0 : index
    %c128_142 = arith.constant 128 : index
    %285 = vector.load %arg24[%c0_141, %c128_142] : memref<176x512xf32, #tpu.memory_space<vmem>>, vector<56x128xf32>
    tpu.vector_store %arg24[%c0_141, %c128_142], %284 {strides = array<i32>} : memref<176x512xf32, #tpu.memory_space<vmem>>, vector<56x128xf32>,
    %286 = vector.extract_strided_slice %280 {offsets = [5, 0], sizes = [51, 128], strides = [1, 1]} : vector<56x128xf32> to vector<51x128xf32>
    %287 = vector.extract_strided_slice %280 {offsets = [0, 0], sizes = [5, 128], strides = [1, 1]} : vector<56x128xf32> to vector<5x128xf32>
    %288 = tpu.concatenate %286, %287 in 0 : vector<51x128xf32>, vector<5x128xf32> -> vector<56x128xf32>
    %c0_143 = arith.constant 0 : index
    %c256_144 = arith.constant 256 : index
    %289 = vector.load %arg24[%c0_143, %c256_144] : memref<176x512xf32, #tpu.memory_space<vmem>>, vector<56x128xf32>
    tpu.vector_store %arg24[%c0_143, %c256_144], %288 {strides = array<i32>} : memref<176x512xf32, #tpu.memory_space<vmem>>, vector<56x128xf32>,
    %290 = vector.extract_strided_slice %280 {offsets = [6, 0], sizes = [50, 128], strides = [1, 1]} : vector<56x128xf32> to vector<50x128xf32>
    %291 = vector.extract_strided_slice %280 {offsets = [0, 0], sizes = [6, 128], strides = [1, 1]} : vector<56x128xf32> to vector<6x128xf32>
    %292 = tpu.concatenate %290, %291 in 0 : vector<50x128xf32>, vector<6x128xf32> -> vector<56x128xf32>
    %c0_145 = arith.constant 0 : index
    %c384_146 = arith.constant 384 : index
    %293 = vector.load %arg24[%c0_145, %c384_146] : memref<176x512xf32, #tpu.memory_space<vmem>>, vector<56x128xf32>
    tpu.vector_store %arg24[%c0_145, %c384_146], %292 {strides = array<i32>} : memref<176x512xf32, #tpu.memory_space<vmem>>, vector<56x128xf32>,
    %c0_147 = arith.constant 0 : index
    %c0_148 = arith.constant 0 : index
    %294 = vector.load %arg24[%c0_147, %c0_148] : memref<176x512xf32, #tpu.memory_space<vmem>>, vector<56x512xf32>
    %295 = arith.truncf %294 : vector<56x512xf32> to vector<56x512xbf16>
    %c0_149 = arith.constant 0 : index
    %c0_150 = arith.constant 0 : index
    %296 = vector.load %arg8[%c0_149, %c0_150] : memref<512x128xbf16, #tpu.memory_space<vmem>>, vector<512x128xbf16>
    %cst_151 = arith.constant dense<0.000000e+00> : vector<56x128xf32>
    %297 = tpu.matmul %295, %296, %cst_151 {dimension_numbers = #tpu.dot_dimension_numbers<[1], [0], [0], [1], [0, 0, 1, 1], [], []>} : vector<56x512xbf16>, vector<512x128xbf16>, vector<56x128xf32> -> vector<56x128xf32>
    %c0_152 = arith.constant 0 : index
    %c0_153 = arith.constant 0 : index
    %298 = vector.load %arg13[%c0_152, %c0_153] : memref<56x1xf32, #tpu.memory_space<vmem>>, vector<56x1xf32>
    %299 = vector.broadcast %298 : vector<56x1xf32> to vector<56x128xf32>
    %300 = arith.mulf %297, %299 : vector<56x128xf32>
    %cst_154 = arith.constant dense<0.000000e+00> : vector<128xf32>
    %301 = vector.multi_reduction <add>, %300, %cst_154 [0] : vector<56x128xf32> to vector<128xf32>
    %302 = vector.shape_cast %301 : vector<128xf32> to vector<1x128xf32>
    %cst_155 = arith.constant 3.125000e-02 : f32
    %303 = vector.broadcast %cst_155 : f32 to vector<1x128xf32>
    %304 = arith.mulf %302, %303 : vector<1x128xf32>
    %305 = arith.mulf %300, %297 : vector<56x128xf32>
    %cst_156 = arith.constant dense<0.000000e+00> : vector<128xf32>
    %306 = vector.multi_reduction <add>, %305, %cst_156 [0] : vector<56x128xf32> to vector<128xf32>
    %307 = vector.shape_cast %306 : vector<128xf32> to vector<1x128xf32>
    %cst_157 = arith.constant 3.125000e-02 : f32
    %308 = vector.broadcast %cst_157 : f32 to vector<1x128xf32>
    %309 = arith.mulf %307, %308 : vector<1x128xf32>
    %310 = arith.mulf %304, %304 : vector<1x128xf32>
    %311 = arith.subf %309, %310 : vector<1x128xf32>
    %c6 = arith.constant 6 : index
    %c0_158 = arith.constant 0 : index
    %312 = vector.load %arg10[%c6, %c0_158] : memref<8x256xf32, #tpu.memory_space<vmem>>, vector<1x128xf32>
    %cst_159 = arith.constant 9.99999974E-6 : f32
    %313 = vector.broadcast %cst_159 : f32 to vector<1x128xf32>
    %314 = arith.addf %311, %313 : vector<1x128xf32>
    %315 = math.rsqrt %314 : vector<1x128xf32>
    %316 = arith.mulf %312, %315 : vector<1x128xf32>
    %c6_160 = arith.constant 6 : index
    %c0_161 = arith.constant 0 : index
    %317 = vector.load %arg11[%c6_160, %c0_161] : memref<8x256xf32, #tpu.memory_space<vmem>>, vector<1x128xf32>
    %318 = arith.mulf %304, %316 : vector<1x128xf32>
    %319 = arith.subf %317, %318 : vector<1x128xf32>
    %320 = vector.broadcast %316 : vector<1x128xf32> to vector<56x128xf32>
    %321 = arith.mulf %297, %320 : vector<56x128xf32>
    %322 = vector.broadcast %319 : vector<1x128xf32> to vector<56x128xf32>
    %323 = arith.addf %321, %322 : vector<56x128xf32>
    %324 = vector.broadcast %298 : vector<56x1xf32> to vector<56x128xf32>
    %325 = arith.mulf %323, %324 : vector<56x128xf32>
    %c0_162 = arith.constant 0 : index
    %c0_163 = arith.constant 0 : index
    %326 = vector.load %arg25[%c0_162, %c0_163] : memref<176x512xf32, #tpu.memory_space<vmem>>, vector<56x128xf32>
    tpu.vector_store %arg25[%c0_162, %c0_163], %325 {strides = array<i32>} : memref<176x512xf32, #tpu.memory_space<vmem>>, vector<56x128xf32>,
    %327 = vector.extract_strided_slice %325 {offsets = [1, 0], sizes = [55, 128], strides = [1, 1]} : vector<56x128xf32> to vector<55x128xf32>
    %328 = vector.extract_strided_slice %325 {offsets = [0, 0], sizes = [1, 128], strides = [1, 1]} : vector<56x128xf32> to vector<1x128xf32>
    %329 = tpu.concatenate %327, %328 in 0 : vector<55x128xf32>, vector<1x128xf32> -> vector<56x128xf32>
    %c0_164 = arith.constant 0 : index
    %c128_165 = arith.constant 128 : index
    %330 = vector.load %arg25[%c0_164, %c128_165] : memref<176x512xf32, #tpu.memory_space<vmem>>, vector<56x128xf32>
    tpu.vector_store %arg25[%c0_164, %c128_165], %329 {strides = array<i32>} : memref<176x512xf32, #tpu.memory_space<vmem>>, vector<56x128xf32>,
    %331 = vector.extract_strided_slice %325 {offsets = [5, 0], sizes = [51, 128], strides = [1, 1]} : vector<56x128xf32> to vector<51x128xf32>
    %332 = vector.extract_strided_slice %325 {offsets = [0, 0], sizes = [5, 128], strides = [1, 1]} : vector<56x128xf32> to vector<5x128xf32>
    %333 = tpu.concatenate %331, %332 in 0 : vector<51x128xf32>, vector<5x128xf32> -> vector<56x128xf32>
    %c0_166 = arith.constant 0 : index
    %c256_167 = arith.constant 256 : index
    %334 = vector.load %arg25[%c0_166, %c256_167] : memref<176x512xf32, #tpu.memory_space<vmem>>, vector<56x128xf32>
    tpu.vector_store %arg25[%c0_166, %c256_167], %333 {strides = array<i32>} : memref<176x512xf32, #tpu.memory_space<vmem>>, vector<56x128xf32>,
    %335 = vector.extract_strided_slice %325 {offsets = [6, 0], sizes = [50, 128], strides = [1, 1]} : vector<56x128xf32> to vector<50x128xf32>
    %336 = vector.extract_strided_slice %325 {offsets = [0, 0], sizes = [6, 128], strides = [1, 1]} : vector<56x128xf32> to vector<6x128xf32>
    %337 = tpu.concatenate %335, %336 in 0 : vector<50x128xf32>, vector<6x128xf32> -> vector<56x128xf32>
    %c0_168 = arith.constant 0 : index
    %c384_169 = arith.constant 384 : index
    %338 = vector.load %arg25[%c0_168, %c384_169] : memref<176x512xf32, #tpu.memory_space<vmem>>, vector<56x128xf32>
    tpu.vector_store %arg25[%c0_168, %c384_169], %337 {strides = array<i32>} : memref<176x512xf32, #tpu.memory_space<vmem>>, vector<56x128xf32>,
    %c0_170 = arith.constant 0 : index
    %c0_171 = arith.constant 0 : index
    %339 = vector.load %arg25[%c0_170, %c0_171] : memref<176x512xf32, #tpu.memory_space<vmem>>, vector<56x512xf32>
    %340 = arith.truncf %339 : vector<56x512xf32> to vector<56x512xbf16>
    %c0_172 = arith.constant 0 : index
    %c0_173 = arith.constant 0 : index
    %341 = vector.load %arg9[%c0_172, %c0_173] : memref<512x256xbf16, #tpu.memory_space<vmem>>, vector<512x256xbf16>
    %cst_174 = arith.constant dense<0.000000e+00> : vector<56x256xf32>
    %342 = tpu.matmul %340, %341, %cst_174 {dimension_numbers = #tpu.dot_dimension_numbers<[1], [0], [0], [1], [0, 0, 1, 1], [], []>} : vector<56x512xbf16>, vector<512x256xbf16>, vector<56x256xf32> -> vector<56x256xf32>
    %c0_175 = arith.constant 0 : index
    %c0_176 = arith.constant 0 : index
    %343 = vector.load %arg13[%c0_175, %c0_176] : memref<56x1xf32, #tpu.memory_space<vmem>>, vector<56x1xf32>
    %344 = vector.broadcast %343 : vector<56x1xf32> to vector<56x256xf32>
    %345 = arith.mulf %342, %344 : vector<56x256xf32>
    %cst_177 = arith.constant dense<0.000000e+00> : vector<256xf32>
    %346 = vector.multi_reduction <add>, %345, %cst_177 [0] : vector<56x256xf32> to vector<256xf32>
    %347 = vector.shape_cast %346 : vector<256xf32> to vector<1x256xf32>
    %cst_178 = arith.constant 3.125000e-02 : f32
    %348 = vector.broadcast %cst_178 : f32 to vector<1x256xf32>
    %349 = arith.mulf %347, %348 : vector<1x256xf32>
    %350 = arith.mulf %345, %342 : vector<56x256xf32>
    %cst_179 = arith.constant dense<0.000000e+00> : vector<256xf32>
    %351 = vector.multi_reduction <add>, %350, %cst_179 [0] : vector<56x256xf32> to vector<256xf32>
    %352 = vector.shape_cast %351 : vector<256xf32> to vector<1x256xf32>
    %cst_180 = arith.constant 3.125000e-02 : f32
    %353 = vector.broadcast %cst_180 : f32 to vector<1x256xf32>
    %354 = arith.mulf %352, %353 : vector<1x256xf32>
    %355 = arith.mulf %349, %349 : vector<1x256xf32>
    %356 = arith.subf %354, %355 : vector<1x256xf32>
    %c7 = arith.constant 7 : index
    %c0_181 = arith.constant 0 : index
    %357 = vector.load %arg10[%c7, %c0_181] : memref<8x256xf32, #tpu.memory_space<vmem>>, vector<1x256xf32>
    %cst_182 = arith.constant 9.99999974E-6 : f32
    %358 = vector.broadcast %cst_182 : f32 to vector<1x256xf32>
    %359 = arith.addf %356, %358 : vector<1x256xf32>
    %360 = math.rsqrt %359 : vector<1x256xf32>
    %361 = arith.mulf %357, %360 : vector<1x256xf32>
    %c7_183 = arith.constant 7 : index
    %c0_184 = arith.constant 0 : index
    %362 = vector.load %arg11[%c7_183, %c0_184] : memref<8x256xf32, #tpu.memory_space<vmem>>, vector<1x256xf32>
    %363 = arith.mulf %349, %361 : vector<1x256xf32>
    %364 = arith.subf %362, %363 : vector<1x256xf32>
    %365 = vector.broadcast %361 : vector<1x256xf32> to vector<56x256xf32>
    %366 = arith.mulf %342, %365 : vector<56x256xf32>
    %367 = vector.broadcast %364 : vector<1x256xf32> to vector<56x256xf32>
    %368 = arith.addf %366, %367 : vector<56x256xf32>
    %369 = vector.broadcast %343 : vector<56x1xf32> to vector<56x256xf32>
    %370 = arith.mulf %368, %369 : vector<56x256xf32>
    %c0_185 = arith.constant 0 : index
    %c0_186 = arith.constant 0 : index
    %371 = vector.load %arg15[%c0_185, %c0_186] : memref<128x56xf32, #tpu.memory_space<vmem>>, vector<128x56xf32>
    %cst_187 = arith.constant dense<0.000000e+00> : vector<128x256xf32>
    %372 = tpu.matmul %371, %370, %cst_187 {dimension_numbers = #tpu.dot_dimension_numbers<[1], [0], [0], [1], [0, 0, 1, 1], [], []>} : vector<128x56xf32>, vector<56x256xf32>, vector<128x256xf32> -> vector<128x256xf32>
    tpu.wait_dma2 semaphore(%arg27 : memref<!tpu.dma_semaphore, #tpu.memory_space<semaphore_mem>>) src(%arg16 : memref<16x256x128xbf16, #tpu.memory_space<any>>) dst(%arg26 : memref<16x256x128xbf16, #tpu.memory_space<vmem>>)
    %373 = arith.truncf %372 : vector<128x256xf32> to vector<128x256xbf16>
    %cst_188 = arith.constant 0.000000e+00 : f32
    %374 = vector.broadcast %cst_188 : f32 to vector<8x128xf32>
    %375 = vector.extract_strided_slice %373 {offsets = [0, 0], sizes = [8, 256], strides = [1, 1]} : vector<128x256xbf16> to vector<8x256xbf16>
    %c0_189 = arith.constant 0 : index
    %c0_190 = arith.constant 0 : index
    %c0_191 = arith.constant 0 : index
    %376 = vector.load %arg26[%c0_189, %c0_190, %c0_191] : memref<16x256x128xbf16, #tpu.memory_space<vmem>>, vector<1x256x128xbf16>
    %377 = vector.shape_cast %376 : vector<1x256x128xbf16> to vector<256x128xbf16>
    %cst_192 = arith.constant dense<0.000000e+00> : vector<8x128xf32>
    %378 = tpu.matmul %375, %377, %cst_192 {dimension_numbers = #tpu.dot_dimension_numbers<[1], [0], [0], [1], [0, 0, 1, 1], [], []>} : vector<8x256xbf16>, vector<256x128xbf16>, vector<8x128xf32> -> vector<8x128xf32>
    %379 = arith.addf %374, %378 : vector<8x128xf32>
    %380 = vector.extract_strided_slice %373 {offsets = [8, 0], sizes = [8, 256], strides = [1, 1]} : vector<128x256xbf16> to vector<8x256xbf16>
    %c1_193 = arith.constant 1 : index
    %c0_194 = arith.constant 0 : index
    %c0_195 = arith.constant 0 : index
    %381 = vector.load %arg26[%c1_193, %c0_194, %c0_195] : memref<16x256x128xbf16, #tpu.memory_space<vmem>>, vector<1x256x128xbf16>
    %382 = vector.shape_cast %381 : vector<1x256x128xbf16> to vector<256x128xbf16>
    %cst_196 = arith.constant dense<0.000000e+00> : vector<8x128xf32>
    %383 = tpu.matmul %380, %382, %cst_196 {dimension_numbers = #tpu.dot_dimension_numbers<[1], [0], [0], [1], [0, 0, 1, 1], [], []>} : vector<8x256xbf16>, vector<256x128xbf16>, vector<8x128xf32> -> vector<8x128xf32>
    %384 = arith.addf %379, %383 : vector<8x128xf32>
    %385 = vector.extract_strided_slice %373 {offsets = [16, 0], sizes = [8, 256], strides = [1, 1]} : vector<128x256xbf16> to vector<8x256xbf16>
    %c2_197 = arith.constant 2 : index
    %c0_198 = arith.constant 0 : index
    %c0_199 = arith.constant 0 : index
    %386 = vector.load %arg26[%c2_197, %c0_198, %c0_199] : memref<16x256x128xbf16, #tpu.memory_space<vmem>>, vector<1x256x128xbf16>
    %387 = vector.shape_cast %386 : vector<1x256x128xbf16> to vector<256x128xbf16>
    %cst_200 = arith.constant dense<0.000000e+00> : vector<8x128xf32>
    %388 = tpu.matmul %385, %387, %cst_200 {dimension_numbers = #tpu.dot_dimension_numbers<[1], [0], [0], [1], [0, 0, 1, 1], [], []>} : vector<8x256xbf16>, vector<256x128xbf16>, vector<8x128xf32> -> vector<8x128xf32>
    %389 = arith.addf %384, %388 : vector<8x128xf32>
    %390 = vector.extract_strided_slice %373 {offsets = [24, 0], sizes = [8, 256], strides = [1, 1]} : vector<128x256xbf16> to vector<8x256xbf16>
    %c3_201 = arith.constant 3 : index
    %c0_202 = arith.constant 0 : index
    %c0_203 = arith.constant 0 : index
    %391 = vector.load %arg26[%c3_201, %c0_202, %c0_203] : memref<16x256x128xbf16, #tpu.memory_space<vmem>>, vector<1x256x128xbf16>
    %392 = vector.shape_cast %391 : vector<1x256x128xbf16> to vector<256x128xbf16>
    %cst_204 = arith.constant dense<0.000000e+00> : vector<8x128xf32>
    %393 = tpu.matmul %390, %392, %cst_204 {dimension_numbers = #tpu.dot_dimension_numbers<[1], [0], [0], [1], [0, 0, 1, 1], [], []>} : vector<8x256xbf16>, vector<256x128xbf16>, vector<8x128xf32> -> vector<8x128xf32>
    %394 = arith.addf %389, %393 : vector<8x128xf32>
    %395 = vector.extract_strided_slice %373 {offsets = [32, 0], sizes = [8, 256], strides = [1, 1]} : vector<128x256xbf16> to vector<8x256xbf16>
    %c4_205 = arith.constant 4 : index
    %c0_206 = arith.constant 0 : index
    %c0_207 = arith.constant 0 : index
    %396 = vector.load %arg26[%c4_205, %c0_206, %c0_207] : memref<16x256x128xbf16, #tpu.memory_space<vmem>>, vector<1x256x128xbf16>
    %397 = vector.shape_cast %396 : vector<1x256x128xbf16> to vector<256x128xbf16>
    %cst_208 = arith.constant dense<0.000000e+00> : vector<8x128xf32>
    %398 = tpu.matmul %395, %397, %cst_208 {dimension_numbers = #tpu.dot_dimension_numbers<[1], [0], [0], [1], [0, 0, 1, 1], [], []>} : vector<8x256xbf16>, vector<256x128xbf16>, vector<8x128xf32> -> vector<8x128xf32>
    %399 = arith.addf %394, %398 : vector<8x128xf32>
    %400 = vector.extract_strided_slice %373 {offsets = [40, 0], sizes = [8, 256], strides = [1, 1]} : vector<128x256xbf16> to vector<8x256xbf16>
    %c5_209 = arith.constant 5 : index
    %c0_210 = arith.constant 0 : index
    %c0_211 = arith.constant 0 : index
    %401 = vector.load %arg26[%c5_209, %c0_210, %c0_211] : memref<16x256x128xbf16, #tpu.memory_space<vmem>>, vector<1x256x128xbf16>
    %402 = vector.shape_cast %401 : vector<1x256x128xbf16> to vector<256x128xbf16>
    %cst_212 = arith.constant dense<0.000000e+00> : vector<8x128xf32>
    %403 = tpu.matmul %400, %402, %cst_212 {dimension_numbers = #tpu.dot_dimension_numbers<[1], [0], [0], [1], [0, 0, 1, 1], [], []>} : vector<8x256xbf16>, vector<256x128xbf16>, vector<8x128xf32> -> vector<8x128xf32>
    %404 = arith.addf %399, %403 : vector<8x128xf32>
    %405 = vector.extract_strided_slice %373 {offsets = [48, 0], sizes = [8, 256], strides = [1, 1]} : vector<128x256xbf16> to vector<8x256xbf16>
    %c6_213 = arith.constant 6 : index
    %c0_214 = arith.constant 0 : index
    %c0_215 = arith.constant 0 : index
    %406 = vector.load %arg26[%c6_213, %c0_214, %c0_215] : memref<16x256x128xbf16, #tpu.memory_space<vmem>>, vector<1x256x128xbf16>
    %407 = vector.shape_cast %406 : vector<1x256x128xbf16> to vector<256x128xbf16>
    %cst_216 = arith.constant dense<0.000000e+00> : vector<8x128xf32>
    %408 = tpu.matmul %405, %407, %cst_216 {dimension_numbers = #tpu.dot_dimension_numbers<[1], [0], [0], [1], [0, 0, 1, 1], [], []>} : vector<8x256xbf16>, vector<256x128xbf16>, vector<8x128xf32> -> vector<8x128xf32>
    %409 = arith.addf %404, %408 : vector<8x128xf32>
    %410 = vector.extract_strided_slice %373 {offsets = [56, 0], sizes = [8, 256], strides = [1, 1]} : vector<128x256xbf16> to vector<8x256xbf16>
    %c7_217 = arith.constant 7 : index
    %c0_218 = arith.constant 0 : index
    %c0_219 = arith.constant 0 : index
    %411 = vector.load %arg26[%c7_217, %c0_218, %c0_219] : memref<16x256x128xbf16, #tpu.memory_space<vmem>>, vector<1x256x128xbf16>
    %412 = vector.shape_cast %411 : vector<1x256x128xbf16> to vector<256x128xbf16>
    %cst_220 = arith.constant dense<0.000000e+00> : vector<8x128xf32>
    %413 = tpu.matmul %410, %412, %cst_220 {dimension_numbers = #tpu.dot_dimension_numbers<[1], [0], [0], [1], [0, 0, 1, 1], [], []>} : vector<8x256xbf16>, vector<256x128xbf16>, vector<8x128xf32> -> vector<8x128xf32>
    %414 = arith.addf %409, %413 : vector<8x128xf32>
    %415 = vector.extract_strided_slice %373 {offsets = [64, 0], sizes = [8, 256], strides = [1, 1]} : vector<128x256xbf16> to vector<8x256xbf16>
    %c8 = arith.constant 8 : index
    %c0_221 = arith.constant 0 : index
    %c0_222 = arith.constant 0 : index
    %416 = vector.load %arg26[%c8, %c0_221, %c0_222] : memref<16x256x128xbf16, #tpu.memory_space<vmem>>, vector<1x256x128xbf16>
    %417 = vector.shape_cast %416 : vector<1x256x128xbf16> to vector<256x128xbf16>
    %cst_223 = arith.constant dense<0.000000e+00> : vector<8x128xf32>
    %418 = tpu.matmul %415, %417, %cst_223 {dimension_numbers = #tpu.dot_dimension_numbers<[1], [0], [0], [1], [0, 0, 1, 1], [], []>} : vector<8x256xbf16>, vector<256x128xbf16>, vector<8x128xf32> -> vector<8x128xf32>
    %419 = arith.addf %414, %418 : vector<8x128xf32>
    %420 = vector.extract_strided_slice %373 {offsets = [72, 0], sizes = [8, 256], strides = [1, 1]} : vector<128x256xbf16> to vector<8x256xbf16>
    %c9 = arith.constant 9 : index
    %c0_224 = arith.constant 0 : index
    %c0_225 = arith.constant 0 : index
    %421 = vector.load %arg26[%c9, %c0_224, %c0_225] : memref<16x256x128xbf16, #tpu.memory_space<vmem>>, vector<1x256x128xbf16>
    %422 = vector.shape_cast %421 : vector<1x256x128xbf16> to vector<256x128xbf16>
    %cst_226 = arith.constant dense<0.000000e+00> : vector<8x128xf32>
    %423 = tpu.matmul %420, %422, %cst_226 {dimension_numbers = #tpu.dot_dimension_numbers<[1], [0], [0], [1], [0, 0, 1, 1], [], []>} : vector<8x256xbf16>, vector<256x128xbf16>, vector<8x128xf32> -> vector<8x128xf32>
    %424 = arith.addf %419, %423 : vector<8x128xf32>
    %425 = vector.extract_strided_slice %373 {offsets = [80, 0], sizes = [8, 256], strides = [1, 1]} : vector<128x256xbf16> to vector<8x256xbf16>
    %c10 = arith.constant 10 : index
    %c0_227 = arith.constant 0 : index
    %c0_228 = arith.constant 0 : index
    %426 = vector.load %arg26[%c10, %c0_227, %c0_228] : memref<16x256x128xbf16, #tpu.memory_space<vmem>>, vector<1x256x128xbf16>
    %427 = vector.shape_cast %426 : vector<1x256x128xbf16> to vector<256x128xbf16>
    %cst_229 = arith.constant dense<0.000000e+00> : vector<8x128xf32>
    %428 = tpu.matmul %425, %427, %cst_229 {dimension_numbers = #tpu.dot_dimension_numbers<[1], [0], [0], [1], [0, 0, 1, 1], [], []>} : vector<8x256xbf16>, vector<256x128xbf16>, vector<8x128xf32> -> vector<8x128xf32>
    %429 = arith.addf %424, %428 : vector<8x128xf32>
    %430 = vector.extract_strided_slice %373 {offsets = [88, 0], sizes = [8, 256], strides = [1, 1]} : vector<128x256xbf16> to vector<8x256xbf16>
    %c11 = arith.constant 11 : index
    %c0_230 = arith.constant 0 : index
    %c0_231 = arith.constant 0 : index
    %431 = vector.load %arg26[%c11, %c0_230, %c0_231] : memref<16x256x128xbf16, #tpu.memory_space<vmem>>, vector<1x256x128xbf16>
    %432 = vector.shape_cast %431 : vector<1x256x128xbf16> to vector<256x128xbf16>
    %cst_232 = arith.constant dense<0.000000e+00> : vector<8x128xf32>
    %433 = tpu.matmul %430, %432, %cst_232 {dimension_numbers = #tpu.dot_dimension_numbers<[1], [0], [0], [1], [0, 0, 1, 1], [], []>} : vector<8x256xbf16>, vector<256x128xbf16>, vector<8x128xf32> -> vector<8x128xf32>
    %434 = arith.addf %429, %433 : vector<8x128xf32>
    %435 = vector.extract_strided_slice %373 {offsets = [96, 0], sizes = [8, 256], strides = [1, 1]} : vector<128x256xbf16> to vector<8x256xbf16>
    %c12 = arith.constant 12 : index
    %c0_233 = arith.constant 0 : index
    %c0_234 = arith.constant 0 : index
    %436 = vector.load %arg26[%c12, %c0_233, %c0_234] : memref<16x256x128xbf16, #tpu.memory_space<vmem>>, vector<1x256x128xbf16>
    %437 = vector.shape_cast %436 : vector<1x256x128xbf16> to vector<256x128xbf16>
    %cst_235 = arith.constant dense<0.000000e+00> : vector<8x128xf32>
    %438 = tpu.matmul %435, %437, %cst_235 {dimension_numbers = #tpu.dot_dimension_numbers<[1], [0], [0], [1], [0, 0, 1, 1], [], []>} : vector<8x256xbf16>, vector<256x128xbf16>, vector<8x128xf32> -> vector<8x128xf32>
    %439 = arith.addf %434, %438 : vector<8x128xf32>
    %440 = vector.extract_strided_slice %373 {offsets = [104, 0], sizes = [8, 256], strides = [1, 1]} : vector<128x256xbf16> to vector<8x256xbf16>
    %c13 = arith.constant 13 : index
    %c0_236 = arith.constant 0 : index
    %c0_237 = arith.constant 0 : index
    %441 = vector.load %arg26[%c13, %c0_236, %c0_237] : memref<16x256x128xbf16, #tpu.memory_space<vmem>>, vector<1x256x128xbf16>
    %442 = vector.shape_cast %441 : vector<1x256x128xbf16> to vector<256x128xbf16>
    %cst_238 = arith.constant dense<0.000000e+00> : vector<8x128xf32>
    %443 = tpu.matmul %440, %442, %cst_238 {dimension_numbers = #tpu.dot_dimension_numbers<[1], [0], [0], [1], [0, 0, 1, 1], [], []>} : vector<8x256xbf16>, vector<256x128xbf16>, vector<8x128xf32> -> vector<8x128xf32>
    %444 = arith.addf %439, %443 : vector<8x128xf32>
    %445 = vector.extract_strided_slice %373 {offsets = [112, 0], sizes = [8, 256], strides = [1, 1]} : vector<128x256xbf16> to vector<8x256xbf16>
    %c14 = arith.constant 14 : index
    %c0_239 = arith.constant 0 : index
    %c0_240 = arith.constant 0 : index
    %446 = vector.load %arg26[%c14, %c0_239, %c0_240] : memref<16x256x128xbf16, #tpu.memory_space<vmem>>, vector<1x256x128xbf16>
    %447 = vector.shape_cast %446 : vector<1x256x128xbf16> to vector<256x128xbf16>
    %cst_241 = arith.constant dense<0.000000e+00> : vector<8x128xf32>
    %448 = tpu.matmul %445, %447, %cst_241 {dimension_numbers = #tpu.dot_dimension_numbers<[1], [0], [0], [1], [0, 0, 1, 1], [], []>} : vector<8x256xbf16>, vector<256x128xbf16>, vector<8x128xf32> -> vector<8x128xf32>
    %449 = arith.addf %444, %448 : vector<8x128xf32>
    %450 = vector.extract_strided_slice %373 {offsets = [120, 0], sizes = [8, 256], strides = [1, 1]} : vector<128x256xbf16> to vector<8x256xbf16>
    %c15 = arith.constant 15 : index
    %c0_242 = arith.constant 0 : index
    %c0_243 = arith.constant 0 : index
    %451 = vector.load %arg26[%c15, %c0_242, %c0_243] : memref<16x256x128xbf16, #tpu.memory_space<vmem>>, vector<1x256x128xbf16>
    %452 = vector.shape_cast %451 : vector<1x256x128xbf16> to vector<256x128xbf16>
    %cst_244 = arith.constant dense<0.000000e+00> : vector<8x128xf32>
    %453 = tpu.matmul %450, %452, %cst_244 {dimension_numbers = #tpu.dot_dimension_numbers<[1], [0], [0], [1], [0, 0, 1, 1], [], []>} : vector<8x256xbf16>, vector<256x128xbf16>, vector<8x128xf32> -> vector<8x128xf32>
    %454 = arith.addf %449, %453 : vector<8x128xf32>
    %c0_245 = arith.constant 0 : index
    %c0_246 = arith.constant 0 : index
    %455 = vector.load %arg1[%c0_245, %c0_246] : memref<2x3xf32, #tpu.memory_space<vmem>>, vector<2x3xf32>
    %c0_247 = arith.constant 0 : index
    %c0_248 = arith.constant 0 : index
    %456 = vector.load %arg17[%c0_247, %c0_248] : memref<3x128xf32, #tpu.memory_space<vmem>>, vector<3x128xf32>
    %cst_249 = arith.constant dense<0.000000e+00> : vector<2x128xf32>
    %457 = tpu.matmul %455, %456, %cst_249 {dimension_numbers = #tpu.dot_dimension_numbers<[1], [0], [0], [1], [0, 0, 1, 1], [], []>} : vector<2x3xf32>, vector<3x128xf32>, vector<2x128xf32> -> vector<2x128xf32>
    %458 = vector.extract_strided_slice %454 {offsets = [0, 0], sizes = [2, 128], strides = [1, 1]} : vector<8x128xf32> to vector<2x128xf32>
    %459 = arith.addf %458, %457 : vector<2x128xf32>
    %c0_250 = arith.constant 0 : index
    %c0_251 = arith.constant 0 : index
    %460 = vector.load %arg18[%c0_250, %c0_251] : memref<1x128xf32, #tpu.memory_space<vmem>>, vector<1x128xf32>
    %461 = vector.broadcast %460 : vector<1x128xf32> to vector<2x128xf32>
    %462 = arith.addf %459, %461 : vector<2x128xf32>
    %cst_252 = arith.constant 0.000000e+00 : f32
    %463 = vector.broadcast %cst_252 : f32 to vector<2x128xf32>
    %464 = arith.maximumf %462, %463 : vector<2x128xf32>
    %c0_253 = arith.constant 0 : index
    %c0_254 = arith.constant 0 : index
    %465 = vector.load %arg19[%c0_253, %c0_254] : memref<128x128xf32, #tpu.memory_space<vmem>>, vector<128x128xf32>
    %cst_255 = arith.constant dense<0.000000e+00> : vector<2x128xf32>
    %466 = tpu.matmul %464, %465, %cst_255 {dimension_numbers = #tpu.dot_dimension_numbers<[1], [0], [0], [1], [0, 0, 1, 1], [], []>} : vector<2x128xf32>, vector<128x128xf32>, vector<2x128xf32> -> vector<2x128xf32>
    %c0_256 = arith.constant 0 : index
    %c0_257 = arith.constant 0 : index
    %467 = vector.load %arg20[%c0_256, %c0_257] : memref<1x128xf32, #tpu.memory_space<vmem>>, vector<1x128xf32>
    %468 = vector.broadcast %467 : vector<1x128xf32> to vector<2x128xf32>
    %469 = arith.addf %466, %468 : vector<2x128xf32>
    %cst_258 = arith.constant 0.000000e+00 : f32
    %470 = vector.broadcast %cst_258 : f32 to vector<2x128xf32>
    %471 = arith.maximumf %469, %470 : vector<2x128xf32>
    %c0_259 = arith.constant 0 : index
    %c0_260 = arith.constant 0 : index
    %472 = vector.load %arg21[%c0_259, %c0_260] : memref<128x1xf32, #tpu.memory_space<vmem>>, vector<128x1xf32>
    %cst_261 = arith.constant dense<0.000000e+00> : vector<2x1xf32>
    %473 = tpu.matmul %471, %472, %cst_261 {dimension_numbers = #tpu.dot_dimension_numbers<[1], [0], [0], [1], [0, 0, 1, 1], [], []>} : vector<2x128xf32>, vector<128x1xf32>, vector<2x1xf32> -> vector<2x1xf32>
    %c0_262 = arith.constant 0 : index
    %c0_263 = arith.constant 0 : index
    %474 = vector.load %arg22[%c0_262, %c0_263] : memref<1x1xf32, #tpu.memory_space<vmem>>, vector<1x1xf32>
    %475 = vector.broadcast %474 : vector<1x1xf32> to vector<2x1xf32>
    %476 = arith.addf %473, %475 : vector<2x1xf32>
    %c0_264 = arith.constant 0 : index
    %c0_265 = arith.constant 0 : index
    %477 = vector.load %arg23[%c0_264, %c0_265] : memref<2x1xf32, #tpu.memory_space<vmem>>, vector<2x1xf32>
    tpu.vector_store %arg23[%c0_264, %c0_265], %476 {strides = array<i32>} : memref<2x1xf32, #tpu.memory_space<vmem>>, vector<2x1xf32>,
    return
  }
}

</mosaic_0001>

<bundles_post_ra>
// kernel: forward.1
= control target key start
LH: loop header
LB: loop body
LE: loop exit
PB: predicated region body
PF: predicated region fallthrough
CT: control target
= control target key end

     0   :  { %s19043_s0 = inlined_call_operand.vmem [shape: f32[176,128], index: 0, kind: input, shape index: {}]   ;;  %s19044_s1 = inlined_call_operand.vmem [shape: f32[2,3], index: 1, kind: input, shape index: {}]   ;;  %s19045_s2 = inlined_call_operand.vmem [shape: bf16[512,128], index: 2, kind: input, shape index: {}]   ;;  %s19046_s3 = inlined_call_operand.vmem [shape: bf16[512,128], index: 3, kind: input, shape index: {}]   ;;  %s19047_s4 = inlined_call_operand.vmem [shape: bf16[512,128], index: 4, kind: input, shape index: {}]   ;;  %s19048_s5 = inlined_call_operand.hbm [shape: bf16[512,128], index: 5, kind: input, shape index: {}]   ;;  %s19049_s6 = inlined_call_operand.hbm [shape: bf16[512,128], index: 6, kind: input, shape index: {}]   ;;  %s19050_s7 = inlined_call_operand.hbm [shape: bf16[512,128], index: 7, kind: input, shape index: {}]   ;;  %s19051_s8 = inlined_call_operand.hbm [shape: bf16[512,128], index: 8, kind: input, shape index: {}]   ;;  %s19052_s9 = inlined_call_operand.vmem [shape: bf16[512,256], index: 9, kind: input, shape index: {}]   ;;  %s19053_s10 = inlined_call_operand.hbm [shape: f32[8,256], index: 10, kind: input, shape index: {}]   ;;  %s19054_s11 = inlined_call_operand.vmem [shape: f32[8,256], index: 11, kind: input, shape index: {}]   ;;  %s19055_s12 = inlined_call_operand.hbm [shape: f32[176,1], index: 12, kind: input, shape index: {}]   ;;  %s19056_s13 = inlined_call_operand.vmem [shape: f32[56,1], index: 13, kind: input, shape index: {}]   ;;  %s19057_s14 = inlined_call_operand.hbm [shape: f32[56,176], index: 14, kind: input, shape index: {}]   ;;  %s19058_s15 = inlined_call_operand.hbm [shape: f32[128,56], index: 15, kind: input, shape index: {}]   ;;  %s19059_s16 = inlined_call_operand.hbm [shape: bf16[16,256,128], index: 16, kind: input, shape index: {}]   ;;  %s19060_s17 = inlined_call_operand.vmem [shape: f32[3,128], index: 17, kind: input, shape index: {}]   ;;  %s19061_s18 = inlined_call_operand.vmem [shape: f32[1,128], index: 18, kind: input, shape index: {}]   ;;  %s19062_s19 = inlined_call_operand.hbm [shape: f32[128,128], index: 19, kind: input, shape index: {}]   ;;  %s19063_s20 = inlined_call_operand.vmem [shape: f32[1,128], index: 20, kind: input, shape index: {}]   ;;  %s19064_s21 = inlined_call_operand.vmem [shape: f32[128,1], index: 21, kind: input, shape index: {}]   ;;  %s19065_s22 = inlined_call_operand.<no memory space> [shape: f32[1,1], index: 22, kind: input, shape index: {}]   ;;  %s19066_s23 = inlined_call_operand.vmem [shape: f32[2,1], index: 23, kind: output, shape index: {}]  }
   0x1   :  { %19105 = sst [smem:[#allocation40_spill]] %s19043_s0  ;;  %v28_v0 = vstv %s19065_s22 }
   0x2   :  { %19106 = sst [smem:[#allocation41_spill]] %s19044_s1  ;;  %29 = vst [vmem:[#allocation6] sm:$0x1] %v28_v0 }
   0x3   :  { %19107 = sst [smem:[#allocation42_spill]] %s19045_s2 }
   0x4   :  { %19108 = sst [smem:[#allocation43_spill]] %s19046_s3 }
   0x5   :  { %19109 = sst [smem:[#allocation44_spill]] %s19047_s4 }
   0x6   :  { %19110 = sst [smem:[#allocation45_spill]] %s19048_s5 }
   0x7   :  { %19111 = sst [smem:[#allocation46_spill]] %s19049_s6 }
   0x8   :  { %19112 = sst [smem:[#allocation47_spill]] %s19050_s7 }
   0x9   :  { %30 = vsyncpa [#allocation8], 0 }
   0xa   :  { %31 = vsyncpa [#allocation10], 0 }
   0xb   :  { %32 = vsyncpa [#allocation13], 0 }
   0xc   :  { %33 = vsyncpa [#allocation16], 0 }
   0xd   :  { %34 = vsyncpa [#allocation19], 0  ;;  %s19113_s5 = sld [smem:[#allocation46_spill]]  ;;  %s14286_s26 = smov [#allocation9]  }
   0xe   :  { %s64_s2 = sshll.u32 %s14286_s26, 4  ;;  %s88_s7 = sshll.u32 %s19051_s8, 4  ;;  %s65_s2 = int_to_ptr.vmem [resolvable:$true] %s64_s2  ;;  %s89_s7 = int_to_ptr.hbm [resolvable:$true] %s88_s7 }
   0xf   :  { %s14287_s28 = smov 64   ;;  %s14288_s22 = smov 4  }
  0x10   :  { %s14289_s29 = smov [#allocation12]   ;;  %s116_s30 = sshll.u32 %s19055_s12, 4  ;;  %s117_s30 = int_to_ptr.hbm [resolvable:$true] %s116_s30 }
  0x11   :  { %s90_s3 = sshll.u32 %s14289_s29, 4  ;;  %s14290_s8 = smov [#allocation15]   ;;  %s91_s3 = int_to_ptr.vmem [resolvable:$true] %s90_s3 }
  0x12   :  { %96 = dma.hbm_to_vmem [thread:$0]  %s89_s7, 4096, %s91_s3, [#allocation13], %s14287_s28, %s14287_s28, %s14288_s22  }
  0x13   :  { %s62_s1 = sshll.u32 %s19113_s5, 4  ;;  %s118_s24 = sshll.u32 %s14290_s8, 4  ;;  %s63_s1 = int_to_ptr.hbm [resolvable:$true] %s62_s1  ;;  %s119_s24 = int_to_ptr.vmem [resolvable:$true] %s118_s24 }
  0x14   :  { %70 = dma.hbm_to_vmem [thread:$0]  %s63_s1, 4096, %s65_s2, [#allocation10], %s14287_s28, %s14287_s28, %s14288_s22  }
  0x15   :  { %s144_s1 = sshll.u32 %s19058_s15, 4  ;;  %s14291_s26 = smov 128   ;;  %s145_s1 = int_to_ptr.hbm [resolvable:$true] %s144_s1 }
  0x16   :  { %s14292_s2 = smov 8   ;;  %s14293_s12 = smov [#allocation18]  }
  0x17   :  { %124 = dma.hbm_to_vmem [thread:$0]  %s117_s30, 2816, %s119_s24, [#allocation16], %s14291_s26, %s14291_s26, %s14292_s2  }
  0x18   :  { %s146_s6 = sshll.u32 %s14293_s12, 4  ;;  %s19114_s0 = sld [smem:[#allocation45_spill]]  ;;  %s147_s6 = int_to_ptr.vmem [resolvable:$true] %s146_s6 }
  0x19   :  { %152 = dma.hbm_to_vmem [thread:$0]  %s145_s1, 2048, %s147_s6, [#allocation19], %s14291_s26, %s14291_s26, %s14292_s2  }
  0x1a   :  { %s19115_s4 = sld [smem:[#allocation47_spill]]  ;;  %s14294_s25 = smov [#allocation7]  }
  0x1b   :  { %s51_s5 = sshll.u32 %s14294_s25, 4  ;;  %s14295_s30 = smov [#allocation11]   ;;  %s52_s5 = int_to_ptr.vmem [resolvable:$true] %s51_s5 }
  0x1c   :  { %s77_s24 = sshll.u32 %s14295_s30, 4  ;;  %s104_s29 = sshll.u32 %s19053_s10, 4  ;;  %s78_s24 = int_to_ptr.vmem [resolvable:$true] %s77_s24  ;;  %s105_s29 = int_to_ptr.hbm [resolvable:$true] %s104_s29 }
  0x1d   :  { %s14296_s15 = smov [#allocation14]   ;;  %s14298_s25 = smov 256  }
  0x1e   :  { %s49_s7 = sshll.u32 %s19114_s0, 4  ;;  %s131_s0 = sshll.u32 %s19057_s14, 4  ;;  %s50_s7 = int_to_ptr.hbm [resolvable:$true] %s49_s7  ;;  %s132_s0 = int_to_ptr.hbm [resolvable:$true] %s131_s0 }
  0x1f   :  { %57 = dma.hbm_to_vmem [thread:$0]  %s50_s7, 4096, %s52_s5, [#allocation8], %s14287_s28, %s14287_s28, %s14288_s22  }
  0x20   :  { %s75_s8 = sshll.u32 %s19115_s4, 4  ;;  %s106_s3 = sshll.u32 %s14296_s15, 4  ;;  %s76_s8 = int_to_ptr.hbm [resolvable:$true] %s75_s8  ;;  %s107_s3 = int_to_ptr.vmem [resolvable:$true] %s106_s3 }
  0x21   :  { %83 = dma.hbm_to_vmem [thread:$0]  %s76_s8, 4096, %s78_s24, [#allocation10], %s14287_s28, %s14287_s28, %s14288_s22  }
  0x22   :  { %109 = dma.hbm_to_vmem [thread:$0]  %s105_s29, 256, %s107_s3, [#allocation13]  }
  0x23   :  { %s14297_s7 = smov [#allocation17]   ;;  %s14299_s10 = smov 16  }
  0x24   :  { %s133_s4 = sshll.u32 %s14297_s7, 4  ;;  %s161_s12 = sshll.u32 %s19062_s19, 4  ;;  %s134_s4 = int_to_ptr.vmem [resolvable:$true] %s133_s4  ;;  %s162_s12 = int_to_ptr.hbm [resolvable:$true] %s161_s12 }
  0x25   :  { %139 = dma.hbm_to_vmem [thread:$0]  %s132_s0, 1792, %s134_s4, [#allocation16], %s14298_s25, %s14298_s25, %s14299_s10  }
  0x26   :  { %s14300_s28 = smov [#allocation20]  }
  0x27   :  { %s163_s22 = sshll.u32 %s14300_s28, 4  ;;  %s164_s22 = int_to_ptr.vmem [resolvable:$true] %s163_s22 }
  0x28   :  { %169 = dma.hbm_to_vmem [thread:$0]  %s162_s12, 2048, %s164_s22, [#allocation19], %s14291_s26, %s14291_s26, %s14292_s2  }
  0x29   :  { %14274 = dma.done.wait [#allocation8], 4096  }
  0x2a   :  { %14275 = vsyncadd [#allocation8], 4294963200 }
  0x2b   :  { %14276 = dma.done.wait [#allocation10], 8192  }
  0x2c   :  { %14277 = vsyncadd [#allocation10], 4294959104 }
  0x2d   :  { %14278 = dma.done.wait [#allocation13], 4352  }
  0x2e   :  { %14279 = vsyncadd [#allocation13], 4294962944 }
  0x2f   :  { %14280 = dma.done.wait [#allocation16], 4608  }
  0x30   :  { %14281 = vsyncadd [#allocation16], 4294962688 }
  0x31   :  { %14282 = dma.done.wait [#allocation19], 4096  }
  0x32   :  { %14283 = vsyncadd [#allocation19], 4294963200  ;;  %v14301_v1 = vmov 0   ;;  %v14474_v2 = vld [vmem:[#allocation15 + $0x20] sm:$0xff]  ;;  %v14476_v3 = vld [vmem:[#allocation15 + $0x10] sm:$0xff]  ;;  %s19116_s26 = sld [smem:[#allocation42_spill]] }
  0x33   :  { %14012 = vset.pattern.permute.xlu2 %v14301_v1  ;;  %14011 = vset.pattern.permute.xlu1 %v14301_v1  ;;  %v14478_v4 = vld [vmem:[#allocation15] sm:$0xff]  ;;  %v14507_v13 = vld [vmem:[#allocation15 + $0x28] sm:$0xff]  ;;  %v14509_v14 = vld [vmem:[#allocation15 + $0x18] sm:$0xff]  ;;  %s19117_s6 = sld [smem:[#allocation40_spill]]  ;;  %vm291_vm0 = vcmask 1046528   ;;  %vm403_vm1 = vcmask 1045504  }
  0x34   :  { %14010 = vset.pattern.permute.xlu0 %v14301_v1  ;;  %1181 = vperm.xlu2 %14012, %v14474_v2   ;;  %v14511_v15 = vld [vmem:[#allocation15 + $0x8] sm:$0xff]  ;;  %v14540_v24 = vld [vmem:[#allocation15 + $0x40] sm:$0xff]  ;;  %v14542_v25 = vld [vmem:[#allocation15 + $0x38] sm:$0xff]  ;;  %s19129_s12 = sld [smem:[#allocation43_spill]]  ;;  %vm5301_vm14 = vcmask 392192   ;;  %vm5442_vm15 = vcmask 1042432  }
  0x35   :  { %1171 = vperm.xlu1 %14011, %v14476_v3   ;;  %1161 = vperm.xlu0 %14010, %v14478_v4   ;;  %v14544_v26 = vld [vmem:[#allocation15 + $0x30] sm:$0xff]  ;;  %v14593_v39 = vld [vmem:[#allocation15 + $0x58] sm:$0xff]  ;;  %v14597_v41 = vld [vmem:[#allocation15 + $0x48] sm:$0xff]  ;;  %s19160_s30 = sld [smem:[#allocation44_spill]]  ;;  %s219_s15 = sshll.u32 %s19059_s16, 4  ;;  %s220_s15 = int_to_ptr.hbm [resolvable:$true] %s219_s15 }
  0x36   :  { %v14595_v40 = vld [vmem:[#allocation15 + $0x50] sm:$0xff]  ;;  %v14646_v63 = vld [vmem:[#allocation15 + $0x68] sm:$0xff]  ;;  %v14650_v1 = vld [vmem:[#allocation15 + $0x60] sm:$0xff] }
  0x37   :  { %v14644_v62 = vld [vmem:[#allocation15 + $0x70] sm:$0xff] }
  0x38   :  { %v13456_v5 = vld [vmem:[%s19116_s26 + $0x38] sm:$0xff]  ;;  %v13455_v9 = vld [vmem:[%s19116_s26 + $0x30] sm:$0xff]  ;;  %v13454_v16 = vld [vmem:[%s19116_s26 + $0x28] sm:$0xff] }
  0x39   :  { %v13464_v6 = vld [vmem:[%s19116_s26 + $0x78] sm:$0xff]  ;;  %881 = vmatpush.bf16.msra.mxu0 %v13456_v5  ;;  %v13463_v10 = vld [vmem:[%s19116_s26 + $0x70] sm:$0xff]  ;;  %v13462_v17 = vld [vmem:[%s19116_s26 + $0x68] sm:$0xff] }
  0x3a   :  { %v13472_v7 = vld [vmem:[%s19116_s26 + $0xb8] sm:$0xff]  ;;  %945 = vmatpush.bf16.msra.mxu1 %v13464_v6  ;;  %v13471_v11 = vld [vmem:[%s19116_s26 + $0xb0] sm:$0xff]  ;;  %v13470_v18 = vld [vmem:[%s19116_s26 + $0xa8] sm:$0xff] }
  0x3b   :  { %v13480_v8 = vld [vmem:[%s19116_s26 + $0xf8] sm:$0xff]  ;;  %1009 = vmatpush.bf16.msra.mxu2 %v13472_v7  ;;  %v13479_v12 = vld [vmem:[%s19116_s26 + $0xf0] sm:$0xff]  ;;  %v13478_v19 = vld [vmem:[%s19116_s26 + $0xe8] sm:$0xff] }
  0x3c   :  { %1073 = vmatpush.bf16.msra.mxu3 %v13480_v8  ;;  %1186 = vperm.xlu2 %14012, %v14507_v13   ;;  %v13453_v20 = vld [vmem:[%s19116_s26 + $0x20] sm:$0xff]  ;;  %v13452_v27 = vld [vmem:[%s19116_s26 + $0x18] sm:$0xff]  ;;  %v13451_v31 = vld [vmem:[%s19116_s26 + $0x10] sm:$0xff] }
  0x3d   :  { %882 = vmatpush.bf16.msra.mxu0 %v13455_v9  ;;  %1176 = vperm.xlu1 %14011, %v14509_v14   ;;  %v13461_v21 = vld [vmem:[%s19116_s26 + $0x60] sm:$0xff]  ;;  %v13460_v28 = vld [vmem:[%s19116_s26 + $0x58] sm:$0xff]  ;;  %v13459_v32 = vld [vmem:[%s19116_s26 + $0x50] sm:$0xff] }
  0x3e   :  { %946 = vmatpush.bf16.msra.mxu1 %v13463_v10  ;;  %1166 = vperm.xlu0 %14010, %v14511_v15   ;;  %v13469_v22 = vld [vmem:[%s19116_s26 + $0xa0] sm:$0xff]  ;;  %v13468_v29 = vld [vmem:[%s19116_s26 + $0x98] sm:$0xff]  ;;  %v13467_v33 = vld [vmem:[%s19116_s26 + $0x90] sm:$0xff] }
  0x3f   :  { %1010 = vmatpush.bf16.msra.mxu2 %v13471_v11  ;;  %v13477_v23 = vld [vmem:[%s19116_s26 + $0xe0] sm:$0xff]  ;;  %v13476_v30 = vld [vmem:[%s19116_s26 + $0xd8] sm:$0xff]  ;;  %v13475_v34 = vld [vmem:[%s19116_s26 + $0xd0] sm:$0xff] }
  0x40   :  { %1074 = vmatpush.bf16.msra.mxu3 %v13479_v12  ;;  %v14576_v35 = vld [vmem:[%s19117_s6] sm:$0xff]  ;;  %v14581_v36 = vld [vmem:[%s19117_s6 + $0x8] sm:$0xff]  ;;  %v14586_v37 = vld [vmem:[%s19117_s6 + $0x10] sm:$0xff] }
  0x41   :  { %883 = vmatpush.bf16.msra.mxu0 %v13454_v16  ;;  %v14591_v38 = vld [vmem:[%s19117_s6 + $0x18] sm:$0xff]  ;;  %v13450_v42 = vld [vmem:[%s19116_s26 + $0x8] sm:$0xff]  ;;  %v292_v46 = vrot.slane %v14576_v35, 1  ;;  %v293_v47 = vrot.slane %v14581_v36, 1  ;;  %v295_v48 = vrot.slane %v14586_v37, 1  ;;  %v404_v50 = vrot.slane %v14581_v36, 2 }
  0x42   :  { %947 = vmatpush.bf16.msra.mxu1 %v13462_v17  ;;  %v13458_v43 = vld [vmem:[%s19116_s26 + $0x48] sm:$0xff]  ;;  %v297_v49 = vrot.slane %v14591_v38, 1  ;;  %v405_v51 = vrot.slane %v14586_v37, 2  ;;  %v407_v52 = vrot.slane %v14591_v38, 2  ;;  %v13449_v53 = vld [vmem:[%s19116_s26] sm:$0xff]  ;;  %v581_v0 = vpack.c.bf16 %v14581_v36, %v14576_v35  ;;  %v14664_v11 = vld [vmem:[#allocation15 + $0x80] sm:$0xff] }
  0x43   :  { %1011 = vmatpush.bf16.msra.mxu2 %v13470_v18  ;;  %v13466_v44 = vld [vmem:[%s19116_s26 + $0x88] sm:$0xff]  ;;  %v13457_v54 = vld [vmem:[%s19116_s26 + $0x40] sm:$0xff]  ;;  %v14636_v57 = vsel %vm291_vm0, %v292_v46, %v293_v47  ;;  %v296_v58 = vsel %vm291_vm0, %v293_v47, %v295_v48 }
  0x44   :  { %1075 = vmatpush.bf16.msra.mxu3 %v13478_v19  ;;  %1201 = vperm.xlu2 %14012, %v14540_v24   ;;  %v13474_v45 = vld [vmem:[%s19116_s26 + $0xc8] sm:$0xff]  ;;  %v13465_v55 = vld [vmem:[%s19116_s26 + $0x80] sm:$0xff]  ;;  %v298_v59 = vsel %vm291_vm0, %v295_v48, %v297_v49  ;;  %v406_v60 = vsel %vm403_vm1, %v404_v50, %v405_v51  ;;  %v408_v61 = vsel %vm403_vm1, %v405_v51, %v407_v52 }
  0x45   :  { %884 = vmatpush.bf16.msra.mxu0 %v13453_v20  ;;  %1196 = vperm.xlu1 %14011, %v14542_v25   ;;  %v13473_v56 = vld [vmem:[%s19116_s26 + $0xc0] sm:$0xff]  ;;  %v582_v5 = vpack.c.bf16 %v296_v58, %v14636_v57  ;;  %v583_v6 = vpack.c.bf16 %v298_v59, %v296_v58  ;;  %v584_v7 = vpack.c.bf16 %v408_v61, %v406_v60  ;;  %v230_v9 = vld [vmem:[%s19117_s6 + $0x28] sm:$0xff]  ;;  %s14302_s26 = smov [#allocation4]  }
  0x46   :  { %948 = vmatpush.bf16.msra.mxu1 %v13461_v21  ;;  %1191 = vperm.xlu0 %14010, %v14544_v26   ;;  %v229_v8 = vld [vmem:[%s19117_s6 + $0x20] sm:$0xff]  ;;  %v14666_v12 = vld [vmem:[#allocation15 + $0x78] sm:$0xff]  ;;  %v301_v17 = vrot.slane %v230_v9, 1  ;;  %v411_v19 = vrot.slane %v230_v9, 2  ;;  %s221_s3 = sshll.u32 %s14302_s26, 4  ;;  %s222_s3 = int_to_ptr.vmem [resolvable:$true] %s221_s3 }
  0x47   :  { %1012 = vmatpush.bf16.msra.mxu2 %v13469_v22  ;;  %v14662_v10 = vld [vmem:[#allocation15 + $0x88] sm:$0xff]  ;;  %v299_v16 = vrot.slane %v229_v8, 1  ;;  %v409_v18 = vrot.slane %v229_v8, 2  ;;  %v234_v58 = vld [vmem:[%s19117_s6 + $0x48] sm:$0xff]  ;;  %224 = dma.hbm_to_vmem [thread:$0]  %s220_s15, 32768, %s222_s3, [#allocation5] }
  0x48   :  { %1076 = vmatpush.bf16.msra.mxu3 %v13477_v23  ;;  %v309_v60 = vrot.slane %v234_v58, 1 }
  0x49   :  { %885 = vmatpush.bf16.msra.mxu0 %v13452_v27  ;;  %v300_v20 = vsel %vm291_vm0, %v297_v49, %v299_v16  ;;  %v302_v21 = vsel %vm291_vm0, %v299_v16, %v301_v17  ;;  %v410_v22 = vsel %vm403_vm1, %v407_v52, %v409_v18  ;;  %v412_v23 = vsel %vm403_vm1, %v409_v18, %v411_v19  ;;  %v14675_v27 = vld [vmem:[#allocation15 + $0xa0] sm:$0xff] }
  0x4a   :  { %949 = vmatpush.bf16.msra.mxu1 %v13460_v28  ;;  %v14677_v28 = vld [vmem:[#allocation15 + $0x98] sm:$0xff]  ;;  %v589_v52 = vpack.c.bf16 %v230_v9, %v229_v8 }
  0x4b   :  { %1013 = vmatpush.bf16.msra.mxu2 %v13468_v29  ;;  %v585_v29 = vpack.c.bf16 %v14591_v38, %v14586_v37  ;;  %v232_v37 = vld [vmem:[%s19117_s6 + $0x38] sm:$0xff] }
  0x4c   :  { %1077 = vmatpush.bf16.msra.mxu3 %v13476_v30  ;;  %1216 = vperm.xlu2 %14012, %v14593_v39   ;;  %v14681_v30 = vld [vmem:[#allocation15 + $0x90] sm:$0xff]  ;;  %v14692_v38 = vld [vmem:[#allocation15 + $0xa8] sm:$0xff] }
  0x4d   :  { %886 = vmatpush.bf16.msra.mxu0 %v13451_v31  ;;  %1211 = vperm.xlu1 %14011, %v14595_v40   ;;  %v586_v31 = vpack.c.bf16 %v300_v20, %v298_v59 }
  0x4e   :  { %950 = vmatpush.bf16.msra.mxu1 %v13459_v32  ;;  %1206 = vperm.xlu0 %14010, %v14597_v41   ;;  %v587_v32 = vpack.c.bf16 %v302_v21, %v300_v20  ;;  %v236_v20 = vld [vmem:[%s19117_s6 + $0x58] sm:$0xff] }
  0x4f   :  { %1014 = vmatpush.bf16.msra.mxu2 %v13467_v33  ;;  %v588_v33 = vpack.c.bf16 %v412_v23, %v410_v22  ;;  %v313_v22 = vrot.slane %v236_v20, 1 }
  0x50   :  { %1078 = vmatpush.bf16.msra.mxu3 %v13475_v34  ;;  %v231_v34 = vld [vmem:[%s19117_s6 + $0x30] sm:$0xff] }
  0x51   :  { %887 = vmatpush.bf16.msra.mxu0 %v13450_v42  ;;  %v303_v42 = vrot.slane %v231_v34, 1  ;;  %v593_v9 = vpack.c.bf16 %v232_v37, %v231_v34 }
  0x52   :  { %951 = vmatpush.bf16.msra.mxu1 %v13458_v43  ;;  %v305_v43 = vrot.slane %v232_v37, 1 }
  0x53   :  { %1015 = vmatpush.bf16.msra.mxu2 %v13466_v44  ;;  %v413_v44 = vrot.slane %v231_v34, 2  ;;  %v304_v47 = vsel %vm291_vm0, %v301_v17, %v303_v42 }
  0x54   :  { %1079 = vmatpush.bf16.msra.mxu3 %v13474_v45  ;;  %1231 = vperm.xlu2 %14012, %v14644_v62   ;;  %v415_v45 = vrot.slane %v232_v37, 2  ;;  %v306_v48 = vsel %vm291_vm0, %v303_v42, %v305_v43 }
  0x55   :  { %888 = vmatpush.bf16.msra.mxu0 %v13449_v53  ;;  %1226 = vperm.xlu1 %14011, %v14646_v63   ;;  %v414_v49 = vsel %vm403_vm1, %v411_v19, %v413_v44  ;;  %v590_v53 = vpack.c.bf16 %v304_v47, %v302_v21  ;;  %v235_v19 = vld [vmem:[%s19117_s6 + $0x50] sm:$0xff] }
  0x56   :  { %952 = vmatpush.bf16.msra.mxu1 %v13457_v54  ;;  %1221 = vperm.xlu0 %14010, %v14650_v1   ;;  %v416_v51 = vsel %vm403_vm1, %v413_v44, %v415_v45  ;;  %v591_v54 = vpack.c.bf16 %v306_v48, %v304_v47  ;;  %v311_v21 = vrot.slane %v235_v19, 1  ;;  %v421_v23 = vrot.slane %v235_v19, 2  ;;  %v238_v47 = vld [vmem:[%s19117_s6 + $0x68] sm:$0xff] }
  0x57   :  { %1016 = vmatpush.bf16.msra.mxu2 %v13465_v55  ;;  %v592_v55 = vpack.c.bf16 %v416_v51, %v414_v49  ;;  %v317_v49 = vrot.slane %v238_v47, 1 }
  0x58   :  { %1080 = vmatpush.bf16.msra.mxu3 %v13473_v56  ;;  %889 = vmatmul.bf16.vlgmr.msra.gmra.mxu0 %v581_v0  ;;  %v233_v56 = vld [vmem:[%s19117_s6 + $0x40] sm:$0xff]  ;;  %v419_v0 = vrot.slane %v234_v58, 2 }
  0x59   :  { %953 = vmatmul.bf16.vlgmr.msra.gmra.mxu1 %v582_v5  ;;  %v307_v59 = vrot.slane %v233_v56, 1  ;;  %v417_v61 = vrot.slane %v233_v56, 2  ;;  %v597_v37 = vpack.c.bf16 %v234_v58, %v233_v56  ;;  %v601_v58 = vpack.c.bf16 %v236_v20, %v235_v19 }
  0x5a   :  { %1017 = vmatmul.bf16.vlgmr.msra.gmra.mxu2 %v583_v6 }
  0x5b   :  { %1081 = vmatmul.bf16.vlgmr.msra.gmra.mxu3 %v584_v7  ;;  %v308_v5 = vsel %vm291_vm0, %v305_v43, %v307_v59  ;;  %v310_v6 = vsel %vm291_vm0, %v307_v59, %v309_v60  ;;  %v418_v7 = vsel %vm403_vm1, %v415_v45, %v417_v61  ;;  %v420_v8 = vsel %vm403_vm1, %v417_v61, %v419_v0  ;;  %v237_v45 = vld [vmem:[%s19117_s6 + $0x60] sm:$0xff] }
  0x5c   :  { %1246 = vperm.xlu2 %14012, %v14662_v10   ;;  %v594_v16 = vpack.c.bf16 %v308_v5, %v306_v48  ;;  %v595_v17 = vpack.c.bf16 %v310_v6, %v308_v5  ;;  %v596_v18 = vpack.c.bf16 %v420_v8, %v418_v7  ;;  %v315_v48 = vrot.slane %v237_v45, 1  ;;  %v240_v5 = vld [vmem:[%s19117_s6 + $0x78] sm:$0xff] }
  0x5d   :  { %1241 = vperm.xlu1 %14011, %v14664_v11   ;;  %v425_v51 = vrot.slane %v237_v45, 2  ;;  %v321_v7 = vrot.slane %v240_v5, 1 }
  0x5e   :  { %1236 = vperm.xlu0 %14010, %v14666_v12  }
  0x64   :  { %1261 = vperm.xlu2 %14012, %v14675_v27  }
  0x65   :  { %1256 = vperm.xlu1 %14011, %v14677_v28  }
  0x66   :  { %1251 = vperm.xlu0 %14010, %v14681_v30  }
  0x68   :  { %894 = vmatmul.bf16.gmra.mxu0 %v585_v29  ;;  %v423_v29 = vrot.slane %v236_v20, 2  ;;  %v605_v20 = vpack.c.bf16 %v238_v47, %v237_v45 }
  0x69   :  { %958 = vmatmul.bf16.gmra.mxu1 %v586_v31  ;;  %v312_v31 = vsel %vm291_vm0, %v309_v60, %v311_v21 }
  0x6a   :  { %1022 = vmatmul.bf16.gmra.mxu2 %v587_v32  ;;  %v314_v32 = vsel %vm291_vm0, %v311_v21, %v313_v22  ;;  %v424_v34 = vsel %vm403_vm1, %v421_v23, %v423_v29  ;;  %v598_v42 = vpack.c.bf16 %v312_v31, %v310_v6 }
  0x6b   :  { %1086 = vmatmul.bf16.gmra.mxu3 %v588_v33  ;;  %v422_v33 = vsel %vm403_vm1, %v419_v0, %v421_v23  ;;  %v599_v43 = vpack.c.bf16 %v314_v32, %v312_v31  ;;  %v239_v0 = vld [vmem:[%s19117_s6 + $0x70] sm:$0xff]  ;;  %v242_v31 = vld [vmem:[%s19117_s6 + $0x88] sm:$0xff] }
  0x6c   :  { %2370 = vperm.xlu2 %14012, %v14511_v15   ;;  %v600_v44 = vpack.c.bf16 %v424_v34, %v422_v33  ;;  %v319_v6 = vrot.slane %v239_v0, 1  ;;  %v429_v8 = vrot.slane %v239_v0, 2  ;;  %v325_v33 = vrot.slane %v242_v31, 1 }
  0x6d   :  { %2365 = vperm.xlu1 %14011, %v14478_v4   ;;  %v609_v45 = vpack.c.bf16 %v240_v5, %v239_v0 }
  0x6e   :  { %1266 = vperm.xlu0 %14010, %v14692_v38  }
  0x74   :  { %2385 = vperm.xlu2 %14012, %v14474_v2  }
  0x75   :  { %2380 = vperm.xlu1 %14011, %v14509_v14  }
  0x76   :  { %2375 = vperm.xlu0 %14010, %v14476_v3  }
  0x78   :  { %899 = vmatmul.bf16.gmra.mxu0 %v589_v52  ;;  %v427_v52 = vrot.slane %v238_v47, 2 }
  0x79   :  { %963 = vmatmul.bf16.gmra.mxu1 %v590_v53  ;;  %v316_v53 = vsel %vm291_vm0, %v313_v22, %v315_v48 }
  0x7a   :  { %1027 = vmatmul.bf16.gmra.mxu2 %v591_v54  ;;  %v318_v54 = vsel %vm291_vm0, %v315_v48, %v317_v49  ;;  %v428_v56 = vsel %vm403_vm1, %v425_v51, %v427_v52  ;;  %v602_v59 = vpack.c.bf16 %v316_v53, %v314_v32 }
  0x7b   :  { %1091 = vmatmul.bf16.gmra.mxu3 %v592_v55  ;;  %v426_v55 = vsel %vm403_vm1, %v423_v29, %v425_v51  ;;  %v603_v60 = vpack.c.bf16 %v318_v54, %v316_v53  ;;  %v241_v29 = vld [vmem:[%s19117_s6 + $0x80] sm:$0xff]  ;;  %v243_v51 = vld [vmem:[%s19117_s6 + $0x90] sm:$0xff] }
  0x7c   :  { %2400 = vperm.xlu2 %14012, %v14542_v25   ;;  %v604_v61 = vpack.c.bf16 %v428_v56, %v426_v55  ;;  %v323_v32 = vrot.slane %v241_v29, 1  ;;  %v433_v34 = vrot.slane %v241_v29, 2  ;;  %v327_v53 = vrot.slane %v243_v51, 1 }
  0x7d   :  { %2395 = vperm.xlu1 %14011, %v14544_v26   ;;  %v437_v55 = vrot.slane %v243_v51, 2  ;;  %v613_v0 = vpack.c.bf16 %v242_v31, %v241_v29 }
  0x7e   :  { %2390 = vperm.xlu0 %14010, %v14507_v13  }
  0x84   :  { %2415 = vperm.xlu2 %14012, %v14595_v40  }
  0x85   :  { %2410 = vperm.xlu1 %14011, %v14597_v41  }
  0x86   :  { %2405 = vperm.xlu0 %14010, %v14540_v24  }
  0x88   :  { %904 = vmatmul.bf16.gmra.mxu0 %v593_v9  ;;  %v431_v9 = vrot.slane %v240_v5, 2 }
  0x89   :  { %968 = vmatmul.bf16.gmra.mxu1 %v594_v16  ;;  %v320_v16 = vsel %vm291_vm0, %v317_v49, %v319_v6 }
  0x8a   :  { %1032 = vmatmul.bf16.gmra.mxu2 %v595_v17  ;;  %v322_v17 = vsel %vm291_vm0, %v319_v6, %v321_v7  ;;  %v432_v19 = vsel %vm403_vm1, %v429_v8, %v431_v9  ;;  %v606_v21 = vpack.c.bf16 %v320_v16, %v318_v54 }
  0x8b   :  { %1096 = vmatmul.bf16.gmra.mxu3 %v596_v18  ;;  %v430_v18 = vsel %vm403_vm1, %v427_v52, %v429_v8  ;;  %v607_v22 = vpack.c.bf16 %v322_v17, %v320_v16  ;;  %v244_v52 = vld [vmem:[%s19117_s6 + $0x98] sm:$0xff] }
  0x8c   :  { %2430 = vperm.xlu2 %14012, %v14646_v63   ;;  %v608_v23 = vpack.c.bf16 %v432_v19, %v430_v18  ;;  %v329_v54 = vrot.slane %v244_v52, 1  ;;  %v439_v56 = vrot.slane %v244_v52, 2  ;;  %v246_v18 = vld [vmem:[%s19117_s6 + $0xa8] sm:$0xff] }
  0x8d   :  { %2425 = vperm.xlu1 %14011, %v14650_v1  }
  0x8e   :  { %2420 = vperm.xlu0 %14010, %v14593_v39  }
  0x94   :  { %2445 = vperm.xlu2 %14012, %v14664_v11  }
  0x95   :  { %2440 = vperm.xlu1 %14011, %v14666_v12  }
  0x96   :  { %2435 = vperm.xlu0 %14010, %v14644_v62  }
  0x98   :  { %909 = vmatmul.bf16.gmra.mxu0 %v597_v37  ;;  %v324_v37 = vsel %vm291_vm0, %v321_v7, %v323_v32 }
  0x99   :  { %973 = vmatmul.bf16.gmra.mxu1 %v598_v42  ;;  %v326_v42 = vsel %vm291_vm0, %v323_v32, %v325_v33  ;;  %v610_v47 = vpack.c.bf16 %v324_v37, %v322_v17  ;;  %v245_v17 = vld [vmem:[%s19117_s6 + $0xa0] sm:$0xff] }
  0x9a   :  { %1037 = vmatmul.bf16.gmra.mxu2 %v599_v43  ;;  %v434_v43 = vsel %vm403_vm1, %v431_v9, %v433_v34  ;;  %v611_v48 = vpack.c.bf16 %v326_v42, %v324_v37  ;;  %v331_v29 = vrot.slane %v245_v17, 1 }
  0x9b   :  { %1101 = vmatmul.bf16.gmra.mxu3 %v600_v44 }
  0x9c   :  { %2460 = vperm.xlu2 %14012, %v14677_v28  }
  0x9d   :  { %2455 = vperm.xlu1 %14011, %v14681_v30  }
  0x9e   :  { %2450 = vperm.xlu0 %14010, %v14662_v10  }
  0xa4   :  { %3569 = vperm.xlu2 %14012, %v14478_v4  }
  0xa5   :  { %2470 = vperm.xlu1 %14011, %v14692_v38  }
  0xa6   :  { %2465 = vperm.xlu0 %14010, %v14675_v27  }
  0xa8   :  { %914 = vmatmul.bf16.gmra.mxu0 %v601_v58  ;;  %v328_v58 = vsel %vm291_vm0, %v325_v33, %v327_v53  ;;  %v441_v33 = vrot.slane %v245_v17, 2 }
  0xa9   :  { %978 = vmatmul.bf16.gmra.mxu1 %v602_v59  ;;  %v330_v59 = vsel %vm291_vm0, %v327_v53, %v329_v54  ;;  %v614_v6 = vpack.c.bf16 %v328_v58, %v326_v42 }
  0xaa   :  { %1042 = vmatmul.bf16.gmra.mxu2 %v603_v60  ;;  %v615_v7 = vpack.c.bf16 %v330_v59, %v328_v58  ;;  %v442_v42 = vsel %vm403_vm1, %v439_v56, %v441_v33 }
  0xab   :  { %1106 = vmatmul.bf16.gmra.mxu3 %v604_v61  ;;  %v440_v61 = vsel %vm403_vm1, %v437_v55, %v439_v56 }
  0xac   :  { %3584 = vperm.xlu2 %14012, %v14509_v14  }
  0xad   :  { %3579 = vperm.xlu1 %14011, %v14476_v3  }
  0xae   :  { %3574 = vperm.xlu0 %14010, %v14511_v15  }
  0xb4   :  { %3599 = vperm.xlu2 %14012, %v14544_v26  }
  0xb5   :  { %3594 = vperm.xlu1 %14011, %v14507_v13  }
  0xb6   :  { %3589 = vperm.xlu0 %14010, %v14474_v2   ;;  %v435_v2 = vrot.slane %v242_v31, 2  ;;  %v333_v31 = vrot.slane %v246_v18, 1 }
  0xb8   :  { %919 = vmatmul.bf16.gmra.mxu0 %v605_v20  ;;  %v436_v44 = vsel %vm403_vm1, %v433_v34, %v435_v2  ;;  %v438_v60 = vsel %vm403_vm1, %v435_v2, %v437_v55  ;;  %v443_v34 = vrot.slane %v246_v18, 2  ;;  %v332_v2 = vsel %vm291_vm0, %v329_v54, %v331_v29 }
  0xb9   :  { %983 = vmatmul.bf16.gmra.mxu1 %v606_v21  ;;  %v612_v49 = vpack.c.bf16 %v436_v44, %v434_v43  ;;  %v616_v9 = vpack.c.bf16 %v440_v61, %v438_v60  ;;  %v334_v37 = vsel %vm291_vm0, %v331_v29, %v333_v31 }
  0xba   :  { %1047 = vmatmul.bf16.gmra.mxu2 %v607_v22  ;;  %v444_v43 = vsel %vm403_vm1, %v441_v33, %v443_v34  ;;  %v619_v53 = vpack.c.bf16 %v334_v37, %v332_v2 }
  0xbb   :  { %1111 = vmatmul.bf16.gmra.mxu3 %v608_v23  ;;  %v620_v58 = vpack.c.bf16 %v444_v43, %v442_v42 }
  0xbc   :  { %3614 = vperm.xlu2 %14012, %v14597_v41  }
  0xbd   :  { %3609 = vperm.xlu1 %14011, %v14540_v24  }
  0xbe   :  { %3604 = vperm.xlu0 %14010, %v14542_v25  }
  0xc4   :  { %3629 = vperm.xlu2 %14012, %v14650_v1  }
  0xc5   :  { %3624 = vperm.xlu1 %14011, %v14593_v39  }
  0xc6   :  { %3619 = vperm.xlu0 %14010, %v14595_v40  }
  0xc8   :  { %924 = vmatmul.bf16.gmra.mxu0 %v609_v45  ;;  %v617_v45 = vpack.c.bf16 %v244_v52, %v243_v51  ;;  %v4753_v51 = vld [vmem:[#allocation15 + $0x20] sm:$0xff] }
  0xc9   :  { %988 = vmatmul.bf16.gmra.mxu1 %v610_v47 }
  0xca   :  { %1052 = vmatmul.bf16.gmra.mxu2 %v611_v48 }
  0xcb   :  { %1116 = vmatmul.bf16.gmra.mxu3 %v612_v49  ;;  %v618_v49 = vpack.c.bf16 %v332_v2, %v330_v59 }
  0xcc   :  { %3644 = vperm.xlu2 %14012, %v14666_v12  }
  0xcd   :  { %3639 = vperm.xlu1 %14011, %v14644_v62  }
  0xce   :  { %3634 = vperm.xlu0 %14010, %v14646_v63  }
  0xd4   :  { %3659 = vperm.xlu2 %14012, %v14681_v30  }
  0xd5   :  { %v890_v5 = vpop.f32.mrf.mxu0  ;;  %3654 = vperm.xlu1 %14011, %v14662_v10  }
  0xd6   :  { %v954_v8 = vpop.f32.mrf.mxu1  ;;  %3649 = vperm.xlu0 %14010, %v14664_v11  }
  0xd7   :  { %v955_v16 = vadd.f32 %v954_v8, %v890_v5 }
  0xd8   :  { %929 = vmatmul.bf16.gmra.mxu0 %v613_v0  ;;  %v466_v0 = vrot.slane %v14576_v35, 2 }
  0xd9   :  { %993 = vmatmul.bf16.gmra.mxu1 %v614_v6 }
  0xda   :  { %1057 = vmatmul.bf16.gmra.mxu2 %v615_v7  ;;  %v621_v7 = vpack.c.bf16 %v246_v18, %v245_v17 }
  0xdb   :  { %1121 = vmatmul.bf16.gmra.mxu3 %v616_v9 }
  0xdc   :  { %3674 = vperm.xlu2 %14012, %v14692_v38  }
  0xdd   :  { %v1018_v19 = vpop.f32.mrf.mxu2  ;;  %v14806_v22 = vpop.f32.mrf.mxu0  ;;  %3669 = vperm.xlu1 %14011, %v14675_v27  }
  0xde   :  { %v1019_v20 = vadd.f32 %v1018_v19, %v955_v16  ;;  %v1082_v21 = vpop.f32.mrf.mxu3  ;;  %v14808_v23 = vpop.f32.mrf.mxu1  ;;  %3664 = vperm.xlu0 %14010, %v14677_v28  }
  0xe0   :  { %v14810_v32 = vadd.f32 %v1082_v21, %v1019_v20 }
  0xe4   :  { %4783 = vperm.xlu2 %14012, %v14476_v3   ;;  %v358_v3 = vsel %vm291_vm0, %v333_v31, %v292_v46 }
  0xe5   :  { %v14819_v44 = vpop.f32.mrf.mxu2  ;;  %v895_v48 = vpop.f32.mrf.mxu0  ;;  %4778 = vperm.xlu1 %14011, %v14511_v15   ;;  %v470_v15 = vsel %vm403_vm1, %v443_v34, %v466_v0  ;;  %v623_v16 = vpack.c.bf16 %v14636_v57, %v358_v3 }
  0xe6   :  { %v14821_v47 = vpop.f32.mrf.mxu3  ;;  %v959_v55 = vpop.f32.mrf.mxu1  ;;  %4773 = vperm.xlu0 %14010, %v14478_v4   ;;  %v467_v4 = vsel %vm403_vm1, %v466_v0, %v404_v50  ;;  %v14933_v0 = vld [vmem:[%s19056_s13 + $0x28] sm:$0xff] }
  0xe7   :  { %v960_v60 = vadd.f32 %v959_v55, %v895_v48  ;;  %v624_v19 = vpack.c.bf16 %v467_v4, %v470_v15  ;;  %v14911_v48 = vld [vmem:[%s19056_s13 + $0x18] sm:$0xff]  ;;  %v14918_v55 = vld [vmem:[%s19056_s13 + $0x10] sm:$0xff] }
  0xe8   :  { %934 = vmatmul.bf16.gmra.mxu0 %v617_v45  ;;  %v14906_v45 = vld [vmem:[%s19056_s13 + $0x20] sm:$0xff] }
  0xe9   :  { %998 = vmatmul.bf16.gmra.mxu1 %v618_v49 }
  0xea   :  { %1062 = vmatmul.bf16.gmra.mxu2 %v619_v53 }
  0xeb   :  { %1126 = vmatmul.bf16.gmra.mxu3 %v620_v58 }
  0xec   :  { %4798 = vperm.xlu2 %14012, %v14507_v13   ;;  %v622_v13 = vpack.c.bf16 %v358_v3, %v334_v37 }
  0xed   :  { %v1023_v54 = vpop.f32.mrf.mxu2  ;;  %v14826_v61 = vpop.f32.mrf.mxu0  ;;  %4793 = vperm.xlu1 %14011, %v4753_v51  }
  0xee   :  { %v1024_v52 = vadd.f32 %v1023_v54, %v960_v60  ;;  %v1087_v56 = vpop.f32.mrf.mxu3  ;;  %v14828_v59 = vpop.f32.mrf.mxu1  ;;  %4788 = vperm.xlu0 %14010, %v14509_v14   ;;  %v14926_v54 = vld [vmem:[%s19056_s13 + $0x30] sm:$0xff] }
  0xf0   :  { %v14831_v5 = vadd.f32 %v1087_v56, %v1024_v52 }
  0xf2   :  { %19118 = vst [vmem:[#allocation31_spill] sm:$0xff] %v14831_v5 }
  0xf4   :  { %4813 = vperm.xlu2 %14012, %v14540_v24  }
  0xf5   :  { %v14842_v6 = vpop.f32.mrf.mxu2  ;;  %v900_v9 = vpop.f32.mrf.mxu0  ;;  %4808 = vperm.xlu1 %14011, %v14542_v25  }
  0xf6   :  { %v14844_v8 = vpop.f32.mrf.mxu3  ;;  %v964_v14 = vpop.f32.mrf.mxu1  ;;  %4803 = vperm.xlu0 %14010, %v14544_v26  }
  0xf7   :  { %v965_v35 = vadd.f32 %v964_v14, %v900_v9 }
  0xf8   :  { %939 = vmatmul.bf16.gmra.mxu0 %v621_v7 }
  0xf9   :  { %1003 = vmatmul.bf16.gmra.mxu1 %v622_v13 }
  0xfa   :  { %1067 = vmatmul.bf16.gmra.mxu2 %v623_v16 }
  0xfb   :  { %1131 = vmatmul.bf16.gmra.mxu3 %v624_v19 }
  0xfc   :  { %4828 = vperm.xlu2 %14012, %v14593_v39  }
  0xfd   :  { %v1028_v36 = vpop.f32.mrf.mxu2  ;;  %v14850_v17 = vpop.f32.mrf.mxu0  ;;  %4823 = vperm.xlu1 %14011, %v14595_v40  }
  0xfe   :  { %v1029_v46 = vadd.f32 %v1028_v36, %v965_v35  ;;  %v1092_v50 = vpop.f32.mrf.mxu3  ;;  %v14852_v18 = vpop.f32.mrf.mxu1  ;;  %4818 = vperm.xlu0 %14010, %v14597_v41  }
  0xff   :  { %v14964_v36 = vpop.permute.xlu1 %1171 }
 0x100   :  { %v14854_v57 = vadd.f32 %v1092_v50, %v1029_v46  ;;  %19119 = vst [vmem:[#allocation32_spill] sm:$0xff] %v14964_v36  ;;  %v14966_v46 = vpop.permute.xlu0 %1161 }
 0x101   :  { %19120 = vst [vmem:[#allocation33_spill] sm:$0xff] %v14966_v46 }
 0x104   :  { %4843 = vperm.xlu2 %14012, %v14644_v62  }
 0x105   :  { %v14859_v24 = vpop.f32.mrf.mxu2  ;;  %v905_v26 = vpop.f32.mrf.mxu0  ;;  %4838 = vperm.xlu1 %14011, %v14646_v63  }
 0x106   :  { %v14861_v25 = vpop.f32.mrf.mxu3  ;;  %v969_v20 = vpop.f32.mrf.mxu1  ;;  %4833 = vperm.xlu0 %14010, %v14650_v1  }
 0x107   :  { %v970_v21 = vadd.f32 %v969_v20, %v905_v26 }
 0x10c   :  { %4858 = vperm.xlu2 %14012, %v14662_v10   ;;  %v14885_v10 = vld [vmem:[%s19056_s13 + $0x8] sm:$0xff] }
 0x10d   :  { %v1033_v29 = vpop.f32.mrf.mxu2  ;;  %v14866_v33 = vpop.f32.mrf.mxu0  ;;  %4853 = vperm.xlu1 %14011, %v14664_v11   ;;  %v14890_v11 = vld [vmem:[%s19056_s13] sm:$0xff] }
 0x10e   :  { %v1034_v31 = vadd.f32 %v1033_v29, %v970_v21  ;;  %v1097_v39 = vpop.f32.mrf.mxu3  ;;  %v14868_v40 = vpop.f32.mrf.mxu1  ;;  %4848 = vperm.xlu0 %14010, %v14666_v12  }
 0x10f   :  { %v14974_v21 = vpop.permute.xlu2 %1181 }
 0x110   :  { %v14870_v41 = vadd.f32 %v1097_v39, %v1034_v31  ;;  %19122 = vst [vmem:[#allocation35_spill] sm:$0xff] %v14974_v21  ;;  %v14981_v31 = vpop.permute.xlu1 %1176  ;;  %v14983_v39 = vpop.permute.xlu0 %1166 }
 0x111   :  { %19123 = vst [vmem:[#allocation36_spill] sm:$0xff] %v14981_v31 }
 0x112   :  { %19124 = vst [vmem:[#allocation37_spill] sm:$0xff] %v14983_v39 }
 0x114   :  { %4873 = vperm.xlu2 %14012, %v14675_v27  }
 0x115   :  { %v14875_v62 = vpop.f32.mrf.mxu2  ;;  %v910_v1 = vpop.f32.mrf.mxu0  ;;  %4868 = vperm.xlu1 %14011, %v14677_v28  }
 0x116   :  { %v14877_v63 = vpop.f32.mrf.mxu3  ;;  %v974_v34 = vpop.f32.mrf.mxu1  ;;  %4863 = vperm.xlu0 %14010, %v14681_v30  }
 0x117   :  { %v975_v2 = vadd.f32 %v974_v34, %v910_v1 }
 0x11c   :  { %5928 = vperm.xlu2 %14012, %v14885_v10  }
 0x11d   :  { %v1038_v37 = vpop.f32.mrf.mxu2  ;;  %v14892_v43 = vpop.f32.mrf.mxu0  ;;  %5923 = vperm.xlu1 %14011, %v14890_v11  }
 0x11e   :  { %v1039_v12 = vadd.f32 %v1038_v37, %v975_v2  ;;  %v1102_v42 = vpop.f32.mrf.mxu3  ;;  %v14894_v27 = vpop.f32.mrf.mxu1  ;;  %4878 = vperm.xlu0 %14010, %v14692_v38  }
 0x120   :  { %v14896_v28 = vadd.f32 %v1102_v42, %v1039_v12  ;;  %v14995_v12 = vpop.permute.xlu2 %1186  ;;  %v957_v42 = vadd.f32 %v14808_v23, %v14806_v22  ;;  %v15016_v22 = vpop.permute.xlu1 %1196 }
 0x124   :  { %5943 = vperm.xlu2 %14012, %v14906_v45  }
 0x125   :  { %v14901_v30 = vpop.f32.mrf.mxu2  ;;  %v915_v53 = vpop.f32.mrf.mxu0  ;;  %5938 = vperm.xlu1 %14011, %v14911_v48  }
 0x126   :  { %v14913_v49 = vpop.f32.mrf.mxu3  ;;  %v979_v38 = vpop.f32.mrf.mxu1  ;;  %5933 = vperm.xlu0 %14010, %v14918_v55  }
 0x127   :  { %v980_v58 = vadd.f32 %v979_v38, %v915_v53  ;;  %v1021_v53 = vadd.f32 %v14819_v44, %v957_v42  ;;  %v967_v44 = vadd.f32 %v14852_v18, %v14850_v17  ;;  %v972_v17 = vadd.f32 %v14868_v40, %v14866_v33 }
 0x129   :  { %v1031_v42 = vadd.f32 %v14859_v24, %v967_v44  ;;  %v1036_v44 = vadd.f32 %v14875_v62, %v972_v17  ;;  %v977_v62 = vadd.f32 %v14894_v27, %v14892_v43 }
 0x12c   :  { %6557 = vperm.xlu2 %14012, %v14890_v11  }
 0x12d   :  { %v1043_v60 = vpop.f32.mrf.mxu2  ;;  %v14928_v56 = vpop.f32.mrf.mxu0  ;;  %5953 = vperm.xlu1 %14011, %v14926_v54  }
 0x12e   :  { %v1044_v51 = vadd.f32 %v1043_v60, %v980_v58  ;;  %v1107_v52 = vpop.f32.mrf.mxu3  ;;  %v14935_v3 = vpop.f32.mrf.mxu1  ;;  %5948 = vperm.xlu0 %14010, %v14933_v0   ;;  %v962_v58 = vadd.f32 %v14828_v59, %v14826_v61 }
 0x12f   :  { %v15024_v61 = vpop.permute.xlu2 %1201 }
 0x130   :  { %v14937_v4 = vadd.f32 %v1107_v52, %v1044_v51  ;;  %v15009_v52 = vpop.permute.xlu0 %1191  ;;  %v1026_v23 = vadd.f32 %v14842_v6, %v962_v58  ;;  %v1269_v6 = vmul.f32 %v14966_v46, %v14810_v32 }
 0x131   :  { %v1275_v27 = vmul.f32 %v15009_v52, %v14870_v41 }
 0x132   :  { %v15029_v59 = vadd.f32 %v14844_v8, %v1026_v23  ;;  %v15050_v23 = vadd.f32 %v14861_v25, %v1031_v42  ;;  %v1319_v40 = vmul.f32 %v1269_v6, %v14810_v32  ;;  %v1273_v25 = vmul.f32 %v14974_v21, %v14854_v57 }
 0x134   :  { %6572 = vperm.xlu2 %14012, %v14911_v48   ;;  %v1272_v24 = vmul.f32 %v14981_v31, %v15029_v59  ;;  %v1274_v17 = vmul.f32 %v14995_v12, %v15050_v23  ;;  %v15070_v31 = vadd.f32 %v14877_v63, %v1036_v44  ;;  %v1323_v43 = vmul.f32 %v1273_v25, %v14854_v57 }
 0x135   :  { %v14942_v15 = vpop.f32.mrf.mxu2  ;;  %v14946_v9 = vpop.f32.mrf.mxu0  ;;  %6567 = vperm.xlu1 %14011, %v14918_v55   ;;  %v982_v63 = vadd.f32 %v14935_v3, %v14928_v56 }
 0x136   :  { %v14944_v7 = vpop.f32.mrf.mxu3  ;;  %v14948_v13 = vpop.f32.mrf.mxu1  ;;  %6562 = vperm.xlu0 %14010, %v14885_v10  }
 0x137   :  { %v15073_v46 = vpop.permute.xlu2 %1216 }
 0x138   :  { %v15055_v33 = vpop.permute.xlu0 %1206 }
 0x13c   :  { %6587 = vperm.xlu2 %14012, %v14926_v54  }
 0x13d   :  { %v14953_v16 = vpop.f32.mrf.mxu2  ;;  %v14957_v19 = vpop.f32.mrf.mxu0  ;;  %6582 = vperm.xlu1 %14011, %v14933_v0  }
 0x13e   :  { %v14955_v14 = vpop.f32.mrf.mxu3  ;;  %v14959_v35 = vpop.f32.mrf.mxu1  ;;  %6577 = vperm.xlu0 %14010, %v14906_v45  }
 0x144   :  { %7201 = vperm.xlu2 %14012, %v14918_v55  }
 0x145   :  { %v14968_v50 = vpop.f32.mrf.mxu2  ;;  %v14972_v20 = vpop.f32.mrf.mxu0  ;;  %7196 = vperm.xlu1 %14011, %v14885_v10  }
 0x146   :  { %v14970_v26 = vpop.f32.mrf.mxu3  ;;  %v14976_v29 = vpop.f32.mrf.mxu1  ;;  %7191 = vperm.xlu0 %14010, %v14890_v11  }
 0x147   :  { %19121 = vst [vmem:[#allocation34_spill] sm:$0xff] %v14970_v26 }
 0x14c   :  { %7216 = vperm.xlu2 %14012, %v14933_v0  }
 0x14d   :  { %v14985_v1 = vpop.f32.mrf.mxu2  ;;  %v14989_v2 = vpop.f32.mrf.mxu0  ;;  %7211 = vperm.xlu1 %14011, %v14906_v45  }
 0x14e   :  { %v14987_v34 = vpop.f32.mrf.mxu3  ;;  %v14991_v37 = vpop.f32.mrf.mxu1  ;;  %7206 = vperm.xlu0 %14010, %v14911_v48  }
 0x14f   :  { %19125 = vst [vmem:[#allocation38_spill] sm:$0xff] %v14987_v34  ;;  %v15012_v34 = vadd.f32 %v14821_v47, %v1021_v53 }
 0x151   :  { %19126 = vst [vmem:[#allocation39_spill] sm:$0xff] %v15012_v34  ;;  %v1270_v47 = vmul.f32 %v14983_v39, %v15012_v34 }
 0x153   :  { %v1320_v8 = vmul.f32 %v1270_v47, %v15012_v34  ;;  %v1291_v42 = vadd.f32 %v1270_v47, %v1269_v6 }
 0x154   :  { %8070 = vperm.xlu2 %14012, %v14885_v10  }
 0x155   :  { %v15001_v38 = vpop.f32.mrf.mxu2  ;;  %v15007_v51 = vpop.f32.mrf.mxu0  ;;  %8065 = vperm.xlu1 %14011, %v14890_v11   ;;  %v1271_v11 = vmul.f32 %v14964_v36, %v14831_v5 }
 0x156   :  { %v15005_v60 = vpop.f32.mrf.mxu3  ;;  %v15014_v26 = vpop.f32.mrf.mxu1  ;;  %7221 = vperm.xlu0 %14010, %v14926_v54  }
 0x157   :  { %v15059_v36 = vpop.permute.xlu1 %1211  ;;  %v1321_v39 = vmul.f32 %v1271_v11, %v14831_v5  ;;  %v1292_v5 = vadd.f32 %v1291_v42, %v1271_v11 }
 0x15c   :  { %8085 = vperm.xlu2 %14012, %v14906_v45   ;;  %v1341_v45 = vadd.f32 %v1320_v8, %v1319_v40  ;;  %v1293_v8 = vadd.f32 %v1292_v5, %v1272_v24  ;;  %v1324_v40 = vmul.f32 %v1274_v17, %v15050_v23  ;;  %v1046_v5 = vadd.f32 %v14942_v15, %v982_v63 }
 0x15d   :  { %v15034_v10 = vpop.f32.mrf.mxu2  ;;  %v15042_v53 = vpop.f32.mrf.mxu0  ;;  %8080 = vperm.xlu1 %14011, %v14911_v48   ;;  %v1322_v48 = vmul.f32 %v1272_v24, %v15029_v59 }
 0x15e   :  { %v15040_v18 = vpop.f32.mrf.mxu3  ;;  %v15045_v58 = vpop.f32.mrf.mxu1  ;;  %8075 = vperm.xlu0 %14010, %v14918_v55   ;;  %v1041_v55 = vadd.f32 %v14901_v30, %v977_v62  ;;  %v1342_v21 = vadd.f32 %v1341_v45, %v1321_v39  ;;  %v985_v30 = vadd.f32 %v14948_v13, %v14946_v9  ;;  %v1276_v39 = vmul.f32 %v15016_v22, %v15070_v31 }
 0x15f   :  { %v1294_v56 = vadd.f32 %v1293_v8, %v1273_v25  ;;  %v1325_v9 = vmul.f32 %v1275_v27, %v14870_v41  ;;  %v1277_v13 = vmul.f32 %v15024_v61, %v14896_v28  ;;  %v15105_v15 = vpop.permute.xlu1 %1226  ;;  %v15117_v8 = vpop.permute.xlu2 %1231 }
 0x160   :  { %v1343_v11 = vadd.f32 %v1342_v21, %v1322_v48  ;;  %v15090_v62 = vadd.f32 %v14913_v49, %v1041_v55  ;;  %v15098_v21 = vpop.permute.xlu0 %1221  ;;  %v1049_v24 = vadd.f32 %v14953_v16, %v985_v30  ;;  %v987_v49 = vadd.f32 %v14959_v35, %v14957_v19 }
 0x161   :  { %v1326_v42 = vmul.f32 %v1276_v39, %v15070_v31  ;;  %v15111_v48 = vadd.f32 %v14944_v7, %v1046_v5  ;;  %v1327_v35 = vmul.f32 %v1277_v13, %v14896_v28 }
 0x162   :  { %v1344_v3 = vadd.f32 %v1343_v11, %v1323_v43  ;;  %v1278_v45 = vmul.f32 %v15055_v33, %v15090_v62  ;;  %v1051_v16 = vadd.f32 %v14968_v50, %v987_v49  ;;  %v15120_v63 = vadd.f32 %v14955_v14, %v1049_v24 }
 0x163   :  { %v992_v50 = vadd.f32 %v14991_v37, %v14989_v2  ;;  %v19128_v37 = vld [vmem:[#allocation38_spill] sm:$0xff]  ;;  %v997_v49 = vadd.f32 %v15045_v58, %v15042_v53 }
 0x164   :  { %v1345_v25 = vadd.f32 %v1344_v3, %v1324_v40  ;;  %v1328_v5 = vmul.f32 %v1278_v45, %v15090_v62  ;;  %v19127_v3 = vld [vmem:[#allocation34_spill] sm:$0xff] }
 0x165   :  { %v15075_v34 = vpop.f32.mrf.mxu2  ;;  %v935_v6 = vpop.f32.mrf.mxu0  ;;  %8095 = vperm.xlu1 %14011, %v14926_v54   ;;  %v990_v54 = vadd.f32 %v14976_v29, %v14972_v20  ;;  %v1279_v20 = vmul.f32 %v15059_v36, %v14937_v4  ;;  %v1056_v14 = vadd.f32 %v15001_v38, %v992_v50 }
 0x166   :  { %v15080_v47 = vpop.f32.mrf.mxu3  ;;  %v999_v44 = vpop.f32.mrf.mxu1  ;;  %8090 = vperm.xlu0 %14010, %v14933_v0   ;;  %v1295_v0 = vadd.f32 %v1294_v56, %v1274_v17  ;;  %v1346_v19 = vadd.f32 %v1345_v25, %v1325_v9  ;;  %v1280_v56 = vmul.f32 %v15073_v46, %v15111_v48  ;;  %v15131_v9 = vadd.f32 %v19127_v3, %v1051_v16 }
 0x167   :  { %v1054_v7 = vadd.f32 %v14985_v1, %v990_v54  ;;  %v1329_v2 = vmul.f32 %v1279_v20, %v14937_v4  ;;  %v1000_v25 = vadd.f32 %v999_v44, %v935_v6  ;;  %v15149_v16 = vadd.f32 %v15005_v60, %v1056_v14 }
 0x168   :  { %v1296_v43 = vadd.f32 %v1295_v0, %v1275_v27  ;;  %v995_v27 = vadd.f32 %v15014_v26, %v15007_v51  ;;  %v1347_v40 = vadd.f32 %v1346_v19, %v1326_v42  ;;  %v1281_v26 = vmul.f32 %v15098_v21, %v15120_v63  ;;  %v15143_v42 = vpop.permute.xlu0 %1236 }
 0x169   :  { %v15138_v51 = vadd.f32 %v19128_v37, %v1054_v7  ;;  %v1330_v38 = vmul.f32 %v1280_v56, %v15111_v48 }
 0x16a   :  { %v1297_v11 = vadd.f32 %v1296_v43, %v1276_v39  ;;  %v1348_v24 = vadd.f32 %v1347_v40, %v1327_v35  ;;  %v1059_v39 = vadd.f32 %v15034_v10, %v995_v27  ;;  %v1061_v43 = vadd.f32 %v15075_v34, %v997_v49  ;;  %v15152_v10 = vpop.permute.xlu1 %1241  ;;  %v15160_v34 = vpop.permute.xlu2 %1246 }
 0x16b   :  { %v1331_v6 = vmul.f32 %v1281_v26, %v15120_v63  ;;  %v1283_v44 = vmul.f32 %v15117_v8, %v15138_v51 }
 0x16c   :  { %v1298_v1 = vadd.f32 %v1297_v11, %v1277_v13  ;;  %v1349_v0 = vadd.f32 %v1348_v24, %v1328_v5  ;;  %v1282_v13 = vmul.f32 %v15105_v15, %v15131_v9  ;;  %v1284_v5 = vmul.f32 %v15143_v42, %v15149_v16 }
 0x16d   :  { %v1063_v55 = vpop.f32.mrf.mxu2  ;;  %v937_v17 = vpop.f32.mrf.mxu0  ;;  %v15166_v3 = vadd.f32 %v15080_v47, %v1061_v43 }
 0x16e   :  { %v1127_v29 = vpop.f32.mrf.mxu3  ;;  %v1001_v30 = vpop.f32.mrf.mxu1  ;;  %v1299_v54 = vadd.f32 %v1298_v1, %v1278_v45  ;;  %v1350_v58 = vadd.f32 %v1349_v0, %v1329_v2  ;;  %v15158_v45 = vadd.f32 %v15040_v18, %v1059_v39  ;;  %v1064_v27 = vadd.f32 %v1063_v55, %v1000_v25 }
 0x16f   :  { %v1002_v11 = vadd.f32 %v1001_v30, %v937_v17  ;;  %v1333_v2 = vmul.f32 %v1283_v44, %v15138_v51  ;;  %v1334_v37 = vmul.f32 %v1284_v5, %v15149_v16  ;;  %v1286_v39 = vmul.f32 %v15160_v34, %v15166_v3 }
 0x170   :  { %v1300_v35 = vadd.f32 %v1299_v54, %v1279_v20  ;;  %v1351_v40 = vadd.f32 %v1350_v58, %v1330_v38  ;;  %v1332_v20 = vmul.f32 %v1282_v13, %v15131_v9  ;;  %v1285_v55 = vmul.f32 %v15152_v10, %v15158_v45  ;;  %v15178_v25 = vpop.permute.xlu0 %1251 }
 0x171   :  { %v15171_v30 = vadd.f32 %v1127_v29, %v1064_v27 }
 0x172   :  { %v1301_v60 = vadd.f32 %v1300_v35, %v1280_v56  ;;  %v1352_v24 = vadd.f32 %v1351_v40, %v1331_v6  ;;  %v1335_v43 = vmul.f32 %v1285_v55, %v15158_v45  ;;  %v1336_v6 = vmul.f32 %v1286_v39, %v15166_v3  ;;  %v15193_v27 = vpop.permute.xlu2 %1261  ;;  %v13496_v40 = vld [vmem:[%s19129_s12 + $0x78] sm:$0xff] }
 0x173   :  { %2149 = vmatpush.bf16.msrb.mxu1 %v13496_v40 }
 0x174   :  { %v1302_v14 = vadd.f32 %v1301_v60, %v1281_v26  ;;  %v1353_v56 = vadd.f32 %v1352_v24, %v1332_v20  ;;  %v13504_v20 = vld [vmem:[%s19129_s12 + $0xb8] sm:$0xff] }
 0x175   :  { %v1065_v19 = vpop.f32.mrf.mxu2  ;;  %v940_v7 = vpop.f32.mrf.mxu0  ;;  %2213 = vmatpush.bf16.msrb.mxu2 %v13504_v20 }
 0x176   :  { %v1129_v53 = vpop.f32.mrf.mxu3  ;;  %v1004_v50 = vpop.f32.mrf.mxu1  ;;  %v1066_v1 = vadd.f32 %v1065_v19, %v1002_v11  ;;  %v1303_v17 = vadd.f32 %v1302_v14, %v1282_v13  ;;  %v1354_v38 = vadd.f32 %v1353_v56, %v1333_v2  ;;  %v1287_v19 = vmul.f32 %v15178_v25, %v15171_v30  ;;  %v13487_v2 = vld [vmem:[%s19129_s12 + $0x30] sm:$0xff] }
 0x177   :  { %v1005_v18 = vadd.f32 %v1004_v50, %v940_v7  ;;  %v15181_v13 = vpop.permute.xlu1 %1256 }
 0x178   :  { %v1304_v49 = vadd.f32 %v1303_v17, %v1283_v44  ;;  %v15176_v26 = vadd.f32 %v1129_v53, %v1066_v1  ;;  %v13488_v53 = vld [vmem:[%s19129_s12 + $0x38] sm:$0xff]  ;;  %v1355_v58 = vadd.f32 %v1354_v38, %v1334_v37  ;;  %v1337_v1 = vmul.f32 %v1287_v19, %v15171_v30 }
 0x179   :  { %2085 = vmatpush.bf16.msrb.mxu0 %v13488_v53  ;;  %v13486_v53 = vld [vmem:[%s19129_s12 + $0x28] sm:$0xff] }
 0x17a   :  { %v1305_v29 = vadd.f32 %v1304_v49, %v1284_v5  ;;  %v1288_v60 = vmul.f32 %v15181_v13, %v15176_v26  ;;  %v1356_v11 = vadd.f32 %v1355_v58, %v1335_v43  ;;  %v13512_v5 = vld [vmem:[%s19129_s12 + $0xf8] sm:$0xff]  ;;  %v13495_v49 = vld [vmem:[%s19129_s12 + $0x70] sm:$0xff]  ;;  %v15226_v58 = vpop.permute.xlu0 %1266 }
 0x17b   :  { %2277 = vmatpush.bf16.msrb.mxu3 %v13512_v5  ;;  %2150 = vmatpush.bf16.msrb.mxu1 %v13495_v49  ;;  %v13492_v49 = vld [vmem:[%s19129_s12 + $0x58] sm:$0xff] }
 0x17c   :  { %v1306_v50 = vadd.f32 %v1305_v29, %v1285_v55  ;;  %v1357_v55 = vadd.f32 %v1356_v11, %v1336_v6  ;;  %v1338_v37 = vmul.f32 %v1288_v60, %v15176_v26  ;;  %v13510_v11 = vld [vmem:[%s19129_s12 + $0xe8] sm:$0xff] }
 0x17d   :  { %v1068_v47 = vpop.f32.mrf.mxu2  ;;  %v942_v44 = vpop.f32.mrf.mxu0  ;;  %2086 = vmatpush.bf16.msrb.mxu0 %v13487_v2  ;;  %v13501_v2 = vld [vmem:[%s19129_s12 + $0xa0] sm:$0xff] }
 0x17e   :  { %v1069_v54 = vadd.f32 %v1068_v47, %v1005_v18  ;;  %v1132_v0 = vpop.f32.mrf.mxu3  ;;  %v1006_v7 = vpop.f32.mrf.mxu1  ;;  %v1307_v14 = vadd.f32 %v1306_v50, %v1286_v39  ;;  %v1358_v38 = vadd.f32 %v1357_v55, %v1337_v1  ;;  %v13494_v50 = vld [vmem:[%s19129_s12 + $0x68] sm:$0xff]  ;;  %v13509_v55 = vld [vmem:[%s19129_s12 + $0xe0] sm:$0xff] }
 0x17f   :  { %v1007_v24 = vadd.f32 %v1006_v7, %v942_v44  ;;  %2151 = vmatpush.bf16.msrb.mxu1 %v13494_v50  ;;  %v13507_v50 = vld [vmem:[%s19129_s12 + $0xd0] sm:$0xff] }
 0x180   :  { %v15185_v35 = vadd.f32 %v1132_v0, %v1069_v54  ;;  %v1308_v56 = vadd.f32 %v1307_v14, %v1287_v19  ;;  %v13503_v54 = vld [vmem:[%s19129_s12 + $0xb0] sm:$0xff]  ;;  %v1359_v6 = vadd.f32 %v1358_v38, %v1338_v37  ;;  %v13485_v14 = vld [vmem:[%s19129_s12 + $0x20] sm:$0xff]  ;;  %v13484_v37 = vld [vmem:[%s19129_s12 + $0x18] sm:$0xff] }
 0x181   :  { %v13511_v0 = vld [vmem:[%s19129_s12 + $0xf0] sm:$0xff]  ;;  %2214 = vmatpush.bf16.msrb.mxu2 %v13503_v54  ;;  %2087 = vmatpush.bf16.msrb.mxu0 %v13486_v53  ;;  %v13500_v54 = vld [vmem:[%s19129_s12 + $0x98] sm:$0xff] }
 0x182   :  { %v1289_v18 = vmul.f32 %v15193_v27, %v15185_v35  ;;  %v1309_v43 = vadd.f32 %v1308_v56, %v1288_v60  ;;  %2278 = vmatpush.bf16.msrb.mxu3 %v13511_v0  ;;  %v13502_v60 = vld [vmem:[%s19129_s12 + $0xa8] sm:$0xff]  ;;  %v13508_v0 = vld [vmem:[%s19129_s12 + $0xd8] sm:$0xff] }
 0x184   :  { %v1339_v29 = vmul.f32 %v1289_v18, %v15185_v35  ;;  %v1310_v44 = vadd.f32 %v1309_v43, %v1289_v18 }
 0x185   :  { %v1070_v17 = vpop.f32.mrf.mxu2  ;;  %2215 = vmatpush.bf16.msrb.mxu2 %v13502_v60  ;;  %2088 = vmatpush.bf16.msrb.mxu0 %v13485_v14  ;;  %v13490_v14 = vld [vmem:[%s19129_s12 + $0x48] sm:$0xff] }
 0x186   :  { %v1071_v47 = vadd.f32 %v1070_v17, %v1007_v24  ;;  %v1134_v39 = vpop.f32.mrf.mxu3  ;;  %v1360_v40 = vadd.f32 %v1359_v6, %v1339_v29  ;;  %2279 = vmatpush.bf16.msrb.mxu3 %v13510_v11  ;;  %v13493_v24 = vld [vmem:[%s19129_s12 + $0x60] sm:$0xff]  ;;  %v13483_v29 = vld [vmem:[%s19129_s12 + $0x10] sm:$0xff] }
 0x187   :  { %2152 = vmatpush.bf16.msrb.mxu1 %v13493_v24 }
 0x188   :  { %v15221_v19 = vadd.f32 %v1134_v39, %v1071_v47 }
 0x189   :  { %2216 = vmatpush.bf16.msrb.mxu2 %v13501_v2  ;;  %2089 = vmatpush.bf16.msrb.mxu0 %v13484_v37  ;;  %v13497_v37 = vld [vmem:[%s19129_s12 + $0x80] sm:$0xff] }
 0x18a   :  { %v1290_v7 = vmul.f32 %v15226_v58, %v15221_v19  ;;  %2280 = vmatpush.bf16.msrb.mxu3 %v13509_v55  ;;  %v13481_v55 = vld [vmem:[%s19129_s12] sm:$0xff] }
 0x18b   :  { %2153 = vmatpush.bf16.msrb.mxu1 %v13492_v49 }
 0x18c   :  { %v1311_v20 = vadd.f32 %v1310_v44, %v1290_v7  ;;  %v1340_v5 = vmul.f32 %v1290_v7, %v15221_v19  ;;  %v13491_v44 = vld [vmem:[%s19129_s12 + $0x50] sm:$0xff] }
 0x18d   :  { %2217 = vmatpush.bf16.msrb.mxu2 %v13500_v54  ;;  %2090 = vmatpush.bf16.msrb.mxu0 %v13483_v29  ;;  %v13499_v7 = vld [vmem:[%s19129_s12 + $0x90] sm:$0xff]  ;;  %v1371_v29 = vld [vmem:[#allocation14] ss:$0 sm:$0xff] }
 0x18e   :  { %v1312_v1 = vrot.slane %v1311_v20, 4  ;;  %v1361_v18 = vadd.f32 %v1360_v40, %v1340_v5  ;;  %2281 = vmatpush.bf16.msrb.mxu3 %v13508_v0  ;;  %v13482_v40 = vld [vmem:[%s19129_s12 + $0x8] sm:$0xff] }
 0x18f   :  { %2154 = vmatpush.bf16.msrb.mxu1 %v13491_v44 }
 0x190   :  { %v1313_v17 = vadd.f32 %v1312_v1, %v1311_v20  ;;  %v1362_v56 = vrot.slane %v1361_v18, 4  ;;  %v13498_v1 = vld [vmem:[%s19129_s12 + $0x88] sm:$0xff] }
 0x191   :  { %2218 = vmatpush.bf16.msrb.mxu2 %v13499_v7  ;;  %2091 = vmatpush.bf16.msrb.mxu0 %v13482_v40  ;;  %v1384_v7 = vld [vmem:[%s19054_s11] ss:$0 sm:$0xff] }
 0x192   :  { %v1314_v47 = vrot.slane %v1313_v17, 2  ;;  %v1363_v39 = vadd.f32 %v1362_v56, %v1361_v18  ;;  %2282 = vmatpush.bf16.msrb.mxu3 %v13507_v50  ;;  %v13506_v18 = vld [vmem:[%s19129_s12 + $0xc8] sm:$0xff]  ;;  %v13489_v56 = vld [vmem:[%s19129_s12 + $0x40] sm:$0xff] }
 0x193   :  { %2155 = vmatpush.bf16.msrb.mxu1 %v13490_v14 }
 0x194   :  { %v1315_v38 = vadd.f32 %v1314_v47, %v1313_v17  ;;  %v1364_v43 = vrot.slane %v1363_v39, 2  ;;  %v13505_v47 = vld [vmem:[%s19129_s12 + $0xc0] sm:$0xff] }
 0x195   :  { %2219 = vmatpush.bf16.msrb.mxu2 %v13498_v1  ;;  %2092 = vmatpush.bf16.msrb.mxu0 %v13481_v55  ;;  %v19131_v1 = vld [vmem:[#allocation31_spill] sm:$0xff] }
 0x196   :  { %v1316_v53 = vrot.slane %v1315_v38, 1  ;;  %v1365_v6 = vadd.f32 %v1364_v43, %v1363_v39  ;;  %2283 = vmatpush.bf16.msrb.mxu3 %v13506_v18 }
 0x197   :  { %2156 = vmatpush.bf16.msrb.mxu1 %v13489_v56 }
 0x198   :  { %v1317_v60 = vadd.f32 %v1316_v53, %v1315_v38  ;;  %v1366_v11 = vrot.slane %v1365_v6, 1 }
 0x199   :  { %2220 = vmatpush.bf16.msrb.mxu2 %v13497_v37 }
 0x19a   :  { %v1318_v20 = vmul.f32 0.0078125, %v1317_v60  ;;  %v1367_v5 = vadd.f32 %v1366_v11, %v1365_v6  ;;  %2284 = vmatpush.bf16.msrb.mxu3 %v13505_v47  ;;  %v19132_v47 = vld [vmem:[#allocation33_spill] sm:$0xff] }
 0x19c   :  { %v1368_v24 = vmul.f32 0.0078125, %v1367_v5  ;;  %v1369_v2 = vmul.f32 %v1318_v20, %v1318_v20  ;;  %v19130_v5 = vld [vmem:[#allocation39_spill] sm:$0xff] }
 0x19e   :  { %v1370_v17 = vsub.f32 %v1368_v24, %v1369_v2 }
 0x1a0   :  { %v1372_v39 = vadd.f32 1e-05, %v1370_v17 }
 0x1a2   :  { %14013 = vrsqrt.f32 %v1372_v39  ;;  %vm1379_vm3 = vweird.f32 %v1372_v39 }
 0x1a8   :  { %v14014_v49 = vpop.eup %14013 }
 0x1a9   :  { %v1374_v54 = vmul.f32 %v14014_v49, %v1372_v39  ;;  %vm1380_vm2 = vweird.f32 %v14014_v49 }
 0x1aa   :  { %vm1381_vm4 = vmor %vm1379_vm3, %vm1380_vm2 }
 0x1ab   :  { %v1375_v0 = vmul.f32 %v14014_v49, %v1374_v54  ;;  %v19134_v54 = vld [vmem:[#allocation32_spill] sm:$0xff] }
 0x1ad   :  { %v1376_v38 = vmul.f32 0.5, %v1375_v0 }
 0x1af   :  { %v1377_v43 = vsub.f32 1.5, %v1376_v38  ;;  %v19135_v38 = vld [vmem:[#allocation36_spill] sm:$0xff] }
 0x1b1   :  { %v1378_v53 = vmul.f32 %v14014_v49, %v1377_v43 }
 0x1b3   :  { %v1382_v6 = vsel %vm1381_vm4, %v14014_v49, %v1378_v53 }
 0x1b4   :  { %v15300_v44 = vmul.f32 %v1382_v6, %v1371_v29  ;;  %v19136_v29 = vld [vmem:[#allocation35_spill] sm:$0xff] }
 0x1b6   :  { %v1385_v50 = vmul.f32 %v15300_v44, %v1318_v20  ;;  %v1408_v60 = vmul.f32 %v15300_v44, %v15221_v19  ;;  %v1387_v40 = vmul.f32 %v15300_v44, %v14810_v32  ;;  %v1388_v14 = vmul.f32 %v15300_v44, %v19130_v5 }
 0x1b7   :  { %v1389_v18 = vmul.f32 %v15300_v44, %v19131_v1  ;;  %v1390_v24 = vmul.f32 %v15300_v44, %v15029_v59  ;;  %v1391_v20 = vmul.f32 %v15300_v44, %v14854_v57  ;;  %v1392_v19 = vmul.f32 %v15300_v44, %v15050_v23  ;;  %v19133_v23 = vld [vmem:[#allocation37_spill] sm:$0xff] }
 0x1b8   :  { %v15308_v11 = vsub.f32 %v1384_v7, %v1385_v50  ;;  %v1393_v57 = vmul.f32 %v15300_v44, %v14870_v41 }
 0x1ba   :  { %v1430_v2 = vadd.f32 %v1408_v60, %v15308_v11  ;;  %v1409_v55 = vadd.f32 %v1387_v40, %v15308_v11  ;;  %v1410_v32 = vadd.f32 %v1388_v14, %v15308_v11  ;;  %v1411_v17 = vadd.f32 %v1389_v18, %v15308_v11 }
 0x1bb   :  { %v1412_v56 = vadd.f32 %v1390_v24, %v15308_v11  ;;  %v1413_v37 = vadd.f32 %v1391_v20, %v15308_v11  ;;  %v1414_v59 = vadd.f32 %v1392_v19, %v15308_v11  ;;  %v1415_v41 = vadd.f32 %v1393_v57, %v15308_v11 }
 0x1bc   :  { %v15332_v39 = vmul.f32 %v1409_v55, %v19132_v47  ;;  %v15335_v49 = vmul.f32 %v1410_v32, %v19133_v23  ;;  %v15338_v0 = vmul.f32 %v1411_v17, %v19134_v54  ;;  %v1395_v54 = vmul.f32 %v15300_v44, %v14896_v28 }
 0x1bd   :  { %v15341_v43 = vmul.f32 %v1412_v56, %v19135_v38  ;;  %v15344_v53 = vmul.f32 %v1413_v37, %v19136_v29  ;;  %v15347_v6 = vmul.f32 %v1414_v59, %v14995_v12  ;;  %v1394_v59 = vmul.f32 %v15300_v44, %v15070_v31 }
 0x1be   :  { %v1785_v7 = vpack.c.bf16 %v15335_v49, %v15332_v39  ;;  %v1497_v50 = vrot.slane %v15332_v39, 1  ;;  %v1498_v60 = vrot.slane %v15335_v49, 1  ;;  %v1500_v40 = vrot.slane %v15338_v0, 1 }
 0x1bf   :  { %v1502_v5 = vrot.slane %v15341_v43, 1  ;;  %v1608_v14 = vrot.slane %v15335_v49, 2  ;;  %v1609_v1 = vrot.slane %v15338_v0, 2  ;;  %v1611_v12 = vrot.slane %v15341_v43, 2 }
 0x1c0   :  { %2093 = vmatmul.bf16.vlgmr.msrb.gmra.mxu0 %v1785_v7  ;;  %v15362_v18 = vsel %vm291_vm0, %v1497_v50, %v1498_v60  ;;  %v1501_v24 = vsel %vm291_vm0, %v1498_v60, %v1500_v40  ;;  %v1504_v37 = vrot.slane %v15344_v53, 1  ;;  %v1506_v57 = vrot.slane %v15347_v6, 1 }
 0x1c1   :  { %v1786_v20 = vpack.c.bf16 %v1501_v24, %v15362_v18  ;;  %v15367_v19 = vsel %vm291_vm0, %v1500_v40, %v1502_v5  ;;  %v1610_v55 = vsel %vm403_vm1, %v1608_v14, %v1609_v1  ;;  %v1612_v32 = vsel %vm403_vm1, %v1609_v1, %v1611_v12 }
 0x1c2   :  { %v1787_v17 = vpack.c.bf16 %v15367_v19, %v1501_v24  ;;  %v1788_v56 = vpack.c.bf16 %v1612_v32, %v1610_v55  ;;  %v15379_v47 = vmul.f32 %v1415_v41, %v15009_v52  ;;  %v1416_v23 = vadd.f32 %v1394_v59, %v15308_v11 }
 0x1c3   :  { %2157 = vmatmul.bf16.vlgmr.msrb.gmra.mxu1 %v1786_v20  ;;  %v1396_v38 = vmul.f32 %v15300_v44, %v15090_v62  ;;  %v15387_v29 = vmul.f32 %v1430_v2, %v15226_v58  ;;  %v1397_v31 = vmul.f32 %v15300_v44, %v14937_v4  ;;  %v1398_v52 = vmul.f32 %v15300_v44, %v15111_v48 }
 0x1c4   :  { %2221 = vmatmul.bf16.vlgmr.msrb.gmra.mxu2 %v1787_v17  ;;  %2285 = vmatmul.bf16.vlgmr.msrb.gmra.mxu3 %v1788_v56  ;;  %v1399_v41 = vmul.f32 %v15300_v44, %v15120_v63  ;;  %v1505_v7 = vsel %vm291_vm0, %v1502_v5, %v1504_v37  ;;  %v1613_v60 = vrot.slane %v15344_v53, 2  ;;  %v1615_v28 = vrot.slane %v15347_v6, 2 }
 0x1c5   :  { %v15399_v62 = vmul.f32 %v1416_v23, %v15016_v22  ;;  %v15402_v58 = vsel %vm291_vm0, %v1504_v37, %v1506_v57  ;;  %v1508_v4 = vrot.slane %v15379_v47, 1  ;;  %v1418_v2 = vadd.f32 %v1396_v38, %v15308_v11 }
 0x1c6   :  { %v1419_v48 = vadd.f32 %v1397_v31, %v15308_v11  ;;  %v1789_v63 = vpack.c.bf16 %v15341_v43, %v15338_v0  ;;  %v1617_v5 = vrot.slane %v15379_v47, 2  ;;  %v1420_v1 = vadd.f32 %v1398_v52, %v15308_v11 }
 0x1c7   :  { %v19081_v40 = vrot.slane %v15399_v62, 1  ;;  %v1790_v22 = vpack.c.bf16 %v1505_v7, %v15367_v19  ;;  %v19079_v24 = vrot.slane %v15399_v62, 2  ;;  %v15415_v20 = vmul.f32 %v1418_v2, %v15055_v33 }
 0x1c8   :  { %v15418_v55 = vmul.f32 %v1419_v48, %v15059_v36  ;;  %v1791_v32 = vpack.c.bf16 %v15402_v58, %v1505_v7  ;;  %v1793_v0 = vpack.c.bf16 %v15347_v6, %v15344_v53  ;;  %v15424_v43 = vmul.f32 %v1420_v1, %v15073_v46 }
 0x1c9   :  { %v1421_v17 = vadd.f32 %v1399_v41, %v15308_v11  ;;  %v1614_v19 = vsel %vm403_vm1, %v1611_v12, %v1613_v60  ;;  %v1616_v56 = vsel %vm403_vm1, %v1613_v60, %v1615_v28  ;;  %v15430_v33 = vsel %vm291_vm0, %v1506_v57, %v1508_v4 }
 0x1ca   :  { %v19080_v36 = vrot.slane %v15415_v20, 1  ;;  %v15436_v37 = vsel %vm291_vm0, %v1508_v4, %v19081_v40  ;;  %v15439_v59 = vsel %vm403_vm1, %v1615_v28, %v1617_v5  ;;  %v15442_v46 = vadd.f32 %v1395_v54, %v15308_v11 }
 0x1cb   :  { %v19078_v12 = vrot.slane %v15415_v20, 2  ;;  %v15448_v57 = vsel %vm403_vm1, %v1617_v5, %v19079_v24  ;;  %v1516_v23 = vrot.slane %v15418_v55, 1  ;;  %v1518_v38 = vrot.slane %v15424_v43, 1 }
 0x1cc   :  { %v1625_v31 = vrot.slane %v15418_v55, 2  ;;  %v1792_v52 = vpack.c.bf16 %v1616_v56, %v1614_v19  ;;  %v1794_v41 = vpack.c.bf16 %v15430_v33, %v15402_v58  ;;  %v1627_v54 = vrot.slane %v15424_v43, 2 }
 0x1cd   :  { %v1795_v60 = vpack.c.bf16 %v15436_v37, %v15430_v33  ;;  %v15463_v28 = vsel %vm291_vm0, %v19080_v36, %v1516_v23  ;;  %v15466_v4 = vsel %vm291_vm0, %v1516_v23, %v1518_v38  ;;  %v1796_v48 = vpack.c.bf16 %v15448_v57, %v15439_v59 }
 0x1ce   :  { %v15471_v2 = vsel %vm403_vm1, %v19078_v12, %v1625_v31  ;;  %v15478_v1 = vsel %vm403_vm1, %v1625_v31, %v1627_v54  ;;  %v15481_v19 = vmul.f32 %v1421_v17, %v15098_v21  ;;  %v1400_v23 = vmul.f32 %v15300_v44, %v15131_v9 }
 0x1cf   :  { %v1402_v7 = vmul.f32 %v15300_v44, %v15149_v16  ;;  %v1403_v21 = vmul.f32 %v15300_v44, %v15158_v45  ;;  %v1404_v17 = vmul.f32 %v15300_v44, %v15166_v3  ;;  %v1405_v16 = vmul.f32 %v15300_v44, %v15171_v30 }
 0x1d0   :  { %2098 = vmatmul.bf16.gmra.mxu0 %v1789_v63  ;;  %v1401_v63 = vmul.f32 %v15300_v44, %v15138_v51  ;;  %v1520_v5 = vrot.slane %v15481_v19, 1  ;;  %v1629_v31 = vrot.slane %v15481_v19, 2  ;;  %v1422_v56 = vadd.f32 %v1400_v23, %v15308_v11 }
 0x1d1   :  { %v1424_v51 = vadd.f32 %v1402_v7, %v15308_v11  ;;  %v1425_v3 = vadd.f32 %v1403_v21, %v15308_v11  ;;  %v1647_v36 = vrot.slane %v15387_v29, 2  ;;  %v1439_v59 = vmul.f32 %v15442_v46, %v15024_v61 }
 0x1d2   :  { %v1423_v9 = vadd.f32 %v1401_v63, %v15308_v11  ;;  %v15503_v12 = vsel %vm291_vm0, %v1518_v38, %v1520_v5  ;;  %v15506_v45 = vsel %vm403_vm1, %v1627_v54, %v1629_v31  ;;  %v15513_v7 = vmul.f32 %v1422_v56, %v15105_v15 }
 0x1d3   :  { %2162 = vmatmul.bf16.gmra.mxu1 %v1790_v22  ;;  %v1538_v22 = vrot.slane %v15387_v29, 1  ;;  %v15522_v38 = vmul.f32 %v1425_v3, %v15152_v10  ;;  %v1427_v54 = vadd.f32 %v1405_v16, %v15308_v11  ;;  %v1406_v63 = vmul.f32 %v15300_v44, %v15176_v26 }
 0x1d4   :  { %2226 = vmatmul.bf16.gmra.mxu2 %v1791_v32  ;;  %2290 = vmatmul.bf16.gmra.mxu3 %v1792_v52  ;;  %v15516_v30 = vmul.f32 %v1423_v9, %v15117_v8  ;;  %v15519_v32 = vmul.f32 %v1424_v51, %v15143_v42  ;;  %v1426_v52 = vadd.f32 %v1404_v17, %v15308_v11  ;;  %v1522_v21 = vrot.slane %v15513_v7, 1 }
 0x1d5   :  { %v1631_v15 = vrot.slane %v15513_v7, 2  ;;  %v1528_v3 = vrot.slane %v15522_v38, 1  ;;  %v1512_v46 = vrot.slane %v1439_v59, 1 }
 0x1d6   :  { %v1524_v42 = vrot.slane %v15516_v30, 1  ;;  %v1526_v56 = vrot.slane %v15519_v32, 1  ;;  %v1633_v10 = vrot.slane %v15516_v30, 2  ;;  %v1635_v17 = vrot.slane %v15519_v32, 2 }
 0x1d7   :  { %v15539_v26 = vsel %vm291_vm0, %v1520_v5, %v1522_v21  ;;  %v15542_v51 = vsel %vm403_vm1, %v1629_v31, %v1631_v15  ;;  %v1637_v31 = vrot.slane %v15522_v38, 2 }
 0x1d8   :  { %v15545_v16 = vsel %vm291_vm0, %v1522_v21, %v1524_v42  ;;  %v15555_v5 = vsel %vm291_vm0, %v1524_v42, %v1526_v56  ;;  %v15560_v21 = vsel %vm403_vm1, %v1631_v15, %v1633_v10  ;;  %v15563_v24 = vsel %vm403_vm1, %v1633_v10, %v1635_v17 }
 0x1d9   :  { %v15566_v8 = vsel %vm291_vm0, %v1526_v56, %v1528_v3  ;;  %v15573_v42 = vmul.f32 %v1426_v52, %v15160_v34  ;;  %v15577_v15 = vmul.f32 %v1427_v54, %v15178_v25  ;;  %v1428_v10 = vadd.f32 %v1406_v63, %v15308_v11 }
 0x1da   :  { %v1814_v9 = vpack.c.bf16 %v15566_v8, %v15555_v5  ;;  %v1407_v56 = vmul.f32 %v15300_v44, %v15185_v35  ;;  %v15585_v40 = vsel %vm403_vm1, %v1635_v17, %v1637_v31 }
 0x1db   :  { %v1530_v23 = vrot.slane %v15573_v42, 1  ;;  %v1639_v34 = vrot.slane %v15573_v42, 2  ;;  %v1817_v52 = vpack.c.bf16 %v15573_v42, %v15522_v38  ;;  %v1532_v25 = vrot.slane %v15577_v15, 1 }
 0x1dc   :  { %v15592_v54 = vmul.f32 %v1428_v10, %v15181_v13  ;;  %v1641_v63 = vrot.slane %v15577_v15, 2  ;;  %v1429_v35 = vadd.f32 %v1407_v56, %v15308_v11  ;;  %v15610_v13 = vsel %vm291_vm0, %v1538_v22, %v1497_v50 }
 0x1dd   :  { %v15600_v44 = vsel %vm291_vm0, %v1528_v3, %v1530_v23  ;;  %v15603_v17 = vsel %vm403_vm1, %v1637_v31, %v1639_v34  ;;  %v1670_v10 = vrot.slane %v15332_v39, 2  ;;  %v15618_v6 = vsel %vm291_vm0, %v1530_v23, %v1532_v25 }
 0x1de   :  { %v1815_v11 = vpack.c.bf16 %v15600_v44, %v15566_v8  ;;  %v1816_v53 = vpack.c.bf16 %v15603_v17, %v15585_v40  ;;  %v1818_v3 = vpack.c.bf16 %v15618_v6, %v15600_v44  ;;  %v15624_v31 = vsel %vm403_vm1, %v1639_v34, %v1641_v63 }
 0x1df   :  { %v1643_v50 = vrot.slane %v15592_v54, 2  ;;  %v1821_v39 = vpack.c.bf16 %v15592_v54, %v15577_v15  ;;  %v15636_v23 = vmul.f32 %v1429_v35, %v15193_v27  ;;  %v1827_v56 = vpack.c.bf16 %v15362_v18, %v15610_v13 }
 0x1e0   :  { %2103 = vmatmul.bf16.gmra.mxu0 %v1793_v0  ;;  %v1534_v0 = vrot.slane %v15592_v54, 1  ;;  %v15643_v34 = vsel %vm403_vm1, %v1670_v10, %v1608_v14 }
 0x1e1   :  { %v1644_v58 = vsel %vm403_vm1, %v1641_v63, %v1643_v50  ;;  %v1536_v14 = vrot.slane %v15636_v23, 1  ;;  %v1825_v33 = vpack.c.bf16 %v15387_v29, %v15636_v23 }
 0x1e2   :  { %v15633_v40 = vsel %vm291_vm0, %v1532_v25, %v1534_v0  ;;  %v1820_v49 = vpack.c.bf16 %v1644_v58, %v15624_v31  ;;  %v1645_v25 = vrot.slane %v15636_v23, 2  ;;  %v1621_v58 = vrot.slane %v1439_v59, 2 }
 0x1e3   :  { %2167 = vmatmul.bf16.gmra.mxu1 %v1794_v41  ;;  %v1819_v27 = vpack.c.bf16 %v15633_v40, %v15618_v6  ;;  %v15655_v41 = vsel %vm403_vm1, %v1647_v36, %v1670_v10 }
 0x1e4   :  { %2231 = vmatmul.bf16.gmra.mxu2 %v1795_v60  ;;  %2295 = vmatmul.bf16.gmra.mxu3 %v1796_v48  ;;  %v1537_v60 = vsel %vm291_vm0, %v1534_v0, %v1536_v14  ;;  %v15670_v48 = vsel %vm291_vm0, %v1536_v14, %v1538_v22  ;;  %v1646_v63 = vsel %vm403_vm1, %v1643_v50, %v1645_v25  ;;  %v19137_v22 = vrot.slane %v15399_v62, 1 }
 0x1e5   :  { %v1648_v35 = vsel %vm403_vm1, %v1645_v25, %v1647_v36  ;;  %v1822_v17 = vpack.c.bf16 %v1537_v60, %v15633_v40  ;;  %v1823_v10 = vpack.c.bf16 %v15670_v48, %v1537_v60  ;;  %v1826_v61 = vpack.c.bf16 %v15610_v13, %v15670_v48 }
 0x1e6   :  { %v1824_v31 = vpack.c.bf16 %v1648_v35, %v1646_v63  ;;  %v1797_v0 = vpack.c.bf16 %v15399_v62, %v15379_v47  ;;  %v1513_v14 = vsel %vm291_vm0, %v19137_v22, %v1512_v46  ;;  %v19138_v50 = vrot.slane %v15415_v20, 1 }
 0x1e7   :  { %v19139_v40 = vrot.slane %v15399_v62, 2  ;;  %v19140_v60 = vrot.slane %v15415_v20, 2  ;;  %v1798_v35 = vpack.c.bf16 %v1513_v14, %v15436_v37  ;;  %v1801_v22 = vpack.c.bf16 %v15415_v20, %v1439_v59 }
 0x1e8   :  { %v1515_v36 = vsel %vm291_vm0, %v1512_v46, %v19138_v50  ;;  %v19141_v62 = vpack.c.bf16 %v15466_v4, %v15463_v28  ;;  %v19143_v37 = vpack.c.bf16 %v15424_v43, %v15418_v55  ;;  %v19145_v20 = vpack.c.bf16 %v15539_v26, %v15503_v12 }
 0x1e9   :  { %v1622_v25 = vsel %vm403_vm1, %v19139_v40, %v1621_v58  ;;  %v1624_v63 = vsel %vm403_vm1, %v1621_v58, %v19140_v60  ;;  %v1799_v47 = vpack.c.bf16 %v1515_v36, %v1513_v14  ;;  %v1802_v46 = vpack.c.bf16 %v15463_v28, %v1515_v36 }
 0x1ea   :  { %v1800_v57 = vpack.c.bf16 %v1624_v63, %v1622_v25  ;;  %v19142_v58 = vpack.c.bf16 %v15478_v1, %v15471_v2  ;;  %v19146_v28 = vpack.c.bf16 %v15542_v51, %v15506_v45  ;;  %v19147_v2 = vpack.c.bf16 %v15513_v7, %v15481_v19 }
 0x1eb   :  { %v19148_v55 = vpack.c.bf16 %v15545_v16, %v15539_v26  ;;  %v19149_v43 = vpack.c.bf16 %v15555_v5, %v15545_v16 }
 0x1f0   :  { %2108 = vmatmul.bf16.gmra.mxu0 %v1797_v0 }
 0x1f3   :  { %2172 = vmatmul.bf16.gmra.mxu1 %v1798_v35 }
 0x1f4   :  { %2236 = vmatmul.bf16.gmra.mxu2 %v1799_v47  ;;  %2300 = vmatmul.bf16.gmra.mxu3 %v1800_v57  ;;  %v19144_v57 = vpack.c.bf16 %v15503_v12, %v15466_v4  ;;  %v19150_v12 = vpack.c.bf16 %v15563_v24, %v15560_v21  ;;  %v19151_v4 = vpack.c.bf16 %v15519_v32, %v15516_v30 }
 0x200   :  { %2113 = vmatmul.bf16.gmra.mxu0 %v1801_v22 }
 0x203   :  { %2177 = vmatmul.bf16.gmra.mxu1 %v1802_v46 }
 0x204   :  { %2241 = vmatmul.bf16.gmra.mxu2 %v19141_v62  ;;  %2305 = vmatmul.bf16.gmra.mxu3 %v19142_v58 }
 0x210   :  { %2118 = vmatmul.bf16.gmra.mxu0 %v19143_v37 }
 0x213   :  { %2182 = vmatmul.bf16.gmra.mxu1 %v19144_v57 }
 0x214   :  { %2246 = vmatmul.bf16.gmra.mxu2 %v19145_v20  ;;  %2310 = vmatmul.bf16.gmra.mxu3 %v19146_v28 }
 0x220   :  { %2123 = vmatmul.bf16.gmra.mxu0 %v19147_v2 }
 0x223   :  { %2187 = vmatmul.bf16.gmra.mxu1 %v19148_v55 }
 0x224   :  { %2251 = vmatmul.bf16.gmra.mxu2 %v19149_v43  ;;  %2315 = vmatmul.bf16.gmra.mxu3 %v19150_v12 }
 0x230   :  { %2128 = vmatmul.bf16.gmra.mxu0 %v19151_v4 }
 0x233   :  { %2192 = vmatmul.bf16.gmra.mxu1 %v1814_v9 }
 0x234   :  { %2256 = vmatmul.bf16.gmra.mxu2 %v1815_v11  ;;  %2320 = vmatmul.bf16.gmra.mxu3 %v1816_v53 }
 0x23d   :  { %v2094_v1 = vpop.f32.mrf.mxu0 }
 0x240   :  { %2133 = vmatmul.bf16.gmra.mxu0 %v1817_v52  ;;  %v2158_v19 = vpop.f32.mrf.mxu1 }
 0x241   :  { %v2159_v45 = vadd.f32 %v2158_v19, %v2094_v1 }
 0x243   :  { %2197 = vmatmul.bf16.gmra.mxu1 %v1818_v3 }
 0x244   :  { %2261 = vmatmul.bf16.gmra.mxu2 %v1819_v27  ;;  %2325 = vmatmul.bf16.gmra.mxu3 %v1820_v49 }
 0x245   :  { %v15737_v24 = vpop.f32.mrf.mxu0 }
 0x247   :  { %v2222_v7 = vpop.f32.mrf.mxu2  ;;  %v2286_v30 = vpop.f32.mrf.mxu3 }
 0x248   :  { %v2223_v32 = vadd.f32 %v2222_v7, %v2159_v45  ;;  %v15739_v8 = vpop.f32.mrf.mxu1 }
 0x24a   :  { %v15741_v9 = vadd.f32 %v2286_v30, %v2223_v32 }
 0x24d   :  { %v2099_v26 = vpop.f32.mrf.mxu0 }
 0x24f   :  { %v15743_v38 = vpop.f32.mrf.mxu2  ;;  %v15745_v51 = vpop.f32.mrf.mxu3 }
 0x250   :  { %2138 = vmatmul.bf16.gmra.mxu0 %v1821_v39  ;;  %v2163_v16 = vpop.f32.mrf.mxu1  ;;  %v19153_v39 = vpack.c.bf16 %v15643_v34, %v15655_v41 }
 0x251   :  { %v2164_v5 = vadd.f32 %v2163_v16, %v2099_v26 }
 0x253   :  { %2202 = vmatmul.bf16.gmra.mxu1 %v1822_v17 }
 0x254   :  { %2266 = vmatmul.bf16.gmra.mxu2 %v1823_v10  ;;  %2330 = vmatmul.bf16.gmra.mxu3 %v1824_v31 }
 0x255   :  { %v15750_v21 = vpop.f32.mrf.mxu0 }
 0x257   :  { %v2227_v42 = vpop.f32.mrf.mxu2  ;;  %v2291_v52 = vpop.f32.mrf.mxu3 }
 0x258   :  { %v2228_v44 = vadd.f32 %v2227_v42, %v2164_v5  ;;  %v15752_v11 = vpop.f32.mrf.mxu1  ;;  %v15824_v42 = vpop.permute.xlu1 %2365 }
 0x259   :  { %19154 = vst [vmem:[#allocation38_spill] sm:$0xff] %v15824_v42 }
 0x25a   :  { %v15754_v53 = vadd.f32 %v2291_v52, %v2228_v44  ;;  %v15828_v44 = vpop.permute.xlu2 %2370 }
 0x25b   :  { %19155 = vst [vmem:[#allocation39_spill] sm:$0xff] %v15828_v44 }
 0x25c   :  { %19152 = vst [vmem:[#allocation34_spill] sm:$0xff] %v15754_v53 }
 0x25d   :  { %v2104_v6 = vpop.f32.mrf.mxu0 }
 0x25f   :  { %v15756_v3 = vpop.f32.mrf.mxu2  ;;  %v15758_v27 = vpop.f32.mrf.mxu3 }
 0x260   :  { %2143 = vmatmul.bf16.gmra.mxu0 %v1825_v33  ;;  %v2168_v15 = vpop.f32.mrf.mxu1 }
 0x261   :  { %v2169_v54 = vadd.f32 %v2168_v15, %v2104_v6 }
 0x263   :  { %2207 = vmatmul.bf16.gmra.mxu1 %v1826_v61 }
 0x264   :  { %2271 = vmatmul.bf16.gmra.mxu2 %v1827_v56  ;;  %2335 = vmatmul.bf16.gmra.mxu3 %v19153_v39 }
 0x265   :  { %v15772_v49 = vpop.f32.mrf.mxu0 }
 0x267   :  { %v2232_v59 = vpop.f32.mrf.mxu2  ;;  %v2296_v17 = vpop.f32.mrf.mxu3 }
 0x268   :  { %v2233_v29 = vadd.f32 %v2232_v59, %v2169_v54  ;;  %v15774_v23 = vpop.f32.mrf.mxu1  ;;  %v15834_v54 = vpop.permute.xlu0 %2375 }
 0x269   :  { %19156 = vst [vmem:[#allocation31_spill] sm:$0xff] %v15834_v54 }
 0x26a   :  { %v15776_v33 = vadd.f32 %v2296_v17, %v2233_v29  ;;  %v15840_v17 = vpop.permute.xlu1 %2380 }
 0x26b   :  { %19157 = vst [vmem:[#allocation33_spill] sm:$0xff] %v15840_v17 }
 0x26d   :  { %v2109_v10 = vpop.f32.mrf.mxu0 }
 0x26f   :  { %v15778_v48 = vpop.f32.mrf.mxu2  ;;  %v15780_v31 = vpop.f32.mrf.mxu3 }
 0x270   :  { %v2173_v18 = vpop.f32.mrf.mxu1 }
 0x271   :  { %v2174_v13 = vadd.f32 %v2173_v18, %v2109_v10  ;;  %v15846_v18 = vpop.permute.xlu2 %2385 }
 0x272   :  { %19158 = vst [vmem:[#allocation37_spill] sm:$0xff] %v15846_v18 }
 0x275   :  { %v15782_v56 = vpop.f32.mrf.mxu0 }
 0x277   :  { %v2237_v34 = vpop.f32.mrf.mxu2  ;;  %v2301_v41 = vpop.f32.mrf.mxu3 }
 0x278   :  { %v2238_v61 = vadd.f32 %v2237_v34, %v2174_v13  ;;  %v15784_v0 = vpop.f32.mrf.mxu1  ;;  %v15850_v34 = vpop.permute.xlu0 %2390 }
 0x27a   :  { %v15786_v14 = vadd.f32 %v2301_v41, %v2238_v61  ;;  %v2161_v41 = vadd.f32 %v15739_v8, %v15737_v24 }
 0x27c   :  { %v2225_v61 = vadd.f32 %v15743_v38, %v2161_v41  ;;  %v2171_v38 = vadd.f32 %v15774_v23, %v15772_v49  ;;  %v2475_v49 = vmul.f32 %v15834_v54, %v15754_v53  ;;  %v2176_v23 = vadd.f32 %v15784_v0, %v15782_v56 }
 0x27d   :  { %v2114_v50 = vpop.f32.mrf.mxu0  ;;  %v2477_v0 = vmul.f32 %v15846_v18, %v15776_v33 }
 0x27e   :  { %v2525_v56 = vmul.f32 %v2475_v49, %v15754_v53 }
 0x27f   :  { %v15788_v36 = vpop.f32.mrf.mxu2  ;;  %v15790_v40 = vpop.f32.mrf.mxu3 }
 0x280   :  { %v2178_v25 = vpop.f32.mrf.mxu1  ;;  %v15873_v8 = vpop.permute.xlu0 %2405 }
 0x281   :  { %v2179_v60 = vadd.f32 %v2178_v25, %v2114_v50 }
 0x285   :  { %v15792_v63 = vpop.f32.mrf.mxu0 }
 0x287   :  { %v2242_v35 = vpop.f32.mrf.mxu2  ;;  %v2306_v47 = vpop.f32.mrf.mxu3 }
 0x288   :  { %v2243_v22 = vadd.f32 %v2242_v35, %v2179_v60  ;;  %v15794_v46 = vpop.f32.mrf.mxu1  ;;  %v15861_v35 = vpop.permute.xlu1 %2395 }
 0x289   :  { %v2181_v54 = vadd.f32 %v15794_v46, %v15792_v63 }
 0x28a   :  { %v15796_v62 = vadd.f32 %v2306_v47, %v2243_v22  ;;  %v2166_v47 = vadd.f32 %v15752_v11, %v15750_v21  ;;  %v2473_v11 = vmul.f32 %v15824_v42, %v15741_v9 }
 0x28c   :  { %v2230_v24 = vadd.f32 %v15756_v3, %v2166_v47  ;;  %v2240_v47 = vadd.f32 %v15788_v36, %v2176_v23 }
 0x28d   :  { %v2119_v58 = vpop.f32.mrf.mxu0 }
 0x28e   :  { %v15882_v21 = vadd.f32 %v15758_v27, %v2230_v24  ;;  %v2523_v24 = vmul.f32 %v2473_v11, %v15741_v9 }
 0x28f   :  { %v15798_v37 = vpop.f32.mrf.mxu2  ;;  %v15800_v57 = vpop.f32.mrf.mxu3 }
 0x290   :  { %v2183_v20 = vpop.f32.mrf.mxu1  ;;  %v15898_v41 = vpop.permute.xlu1 %2410  ;;  %v2245_v23 = vadd.f32 %v15798_v37, %v2181_v54 }
 0x291   :  { %v2184_v28 = vadd.f32 %v2183_v20, %v2119_v58  ;;  %v15868_v58 = vadd.f32 %v15745_v51, %v2225_v61  ;;  %v15870_v20 = vpop.permute.xlu2 %2400  ;;  %v2235_v51 = vadd.f32 %v15778_v48, %v2171_v38  ;;  %v2476_v48 = vmul.f32 %v15840_v17, %v15882_v21  ;;  %v15914_v17 = vpop.permute.xlu0 %2420 }
 0x292   :  { %v15938_v54 = vadd.f32 %v15800_v57, %v2245_v23 }
 0x293   :  { %19159 = vst [vmem:[#allocation32_spill] sm:$0xff] %v15868_v58  ;;  %v15903_v61 = vadd.f32 %v15780_v31, %v2235_v51  ;;  %v2526_v31 = vmul.f32 %v2476_v48, %v15882_v21  ;;  %v15920_v51 = vadd.f32 %v15790_v40, %v2240_v47 }
 0x295   :  { %v15802_v2 = vpop.f32.mrf.mxu0  ;;  %v2478_v36 = vmul.f32 %v15850_v34, %v15903_v61 }
 0x297   :  { %v2247_v55 = vpop.f32.mrf.mxu2  ;;  %v2311_v43 = vpop.f32.mrf.mxu3  ;;  %v2528_v37 = vmul.f32 %v2478_v36, %v15903_v61 }
 0x298   :  { %v2248_v12 = vadd.f32 %v2247_v55, %v2184_v28  ;;  %v15804_v4 = vpop.f32.mrf.mxu1  ;;  %v2474_v28 = vmul.f32 %v15828_v44, %v15868_v58 }
 0x299   :  { %v15907_v38 = vpop.permute.xlu2 %2415  ;;  %v2186_v40 = vadd.f32 %v15804_v4, %v15802_v2  ;;  %v2481_v4 = vmul.f32 %v15873_v8, %v15796_v62 }
 0x29a   :  { %v15806_v1 = vadd.f32 %v2311_v43, %v2248_v12  ;;  %v2524_v27 = vmul.f32 %v2474_v28, %v15868_v58  ;;  %v2495_v44 = vadd.f32 %v2474_v28, %v2473_v11  ;;  %v2527_v28 = vmul.f32 %v2477_v0, %v15776_v33 }
 0x29b   :  { %v2479_v11 = vmul.f32 %v15861_v35, %v15786_v14 }
 0x29c   :  { %v2545_v42 = vadd.f32 %v2524_v27, %v2523_v24  ;;  %v2496_v18 = vadd.f32 %v2495_v44, %v2475_v49  ;;  %v2480_v44 = vmul.f32 %v15870_v20, %v15920_v51 }
 0x29d   :  { %v15808_v19 = vpop.f32.mrf.mxu0  ;;  %v2529_v2 = vmul.f32 %v2479_v11, %v15786_v14 }
 0x29e   :  { %v2546_v46 = vadd.f32 %v2545_v42, %v2525_v56  ;;  %v2497_v24 = vadd.f32 %v2496_v18, %v2476_v48  ;;  %v15943_v56 = vpop.permute.xlu1 %2425 }
 0x29f   :  { %v15810_v45 = vpop.f32.mrf.mxu2  ;;  %v15812_v7 = vpop.f32.mrf.mxu3 }
 0x2a0   :  { %v15814_v30 = vpop.f32.mrf.mxu1  ;;  %v2547_v47 = vadd.f32 %v2546_v46, %v2526_v31  ;;  %v2250_v42 = vadd.f32 %v15810_v45, %v2186_v40  ;;  %v2498_v18 = vadd.f32 %v2497_v24, %v2477_v0 }
 0x2a1   :  { %v2189_v49 = vadd.f32 %v15814_v30, %v15808_v19  ;;  %v15951_v23 = vpop.permute.xlu2 %2430  ;;  %v2530_v19 = vmul.f32 %v2480_v44, %v15920_v51  ;;  %v2482_v30 = vmul.f32 %v15898_v41, %v15938_v54 }
 0x2a2   :  { %v2548_v48 = vadd.f32 %v2547_v47, %v2527_v28  ;;  %v2499_v45 = vadd.f32 %v2498_v18, %v2478_v36  ;;  %v15957_v0 = vadd.f32 %v15812_v7, %v2250_v42  ;;  %v2531_v36 = vmul.f32 %v2481_v4, %v15796_v62 }
 0x2a3   :  { %v2532_v18 = vmul.f32 %v2482_v30, %v15938_v54 }
 0x2a4   :  { %v2549_v46 = vadd.f32 %v2548_v48, %v2528_v37  ;;  %v15963_v37 = vpop.permute.xlu0 %2435  ;;  %v2484_v48 = vmul.f32 %v15914_v17, %v15957_v0 }
 0x2a5   :  { %v15816_v32 = vpop.f32.mrf.mxu0 }
 0x2a7   :  { %v15818_v26 = vpop.f32.mrf.mxu2  ;;  %v15820_v16 = vpop.f32.mrf.mxu3 }
 0x2a8   :  { %v15822_v5 = vpop.f32.mrf.mxu1  ;;  %v2253_v31 = vadd.f32 %v15818_v26, %v2189_v49  ;;  %v2483_v49 = vmul.f32 %v15907_v38, %v15806_v1 }
 0x2a9   :  { %v2191_v57 = vadd.f32 %v15822_v5, %v15816_v32  ;;  %v2500_v32 = vadd.f32 %v2499_v45, %v2479_v11  ;;  %v2550_v5 = vadd.f32 %v2549_v46, %v2529_v2  ;;  %v15989_v46 = vpop.permute.xlu1 %2440 }
 0x2aa   :  { %v15968_v7 = vadd.f32 %v15820_v16, %v2253_v31 }
 0x2ab   :  { %v2501_v42 = vadd.f32 %v2500_v32, %v2480_v44  ;;  %v2551_v11 = vadd.f32 %v2550_v5, %v2530_v19 }
 0x2ad   :  { %v15826_v52 = vpop.f32.mrf.mxu0  ;;  %v2552_v31 = vadd.f32 %v2551_v11, %v2531_v36 }
 0x2af   :  { %v15830_v6 = vpop.f32.mrf.mxu2  ;;  %v15832_v15 = vpop.f32.mrf.mxu3  ;;  %v2553_v19 = vadd.f32 %v2552_v31, %v2532_v18 }
 0x2b0   :  { %v15836_v39 = vpop.f32.mrf.mxu1  ;;  %v2255_v28 = vadd.f32 %v15830_v6, %v2191_v57 }
 0x2b1   :  { %v2194_v26 = vadd.f32 %v15836_v39, %v15826_v52 }
 0x2b2   :  { %v15977_v2 = vadd.f32 %v15832_v15, %v2255_v28 }
 0x2b5   :  { %v15838_v59 = vpop.f32.mrf.mxu0 }
 0x2b7   :  { %v15842_v29 = vpop.f32.mrf.mxu2  ;;  %v15844_v10 = vpop.f32.mrf.mxu3 }
 0x2b8   :  { %v15848_v13 = vpop.f32.mrf.mxu1  ;;  %v2258_v6 = vadd.f32 %v15842_v29, %v2194_v26  ;;  %v2502_v29 = vadd.f32 %v2501_v42, %v2481_v4 }
 0x2b9   :  { %v2196_v52 = vadd.f32 %v15848_v13, %v15838_v59  ;;  %v2533_v59 = vmul.f32 %v2483_v49, %v15806_v1  ;;  %v2485_v13 = vmul.f32 %v15943_v56, %v15968_v7 }
 0x2ba   :  { %v15986_v44 = vadd.f32 %v15844_v10, %v2258_v6  ;;  %v2503_v15 = vadd.f32 %v2502_v29, %v2482_v30  ;;  %v16001_v30 = vpop.permute.xlu2 %2445 }
 0x2bb   :  { %v2554_v5 = vadd.f32 %v2553_v19, %v2533_v59 }
 0x2bc   :  { %v2504_v26 = vadd.f32 %v2503_v15, %v2483_v49  ;;  %v16009_v49 = vpop.permute.xlu0 %2450 }
 0x2bd   :  { %v15855_v50 = vpop.f32.mrf.mxu0 }
 0x2be   :  { %v2505_v6 = vadd.f32 %v2504_v26, %v2484_v48 }
 0x2bf   :  { %v15857_v25 = vpop.f32.mrf.mxu2  ;;  %v15859_v60 = vpop.f32.mrf.mxu3 }
 0x2c0   :  { %v15865_v22 = vpop.f32.mrf.mxu1  ;;  %v2260_v57 = vadd.f32 %v15857_v25, %v2196_v52  ;;  %v2506_v18 = vadd.f32 %v2505_v6, %v2485_v13 }
 0x2c1   :  { %v2199_v16 = vadd.f32 %v15865_v22, %v15855_v50  ;;  %v2534_v50 = vmul.f32 %v2484_v48, %v15957_v0  ;;  %v2486_v22 = vmul.f32 %v15951_v23, %v15977_v2 }
 0x2c2   :  { %v15997_v4 = vadd.f32 %v15859_v60, %v2260_v57 }
 0x2c4   :  { %v16039_v6 = vpop.permute.xlu0 %2465 }
 0x2c5   :  { %v15879_v55 = vpop.f32.mrf.mxu0 }
 0x2c7   :  { %v15887_v43 = vpop.f32.mrf.mxu2  ;;  %v15889_v3 = vpop.f32.mrf.mxu3 }
 0x2c8   :  { %v15895_v12 = vpop.f32.mrf.mxu1  ;;  %v2263_v45 = vadd.f32 %v15887_v43, %v2199_v16 }
 0x2c9   :  { %v2201_v25 = vadd.f32 %v15895_v12, %v15879_v55  ;;  %v2535_v55 = vmul.f32 %v2485_v13, %v15968_v7  ;;  %v2487_v12 = vmul.f32 %v15963_v37, %v15986_v44 }
 0x2ca   :  { %v16007_v36 = vadd.f32 %v15889_v3, %v2263_v45 }
 0x2cb   :  { %v2537_v29 = vmul.f32 %v2487_v12, %v15986_v44 }
 0x2cd   :  { %v15923_v53 = vpop.f32.mrf.mxu0 }
 0x2cf   :  { %v15925_v58 = vpop.f32.mrf.mxu2  ;;  %v15927_v63 = vpop.f32.mrf.mxu3 }
 0x2d0   :  { %v2203_v27 = vpop.f32.mrf.mxu1  ;;  %v2265_v43 = vadd.f32 %v15925_v58, %v2201_v25  ;;  %v2555_v58 = vadd.f32 %v2554_v5, %v2534_v50  ;;  %v16027_v50 = vpop.permute.xlu1 %2455 }
 0x2d1   :  { %v2204_v32 = vadd.f32 %v2203_v27, %v15923_v53  ;;  %v2536_v53 = vmul.f32 %v2486_v22, %v15977_v2  ;;  %v2488_v27 = vmul.f32 %v15989_v46, %v15997_v4 }
 0x2d2   :  { %v16015_v57 = vadd.f32 %v15927_v63, %v2265_v43  ;;  %v2556_v3 = vadd.f32 %v2555_v58, %v2535_v55 }
 0x2d3   :  { %v2538_v59 = vmul.f32 %v2488_v27, %v15997_v4 }
 0x2d4   :  { %v2557_v31 = vadd.f32 %v2556_v3, %v2536_v53  ;;  %v2490_v63 = vmul.f32 %v16009_v49, %v16015_v57 }
 0x2d5   :  { %v2141_v39 = vpop.f32.mrf.mxu0 }
 0x2d7   :  { %v2267_v24 = vpop.f32.mrf.mxu2  ;;  %v2331_v40 = vpop.f32.mrf.mxu3 }
 0x2d8   :  { %v2205_v47 = vpop.f32.mrf.mxu1  ;;  %v2268_v52 = vadd.f32 %v2267_v24, %v2204_v32  ;;  %v2489_v24 = vmul.f32 %v16001_v30, %v16007_v36  ;;  %v16034_v32 = vpop.permute.xlu2 %2460 }
 0x2d9   :  { %v2206_v42 = vadd.f32 %v2205_v47, %v2141_v39  ;;  %v2507_v47 = vadd.f32 %v2506_v18, %v2486_v22 }
 0x2da   :  { %v16020_v39 = vadd.f32 %v2331_v40, %v2268_v52  ;;  %v2539_v22 = vmul.f32 %v2489_v24, %v16007_v36 }
 0x2db   :  { %v2508_v13 = vadd.f32 %v2507_v47, %v2487_v12 }
 0x2dc   :  { %v2491_v26 = vmul.f32 %v16027_v50, %v16020_v39 }
 0x2dd   :  { %v2144_v11 = vpop.f32.mrf.mxu0  ;;  %v2509_v40 = vadd.f32 %v2508_v13, %v2488_v27 }
 0x2de   :  { %v2541_v53 = vmul.f32 %v2491_v26, %v16020_v39 }
 0x2df   :  { %v2269_v28 = vpop.f32.mrf.mxu2  ;;  %v2333_v10 = vpop.f32.mrf.mxu3  ;;  %v2510_v12 = vadd.f32 %v2509_v40, %v2489_v24 }
 0x2e0   :  { %v2208_v60 = vpop.f32.mrf.mxu1  ;;  %v2270_v16 = vadd.f32 %v2269_v28, %v2206_v42  ;;  %v2558_v28 = vadd.f32 %v2557_v31, %v2537_v29 }
 0x2e1   :  { %v2209_v48 = vadd.f32 %v2208_v60, %v2144_v11  ;;  %v2511_v58 = vadd.f32 %v2510_v12, %v2490_v63 }
 0x2e2   :  { %v16025_v25 = vadd.f32 %v2333_v10, %v2270_v16  ;;  %v2559_v5 = vadd.f32 %v2558_v28, %v2538_v59  ;;  %v2540_v10 = vmul.f32 %v2490_v63, %v16015_v57 }
 0x2e3   :  { %v2512_v3 = vadd.f32 %v2511_v58, %v2491_v26 }
 0x2e4   :  { %v2492_v60 = vmul.f32 %v16034_v32, %v16025_v25  ;;  %v2560_v52 = vadd.f32 %v2559_v5, %v2539_v22 }
 0x2e5   :  { %v2146_v42 = vpop.f32.mrf.mxu0 }
 0x2e6   :  { %v2561_v16 = vadd.f32 %v2560_v52, %v2540_v10  ;;  %v2542_v29 = vmul.f32 %v2492_v60, %v16025_v25  ;;  %v2513_v31 = vadd.f32 %v2512_v3, %v2492_v60 }
 0x2e7   :  { %v2272_v45 = vpop.f32.mrf.mxu2  ;;  %v2336_v15 = vpop.f32.mrf.mxu3 }
 0x2e8   :  { %v2273_v19 = vadd.f32 %v2272_v45, %v2209_v48  ;;  %v2210_v55 = vpop.f32.mrf.mxu1  ;;  %v2562_v48 = vadd.f32 %v2561_v16, %v2541_v53 }
 0x2e9   :  { %v2211_v11 = vadd.f32 %v2210_v55, %v2146_v42 }
 0x2ea   :  { %v16032_v43 = vadd.f32 %v2336_v15, %v2273_v19  ;;  %v16048_v15 = vpop.permute.xlu1 %2470  ;;  %v2563_v13 = vadd.f32 %v2562_v48, %v2542_v29  ;;  %v13536_v48 = vld [vmem:[%s19160_s30 + $0xb8] sm:$0xff] }
 0x2eb   :  { %3417 = vmatpush.bf16.msra.mxu2 %v13536_v48 }
 0x2ec   :  { %v2493_v27 = vmul.f32 %v16039_v6, %v16032_v43 }
 0x2ee   :  { %v2543_v59 = vmul.f32 %v2493_v27, %v16032_v43  ;;  %v2514_v63 = vadd.f32 %v2513_v31, %v2493_v27  ;;  %v13544_v31 = vld [vmem:[%s19160_s30 + $0xf8] sm:$0xff] }
 0x2ef   :  { %v2274_v18 = vpop.f32.mrf.mxu2  ;;  %v2338_v47 = vpop.f32.mrf.mxu3  ;;  %3481 = vmatpush.bf16.msra.mxu3 %v13544_v31  ;;  %v13531_v31 = vld [vmem:[%s19160_s30 + $0x90] sm:$0xff] }
 0x2f0   :  { %v2275_v24 = vadd.f32 %v2274_v18, %v2211_v11  ;;  %v2564_v28 = vadd.f32 %v2563_v13, %v2543_v59  ;;  %v13519_v13 = vld [vmem:[%s19160_s30 + $0x30] sm:$0xff] }
 0x2f2   :  { %v16046_v45 = vadd.f32 %v2338_v47, %v2275_v24  ;;  %v13520_v24 = vld [vmem:[%s19160_s30 + $0x38] sm:$0xff] }
 0x2f3   :  { %v13528_v47 = vld [vmem:[%s19160_s30 + $0x78] sm:$0xff]  ;;  %3289 = vmatpush.bf16.msra.mxu0 %v13520_v24  ;;  %v13515_v24 = vld [vmem:[%s19160_s30 + $0x10] sm:$0xff] }
 0x2f4   :  { %v2494_v19 = vmul.f32 %v16048_v15, %v16046_v45  ;;  %3353 = vmatpush.bf16.msra.mxu1 %v13528_v47  ;;  %v13523_v47 = vld [vmem:[%s19160_s30 + $0x50] sm:$0xff] }
 0x2f6   :  { %v2515_v22 = vadd.f32 %v2514_v63, %v2494_v19  ;;  %v2544_v40 = vmul.f32 %v2494_v19, %v16046_v45  ;;  %v13527_v63 = vld [vmem:[%s19160_s30 + $0x70] sm:$0xff] }
 0x2f7   :  { %v13535_v19 = vld [vmem:[%s19160_s30 + $0xb0] sm:$0xff]  ;;  %3290 = vmatpush.bf16.msra.mxu0 %v13519_v13  ;;  %v2575_v13 = vld [vmem:[#allocation14 + $0x1] ss:$0 sm:$0xff] }
 0x2f8   :  { %v2516_v26 = vrot.slane %v2515_v22, 4  ;;  %v2565_v5 = vadd.f32 %v2564_v28, %v2544_v40  ;;  %v13543_v28 = vld [vmem:[%s19160_s30 + $0xf0] sm:$0xff]  ;;  %3354 = vmatpush.bf16.msra.mxu1 %v13527_v63  ;;  %v13518_v40 = vld [vmem:[%s19160_s30 + $0x28] sm:$0xff]  ;;  %3418 = vmatpush.bf16.msra.mxu2 %v13535_v19 }
 0x2f9   :  { %3482 = vmatpush.bf16.msra.mxu3 %v13543_v28  ;;  %v13514_v19 = vld [vmem:[%s19160_s30 + $0x8] sm:$0xff] }
 0x2fa   :  { %v2517_v55 = vadd.f32 %v2516_v26, %v2515_v22  ;;  %v2566_v12 = vrot.slane %v2565_v5, 4  ;;  %v13526_v26 = vld [vmem:[%s19160_s30 + $0x68] sm:$0xff] }
 0x2fb   :  { %3291 = vmatpush.bf16.msra.mxu0 %v13518_v40  ;;  %v13522_v28 = vld [vmem:[%s19160_s30 + $0x48] sm:$0xff] }
 0x2fc   :  { %v2518_v10 = vrot.slane %v2517_v55, 2  ;;  %v2567_v60 = vadd.f32 %v2566_v12, %v2565_v5  ;;  %v13534_v5 = vld [vmem:[%s19160_s30 + $0xa8] sm:$0xff]  ;;  %3355 = vmatpush.bf16.msra.mxu1 %v13526_v26  ;;  %v13517_v12 = vld [vmem:[%s19160_s30 + $0x20] sm:$0xff] }
 0x2fd   :  { %3419 = vmatpush.bf16.msra.mxu2 %v13534_v5  ;;  %v13530_v26 = vld [vmem:[%s19160_s30 + $0x88] sm:$0xff] }
 0x2fe   :  { %v2519_v52 = vadd.f32 %v2518_v10, %v2517_v55  ;;  %v2568_v42 = vrot.slane %v2567_v60, 2  ;;  %v13542_v55 = vld [vmem:[%s19160_s30 + $0xe8] sm:$0xff]  ;;  %v13525_v10 = vld [vmem:[%s19160_s30 + $0x60] sm:$0xff] }
 0x2ff   :  { %3483 = vmatpush.bf16.msra.mxu3 %v13542_v55  ;;  %3292 = vmatpush.bf16.msra.mxu0 %v13517_v12  ;;  %v2588_v55 = vld [vmem:[%s19054_s11 + $0x1] ss:$0 sm:$0xff] }
 0x300   :  { %v2520_v58 = vrot.slane %v2519_v52, 1  ;;  %v2569_v53 = vadd.f32 %v2568_v42, %v2567_v60  ;;  %v13533_v60 = vld [vmem:[%s19160_s30 + $0xa0] sm:$0xff]  ;;  %3356 = vmatpush.bf16.msra.mxu1 %v13525_v10 }
 0x301   :  { %3420 = vmatpush.bf16.msra.mxu2 %v13533_v60  ;;  %v13513_v60 = vld [vmem:[%s19160_s30] sm:$0xff] }
 0x302   :  { %v2521_v11 = vadd.f32 %v2520_v58, %v2519_v52  ;;  %v2570_v18 = vrot.slane %v2569_v53, 1  ;;  %v13541_v52 = vld [vmem:[%s19160_s30 + $0xe0] sm:$0xff] }
 0x303   :  { %3484 = vmatpush.bf16.msra.mxu3 %v13541_v52  ;;  %v13521_v52 = vld [vmem:[%s19160_s30 + $0x40] sm:$0xff] }
 0x304   :  { %v16053_v27 = vmul.f32 0.0078125, %v2521_v11  ;;  %v2571_v16 = vadd.f32 %v2570_v18, %v2569_v53  ;;  %v13516_v53 = vld [vmem:[%s19160_s30 + $0x18] sm:$0xff] }
 0x305   :  { %v13524_v11 = vld [vmem:[%s19160_s30 + $0x58] sm:$0xff]  ;;  %3293 = vmatpush.bf16.msra.mxu0 %v13516_v53 }
 0x306   :  { %v2572_v3 = vmul.f32 0.0078125, %v2571_v16  ;;  %v2573_v29 = vmul.f32 %v16053_v27, %v16053_v27  ;;  %v13532_v16 = vld [vmem:[%s19160_s30 + $0x98] sm:$0xff]  ;;  %3357 = vmatpush.bf16.msra.mxu1 %v13524_v11 }
 0x307   :  { %3421 = vmatpush.bf16.msra.mxu2 %v13532_v16  ;;  %v19161_v53 = vld [vmem:[#allocation32_spill] sm:$0xff] }
 0x308   :  { %v2574_v59 = vsub.f32 %v2572_v3, %v2573_v29  ;;  %v13540_v3 = vld [vmem:[%s19160_s30 + $0xd8] sm:$0xff] }
 0x309   :  { %3485 = vmatpush.bf16.msra.mxu3 %v13540_v3  ;;  %3294 = vmatpush.bf16.msra.mxu0 %v13515_v24 }
 0x30a   :  { %v2576_v22 = vadd.f32 1e-05, %v2574_v59  ;;  %v13539_v59 = vld [vmem:[%s19160_s30 + $0xd0] sm:$0xff]  ;;  %3358 = vmatpush.bf16.msra.mxu1 %v13523_v47 }
 0x30b   :  { %3422 = vmatpush.bf16.msra.mxu2 %v13531_v31 }
 0x30c   :  { %14015 = vrsqrt.f32 %v2576_v22  ;;  %vm2583_vm6 = vweird.f32 %v2576_v22 }
 0x30d   :  { %3486 = vmatpush.bf16.msra.mxu3 %v13539_v59  ;;  %3295 = vmatpush.bf16.msra.mxu0 %v13514_v19 }
 0x30e   :  { %3359 = vmatpush.bf16.msra.mxu1 %v13522_v28  ;;  %v19165_v28 = vld [vmem:[#allocation31_spill] sm:$0xff] }
 0x30f   :  { %3423 = vmatpush.bf16.msra.mxu2 %v13530_v26  ;;  %v19166_v26 = vld [vmem:[#allocation33_spill] sm:$0xff] }
 0x311   :  { %3296 = vmatpush.bf16.msra.mxu0 %v13513_v60 }
 0x312   :  { %v14016_v42 = vpop.eup %14015  ;;  %3360 = vmatpush.bf16.msra.mxu1 %v13521_v52 }
 0x313   :  { %v2578_v58 = vmul.f32 %v14016_v42, %v2576_v22  ;;  %vm2584_vm5 = vweird.f32 %v14016_v42  ;;  %v13538_v22 = vld [vmem:[%s19160_s30 + $0xc8] sm:$0xff] }
 0x314   :  { %vm2585_vm7 = vmor %vm2583_vm6, %vm2584_vm5  ;;  %3487 = vmatpush.bf16.msra.mxu3 %v13538_v22 }
 0x315   :  { %v2579_v18 = vmul.f32 %v14016_v42, %v2578_v58 }
 0x317   :  { %v2580_v29 = vmul.f32 0.5, %v2579_v18  ;;  %v19162_v18 = vld [vmem:[#allocation34_spill] sm:$0xff] }
 0x319   :  { %v2581_v48 = vsub.f32 1.5, %v2580_v29 }
 0x31b   :  { %v2582_v63 = vmul.f32 %v14016_v42, %v2581_v48 }
 0x31d   :  { %v2586_v40 = vsel %vm2585_vm7, %v14016_v42, %v2582_v63  ;;  %v13529_v42 = vld [vmem:[%s19160_s30 + $0x80] sm:$0xff] }
 0x31e   :  { %v16141_v5 = vmul.f32 %v2586_v40, %v2575_v13  ;;  %3424 = vmatpush.bf16.msra.mxu2 %v13529_v42 }
 0x320   :  { %v2589_v12 = vmul.f32 %v16141_v5, %v16053_v27  ;;  %v2612_v10 = vmul.f32 %v16141_v5, %v16046_v45  ;;  %v13537_v45 = vld [vmem:[%s19160_s30 + $0xc0] sm:$0xff]  ;;  %v2591_v58 = vmul.f32 %v16141_v5, %v15741_v9  ;;  %v2592_v11 = vmul.f32 %v16141_v5, %v19161_v53 }
 0x321   :  { %v2593_v16 = vmul.f32 %v16141_v5, %v19162_v18  ;;  %v2594_v3 = vmul.f32 %v16141_v5, %v15882_v21  ;;  %v2595_v29 = vmul.f32 %v16141_v5, %v15776_v33  ;;  %v2596_v24 = vmul.f32 %v16141_v5, %v15903_v61  ;;  %3488 = vmatpush.bf16.msra.mxu3 %v13537_v45  ;;  %v19163_v33 = vld [vmem:[#allocation38_spill] sm:$0xff]  ;;  %v19164_v61 = vld [vmem:[#allocation39_spill] sm:$0xff] }
 0x322   :  { %v16162_v27 = vsub.f32 %v2588_v55, %v2589_v12  ;;  %v19167_v55 = vld [vmem:[#allocation37_spill] sm:$0xff] }
 0x324   :  { %v2634_v47 = vadd.f32 %v2612_v10, %v16162_v27  ;;  %v2613_v9 = vadd.f32 %v2591_v58, %v16162_v27  ;;  %v2614_v48 = vadd.f32 %v2592_v11, %v16162_v27  ;;  %v2615_v31 = vadd.f32 %v2593_v16, %v16162_v27 }
 0x325   :  { %v2616_v21 = vadd.f32 %v2594_v3, %v16162_v27  ;;  %v2617_v59 = vadd.f32 %v2595_v29, %v16162_v27  ;;  %v2618_v19 = vadd.f32 %v2596_v24, %v16162_v27 }
 0x326   :  { %v16183_v13 = vmul.f32 %v2613_v9, %v19163_v33  ;;  %v16186_v63 = vmul.f32 %v2614_v48, %v19164_v61  ;;  %v16190_v40 = vmul.f32 %v2615_v31, %v19165_v28  ;;  %v16233_v28 = vmul.f32 %v2634_v47, %v16048_v15 }
 0x327   :  { %v16193_v22 = vmul.f32 %v2616_v21, %v19166_v26  ;;  %v16196_v12 = vmul.f32 %v2617_v59, %v19167_v55  ;;  %v16213_v16 = vmul.f32 %v2618_v19, %v15850_v34  ;;  %v2597_v34 = vmul.f32 %v16141_v5, %v15786_v14 }
 0x328   :  { %v2989_v10 = vpack.c.bf16 %v16186_v63, %v16183_v13  ;;  %v2701_v60 = vrot.slane %v16183_v13, 1  ;;  %v2702_v52 = vrot.slane %v16186_v63, 1  ;;  %v2812_v42 = vrot.slane %v16186_v63, 2 }
 0x329   :  { %v2704_v45 = vrot.slane %v16190_v40, 1  ;;  %v2706_v58 = vrot.slane %v16193_v22, 1  ;;  %v2813_v53 = vrot.slane %v16190_v40, 2  ;;  %v2815_v11 = vrot.slane %v16193_v22, 2 }
 0x32a   :  { %3297 = vmatmul.bf16.vlgmr.msra.gmra.mxu0 %v2989_v10  ;;  %v16210_v18 = vsel %vm291_vm0, %v2701_v60, %v2702_v52  ;;  %v2708_v59 = vrot.slane %v16196_v12, 1  ;;  %v2710_v33 = vrot.slane %v16213_v16, 1  ;;  %v2619_v61 = vadd.f32 %v2597_v34, %v16162_v27 }
 0x32b   :  { %v2705_v3 = vsel %vm291_vm0, %v2702_v52, %v2704_v45  ;;  %v16217_v29 = vsel %vm291_vm0, %v2704_v45, %v2706_v58  ;;  %v2814_v24 = vsel %vm403_vm1, %v2812_v42, %v2813_v53  ;;  %v2816_v9 = vsel %vm403_vm1, %v2813_v53, %v2815_v11 }
 0x32c   :  { %v2990_v48 = vpack.c.bf16 %v2705_v3, %v16210_v18  ;;  %v2991_v31 = vpack.c.bf16 %v16217_v29, %v2705_v3  ;;  %v2992_v21 = vpack.c.bf16 %v2816_v9, %v2814_v24  ;;  %v2598_v19 = vmul.f32 %v16141_v5, %v15920_v51 }
 0x32d   :  { %v16236_v26 = vmul.f32 %v2619_v61, %v15861_v35  ;;  %v2709_v55 = vsel %vm291_vm0, %v2706_v58, %v2708_v59  ;;  %v2600_v10 = vmul.f32 %v16141_v5, %v15938_v54  ;;  %v2601_v52 = vmul.f32 %v16141_v5, %v15806_v1 }
 0x32e   :  { %3361 = vmatmul.bf16.vlgmr.msra.gmra.mxu1 %v2990_v48  ;;  %3425 = vmatmul.bf16.vlgmr.msra.gmra.mxu2 %v2991_v31  ;;  %v2620_v14 = vadd.f32 %v2598_v19, %v16162_v27  ;;  %v2602_v51 = vmul.f32 %v16141_v5, %v15957_v0  ;;  %v16247_v45 = vsel %vm291_vm0, %v2708_v59, %v2710_v33  ;;  %v2817_v15 = vrot.slane %v16196_v12, 2 }
 0x32f   :  { %3489 = vmatmul.bf16.vlgmr.msra.gmra.mxu3 %v2992_v21  ;;  %v2819_v35 = vrot.slane %v16213_v16, 2  ;;  %v2712_v58 = vrot.slane %v16236_v26, 1  ;;  %v2622_v54 = vadd.f32 %v2600_v10, %v16162_v27  ;;  %v2623_v53 = vadd.f32 %v2601_v52, %v16162_v27 }
 0x330   :  { %v16252_v47 = vmul.f32 %v2620_v14, %v15870_v20  ;;  %v2624_v1 = vadd.f32 %v2602_v51, %v16162_v27  ;;  %v2821_v3 = vrot.slane %v16236_v26, 2  ;;  %v2599_v9 = vmul.f32 %v16141_v5, %v15796_v62 }
 0x331   :  { %v2993_v20 = vpack.c.bf16 %v16193_v22, %v16190_v40  ;;  %v2994_v48 = vpack.c.bf16 %v2709_v55, %v16217_v29  ;;  %v2997_v31 = vpack.c.bf16 %v16213_v16, %v16196_v12  ;;  %v16269_v21 = vmul.f32 %v2622_v54, %v15898_v41 }
 0x332   :  { %v2714_v0 = vrot.slane %v16252_v47, 1  ;;  %v2823_v24 = vrot.slane %v16252_v47, 2  ;;  %v2818_v34 = vsel %vm403_vm1, %v2815_v11, %v2817_v15  ;;  %v2820_v59 = vsel %vm403_vm1, %v2817_v15, %v2819_v35 }
 0x333   :  { %v2621_v61 = vadd.f32 %v2599_v9, %v16162_v27  ;;  %v16275_v19 = vmul.f32 %v2623_v53, %v15907_v38  ;;  %v2995_v62 = vpack.c.bf16 %v16247_v45, %v2709_v55  ;;  %v16279_v40 = vsel %vm291_vm0, %v2710_v33, %v2712_v58 }
 0x334   :  { %v16284_v22 = vsel %vm291_vm0, %v2712_v58, %v2714_v0  ;;  %v2718_v41 = vrot.slane %v16269_v21, 1  ;;  %v16288_v11 = vsel %vm403_vm1, %v2819_v35, %v2821_v3  ;;  %v16293_v38 = vsel %vm403_vm1, %v2821_v3, %v2823_v24 }
 0x335   :  { %v19089_v29 = vrot.slane %v16269_v21, 2  ;;  %v2603_v33 = vmul.f32 %v16141_v5, %v15968_v7  ;;  %v2996_v14 = vpack.c.bf16 %v2820_v59, %v2818_v34  ;;  %v2720_v55 = vrot.slane %v16275_v19, 1 }
 0x336   :  { %v16300_v10 = vmul.f32 %v2624_v1, %v15914_v17  ;;  %v2829_v52 = vrot.slane %v16275_v19, 2  ;;  %v2998_v51 = vpack.c.bf16 %v16279_v40, %v16247_v45  ;;  %v2999_v15 = vpack.c.bf16 %v16284_v22, %v16279_v40 }
 0x337   :  { %v16308_v35 = vmul.f32 %v2621_v61, %v15873_v8  ;;  %v2625_v7 = vadd.f32 %v2603_v33, %v16162_v27  ;;  %v3000_v58 = vpack.c.bf16 %v16293_v38, %v16288_v11  ;;  %v16316_v17 = vsel %vm291_vm0, %v2718_v41, %v2720_v55 }
 0x338   :  { %v2722_v54 = vrot.slane %v16300_v10, 1  ;;  %v2604_v53 = vmul.f32 %v16141_v5, %v15977_v2  ;;  %v16324_v8 = vsel %vm403_vm1, %v19089_v29, %v2829_v52  ;;  %v2831_v1 = vrot.slane %v16300_v10, 2 }
 0x339   :  { %v16330_v9 = vmul.f32 %v2625_v7, %v15943_v56  ;;  %v2605_v2 = vmul.f32 %v16141_v5, %v15986_v44  ;;  %v2606_v59 = vmul.f32 %v16141_v5, %v15997_v4  ;;  %v2609_v7 = vmul.f32 %v16141_v5, %v16020_v39 }
 0x33a   :  { %3302 = vmatmul.bf16.gmra.mxu0 %v2993_v20  ;;  %v16333_v20 = vsel %vm291_vm0, %v2720_v55, %v2722_v54  ;;  %v2626_v34 = vadd.f32 %v2604_v53, %v16162_v27  ;;  %v16343_v33 = vsel %vm403_vm1, %v2829_v52, %v2831_v1  ;;  %v2607_v53 = vmul.f32 %v16141_v5, %v16007_v36 }
 0x33b   :  { %v2724_v56 = vrot.slane %v16330_v9, 1  ;;  %v2833_v55 = vrot.slane %v16330_v9, 2  ;;  %v2627_v4 = vadd.f32 %v2605_v2, %v16162_v27  ;;  %v2611_v39 = vmul.f32 %v16141_v5, %v16032_v43 }
 0x33c   :  { %v16350_v44 = vmul.f32 %v2626_v34, %v15951_v23  ;;  %v2629_v36 = vadd.f32 %v2607_v53, %v16162_v27  ;;  %v2716_v45 = vrot.slane %v16308_v35, 1 }
 0x33d   :  { %v16358_v52 = vsel %vm403_vm1, %v2831_v1, %v2833_v55  ;;  %v2633_v43 = vadd.f32 %v2611_v39, %v16162_v27 }
 0x33e   :  { %3366 = vmatmul.bf16.gmra.mxu1 %v2994_v48  ;;  %3430 = vmatmul.bf16.gmra.mxu2 %v2995_v62  ;;  %v2628_v48 = vadd.f32 %v2606_v59, %v16162_v27  ;;  %v16355_v62 = vsel %vm291_vm0, %v2722_v54, %v2724_v56  ;;  %v2726_v34 = vrot.slane %v16350_v44, 1  ;;  %v2835_v2 = vrot.slane %v16350_v44, 2 }
 0x33f   :  { %3494 = vmatmul.bf16.gmra.mxu3 %v2996_v14  ;;  %v2608_v14 = vmul.f32 %v16141_v5, %v16015_v57  ;;  %v16371_v59 = vmul.f32 %v2627_v4, %v15963_v37  ;;  %v2610_v37 = vmul.f32 %v16141_v5, %v16025_v25  ;;  %v16487_v40 = vmul.f32 %v2633_v43, %v16039_v6 }
 0x340   :  { %v16374_v1 = vmul.f32 %v2628_v48, %v15989_v46  ;;  %v16379_v3 = vsel %vm291_vm0, %v2724_v56, %v2726_v34  ;;  %v16382_v23 = vsel %vm403_vm1, %v2833_v55, %v2835_v2  ;;  %v2631_v46 = vadd.f32 %v2609_v7, %v16162_v27 }
 0x341   :  { %v2630_v57 = vadd.f32 %v2608_v14, %v16162_v27  ;;  %v2728_v48 = vrot.slane %v16371_v59, 1  ;;  %v2837_v53 = vrot.slane %v16371_v59, 2  ;;  %v16399_v14 = vmul.f32 %v2629_v36, %v16001_v30 }
 0x342   :  { %v2730_v56 = vrot.slane %v16374_v1, 1  ;;  %v2839_v55 = vrot.slane %v16374_v1, 2  ;;  %v2740_v63 = vrot.slane %v16487_v40, 1 }
 0x343   :  { %v16402_v25 = vsel %vm291_vm0, %v2726_v34, %v2728_v48  ;;  %v16408_v4 = vmul.f32 %v2630_v57, %v16009_v49  ;;  %v16416_v30 = vsel %vm403_vm1, %v2835_v2, %v2837_v53  ;;  %v2732_v49 = vrot.slane %v16399_v14, 1 }
 0x344   :  { %v16405_v54 = vsel %vm291_vm0, %v2728_v48, %v2730_v56  ;;  %v16419_v34 = vsel %vm403_vm1, %v2837_v53, %v2839_v55  ;;  %v2841_v7 = vrot.slane %v16399_v14, 2  ;;  %v16430_v2 = vmul.f32 %v2631_v46, %v16027_v50 }
 0x345   :  { %v2734_v57 = vrot.slane %v16408_v4, 1  ;;  %v2843_v48 = vrot.slane %v16408_v4, 2  ;;  %v2632_v53 = vadd.f32 %v2610_v37, %v16162_v27  ;;  %v16437_v36 = vsel %vm291_vm0, %v2730_v56, %v2732_v49 }
 0x346   :  { %v16443_v29 = vsel %vm403_vm1, %v2839_v55, %v2841_v7  ;;  %v3018_v50 = vpack.c.bf16 %v16437_v36, %v16405_v54  ;;  %v2736_v16 = vrot.slane %v16430_v2, 1  ;;  %v2845_v56 = vrot.slane %v16430_v2, 2 }
 0x347   :  { %v16440_v61 = vsel %vm291_vm0, %v2732_v49, %v2734_v57  ;;  %v16452_v12 = vsel %vm403_vm1, %v2841_v7, %v2843_v48  ;;  %v16458_v46 = vmul.f32 %v2632_v53, %v16034_v32  ;;  %v2742_v55 = vrot.slane %v16233_v28, 1 }
 0x348   :  { %v3019_v37 = vpack.c.bf16 %v16440_v61, %v16437_v36  ;;  %v16463_v5 = vsel %vm291_vm0, %v2734_v57, %v2736_v16  ;;  %v2851_v49 = vrot.slane %v16233_v28, 2  ;;  %v2874_v7 = vrot.slane %v16183_v13, 2 }
 0x349   :  { %v3022_v32 = vpack.c.bf16 %v16463_v5, %v16440_v61  ;;  %v2738_v27 = vrot.slane %v16458_v46, 1  ;;  %v16478_v39 = vsel %vm403_vm1, %v2843_v48, %v2845_v56  ;;  %v2847_v57 = vrot.slane %v16458_v46, 2 }
 0x34a   :  { %3307 = vmatmul.bf16.gmra.mxu0 %v2997_v31  ;;  %v3020_v31 = vpack.c.bf16 %v16452_v12, %v16443_v29  ;;  %v16506_v6 = vsel %vm403_vm1, %v2851_v49, %v2874_v7  ;;  %v2825_v53 = vrot.slane %v16308_v35, 2  ;;  %v19181_v61 = vpack.c.bf16 %v16458_v46, %v16430_v2 }
 0x34b   :  { %v16500_v48 = vsel %vm291_vm0, %v2736_v16, %v2738_v27  ;;  %v2848_v11 = vsel %vm403_vm1, %v2845_v56, %v2847_v57  ;;  %v2741_v16 = vsel %vm291_vm0, %v2738_v27, %v2740_v63  ;;  %v16519_v56 = vsel %vm291_vm0, %v2740_v63, %v2742_v55 }
 0x34c   :  { %v3023_v13 = vpack.c.bf16 %v16500_v48, %v16463_v5  ;;  %v2717_v27 = vsel %vm291_vm0, %v2714_v0, %v2716_v45  ;;  %v3005_v0 = vpack.c.bf16 %v16269_v21, %v16308_v35  ;;  %v19174_v35 = vpack.c.bf16 %v16382_v23, %v16358_v52 }
 0x34d   :  { %v19183_v2 = vpack.c.bf16 %v16233_v28, %v16487_v40 }
 0x34e   :  { %3371 = vmatmul.bf16.gmra.mxu1 %v2998_v51  ;;  %3435 = vmatmul.bf16.gmra.mxu2 %v2999_v15  ;;  %v16492_v51 = vsel %vm291_vm0, %v2742_v55, %v2701_v60  ;;  %v16497_v15 = vsel %vm403_vm1, %v2874_v7, %v2812_v42  ;;  %v3024_v60 = vpack.c.bf16 %v2848_v11, %v16478_v39  ;;  %v2849_v42 = vrot.slane %v16487_v40, 2 }
 0x34f   :  { %3499 = vmatmul.bf16.gmra.mxu3 %v3000_v58  ;;  %v3026_v39 = vpack.c.bf16 %v2741_v16, %v16500_v48  ;;  %v3027_v11 = vpack.c.bf16 %v16519_v56, %v2741_v16  ;;  %v3030_v58 = vpack.c.bf16 %v16492_v51, %v16519_v56  ;;  %v3001_v55 = vpack.c.bf16 %v16252_v47, %v16236_v26 }
 0x350   :  { %v2850_v43 = vsel %vm403_vm1, %v2847_v57, %v2849_v42  ;;  %v2852_v7 = vsel %vm403_vm1, %v2849_v42, %v2851_v49  ;;  %v2719_v49 = vsel %vm291_vm0, %v2716_v45, %v2718_v41  ;;  %v2826_v57 = vsel %vm403_vm1, %v2823_v24, %v2825_v53 }
 0x351   :  { %v3028_v38 = vpack.c.bf16 %v2852_v7, %v2850_v43  ;;  %v19168_v48 = vrot.slane %v16269_v21, 2  ;;  %v3002_v42 = vpack.c.bf16 %v2717_v27, %v16284_v22  ;;  %v3003_v26 = vpack.c.bf16 %v2719_v49, %v2717_v27 }
 0x352   :  { %v3006_v41 = vpack.c.bf16 %v16316_v17, %v2719_v49  ;;  %v19169_v47 = vpack.c.bf16 %v16333_v20, %v16316_v17  ;;  %v19170_v24 = vpack.c.bf16 %v16343_v33, %v16324_v8  ;;  %v19171_v22 = vpack.c.bf16 %v16300_v10, %v16275_v19 }
 0x353   :  { %v2828_v63 = vsel %vm403_vm1, %v2825_v53, %v19168_v48  ;;  %v19172_v45 = vpack.c.bf16 %v16355_v62, %v16333_v20  ;;  %v19173_v21 = vpack.c.bf16 %v16379_v3, %v16355_v62  ;;  %v19175_v17 = vpack.c.bf16 %v16350_v44, %v16330_v9 }
 0x354   :  { %v3004_v16 = vpack.c.bf16 %v2828_v63, %v2826_v57  ;;  %v19176_v19 = vpack.c.bf16 %v16402_v25, %v16379_v3  ;;  %v19177_v10 = vpack.c.bf16 %v16405_v54, %v16402_v25  ;;  %v19178_v8 = vpack.c.bf16 %v16419_v34, %v16416_v30 }
 0x355   :  { %v19179_v20 = vpack.c.bf16 %v16374_v1, %v16371_v59  ;;  %v19180_v9 = vpack.c.bf16 %v16408_v4, %v16399_v14  ;;  %v19185_v53 = vpack.c.bf16 %v16497_v15, %v16506_v6 }
 0x35a   :  { %3312 = vmatmul.bf16.gmra.mxu0 %v3001_v55 }
 0x35e   :  { %3376 = vmatmul.bf16.gmra.mxu1 %v3002_v42  ;;  %3440 = vmatmul.bf16.gmra.mxu2 %v3003_v26 }
 0x35f   :  { %3504 = vmatmul.bf16.gmra.mxu3 %v3004_v16 }
 0x36a   :  { %3317 = vmatmul.bf16.gmra.mxu0 %v3005_v0 }
 0x36e   :  { %3381 = vmatmul.bf16.gmra.mxu1 %v3006_v41  ;;  %3445 = vmatmul.bf16.gmra.mxu2 %v19169_v47 }
 0x36f   :  { %3509 = vmatmul.bf16.gmra.mxu3 %v19170_v24 }
 0x37a   :  { %3322 = vmatmul.bf16.gmra.mxu0 %v19171_v22 }
 0x37e   :  { %3386 = vmatmul.bf16.gmra.mxu1 %v19172_v45  ;;  %3450 = vmatmul.bf16.gmra.mxu2 %v19173_v21 }
 0x37f   :  { %3514 = vmatmul.bf16.gmra.mxu3 %v19174_v35 }
 0x38a   :  { %3327 = vmatmul.bf16.gmra.mxu0 %v19175_v17 }
 0x38e   :  { %3391 = vmatmul.bf16.gmra.mxu1 %v19176_v19  ;;  %3455 = vmatmul.bf16.gmra.mxu2 %v19177_v10 }
 0x38f   :  { %3519 = vmatmul.bf16.gmra.mxu3 %v19178_v8 }
 0x39a   :  { %3332 = vmatmul.bf16.gmra.mxu0 %v19179_v20 }
 0x39e   :  { %3396 = vmatmul.bf16.gmra.mxu1 %v3018_v50  ;;  %3460 = vmatmul.bf16.gmra.mxu2 %v3019_v37 }
 0x39f   :  { %3524 = vmatmul.bf16.gmra.mxu3 %v3020_v31 }
 0x3a7   :  { %v3298_v3 = vpop.f32.mrf.mxu0 }
 0x3aa   :  { %3337 = vmatmul.bf16.gmra.mxu0 %v19180_v9 }
 0x3ab   :  { %v3362_v33 = vpop.f32.mrf.mxu1 }
 0x3ac   :  { %v3363_v44 = vadd.f32 %v3362_v33, %v3298_v3 }
 0x3ae   :  { %3401 = vmatmul.bf16.gmra.mxu1 %v3022_v32  ;;  %3465 = vmatmul.bf16.gmra.mxu2 %v3023_v13 }
 0x3af   :  { %3529 = vmatmul.bf16.gmra.mxu3 %v3024_v60  ;;  %v16595_v62 = vpop.f32.mrf.mxu0  ;;  %v19184_v60 = vpack.c.bf16 %v16210_v18, %v16492_v51 }
 0x3b1   :  { %v3426_v52 = vpop.f32.mrf.mxu2 }
 0x3b2   :  { %v3427_v23 = vadd.f32 %v3426_v52, %v3363_v44  ;;  %v3490_v54 = vpop.f32.mrf.mxu3 }
 0x3b3   :  { %v16597_v29 = vpop.f32.mrf.mxu1 }
 0x3b4   :  { %v16599_v59 = vadd.f32 %v3490_v54, %v3427_v23 }
 0x3b7   :  { %v3303_v1 = vpop.f32.mrf.mxu0 }
 0x3b9   :  { %v16601_v4 = vpop.f32.mrf.mxu2 }
 0x3ba   :  { %v16603_v14 = vpop.f32.mrf.mxu3  ;;  %3342 = vmatmul.bf16.gmra.mxu0 %v19181_v61 }
 0x3bb   :  { %v3367_v25 = vpop.f32.mrf.mxu1 }
 0x3bc   :  { %v3368_v30 = vadd.f32 %v3367_v25, %v3303_v1 }
 0x3be   :  { %3406 = vmatmul.bf16.gmra.mxu1 %v3026_v39  ;;  %3470 = vmatmul.bf16.gmra.mxu2 %v3027_v11 }
 0x3bf   :  { %3534 = vmatmul.bf16.gmra.mxu3 %v3028_v38  ;;  %v16608_v34 = vpop.f32.mrf.mxu0 }
 0x3c1   :  { %v3431_v36 = vpop.f32.mrf.mxu2 }
 0x3c2   :  { %v3432_v50 = vadd.f32 %v3431_v36, %v3368_v30  ;;  %v3495_v37 = vpop.f32.mrf.mxu3 }
 0x3c3   :  { %v16610_v12 = vpop.f32.mrf.mxu1 }
 0x3c4   :  { %v16612_v31 = vadd.f32 %v3495_v37, %v3432_v50  ;;  %v16682_v37 = vpop.permute.xlu2 %3569 }
 0x3c5   :  { %19186 = vst [vmem:[#allocation35_spill] sm:$0xff] %v16682_v37 }
 0x3c6   :  { %19182 = vst [vmem:[#allocation36_spill] sm:$0xff] %v16612_v31 }
 0x3c7   :  { %v3308_v5 = vpop.f32.mrf.mxu0 }
 0x3c9   :  { %v16614_v32 = vpop.f32.mrf.mxu2 }
 0x3ca   :  { %v16616_v13 = vpop.f32.mrf.mxu3  ;;  %3347 = vmatmul.bf16.gmra.mxu0 %v19183_v2  ;;  %v16686_v2 = vpop.permute.xlu0 %3574 }
 0x3cb   :  { %v3372_v46 = vpop.f32.mrf.mxu1  ;;  %19187 = vst [vmem:[#allocation32_spill] sm:$0xff] %v16686_v2 }
 0x3cc   :  { %v3373_v38 = vadd.f32 %v3372_v46, %v3308_v5 }
 0x3ce   :  { %3411 = vmatmul.bf16.gmra.mxu1 %v3030_v58  ;;  %3475 = vmatmul.bf16.gmra.mxu2 %v19184_v60 }
 0x3cf   :  { %3539 = vmatmul.bf16.gmra.mxu3 %v19185_v53  ;;  %v16630_v43 = vpop.f32.mrf.mxu0 }
 0x3d1   :  { %v3436_v7 = vpop.f32.mrf.mxu2 }
 0x3d2   :  { %v3437_v39 = vadd.f32 %v3436_v7, %v3373_v38  ;;  %v3500_v28 = vpop.f32.mrf.mxu3  ;;  %v16690_v38 = vpop.permute.xlu1 %3579 }
 0x3d3   :  { %v16632_v40 = vpop.f32.mrf.mxu1  ;;  %19188 = vst [vmem:[#allocation34_spill] sm:$0xff] %v16690_v38 }
 0x3d4   :  { %v16634_v11 = vadd.f32 %v3500_v28, %v3437_v39  ;;  %v16698_v39 = vpop.permute.xlu2 %3584 }
 0x3d5   :  { %19189 = vst [vmem:[#allocation38_spill] sm:$0xff] %v16698_v39 }
 0x3d7   :  { %v3313_v55 = vpop.f32.mrf.mxu0 }
 0x3d9   :  { %v16636_v56 = vpop.f32.mrf.mxu2 }
 0x3da   :  { %v16638_v58 = vpop.f32.mrf.mxu3 }
 0x3db   :  { %v3377_v18 = vpop.f32.mrf.mxu1 }
 0x3dc   :  { %v3378_v51 = vadd.f32 %v3377_v18, %v3313_v55  ;;  %v16704_v18 = vpop.permute.xlu0 %3589 }
 0x3dd   :  { %19190 = vst [vmem:[#allocation39_spill] sm:$0xff] %v16704_v18 }
 0x3df   :  { %v16640_v27 = vpop.f32.mrf.mxu0 }
 0x3e1   :  { %v3441_v15 = vpop.f32.mrf.mxu2 }
 0x3e2   :  { %v3442_v6 = vadd.f32 %v3441_v15, %v3378_v51  ;;  %v3505_v49 = vpop.f32.mrf.mxu3  ;;  %v16708_v15 = vpop.permute.xlu1 %3594 }
 0x3e3   :  { %v16642_v57 = vpop.f32.mrf.mxu1  ;;  %19191 = vst [vmem:[#allocation31_spill] sm:$0xff] %v16708_v15 }
 0x3e4   :  { %v16644_v48 = vadd.f32 %v3505_v49, %v3442_v6  ;;  %v3365_v6 = vadd.f32 %v16597_v29, %v16595_v62  ;;  %v16729_v29 = vpop.permute.xlu0 %3604 }
 0x3e6   :  { %v3429_v49 = vadd.f32 %v16601_v4, %v3365_v6 }
 0x3e7   :  { %v3318_v63 = vpop.f32.mrf.mxu0 }
 0x3e9   :  { %v16646_v42 = vpop.f32.mrf.mxu2 }
 0x3ea   :  { %v16648_v26 = vpop.f32.mrf.mxu3  ;;  %v16731_v4 = vpop.permute.xlu1 %3609 }
 0x3eb   :  { %v3382_v16 = vpop.f32.mrf.mxu1 }
 0x3ec   :  { %v3383_v0 = vadd.f32 %v3382_v16, %v3318_v63 }
 0x3ef   :  { %v16650_v41 = vpop.f32.mrf.mxu0 }
 0x3f1   :  { %v3446_v47 = vpop.f32.mrf.mxu2 }
 0x3f2   :  { %v3447_v24 = vadd.f32 %v3446_v47, %v3383_v0  ;;  %v3510_v22 = vpop.f32.mrf.mxu3  ;;  %v3370_v0 = vadd.f32 %v16610_v12, %v16608_v34 }
 0x3f3   :  { %v16652_v45 = vpop.f32.mrf.mxu1 }
 0x3f4   :  { %v16654_v21 = vadd.f32 %v3510_v22, %v3447_v24  ;;  %v16721_v24 = vpop.permute.xlu2 %3599  ;;  %v16724_v22 = vadd.f32 %v16603_v14, %v3429_v49  ;;  %v3434_v62 = vadd.f32 %v16614_v32, %v3370_v0  ;;  %v3677_v32 = vmul.f32 %v16682_v37, %v16599_v59 }
 0x3f6   :  { %v3678_v34 = vmul.f32 %v16686_v2, %v16724_v22 }
 0x3f7   :  { %v3323_v35 = vpop.f32.mrf.mxu0 }
 0x3f9   :  { %v16656_v17 = vpop.f32.mrf.mxu2 }
 0x3fa   :  { %v16658_v19 = vpop.f32.mrf.mxu3 }
 0x3fb   :  { %v3387_v10 = vpop.f32.mrf.mxu1 }
 0x3fc   :  { %v3388_v8 = vadd.f32 %v3387_v10, %v3323_v35  ;;  %v3375_v10 = vadd.f32 %v16632_v40, %v16630_v43  ;;  %v3380_v43 = vadd.f32 %v16642_v57, %v16640_v27  ;;  %v16762_v0 = vpop.permute.xlu2 %3614  ;;  %v3681_v57 = vmul.f32 %v16704_v18, %v16634_v11 }
 0x3fe   :  { %v3439_v14 = vadd.f32 %v16636_v56, %v3375_v10  ;;  %v3444_v49 = vadd.f32 %v16646_v42, %v3380_v43  ;;  %v3385_v10 = vadd.f32 %v16652_v45, %v16650_v41 }
 0x3ff   :  { %v16660_v20 = vpop.f32.mrf.mxu0 }
 0x400   :  { %v16759_v56 = vadd.f32 %v16638_v58, %v3439_v14  ;;  %v16772_v58 = vpop.permute.xlu1 %3624  ;;  %v16778_v43 = vadd.f32 %v16648_v26, %v3444_v49  ;;  %v3449_v37 = vadd.f32 %v16656_v17, %v3385_v10 }
 0x401   :  { %v3451_v3 = vpop.f32.mrf.mxu2 }
 0x402   :  { %v3452_v9 = vadd.f32 %v3451_v3, %v3388_v8  ;;  %v3515_v33 = vpop.f32.mrf.mxu3  ;;  %v16740_v8 = vadd.f32 %v16616_v13, %v3434_v62  ;;  %v3727_v62 = vmul.f32 %v3677_v32, %v16599_v59  ;;  %v3682_v14 = vmul.f32 %v16708_v15, %v16759_v56 }
 0x403   :  { %v16662_v44 = vpop.f32.mrf.mxu1 }
 0x404   :  { %v16664_v52 = vadd.f32 %v3515_v33, %v3452_v9  ;;  %v3679_v9 = vmul.f32 %v16690_v38, %v16612_v31  ;;  %v3728_v33 = vmul.f32 %v3678_v34, %v16724_v22  ;;  %v3680_v13 = vmul.f32 %v16698_v39, %v16740_v8  ;;  %v16770_v38 = vpop.permute.xlu0 %3619 }
 0x405   :  { %v3699_v39 = vadd.f32 %v3678_v34, %v3677_v32  ;;  %v3731_v34 = vmul.f32 %v3681_v57, %v16634_v11  ;;  %v3683_v32 = vmul.f32 %v16721_v24, %v16644_v48  ;;  %v3390_v26 = vadd.f32 %v16662_v44, %v16660_v20  ;;  %v16804_v44 = vpop.permute.xlu2 %3629 }
 0x406   :  { %v3729_v27 = vmul.f32 %v3679_v9, %v16612_v31  ;;  %v3749_v2 = vadd.f32 %v3728_v33, %v3727_v62  ;;  %v3730_v42 = vmul.f32 %v3680_v13, %v16740_v8  ;;  %v3732_v17 = vmul.f32 %v3682_v14, %v16759_v56 }
 0x407   :  { %v16666_v23 = vpop.f32.mrf.mxu0  ;;  %v3700_v18 = vadd.f32 %v3699_v39, %v3679_v9  ;;  %v3684_v39 = vmul.f32 %v16729_v29, %v16778_v43  ;;  %v3685_v20 = vmul.f32 %v16731_v4, %v16654_v21 }
 0x408   :  { %v3750_v45 = vadd.f32 %v3749_v2, %v3729_v27  ;;  %v16796_v2 = vadd.f32 %v16658_v19, %v3449_v37 }
 0x409   :  { %v16668_v54 = vpop.f32.mrf.mxu2  ;;  %v3701_v62 = vadd.f32 %v3700_v18, %v3680_v13  ;;  %v3733_v13 = vmul.f32 %v3683_v32, %v16644_v48 }
 0x40a   :  { %v16670_v1 = vpop.f32.mrf.mxu3  ;;  %v3751_v15 = vadd.f32 %v3750_v45, %v3730_v42  ;;  %v3454_v9 = vadd.f32 %v16668_v54, %v3390_v26  ;;  %v3734_v54 = vmul.f32 %v3684_v39, %v16778_v43 }
 0x40b   :  { %v16672_v61 = vpop.f32.mrf.mxu1  ;;  %v3702_v10 = vadd.f32 %v3701_v62, %v3681_v57  ;;  %v16820_v62 = vpop.permute.xlu1 %3639 }
 0x40c   :  { %v3393_v27 = vadd.f32 %v16672_v61, %v16666_v23  ;;  %v3752_v18 = vadd.f32 %v3751_v15, %v3731_v34  ;;  %v3686_v23 = vmul.f32 %v16762_v0, %v16796_v2  ;;  %v16812_v61 = vpop.permute.xlu0 %3634  ;;  %v16815_v15 = vadd.f32 %v16670_v1, %v3454_v9 }
 0x40d   :  { %v3703_v37 = vadd.f32 %v3702_v10, %v3682_v14  ;;  %v3735_v14 = vmul.f32 %v3685_v20, %v16654_v21 }
 0x40e   :  { %v3753_v45 = vadd.f32 %v3752_v18, %v3732_v17  ;;  %v3687_v17 = vmul.f32 %v16770_v38, %v16664_v52  ;;  %v3688_v18 = vmul.f32 %v16772_v58, %v16815_v15 }
 0x40f   :  { %v16674_v25 = vpop.f32.mrf.mxu0 }
 0x411   :  { %v16676_v30 = vpop.f32.mrf.mxu2 }
 0x412   :  { %v16678_v36 = vpop.f32.mrf.mxu3  ;;  %v3457_v42 = vadd.f32 %v16676_v30, %v3393_v27 }
 0x413   :  { %v16680_v50 = vpop.f32.mrf.mxu1 }
 0x414   :  { %v3395_v19 = vadd.f32 %v16680_v50, %v16674_v25  ;;  %v3704_v25 = vadd.f32 %v3703_v37, %v3683_v32  ;;  %v3754_v50 = vadd.f32 %v3753_v45, %v3733_v13  ;;  %v16826_v27 = vadd.f32 %v16678_v36, %v3457_v42 }
 0x415   :  { %v3736_v32 = vmul.f32 %v3686_v23, %v16796_v2 }
 0x416   :  { %v3705_v9 = vadd.f32 %v3704_v25, %v3684_v39  ;;  %v3755_v10 = vadd.f32 %v3754_v50, %v3734_v54  ;;  %v16859_v25 = vpop.permute.xlu0 %3649 }
 0x417   :  { %v16684_v5 = vpop.f32.mrf.mxu0 }
 0x418   :  { %v3706_v42 = vadd.f32 %v3705_v9, %v3685_v20  ;;  %v16867_v9 = vpop.permute.xlu1 %3654 }
 0x419   :  { %v16688_v46 = vpop.f32.mrf.mxu2 }
 0x41a   :  { %v16692_v60 = vpop.f32.mrf.mxu3  ;;  %v3459_v57 = vadd.f32 %v16688_v46, %v3395_v19  ;;  %v3756_v19 = vadd.f32 %v3755_v10, %v3735_v14  ;;  %v3707_v45 = vadd.f32 %v3706_v42, %v3686_v23 }
 0x41b   :  { %v16694_v53 = vpop.f32.mrf.mxu1 }
 0x41c   :  { %v3398_v30 = vadd.f32 %v16694_v53, %v16684_v5  ;;  %v16835_v13 = vadd.f32 %v16692_v60, %v3459_v57  ;;  %v3757_v54 = vadd.f32 %v3756_v19, %v3736_v32 }
 0x41f   :  { %v16696_v7 = vpop.f32.mrf.mxu0 }
 0x421   :  { %v16700_v28 = vpop.f32.mrf.mxu2 }
 0x422   :  { %v16702_v55 = vpop.f32.mrf.mxu3  ;;  %v3462_v1 = vadd.f32 %v16700_v28, %v3398_v30 }
 0x423   :  { %v16706_v51 = vpop.f32.mrf.mxu1 }
 0x424   :  { %v3400_v46 = vadd.f32 %v16706_v51, %v16696_v7  ;;  %v3737_v7 = vmul.f32 %v3687_v17, %v16664_v52  ;;  %v3689_v51 = vmul.f32 %v16804_v44, %v16826_v27  ;;  %v16844_v39 = vadd.f32 %v16702_v55, %v3462_v1 }
 0x425   :  { %v3708_v55 = vadd.f32 %v3707_v45, %v3687_v17 }
 0x426   :  { %v3691_v50 = vmul.f32 %v16820_v62, %v16844_v39 }
 0x427   :  { %v16713_v63 = vpop.f32.mrf.mxu0  ;;  %v3709_v1 = vadd.f32 %v3708_v55, %v3688_v18 }
 0x428   :  { %v3741_v42 = vmul.f32 %v3691_v50, %v16844_v39 }
 0x429   :  { %v16715_v16 = vpop.f32.mrf.mxu2  ;;  %v3710_v32 = vadd.f32 %v3709_v1, %v3689_v51  ;;  %v16897_v1 = vpop.permute.xlu1 %3669 }
 0x42a   :  { %v16719_v47 = vpop.f32.mrf.mxu3  ;;  %v3464_v36 = vadd.f32 %v16715_v16, %v3400_v46  ;;  %v16849_v16 = vpop.permute.xlu2 %3644 }
 0x42b   :  { %v16726_v35 = vpop.f32.mrf.mxu1 }
 0x42c   :  { %v3403_v28 = vadd.f32 %v16726_v35, %v16713_v63  ;;  %v3738_v63 = vmul.f32 %v3688_v18, %v16815_v15  ;;  %v3690_v35 = vmul.f32 %v16812_v61, %v16835_v13  ;;  %v16855_v20 = vadd.f32 %v16719_v47, %v3464_v36 }
 0x42f   :  { %v16737_v12 = vpop.f32.mrf.mxu0 }
 0x431   :  { %v16745_v3 = vpop.f32.mrf.mxu2 }
 0x432   :  { %v16751_v40 = vpop.f32.mrf.mxu3  ;;  %v3467_v37 = vadd.f32 %v16745_v3, %v3403_v28 }
 0x433   :  { %v16754_v6 = vpop.f32.mrf.mxu1 }
 0x434   :  { %v3405_v60 = vadd.f32 %v16754_v6, %v16737_v12  ;;  %v3758_v12 = vadd.f32 %v3757_v54, %v3737_v7  ;;  %v3739_v6 = vmul.f32 %v3689_v51, %v16826_v27  ;;  %v16865_v14 = vadd.f32 %v16751_v40, %v3467_v37 }
 0x437   :  { %v16781_v31 = vpop.f32.mrf.mxu0 }
 0x439   :  { %v16783_v41 = vpop.f32.mrf.mxu2 }
 0x43a   :  { %v16788_v33 = vpop.f32.mrf.mxu3  ;;  %v3469_v30 = vadd.f32 %v16783_v41, %v3405_v60  ;;  %v3759_v41 = vadd.f32 %v3758_v12, %v3738_v63  ;;  %v16885_v63 = vpop.permute.xlu2 %3659 }
 0x43b   :  { %v3407_v49 = vpop.f32.mrf.mxu1 }
 0x43c   :  { %v3408_v3 = vadd.f32 %v3407_v49, %v16781_v31  ;;  %v3740_v31 = vmul.f32 %v3690_v35, %v16835_v13  ;;  %v3692_v49 = vmul.f32 %v16849_v16, %v16855_v20  ;;  %v16873_v36 = vadd.f32 %v16788_v33, %v3469_v30 }
 0x43d   :  { %v3760_v40 = vadd.f32 %v3759_v41, %v3739_v6 }
 0x43e   :  { %v3742_v7 = vmul.f32 %v3692_v49, %v16855_v20  ;;  %v3694_v33 = vmul.f32 %v16867_v9, %v16873_v36 }
 0x43f   :  { %v3345_v5 = vpop.f32.mrf.mxu0  ;;  %v3761_v19 = vadd.f32 %v3760_v40, %v3740_v31 }
 0x441   :  { %v3471_v34 = vpop.f32.mrf.mxu2 }
 0x442   :  { %v3535_v26 = vpop.f32.mrf.mxu3  ;;  %v3472_v46 = vadd.f32 %v3471_v34, %v3408_v3  ;;  %v3693_v34 = vmul.f32 %v16859_v25, %v16865_v14  ;;  %v16892_v3 = vpop.permute.xlu0 %3664 }
 0x443   :  { %v3409_v53 = vpop.f32.mrf.mxu1 }
 0x444   :  { %v3410_v17 = vadd.f32 %v3409_v53, %v3345_v5  ;;  %v3711_v5 = vadd.f32 %v3710_v32, %v3690_v35  ;;  %v16878_v53 = vadd.f32 %v3535_v26, %v3472_v46  ;;  %v3743_v35 = vmul.f32 %v3693_v34, %v16865_v14 }
 0x446   :  { %v3712_v45 = vadd.f32 %v3711_v5, %v3691_v50  ;;  %v3695_v55 = vmul.f32 %v16885_v63, %v16878_v53 }
 0x447   :  { %v3348_v10 = vpop.f32.mrf.mxu0 }
 0x448   :  { %v3713_v26 = vadd.f32 %v3712_v45, %v3692_v49  ;;  %v3745_v31 = vmul.f32 %v3695_v55, %v16878_v53  ;;  %v16906_v45 = vpop.permute.xlu2 %3674 }
 0x449   :  { %v3473_v57 = vpop.f32.mrf.mxu2 }
 0x44a   :  { %v3537_v23 = vpop.f32.mrf.mxu3  ;;  %v3474_v28 = vadd.f32 %v3473_v57, %v3410_v17  ;;  %v3762_v57 = vadd.f32 %v3761_v19, %v3741_v42  ;;  %v3714_v50 = vadd.f32 %v3713_v26, %v3693_v34 }
 0x44b   :  { %v3412_v47 = vpop.f32.mrf.mxu1 }
 0x44c   :  { %v3413_v18 = vadd.f32 %v3412_v47, %v3348_v10  ;;  %v16883_v51 = vadd.f32 %v3537_v23, %v3474_v28  ;;  %v3763_v12 = vadd.f32 %v3762_v57, %v3742_v7  ;;  %v3744_v23 = vmul.f32 %v3694_v33, %v16873_v36 }
 0x44d   :  { %v3715_v41 = vadd.f32 %v3714_v50, %v3694_v33 }
 0x44e   :  { %v3696_v47 = vmul.f32 %v16892_v3, %v16883_v51  ;;  %v3764_v46 = vadd.f32 %v3763_v12, %v3743_v35 }
 0x44f   :  { %v3350_v17 = vpop.f32.mrf.mxu0  ;;  %v3716_v40 = vadd.f32 %v3715_v41, %v3695_v55 }
 0x450   :  { %v3765_v28 = vadd.f32 %v3764_v46, %v3744_v23  ;;  %v3746_v42 = vmul.f32 %v3696_v47, %v16883_v51 }
 0x451   :  { %v3476_v37 = vpop.f32.mrf.mxu2  ;;  %v3717_v19 = vadd.f32 %v3716_v40, %v3696_v47 }
 0x452   :  { %v3477_v60 = vadd.f32 %v3476_v37, %v3413_v18  ;;  %v3540_v54 = vpop.f32.mrf.mxu3  ;;  %v3766_v18 = vadd.f32 %v3765_v28, %v3745_v31 }
 0x453   :  { %v3414_v6 = vpop.f32.mrf.mxu1 }
 0x454   :  { %v16890_v30 = vadd.f32 %v3540_v54, %v3477_v60  ;;  %v3415_v10 = vadd.f32 %v3414_v6, %v3350_v17  ;;  %v3767_v33 = vadd.f32 %v3766_v18, %v3746_v42  ;;  %v13568_v18 = vld [vmem:[#allocation7 + $0xb8] sm:$0xff] }
 0x455   :  { %4621 = vmatpush.bf16.msrb.mxu2 %v13568_v18 }
 0x456   :  { %v3697_v49 = vmul.f32 %v16897_v1, %v16890_v30 }
 0x458   :  { %v3747_v7 = vmul.f32 %v3697_v49, %v16890_v30  ;;  %v3718_v60 = vadd.f32 %v3717_v19, %v3697_v49  ;;  %v13576_v19 = vld [vmem:[#allocation7 + $0xf8] sm:$0xff] }
 0x459   :  { %v3478_v32 = vpop.f32.mrf.mxu2  ;;  %4685 = vmatpush.bf16.msrb.mxu3 %v13576_v19  ;;  %v13563_v19 = vld [vmem:[#allocation7 + $0x90] sm:$0xff] }
 0x45a   :  { %v3479_v34 = vadd.f32 %v3478_v32, %v3415_v10  ;;  %v3542_v5 = vpop.f32.mrf.mxu3  ;;  %v3768_v57 = vadd.f32 %v3767_v33, %v3747_v7  ;;  %v13551_v33 = vld [vmem:[#allocation7 + $0x30] sm:$0xff] }
 0x45c   :  { %v16904_v37 = vadd.f32 %v3542_v5, %v3479_v34  ;;  %v13552_v34 = vld [vmem:[#allocation7 + $0x38] sm:$0xff] }
 0x45d   :  { %v13560_v5 = vld [vmem:[#allocation7 + $0x78] sm:$0xff]  ;;  %4493 = vmatpush.bf16.msrb.mxu0 %v13552_v34  ;;  %v13547_v34 = vld [vmem:[#allocation7 + $0x10] sm:$0xff] }
 0x45e   :  { %v3698_v54 = vmul.f32 %v16906_v45, %v16904_v37  ;;  %4557 = vmatpush.bf16.msrb.mxu1 %v13560_v5  ;;  %v13555_v5 = vld [vmem:[#allocation7 + $0x50] sm:$0xff] }
 0x460   :  { %v3719_v35 = vadd.f32 %v3718_v60, %v3698_v54  ;;  %v3748_v26 = vmul.f32 %v3698_v54, %v16904_v37  ;;  %v13559_v60 = vld [vmem:[#allocation7 + $0x70] sm:$0xff] }
 0x461   :  { %v13567_v54 = vld [vmem:[#allocation7 + $0xb0] sm:$0xff]  ;;  %4494 = vmatpush.bf16.msrb.mxu0 %v13551_v33  ;;  %v3779_v33 = vld [vmem:[#allocation14 + $0x2] ss:$0 sm:$0xff] }
 0x462   :  { %v3720_v55 = vrot.slane %v3719_v35, 4  ;;  %v3769_v12 = vadd.f32 %v3768_v57, %v3748_v26  ;;  %v13575_v57 = vld [vmem:[#allocation7 + $0xf0] sm:$0xff]  ;;  %4558 = vmatpush.bf16.msrb.mxu1 %v13559_v60  ;;  %v13550_v26 = vld [vmem:[#allocation7 + $0x28] sm:$0xff]  ;;  %4622 = vmatpush.bf16.msrb.mxu2 %v13567_v54 }
 0x463   :  { %4686 = vmatpush.bf16.msrb.mxu3 %v13575_v57  ;;  %v13546_v54 = vld [vmem:[#allocation7 + $0x8] sm:$0xff] }
 0x464   :  { %v3721_v6 = vadd.f32 %v3720_v55, %v3719_v35  ;;  %v3770_v50 = vrot.slane %v3769_v12, 4  ;;  %v13558_v55 = vld [vmem:[#allocation7 + $0x68] sm:$0xff] }
 0x465   :  { %4495 = vmatpush.bf16.msrb.mxu0 %v13550_v26  ;;  %v13554_v57 = vld [vmem:[#allocation7 + $0x48] sm:$0xff] }
 0x466   :  { %v3722_v23 = vrot.slane %v3721_v6, 2  ;;  %v3771_v47 = vadd.f32 %v3770_v50, %v3769_v12  ;;  %v13566_v12 = vld [vmem:[#allocation7 + $0xa8] sm:$0xff]  ;;  %4559 = vmatpush.bf16.msrb.mxu1 %v13558_v55  ;;  %v13549_v50 = vld [vmem:[#allocation7 + $0x20] sm:$0xff] }
 0x467   :  { %4623 = vmatpush.bf16.msrb.mxu2 %v13566_v12  ;;  %v13562_v55 = vld [vmem:[#allocation7 + $0x88] sm:$0xff] }
 0x468   :  { %v3723_v46 = vadd.f32 %v3722_v23, %v3721_v6  ;;  %v3772_v17 = vrot.slane %v3771_v47, 2  ;;  %v13574_v6 = vld [vmem:[#allocation7 + $0xe8] sm:$0xff]  ;;  %v13557_v23 = vld [vmem:[#allocation7 + $0x60] sm:$0xff] }
 0x469   :  { %4687 = vmatpush.bf16.msrb.mxu3 %v13574_v6  ;;  %4496 = vmatpush.bf16.msrb.mxu0 %v13549_v50  ;;  %v13570_v12 = vld [vmem:[#allocation7 + $0xc8] sm:$0xff]  ;;  %v3792_v50 = vld [vmem:[%s19054_s11 + $0x2] ss:$0 sm:$0xff] }
 0x46a   :  { %v3724_v41 = vrot.slane %v3723_v46, 1  ;;  %v3773_v31 = vadd.f32 %v3772_v17, %v3771_v47  ;;  %v13565_v47 = vld [vmem:[#allocation7 + $0xa0] sm:$0xff]  ;;  %4560 = vmatpush.bf16.msrb.mxu1 %v13557_v23 }
 0x46b   :  { %4624 = vmatpush.bf16.msrb.mxu2 %v13565_v47  ;;  %v13545_v47 = vld [vmem:[#allocation7] sm:$0xff] }
 0x46c   :  { %v3725_v10 = vadd.f32 %v3724_v41, %v3723_v46  ;;  %v3774_v32 = vrot.slane %v3773_v31, 1  ;;  %v13573_v46 = vld [vmem:[#allocation7 + $0xe0] sm:$0xff] }
 0x46d   :  { %4688 = vmatpush.bf16.msrb.mxu3 %v13573_v46  ;;  %v13553_v46 = vld [vmem:[#allocation7 + $0x40] sm:$0xff] }
 0x46e   :  { %v16911_v49 = vmul.f32 0.0078125, %v3725_v10  ;;  %v3775_v28 = vadd.f32 %v3774_v32, %v3773_v31  ;;  %v13548_v31 = vld [vmem:[#allocation7 + $0x18] sm:$0xff] }
 0x46f   :  { %v13556_v10 = vld [vmem:[#allocation7 + $0x58] sm:$0xff]  ;;  %4497 = vmatpush.bf16.msrb.mxu0 %v13548_v31 }
 0x470   :  { %v3776_v40 = vmul.f32 0.0078125, %v3775_v28  ;;  %v3777_v42 = vmul.f32 %v16911_v49, %v16911_v49  ;;  %v13564_v28 = vld [vmem:[#allocation7 + $0x98] sm:$0xff]  ;;  %4561 = vmatpush.bf16.msrb.mxu1 %v13556_v10 }
 0x471   :  { %4625 = vmatpush.bf16.msrb.mxu2 %v13564_v28 }
 0x472   :  { %v3778_v7 = vsub.f32 %v3776_v40, %v3777_v42  ;;  %v13572_v40 = vld [vmem:[#allocation7 + $0xd8] sm:$0xff] }
 0x473   :  { %4689 = vmatpush.bf16.msrb.mxu3 %v13572_v40  ;;  %4498 = vmatpush.bf16.msrb.mxu0 %v13547_v34 }
 0x474   :  { %v3780_v35 = vadd.f32 1e-05, %v3778_v7  ;;  %v13571_v7 = vld [vmem:[#allocation7 + $0xd0] sm:$0xff]  ;;  %4562 = vmatpush.bf16.msrb.mxu1 %v13555_v5 }
 0x475   :  { %4626 = vmatpush.bf16.msrb.mxu2 %v13563_v19 }
 0x476   :  { %14017 = vrsqrt.f32 %v3780_v35  ;;  %vm3787_vm9 = vweird.f32 %v3780_v35 }
 0x477   :  { %4690 = vmatpush.bf16.msrb.mxu3 %v13571_v7  ;;  %4499 = vmatpush.bf16.msrb.mxu0 %v13546_v54 }
 0x478   :  { %4563 = vmatpush.bf16.msrb.mxu1 %v13554_v57  ;;  %v19196_v57 = vld [vmem:[#allocation38_spill] sm:$0xff] }
 0x479   :  { %4627 = vmatpush.bf16.msrb.mxu2 %v13562_v55  ;;  %v19197_v55 = vld [vmem:[#allocation39_spill] sm:$0xff] }
 0x47b   :  { %4691 = vmatpush.bf16.msrb.mxu3 %v13570_v12  ;;  %4500 = vmatpush.bf16.msrb.mxu0 %v13545_v47 }
 0x47c   :  { %v14018_v17 = vpop.eup %14017  ;;  %4564 = vmatpush.bf16.msrb.mxu1 %v13553_v46 }
 0x47d   :  { %v3782_v41 = vmul.f32 %v14018_v17, %v3780_v35  ;;  %vm3788_vm8 = vweird.f32 %v14018_v17 }
 0x47e   :  { %vm3789_vm10 = vmor %vm3787_vm9, %vm3788_vm8 }
 0x47f   :  { %v3783_v32 = vmul.f32 %v14018_v17, %v3782_v41  ;;  %v13569_v41 = vld [vmem:[#allocation7 + $0xc0] sm:$0xff] }
 0x480   :  { %4692 = vmatpush.bf16.msrb.mxu3 %v13569_v41 }
 0x481   :  { %v3784_v42 = vmul.f32 0.5, %v3783_v32 }
 0x483   :  { %v3785_v18 = vsub.f32 1.5, %v3784_v42 }
 0x485   :  { %v3786_v60 = vmul.f32 %v14018_v17, %v3785_v18 }
 0x487   :  { %v3790_v26 = vsel %vm3789_vm10, %v14018_v17, %v3786_v60  ;;  %v13561_v17 = vld [vmem:[#allocation7 + $0x80] sm:$0xff]  ;;  %v19195_v60 = vld [vmem:[#allocation34_spill] sm:$0xff] }
 0x488   :  { %v16915_v6 = vmul.f32 %v3790_v26, %v3779_v33  ;;  %4628 = vmatpush.bf16.msrb.mxu2 %v13561_v17 }
 0x48a   :  { %v3793_v23 = vmul.f32 %v16915_v6, %v16911_v49  ;;  %v3816_v35 = vmul.f32 %v16915_v6, %v16904_v37  ;;  %v3795_v10 = vmul.f32 %v16915_v6, %v16599_v59  ;;  %v3796_v32 = vmul.f32 %v16915_v6, %v16724_v22  ;;  %v19192_v49 = vld [vmem:[#allocation36_spill] sm:$0xff] }
 0x48b   :  { %v3797_v28 = vmul.f32 %v16915_v6, %v19192_v49  ;;  %v3798_v37 = vmul.f32 %v16915_v6, %v16740_v8  ;;  %v3799_v40 = vmul.f32 %v16915_v6, %v16634_v11  ;;  %v3800_v42 = vmul.f32 %v16915_v6, %v16759_v56  ;;  %v19193_v11 = vld [vmem:[#allocation35_spill] sm:$0xff]  ;;  %v19194_v56 = vld [vmem:[#allocation32_spill] sm:$0xff] }
 0x48c   :  { %v16924_v31 = vsub.f32 %v3792_v50, %v3793_v23  ;;  %v19198_v49 = vld [vmem:[#allocation31_spill] sm:$0xff] }
 0x48e   :  { %v3838_v34 = vadd.f32 %v3816_v35, %v16924_v31  ;;  %v3817_v59 = vadd.f32 %v3795_v10, %v16924_v31  ;;  %v3818_v5 = vadd.f32 %v3796_v32, %v16924_v31  ;;  %v3819_v22 = vadd.f32 %v3797_v28, %v16924_v31 }
 0x48f   :  { %v3820_v8 = vadd.f32 %v3798_v37, %v16924_v31  ;;  %v3821_v18 = vadd.f32 %v3799_v40, %v16924_v31  ;;  %v3822_v33 = vadd.f32 %v3800_v42, %v16924_v31 }
 0x490   :  { %v16945_v19 = vmul.f32 %v3817_v59, %v19193_v11  ;;  %v16948_v7 = vmul.f32 %v3818_v5, %v19194_v56  ;;  %v16952_v54 = vmul.f32 %v3819_v22, %v19195_v60  ;;  %v3802_v60 = vmul.f32 %v16915_v6, %v16778_v43 }
 0x491   :  { %v16955_v26 = vmul.f32 %v3820_v8, %v19196_v57  ;;  %v16958_v12 = vmul.f32 %v3821_v18, %v19197_v55  ;;  %v16975_v28 = vmul.f32 %v3822_v33, %v19198_v49  ;;  %v3801_v33 = vmul.f32 %v16915_v6, %v16644_v48 }
 0x492   :  { %v4193_v50 = vpack.c.bf16 %v16948_v7, %v16945_v19  ;;  %v3905_v23 = vrot.slane %v16945_v19, 1  ;;  %v3906_v35 = vrot.slane %v16948_v7, 1  ;;  %v4016_v47 = vrot.slane %v16948_v7, 2 }
 0x493   :  { %v3908_v46 = vrot.slane %v16952_v54, 1  ;;  %v3910_v17 = vrot.slane %v16955_v26, 1  ;;  %v4017_v41 = vrot.slane %v16952_v54, 2  ;;  %v4019_v10 = vrot.slane %v16955_v26, 2 }
 0x494   :  { %4501 = vmatmul.bf16.vlgmr.msrb.gmra.mxu0 %v4193_v50  ;;  %v16972_v32 = vsel %vm291_vm0, %v3905_v23, %v3906_v35  ;;  %v3912_v18 = vrot.slane %v16958_v12, 1  ;;  %v3914_v11 = vrot.slane %v16975_v28, 1  ;;  %v4021_v56 = vrot.slane %v16958_v12, 2 }
 0x495   :  { %v3909_v37 = vsel %vm291_vm0, %v3906_v35, %v3908_v46  ;;  %v16979_v40 = vsel %vm291_vm0, %v3908_v46, %v3910_v17  ;;  %v4018_v42 = vsel %vm403_vm1, %v4016_v47, %v4017_v41  ;;  %v4020_v59 = vsel %vm403_vm1, %v4017_v41, %v4019_v10 }
 0x496   :  { %v4194_v5 = vpack.c.bf16 %v3909_v37, %v16972_v32  ;;  %v4195_v22 = vpack.c.bf16 %v16979_v40, %v3909_v37  ;;  %v4196_v8 = vpack.c.bf16 %v4020_v59, %v4018_v42  ;;  %v4023_v57 = vrot.slane %v16975_v28, 2 }
 0x497   :  { %v3913_v55 = vsel %vm291_vm0, %v3910_v17, %v3912_v18  ;;  %v3823_v50 = vadd.f32 %v3801_v33, %v16924_v31  ;;  %v3824_v35 = vadd.f32 %v3802_v60, %v16924_v31  ;;  %v16999_v46 = vsel %vm291_vm0, %v3912_v18, %v3914_v11 }
 0x498   :  { %4565 = vmatmul.bf16.vlgmr.msrb.gmra.mxu1 %v4194_v5  ;;  %4629 = vmatmul.bf16.vlgmr.msrb.gmra.mxu2 %v4195_v22  ;;  %v3804_v41 = vmul.f32 %v16915_v6, %v16796_v2  ;;  %v3805_v48 = vmul.f32 %v16915_v6, %v16664_v52  ;;  %v3806_v43 = vmul.f32 %v16915_v6, %v16815_v15 }
 0x499   :  { %4693 = vmatmul.bf16.vlgmr.msrb.gmra.mxu3 %v4196_v8  ;;  %v4022_v49 = vsel %vm403_vm1, %v4019_v10, %v4021_v56  ;;  %v17009_v17 = vmul.f32 %v3823_v50, %v16721_v24  ;;  %v17012_v37 = vmul.f32 %v3824_v35, %v16729_v29  ;;  %v3803_v42 = vmul.f32 %v16915_v6, %v16654_v21 }
 0x49a   :  { %v4024_v59 = vsel %vm403_vm1, %v4021_v56, %v4023_v57  ;;  %v3826_v2 = vadd.f32 %v3804_v41, %v16924_v31  ;;  %v3827_v52 = vadd.f32 %v3805_v48, %v16924_v31  ;;  %v3828_v5 = vadd.f32 %v3806_v43, %v16924_v31 }
 0x49b   :  { %v3916_v15 = vrot.slane %v17009_v17, 1  ;;  %v3918_v10 = vrot.slane %v17012_v37, 1  ;;  %v4025_v24 = vrot.slane %v17009_v17, 2  ;;  %v3825_v29 = vadd.f32 %v3803_v42, %v16924_v31 }
 0x49c   :  { %v17025_v22 = vmul.f32 %v3838_v34, %v16906_v45  ;;  %v17028_v21 = vmul.f32 %v3826_v2, %v16762_v0  ;;  %v4197_v8 = vpack.c.bf16 %v16955_v26, %v16952_v54  ;;  %v4198_v18 = vpack.c.bf16 %v3913_v55, %v16979_v40 }
 0x49d   :  { %v4201_v56 = vpack.c.bf16 %v16975_v28, %v16958_v12  ;;  %v4027_v33 = vrot.slane %v17012_v37, 2  ;;  %v4199_v60 = vpack.c.bf16 %v16999_v46, %v3913_v55  ;;  %v4200_v50 = vpack.c.bf16 %v4024_v59, %v4022_v49 }
 0x49e   :  { %v17038_v35 = vsel %vm291_vm0, %v3914_v11, %v3916_v15  ;;  %v3807_v0 = vmul.f32 %v16915_v6, %v16826_v27  ;;  %v17045_v45 = vsel %vm291_vm0, %v3916_v15, %v3918_v10  ;;  %v17048_v34 = vsel %vm403_vm1, %v4023_v57, %v4025_v24 }
 0x49f   :  { %v17051_v54 = vmul.f32 %v3825_v29, %v16731_v4  ;;  %v3808_v26 = vmul.f32 %v16915_v6, %v16835_v13  ;;  %v3922_v40 = vrot.slane %v17028_v21, 1  ;;  %v17057_v11 = vmul.f32 %v3827_v52, %v16770_v38 }
 0x4a0   :  { %v17060_v27 = vmul.f32 %v3828_v5, %v16772_v58  ;;  %v3829_v55 = vadd.f32 %v3807_v0, %v16924_v31  ;;  %v4202_v57 = vpack.c.bf16 %v17038_v35, %v16999_v46  ;;  %v17068_v4 = vsel %vm403_vm1, %v4025_v24, %v4027_v33 }
 0x4a1   :  { %v19097_v13 = vrot.slane %v17028_v21, 2  ;;  %v3830_v41 = vadd.f32 %v3808_v26, %v16924_v31  ;;  %v4203_v38 = vpack.c.bf16 %v17045_v45, %v17038_v35  ;;  %v3924_v58 = vrot.slane %v17057_v11, 1 }
 0x4a2   :  { %v3926_v48 = vrot.slane %v17060_v27, 1  ;;  %v3809_v43 = vmul.f32 %v16915_v6, %v16844_v39  ;;  %v4033_v49 = vrot.slane %v17057_v11, 2  ;;  %v4035_v42 = vrot.slane %v17060_v27, 2 }
 0x4a3   :  { %v17083_v2 = vmul.f32 %v3829_v55, %v16804_v44  ;;  %v17088_v52 = vsel %vm291_vm0, %v3922_v40, %v3924_v58  ;;  %v17094_v39 = vmul.f32 %v3830_v41, %v16812_v61  ;;  %v4204_v24 = vpack.c.bf16 %v17068_v4, %v17048_v34 }
 0x4a4   :  { %4506 = vmatmul.bf16.gmra.mxu0 %v4197_v8  ;;  %v17091_v5 = vsel %vm291_vm0, %v3924_v58, %v3926_v48  ;;  %v3831_v15 = vadd.f32 %v3809_v43, %v16924_v31  ;;  %v17104_v29 = vsel %vm403_vm1, %v19097_v13, %v4033_v49  ;;  %v17108_v61 = vsel %vm403_vm1, %v4033_v49, %v4035_v42 }
 0x4a5   :  { %v3928_v8 = vrot.slane %v17083_v2, 1  ;;  %v4039_v0 = vrot.slane %v17094_v39, 2  ;;  %v3813_v58 = vmul.f32 %v16915_v6, %v16878_v53  ;;  %v3814_v26 = vmul.f32 %v16915_v6, %v16883_v51 }
 0x4a7   :  { %v17116_v55 = vsel %vm291_vm0, %v3926_v48, %v3928_v8  ;;  %v3836_v51 = vadd.f32 %v3814_v26, %v16924_v31 }
 0x4a8   :  { %4570 = vmatmul.bf16.gmra.mxu1 %v4198_v18  ;;  %4634 = vmatmul.bf16.gmra.mxu2 %v4199_v60  ;;  %v3930_v18 = vrot.slane %v17094_v39, 1  ;;  %v4037_v60 = vrot.slane %v17083_v2, 2 }
 0x4a9   :  { %4698 = vmatmul.bf16.gmra.mxu3 %v4200_v50  ;;  %v17121_v50 = vmul.f32 %v3831_v15, %v16820_v62  ;;  %v3810_v15 = vmul.f32 %v16915_v6, %v16855_v20  ;;  %v3815_v20 = vmul.f32 %v16915_v6, %v16890_v30 }
 0x4aa   :  { %v17126_v43 = vsel %vm291_vm0, %v3928_v8, %v3930_v18  ;;  %v17129_v49 = vsel %vm403_vm1, %v4035_v42, %v4037_v60  ;;  %v17132_v59 = vsel %vm403_vm1, %v4037_v60, %v4039_v0  ;;  %v3811_v42 = vmul.f32 %v16915_v6, %v16865_v14 }
 0x4ab   :  { %v3932_v62 = vrot.slane %v17121_v50, 1  ;;  %v4041_v8 = vrot.slane %v17121_v50, 2  ;;  %v3812_v60 = vmul.f32 %v16915_v6, %v16873_v36  ;;  %v3832_v41 = vadd.f32 %v3810_v15, %v16924_v31 }
 0x4ac   :  { %v3833_v36 = vadd.f32 %v3811_v42, %v16924_v31  ;;  %v3835_v15 = vadd.f32 %v3813_v58, %v16924_v31  ;;  %v3837_v13 = vadd.f32 %v3815_v20, %v16924_v31  ;;  %v4055_v42 = vrot.slane %v17025_v22, 2 }
 0x4ad   :  { %v17149_v48 = vsel %vm291_vm0, %v3930_v18, %v3932_v62  ;;  %v17159_v44 = vsel %vm403_vm1, %v4039_v0, %v4041_v8  ;;  %v3834_v53 = vadd.f32 %v3812_v60, %v16924_v31  ;;  %v17164_v18 = vmul.f32 %v3832_v41, %v16849_v16 }
 0x4ae   :  { %v4218_v14 = vpack.c.bf16 %v17149_v48, %v17126_v43  ;;  %v17170_v30 = vmul.f32 %v3833_v36, %v16859_v25  ;;  %v3946_v0 = vrot.slane %v17025_v22, 1  ;;  %v17182_v26 = vmul.f32 %v3835_v15, %v16885_v63 }
 0x4af   :  { %v17173_v6 = vmul.f32 %v3834_v53, %v16867_v9  ;;  %v3934_v60 = vrot.slane %v17164_v18, 1  ;;  %v4043_v16 = vrot.slane %v17164_v18, 2 }
 0x4b0   :  { %v3936_v25 = vrot.slane %v17170_v30, 1  ;;  %v4045_v9 = vrot.slane %v17170_v30, 2  ;;  %v3940_v53 = vrot.slane %v17182_v26, 1 }
 0x4b1   :  { %v3938_v31 = vrot.slane %v17173_v6, 1  ;;  %v4047_v58 = vrot.slane %v17173_v6, 2  ;;  %v17192_v20 = vsel %vm291_vm0, %v3932_v62, %v3934_v60  ;;  %v17195_v36 = vsel %vm403_vm1, %v4041_v8, %v4043_v16 }
 0x4b2   :  { %v4219_v15 = vpack.c.bf16 %v17192_v20, %v17149_v48  ;;  %v17205_v12 = vsel %vm291_vm0, %v3934_v60, %v3936_v25  ;;  %v17215_v8 = vsel %vm403_vm1, %v4043_v16, %v4045_v9 }
 0x4b3   :  { %v17208_v28 = vsel %vm291_vm0, %v3936_v25, %v3938_v31  ;;  %v17218_v63 = vsel %vm403_vm1, %v4045_v9, %v4047_v58  ;;  %v17223_v60 = vsel %vm291_vm0, %v3938_v31, %v3940_v53  ;;  %v17226_v25 = vmul.f32 %v3836_v51, %v16892_v3 }
 0x4b4   :  { %4511 = vmatmul.bf16.gmra.mxu0 %v4201_v56  ;;  %v4223_v62 = vpack.c.bf16 %v17208_v28, %v17205_v12  ;;  %v4049_v56 = vrot.slane %v17182_v26, 2  ;;  %v4226_v16 = vpack.c.bf16 %v17223_v60, %v17208_v28  ;;  %v17238_v9 = vmul.f32 %v3837_v13, %v16897_v1 }
 0x4b5   :  { %v17243_v3 = vsel %vm291_vm0, %v3946_v0, %v3905_v23  ;;  %v4078_v51 = vrot.slane %v16945_v19, 2  ;;  %v3942_v46 = vrot.slane %v17226_v25, 1 }
 0x4b6   :  { %v4050_v35 = vsel %vm403_vm1, %v4047_v58, %v4049_v56  ;;  %v3944_v13 = vrot.slane %v17238_v9, 1  ;;  %v4053_v23 = vrot.slane %v17238_v9, 2 }
 0x4b7   :  { %v17261_v4 = vsel %vm291_vm0, %v3940_v53, %v3942_v46  ;;  %v17270_v31 = vsel %vm403_vm1, %v4055_v42, %v4078_v51 }
 0x4b8   :  { %4575 = vmatmul.bf16.gmra.mxu1 %v4202_v57  ;;  %4639 = vmatmul.bf16.gmra.mxu2 %v4203_v38  ;;  %v4051_v57 = vrot.slane %v17226_v25, 2  ;;  %v4227_v58 = vpack.c.bf16 %v17261_v4, %v17223_v60  ;;  %v3945_v1 = vsel %vm291_vm0, %v3942_v46, %v3944_v13  ;;  %v17276_v34 = vsel %vm291_vm0, %v3944_v13, %v3946_v0 }
 0x4b9   :  { %4703 = vmatmul.bf16.gmra.mxu3 %v4204_v24  ;;  %v17267_v24 = vsel %vm403_vm1, %v4078_v51, %v4016_v47  ;;  %v4230_v53 = vpack.c.bf16 %v3945_v1, %v17261_v4  ;;  %v4056_v47 = vsel %vm403_vm1, %v4053_v23, %v4055_v42  ;;  %v4234_v51 = vpack.c.bf16 %v17243_v3, %v17276_v34 }
 0x4ba   :  { %v4052_v38 = vsel %vm403_vm1, %v4049_v56, %v4051_v57  ;;  %v4231_v56 = vpack.c.bf16 %v17276_v34, %v3945_v1  ;;  %v4054_v7 = vsel %vm403_vm1, %v4051_v57, %v4053_v23  ;;  %v4236_v60 = vpack.c.bf16 %v17267_v24, %v17270_v31 }
 0x4bb   :  { %v4228_v19 = vpack.c.bf16 %v4052_v38, %v4050_v35  ;;  %v4232_v41 = vpack.c.bf16 %v4056_v47, %v4054_v7  ;;  %v3920_v46 = vrot.slane %v17051_v54, 1  ;;  %v4029_v0 = vrot.slane %v17051_v54, 2 }
 0x4bc   :  { %v4205_v35 = vpack.c.bf16 %v17012_v37, %v17009_v17  ;;  %v19199_v13 = vrot.slane %v17028_v21, 2  ;;  %v19200_v37 = vpack.c.bf16 %v17091_v5, %v17088_v52  ;;  %v19203_v7 = vpack.c.bf16 %v17116_v55, %v17091_v5 }
 0x4bd   :  { %v3921_v57 = vsel %vm291_vm0, %v3918_v10, %v3920_v46  ;;  %v3923_v42 = vsel %vm291_vm0, %v3920_v46, %v3922_v40  ;;  %v4030_v1 = vsel %vm403_vm1, %v4027_v33, %v4029_v0  ;;  %v4209_v10 = vpack.c.bf16 %v17028_v21, %v17051_v54 }
 0x4be   :  { %v4032_v23 = vsel %vm403_vm1, %v4029_v0, %v19199_v13  ;;  %v4206_v4 = vpack.c.bf16 %v3921_v57, %v17045_v45  ;;  %v4207_v17 = vpack.c.bf16 %v3923_v42, %v3921_v57  ;;  %v4210_v40 = vpack.c.bf16 %v17088_v52, %v3923_v42 }
 0x4bf   :  { %v4208_v38 = vpack.c.bf16 %v4032_v23, %v4030_v1  ;;  %v19201_v33 = vpack.c.bf16 %v17108_v61, %v17104_v29  ;;  %v19202_v45 = vpack.c.bf16 %v17060_v27, %v17057_v11  ;;  %v19204_v21 = vpack.c.bf16 %v17126_v43, %v17116_v55 }
 0x4c0   :  { %v19205_v54 = vpack.c.bf16 %v17132_v59, %v17129_v49  ;;  %v19206_v52 = vpack.c.bf16 %v17094_v39, %v17083_v2  ;;  %v19207_v11 = vpack.c.bf16 %v17195_v36, %v17159_v44  ;;  %v19208_v27 = vpack.c.bf16 %v17164_v18, %v17121_v50 }
 0x4c1   :  { %v19209_v59 = vpack.c.bf16 %v17205_v12, %v17192_v20  ;;  %v19210_v2 = vpack.c.bf16 %v17218_v63, %v17215_v8  ;;  %v19211_v39 = vpack.c.bf16 %v17173_v6, %v17170_v30  ;;  %v19212_v30 = vpack.c.bf16 %v17226_v25, %v17182_v26 }
 0x4c2   :  { %v19213_v26 = vpack.c.bf16 %v17025_v22, %v17238_v9  ;;  %v19214_v25 = vpack.c.bf16 %v16972_v32, %v17243_v3  ;;  %vm5472_vm1 = vcmask 1041408  }
 0x4c4   :  { %4516 = vmatmul.bf16.gmra.mxu0 %v4205_v35 }
 0x4c8   :  { %4580 = vmatmul.bf16.gmra.mxu1 %v4206_v4  ;;  %4644 = vmatmul.bf16.gmra.mxu2 %v4207_v17 }
 0x4c9   :  { %4708 = vmatmul.bf16.gmra.mxu3 %v4208_v38 }
 0x4d4   :  { %4521 = vmatmul.bf16.gmra.mxu0 %v4209_v10 }
 0x4d8   :  { %4585 = vmatmul.bf16.gmra.mxu1 %v4210_v40  ;;  %4649 = vmatmul.bf16.gmra.mxu2 %v19200_v37 }
 0x4d9   :  { %4713 = vmatmul.bf16.gmra.mxu3 %v19201_v33 }
 0x4e4   :  { %4526 = vmatmul.bf16.gmra.mxu0 %v19202_v45 }
 0x4e8   :  { %4590 = vmatmul.bf16.gmra.mxu1 %v19203_v7  ;;  %4654 = vmatmul.bf16.gmra.mxu2 %v19204_v21 }
 0x4e9   :  { %4718 = vmatmul.bf16.gmra.mxu3 %v19205_v54 }
 0x4f4   :  { %4531 = vmatmul.bf16.gmra.mxu0 %v19206_v52 }
 0x4f8   :  { %4595 = vmatmul.bf16.gmra.mxu1 %v4218_v14  ;;  %4659 = vmatmul.bf16.gmra.mxu2 %v4219_v15 }
 0x4f9   :  { %4723 = vmatmul.bf16.gmra.mxu3 %v19207_v11 }
 0x504   :  { %4536 = vmatmul.bf16.gmra.mxu0 %v19208_v27 }
 0x508   :  { %4600 = vmatmul.bf16.gmra.mxu1 %v19209_v59  ;;  %4664 = vmatmul.bf16.gmra.mxu2 %v4223_v62 }
 0x509   :  { %4728 = vmatmul.bf16.gmra.mxu3 %v19210_v2 }
 0x511   :  { %v4502_v5 = vpop.f32.mrf.mxu0 }
 0x514   :  { %4541 = vmatmul.bf16.gmra.mxu0 %v19211_v39 }
 0x515   :  { %v4566_v44 = vpop.f32.mrf.mxu1 }
 0x516   :  { %v4567_v61 = vadd.f32 %v4566_v44, %v4502_v5 }
 0x518   :  { %4605 = vmatmul.bf16.gmra.mxu1 %v4226_v16  ;;  %4669 = vmatmul.bf16.gmra.mxu2 %v4227_v58 }
 0x519   :  { %4733 = vmatmul.bf16.gmra.mxu3 %v4228_v19  ;;  %v17351_v29 = vpop.f32.mrf.mxu0 }
 0x51b   :  { %v4630_v55 = vpop.f32.mrf.mxu2 }
 0x51c   :  { %v4631_v50 = vadd.f32 %v4630_v55, %v4567_v61  ;;  %v4694_v43 = vpop.f32.mrf.mxu3 }
 0x51d   :  { %v17353_v49 = vpop.f32.mrf.mxu1 }
 0x51e   :  { %v17355_v48 = vadd.f32 %v4694_v43, %v4631_v50 }
 0x521   :  { %v4507_v14 = vpop.f32.mrf.mxu0 }
 0x523   :  { %v17357_v18 = vpop.f32.mrf.mxu2 }
 0x524   :  { %v17359_v20 = vpop.f32.mrf.mxu3  ;;  %4546 = vmatmul.bf16.gmra.mxu0 %v19212_v30 }
 0x525   :  { %v4571_v6 = vpop.f32.mrf.mxu1 }
 0x526   :  { %v4572_v63 = vadd.f32 %v4571_v6, %v4507_v14 }
 0x528   :  { %4610 = vmatmul.bf16.gmra.mxu1 %v4230_v53  ;;  %4674 = vmatmul.bf16.gmra.mxu2 %v4231_v56 }
 0x529   :  { %4738 = vmatmul.bf16.gmra.mxu3 %v4232_v41  ;;  %v17364_v36 = vpop.f32.mrf.mxu0 }
 0x52b   :  { %v4635_v15 = vpop.f32.mrf.mxu2 }
 0x52c   :  { %v4636_v12 = vadd.f32 %v4635_v15, %v4572_v63  ;;  %v4699_v28 = vpop.f32.mrf.mxu3 }
 0x52d   :  { %v17366_v62 = vpop.f32.mrf.mxu1 }
 0x52e   :  { %v17368_v8 = vadd.f32 %v4699_v28, %v4636_v12 }
 0x531   :  { %v4512_v16 = vpop.f32.mrf.mxu0 }
 0x533   :  { %v17370_v19 = vpop.f32.mrf.mxu2 }
 0x534   :  { %v17372_v58 = vpop.f32.mrf.mxu3  ;;  %4551 = vmatmul.bf16.gmra.mxu0 %v19213_v26  ;;  %v17432_v26 = vpop.permute.xlu0 %4773 }
 0x535   :  { %v4576_v41 = vpop.f32.mrf.mxu1  ;;  %19215 = vst [vmem:[#allocation33_spill] sm:$0xff] %v17432_v26 }
 0x536   :  { %v4577_v56 = vadd.f32 %v4576_v41, %v4512_v16 }
 0x538   :  { %4615 = vmatmul.bf16.gmra.mxu1 %v4234_v51  ;;  %4679 = vmatmul.bf16.gmra.mxu2 %v19214_v25  ;;  %v17436_v25 = vpop.permute.xlu1 %4778 }
 0x539   :  { %4743 = vmatmul.bf16.gmra.mxu3 %v4236_v60  ;;  %v4514_v53 = vpop.f32.mrf.mxu0  ;;  %19216 = vst [vmem:[#allocation37_spill] sm:$0xff] %v17436_v25 }
 0x53b   :  { %v4640_v47 = vpop.f32.mrf.mxu2 }
 0x53c   :  { %v4641_v46 = vadd.f32 %v4640_v47, %v4577_v56  ;;  %v4704_v0 = vpop.f32.mrf.mxu3  ;;  %v17440_v56 = vpop.permute.xlu2 %4783 }
 0x53d   :  { %v4578_v22 = vpop.f32.mrf.mxu1  ;;  %19217 = vst [vmem:[#allocation36_spill] sm:$0xff] %v17440_v56 }
 0x53e   :  { %v17386_v9 = vadd.f32 %v4704_v0, %v4641_v46  ;;  %v17388_v35 = vadd.f32 %v4578_v22, %v4514_v53  ;;  %v17448_v22 = vpop.permute.xlu0 %4788 }
 0x53f   :  { %19218 = vst [vmem:[#allocation35_spill] sm:$0xff] %v17448_v22 }
 0x541   :  { %v4517_v34 = vpop.f32.mrf.mxu0 }
 0x543   :  { %v17390_v51 = vpop.f32.mrf.mxu2 }
 0x544   :  { %v17392_v57 = vpop.f32.mrf.mxu3 }
 0x545   :  { %v4581_v32 = vpop.f32.mrf.mxu1 }
 0x546   :  { %v4582_v42 = vadd.f32 %v4581_v32, %v4517_v34 }
 0x549   :  { %v4519_v3 = vpop.f32.mrf.mxu0 }
 0x54b   :  { %v4645_v24 = vpop.f32.mrf.mxu2 }
 0x54c   :  { %v4646_v31 = vadd.f32 %v4645_v24, %v4582_v42  ;;  %v4709_v60 = vpop.f32.mrf.mxu3  ;;  %v17458_v24 = vpop.permute.xlu2 %4798 }
 0x54d   :  { %v4583_v1 = vpop.f32.mrf.mxu1  ;;  %19220 = vst [vmem:[#allocation34_spill] sm:$0xff] %v17458_v24 }
 0x54e   :  { %v17394_v13 = vadd.f32 %v4709_v60, %v4646_v31  ;;  %v17396_v23 = vadd.f32 %v4583_v1, %v4519_v3  ;;  %v17454_v3 = vpop.permute.xlu1 %4793  ;;  %v4569_v31 = vadd.f32 %v17353_v49, %v17351_v29 }
 0x54f   :  { %19219 = vst [vmem:[#allocation32_spill] sm:$0xff] %v17454_v3 }
 0x550   :  { %v4633_v60 = vadd.f32 %v17357_v18, %v4569_v31 }
 0x551   :  { %v4522_v4 = vpop.f32.mrf.mxu0 }
 0x553   :  { %v17398_v17 = vpop.f32.mrf.mxu2 }
 0x554   :  { %v17400_v38 = vpop.f32.mrf.mxu3  ;;  %v17481_v18 = vpop.permute.xlu2 %4813 }
 0x555   :  { %v4586_v10 = vpop.f32.mrf.mxu1 }
 0x556   :  { %v4587_v37 = vadd.f32 %v4586_v10, %v4522_v4  ;;  %v4574_v10 = vadd.f32 %v17366_v62, %v17364_v36  ;;  %v17479_v49 = vpop.permute.xlu1 %4808  ;;  %v4881_v62 = vmul.f32 %v17432_v26, %v17355_v48 }
 0x558   :  { %v4638_v29 = vadd.f32 %v17370_v19, %v4574_v10  ;;  %v4883_v19 = vmul.f32 %v17440_v56, %v17368_v8 }
 0x559   :  { %v4524_v40 = vpop.f32.mrf.mxu0 }
 0x55a   :  { %v17488_v36 = vadd.f32 %v17372_v58, %v4638_v29  ;;  %v4933_v31 = vmul.f32 %v4883_v19, %v17368_v8 }
 0x55b   :  { %v4650_v33 = vpop.f32.mrf.mxu2 }
 0x55c   :  { %v4651_v45 = vadd.f32 %v4650_v33, %v4587_v37  ;;  %v4714_v7 = vpop.f32.mrf.mxu3  ;;  %v17471_v37 = vpop.permute.xlu0 %4803  ;;  %v17474_v33 = vadd.f32 %v17359_v20, %v4633_v60  ;;  %19221 = vst [vmem:[#allocation38_spill] sm:$0xff] %v17488_v36  ;;  %v4643_v20 = vadd.f32 %v17390_v51, %v17388_v35  ;;  %v4884_v58 = vmul.f32 %v17448_v22, %v17488_v36 }
 0x55d   :  { %v4588_v21 = vpop.f32.mrf.mxu1  ;;  %v4648_v35 = vadd.f32 %v17398_v17, %v17396_v23  ;;  %v4885_v60 = vmul.f32 %v17454_v3, %v17386_v9  ;;  %v17518_v22 = vpop.permute.xlu2 %4828 }
 0x55e   :  { %v17402_v54 = vadd.f32 %v4714_v7, %v4651_v45  ;;  %v17404_v52 = vadd.f32 %v4588_v21, %v4524_v40  ;;  %v4882_v7 = vmul.f32 %v17436_v25, %v17474_v33  ;;  %v17516_v10 = vpop.permute.xlu1 %4823 }
 0x55f   :  { %v17524_v17 = vadd.f32 %v17400_v38, %v4648_v35 }
 0x560   :  { %v4903_v29 = vadd.f32 %v4882_v7, %v4881_v62 }
 0x561   :  { %v4527_v11 = vpop.f32.mrf.mxu0 }
 0x562   :  { %v4904_v25 = vadd.f32 %v4903_v29, %v4883_v19 }
 0x563   :  { %v17406_v27 = vpop.f32.mrf.mxu2 }
 0x564   :  { %v17408_v59 = vpop.f32.mrf.mxu3  ;;  %v17510_v51 = vpop.permute.xlu0 %4818 }
 0x565   :  { %v4591_v2 = vpop.f32.mrf.mxu1 }
 0x566   :  { %v4592_v39 = vadd.f32 %v4591_v2, %v4527_v11 }
 0x569   :  { %v17410_v5 = vpop.f32.mrf.mxu0 }
 0x56b   :  { %v4655_v44 = vpop.f32.mrf.mxu2 }
 0x56c   :  { %v4656_v61 = vadd.f32 %v4655_v44, %v4592_v39  ;;  %v4719_v55 = vpop.f32.mrf.mxu3  ;;  %v4932_v39 = vmul.f32 %v4882_v7, %v17474_v33 }
 0x56d   :  { %v17412_v50 = vpop.f32.mrf.mxu1 }
 0x56e   :  { %v17414_v43 = vadd.f32 %v4719_v55, %v4656_v61  ;;  %v17506_v61 = vadd.f32 %v17392_v57, %v4643_v20  ;;  %v4931_v55 = vmul.f32 %v4881_v62, %v17355_v48  ;;  %v4934_v57 = vmul.f32 %v4884_v58, %v17488_v36 }
 0x56f   :  { %v4653_v20 = vadd.f32 %v17406_v27, %v17404_v52  ;;  %v4935_v62 = vmul.f32 %v4885_v60, %v17386_v9  ;;  %v4594_v38 = vadd.f32 %v17412_v50, %v17410_v5  ;;  %v4888_v27 = vmul.f32 %v17479_v49, %v17524_v17  ;;  %v17551_v50 = vpop.permute.xlu0 %4833 }
 0x570   :  { %v4953_v56 = vadd.f32 %v4932_v39, %v4931_v55  ;;  %v4886_v23 = vmul.f32 %v17458_v24, %v17506_v61  ;;  %v4887_v39 = vmul.f32 %v17471_v37, %v17394_v13  ;;  %v4905_v24 = vadd.f32 %v4904_v25, %v4884_v58 }
 0x571   :  { %v17416_v14 = vpop.f32.mrf.mxu0  ;;  %v4889_v5 = vmul.f32 %v17481_v18, %v17402_v54 }
 0x572   :  { %v4954_v7 = vadd.f32 %v4953_v56, %v4933_v31  ;;  %v4936_v52 = vmul.f32 %v4886_v23, %v17506_v61  ;;  %v17543_v56 = vadd.f32 %v17408_v59, %v4653_v20  ;;  %v4906_v29 = vadd.f32 %v4905_v24, %v4885_v60 }
 0x573   :  { %v17418_v30 = vpop.f32.mrf.mxu2  ;;  %v4937_v58 = vmul.f32 %v4887_v39, %v17394_v13 }
 0x574   :  { %v17420_v6 = vpop.f32.mrf.mxu3  ;;  %v4955_v36 = vadd.f32 %v4954_v7, %v4934_v57  ;;  %v4658_v19 = vadd.f32 %v17418_v30, %v4594_v38  ;;  %v4907_v20 = vadd.f32 %v4906_v29, %v4886_v23  ;;  %v4938_v30 = vmul.f32 %v4888_v27, %v17524_v17 }
 0x575   :  { %v17422_v63 = vpop.f32.mrf.mxu1  ;;  %v4939_v23 = vmul.f32 %v4889_v5, %v17402_v54 }
 0x576   :  { %v4597_v31 = vadd.f32 %v17422_v63, %v17416_v14  ;;  %v4956_v25 = vadd.f32 %v4955_v36, %v4935_v62  ;;  %v4890_v14 = vmul.f32 %v17510_v51, %v17543_v56  ;;  %v17559_v63 = vpop.permute.xlu1 %4838  ;;  %v17562_v24 = vadd.f32 %v17420_v6, %v4658_v19  ;;  %v17567_v62 = vpop.permute.xlu2 %4843 }
 0x578   :  { %v4957_v7 = vadd.f32 %v4956_v25, %v4936_v52  ;;  %v4891_v52 = vmul.f32 %v17516_v10, %v17414_v43  ;;  %v4892_v25 = vmul.f32 %v17518_v22, %v17562_v24 }
 0x579   :  { %v17424_v15 = vpop.f32.mrf.mxu0 }
 0x57b   :  { %v17426_v12 = vpop.f32.mrf.mxu2 }
 0x57c   :  { %v17428_v28 = vpop.f32.mrf.mxu3  ;;  %v4661_v57 = vadd.f32 %v17426_v12, %v4597_v31 }
 0x57d   :  { %v17430_v16 = vpop.f32.mrf.mxu1 }
 0x57e   :  { %v4599_v59 = vadd.f32 %v17430_v16, %v17424_v15  ;;  %v4908_v15 = vadd.f32 %v4907_v20, %v4887_v39  ;;  %v4958_v16 = vadd.f32 %v4957_v7, %v4937_v58  ;;  %v17573_v31 = vadd.f32 %v17428_v28, %v4661_v57 }
 0x57f   :  { %v4940_v39 = vmul.f32 %v4890_v14, %v17543_v56 }
 0x580   :  { %v4909_v19 = vadd.f32 %v4908_v15, %v4888_v27  ;;  %v4959_v29 = vadd.f32 %v4958_v16, %v4938_v30  ;;  %v17606_v15 = vpop.permute.xlu1 %4853 }
 0x581   :  { %v17434_v41 = vpop.f32.mrf.mxu0 }
 0x582   :  { %v4910_v57 = vadd.f32 %v4909_v19, %v4889_v5  ;;  %v17614_v19 = vpop.permute.xlu2 %4858 }
 0x583   :  { %v17438_v53 = vpop.f32.mrf.mxu2 }
 0x584   :  { %v17442_v47 = vpop.f32.mrf.mxu3  ;;  %v4663_v36 = vadd.f32 %v17438_v53, %v4599_v59  ;;  %v4960_v59 = vadd.f32 %v4959_v29, %v4939_v23  ;;  %v4911_v7 = vadd.f32 %v4910_v57, %v4890_v14 }
 0x585   :  { %v17444_v46 = vpop.f32.mrf.mxu1 }
 0x586   :  { %v4602_v12 = vadd.f32 %v17444_v46, %v17434_v41  ;;  %v17582_v58 = vadd.f32 %v17442_v47, %v4663_v36  ;;  %v4961_v30 = vadd.f32 %v4960_v59, %v4940_v39 }
 0x589   :  { %v17446_v0 = vpop.f32.mrf.mxu0 }
 0x58b   :  { %v17450_v34 = vpop.f32.mrf.mxu2 }
 0x58c   :  { %v17452_v32 = vpop.f32.mrf.mxu3  ;;  %v4666_v6 = vadd.f32 %v17450_v34, %v4602_v12 }
 0x58d   :  { %v17456_v42 = vpop.f32.mrf.mxu1 }
 0x58e   :  { %v4604_v53 = vadd.f32 %v17456_v42, %v17446_v0  ;;  %v4941_v0 = vmul.f32 %v4891_v52, %v17414_v43  ;;  %v4893_v42 = vmul.f32 %v17551_v50, %v17573_v31  ;;  %v17591_v27 = vadd.f32 %v17452_v32, %v4666_v6 }
 0x58f   :  { %v4912_v32 = vadd.f32 %v4911_v7, %v4891_v52 }
 0x590   :  { %v4895_v16 = vmul.f32 %v17567_v62, %v17591_v27 }
 0x591   :  { %v17463_v1 = vpop.f32.mrf.mxu0  ;;  %v4913_v6 = vadd.f32 %v4912_v32, %v4892_v25 }
 0x592   :  { %v4945_v57 = vmul.f32 %v4895_v16, %v17591_v27 }
 0x593   :  { %v17465_v4 = vpop.f32.mrf.mxu2  ;;  %v4914_v39 = vadd.f32 %v4913_v6, %v4893_v42  ;;  %v17644_v6 = vpop.permute.xlu2 %4873 }
 0x594   :  { %v17469_v40 = vpop.f32.mrf.mxu3  ;;  %v4668_v28 = vadd.f32 %v17465_v4, %v4604_v53  ;;  %v17596_v4 = vpop.permute.xlu0 %4848 }
 0x595   :  { %v17476_v45 = vpop.f32.mrf.mxu1 }
 0x596   :  { %v4607_v34 = vadd.f32 %v17476_v45, %v17463_v1  ;;  %v4942_v1 = vmul.f32 %v4892_v25, %v17562_v24  ;;  %v4894_v45 = vmul.f32 %v17559_v63, %v17582_v58  ;;  %v17602_v5 = vadd.f32 %v17469_v40, %v4668_v28 }
 0x599   :  { %v17485_v21 = vpop.f32.mrf.mxu0 }
 0x59b   :  { %v17494_v11 = vpop.f32.mrf.mxu2 }
 0x59c   :  { %v17498_v2 = vpop.f32.mrf.mxu3  ;;  %v4671_v20 = vadd.f32 %v17494_v11, %v4607_v34 }
 0x59d   :  { %v17501_v44 = vpop.f32.mrf.mxu1 }
 0x59e   :  { %v4609_v47 = vadd.f32 %v17501_v44, %v17485_v21  ;;  %v4962_v21 = vadd.f32 %v4961_v30, %v4941_v0  ;;  %v4943_v44 = vmul.f32 %v4893_v42, %v17573_v31  ;;  %v17612_v23 = vadd.f32 %v17498_v2, %v4671_v20 }
 0x5a1   :  { %v17528_v26 = vpop.f32.mrf.mxu0 }
 0x5a3   :  { %v17530_v3 = vpop.f32.mrf.mxu2 }
 0x5a4   :  { %v17535_v55 = vpop.f32.mrf.mxu3  ;;  %v4673_v12 = vadd.f32 %v17530_v3, %v4609_v47  ;;  %v4963_v3 = vadd.f32 %v4962_v21, %v4942_v1  ;;  %v17632_v1 = vpop.permute.xlu0 %4863 }
 0x5a5   :  { %v4611_v35 = vpop.f32.mrf.mxu1 }
 0x5a6   :  { %v4612_v11 = vadd.f32 %v4611_v35, %v17528_v26  ;;  %v4944_v26 = vmul.f32 %v4894_v45, %v17582_v58  ;;  %v4896_v35 = vmul.f32 %v17596_v4, %v17602_v5  ;;  %v17620_v28 = vadd.f32 %v17535_v55, %v4673_v12 }
 0x5a7   :  { %v4964_v2 = vadd.f32 %v4963_v3, %v4943_v44 }
 0x5a8   :  { %v4946_v0 = vmul.f32 %v4896_v35, %v17602_v5  ;;  %v4898_v55 = vmul.f32 %v17614_v19, %v17620_v28 }
 0x5a9   :  { %v4549_v41 = vpop.f32.mrf.mxu0  ;;  %v4965_v59 = vadd.f32 %v4964_v2, %v4944_v26 }
 0x5ab   :  { %v4675_v60 = vpop.f32.mrf.mxu2 }
 0x5ac   :  { %v4739_v38 = vpop.f32.mrf.mxu3  ;;  %v4676_v53 = vadd.f32 %v4675_v60, %v4612_v11  ;;  %v4897_v60 = vmul.f32 %v17606_v15, %v17612_v23  ;;  %v17639_v11 = vpop.permute.xlu1 %4868 }
 0x5ad   :  { %v4613_v46 = vpop.f32.mrf.mxu1 }
 0x5ae   :  { %v4614_v52 = vadd.f32 %v4613_v46, %v4549_v41  ;;  %v4915_v41 = vadd.f32 %v4914_v39, %v4894_v45  ;;  %v17625_v46 = vadd.f32 %v4739_v38, %v4676_v53  ;;  %v4947_v45 = vmul.f32 %v4897_v60, %v17612_v23 }
 0x5b0   :  { %v4916_v7 = vadd.f32 %v4915_v41, %v4895_v16  ;;  %v4899_v32 = vmul.f32 %v17632_v1, %v17625_v46 }
 0x5b1   :  { %v4552_v29 = vpop.f32.mrf.mxu0 }
 0x5b2   :  { %v4917_v38 = vadd.f32 %v4916_v7, %v4896_v35  ;;  %v4949_v26 = vmul.f32 %v4899_v32, %v17625_v46  ;;  %v17651_v7 = vpop.permute.xlu0 %4878 }
 0x5b3   :  { %v4677_v36 = vpop.f32.mrf.mxu2 }
 0x5b4   :  { %v4741_v14 = vpop.f32.mrf.mxu3  ;;  %v4678_v34 = vadd.f32 %v4677_v36, %v4614_v52  ;;  %v4966_v36 = vadd.f32 %v4965_v59, %v4945_v57  ;;  %v4918_v16 = vadd.f32 %v4917_v38, %v4897_v60 }
 0x5b5   :  { %v4616_v40 = vpop.f32.mrf.mxu1 }
 0x5b6   :  { %v4617_v25 = vadd.f32 %v4616_v40, %v4552_v29  ;;  %v17630_v42 = vadd.f32 %v4741_v14, %v4678_v34  ;;  %v4967_v21 = vadd.f32 %v4966_v36, %v4946_v0  ;;  %v4948_v14 = vmul.f32 %v4898_v55, %v17620_v28 }
 0x5b7   :  { %v4919_v3 = vadd.f32 %v4918_v16, %v4898_v55 }
 0x5b8   :  { %v4900_v40 = vmul.f32 %v17639_v11, %v17630_v42  ;;  %v4968_v53 = vadd.f32 %v4967_v21, %v4947_v45 }
 0x5b9   :  { %v4554_v52 = vpop.f32.mrf.mxu0  ;;  %v4920_v2 = vadd.f32 %v4919_v3, %v4899_v32 }
 0x5ba   :  { %v4969_v34 = vadd.f32 %v4968_v53, %v4948_v14  ;;  %v4950_v57 = vmul.f32 %v4900_v40, %v17630_v42 }
 0x5bb   :  { %v4680_v20 = vpop.f32.mrf.mxu2  ;;  %v4921_v59 = vadd.f32 %v4920_v2, %v4900_v40 }
 0x5bc   :  { %v4681_v47 = vadd.f32 %v4680_v20, %v4617_v25  ;;  %v4744_v30 = vpop.f32.mrf.mxu3  ;;  %v4970_v25 = vadd.f32 %v4969_v34, %v4949_v26 }
 0x5bd   :  { %v4618_v44 = vpop.f32.mrf.mxu1 }
 0x5be   :  { %v17637_v12 = vadd.f32 %v4744_v30, %v4681_v47  ;;  %v4619_v29 = vadd.f32 %v4618_v44, %v4554_v52  ;;  %v4971_v55 = vadd.f32 %v4970_v25, %v4950_v57 }
 0x5c0   :  { %v4901_v35 = vmul.f32 %v17644_v6, %v17637_v12 }
 0x5c2   :  { %v4951_v0 = vmul.f32 %v4901_v35, %v17637_v12  ;;  %v4922_v47 = vadd.f32 %v4921_v59, %v4901_v35 }
 0x5c3   :  { %v4682_v39 = vpop.f32.mrf.mxu2 }
 0x5c4   :  { %v4683_v60 = vadd.f32 %v4682_v39, %v4619_v29  ;;  %v4746_v41 = vpop.f32.mrf.mxu3  ;;  %v4972_v36 = vadd.f32 %v4971_v55, %v4951_v0 }
 0x5c6   :  { %v4747_v20 = vadd.f32 %v4746_v41, %v4683_v60 }
 0x5c8   :  { %v4902_v30 = vmul.f32 %v17651_v7, %v4747_v20 }
 0x5ca   :  { %v4923_v45 = vadd.f32 %v4922_v47, %v4902_v30  ;;  %v4952_v38 = vmul.f32 %v4902_v30, %v4747_v20  ;;  %v4983_v30 = vld [vmem:[#allocation14 + $0x3] ss:$0 sm:$0xff] }
 0x5cc   :  { %v4924_v21 = vrot.slane %v4923_v45, 4  ;;  %v4973_v32 = vadd.f32 %v4972_v36, %v4952_v38 }
 0x5ce   :  { %v4925_v44 = vadd.f32 %v4924_v21, %v4923_v45  ;;  %v4974_v16 = vrot.slane %v4973_v32, 4  ;;  %v4996_v21 = vld [vmem:[%s19054_s11 + $0x3] ss:$0 sm:$0xff] }
 0x5d0   :  { %v4926_v14 = vrot.slane %v4925_v44, 2  ;;  %v4975_v53 = vadd.f32 %v4974_v16, %v4973_v32 }
 0x5d2   :  { %v4927_v52 = vadd.f32 %v4926_v14, %v4925_v44  ;;  %v4976_v40 = vrot.slane %v4975_v53, 2 }
 0x5d4   :  { %v4928_v3 = vrot.slane %v4927_v52, 1  ;;  %v4977_v26 = vadd.f32 %v4976_v40, %v4975_v53 }
 0x5d6   :  { %v4929_v29 = vadd.f32 %v4928_v3, %v4927_v52  ;;  %v4978_v39 = vrot.slane %v4977_v26, 1 }
 0x5d8   :  { %v4930_v34 = vmul.f32 0.0078125, %v4929_v29  ;;  %v4979_v2 = vadd.f32 %v4978_v39, %v4977_v26 }
 0x5da   :  { %v4980_v35 = vmul.f32 0.0078125, %v4979_v2  ;;  %v4981_v57 = vmul.f32 %v4930_v34, %v4930_v34 }
 0x5dc   :  { %v4982_v60 = vsub.f32 %v4980_v35, %v4981_v57 }
 0x5de   :  { %v4984_v41 = vadd.f32 1e-05, %v4982_v60  ;;  %v19222_v60 = vld [vmem:[#allocation33_spill] sm:$0xff] }
 0x5e0   :  { %14019 = vrsqrt.f32 %v4984_v41  ;;  %vm4991_vm12 = vweird.f32 %v4984_v41 }
 0x5e6   :  { %v14020_v25 = vpop.eup %14019 }
 0x5e7   :  { %v4986_v59 = vmul.f32 %v14020_v25, %v4984_v41  ;;  %vm4992_vm11 = vweird.f32 %v14020_v25 }
 0x5e8   :  { %vm4993_vm13 = vmor %vm4991_vm12, %vm4992_vm11 }
 0x5e9   :  { %v4987_v0 = vmul.f32 %v14020_v25, %v4986_v59 }
 0x5eb   :  { %v4988_v55 = vmul.f32 0.5, %v4987_v0  ;;  %v19224_v0 = vld [vmem:[#allocation36_spill] sm:$0xff] }
 0x5ed   :  { %v4989_v47 = vsub.f32 1.5, %v4988_v55 }
 0x5ef   :  { %v4990_v36 = vmul.f32 %v14020_v25, %v4989_v47 }
 0x5f1   :  { %v4994_v45 = vsel %vm4993_vm13, %v14020_v25, %v4990_v36  ;;  %v19223_v25 = vld [vmem:[#allocation37_spill] sm:$0xff] }
 0x5f2   :  { %v17654_v38 = vmul.f32 %v4994_v45, %v4983_v30 }
 0x5f4   :  { %v4997_v32 = vmul.f32 %v17654_v38, %v4930_v34  ;;  %v5020_v44 = vmul.f32 %v17654_v38, %v4747_v20  ;;  %v5014_v16 = vmul.f32 %v17654_v38, %v17602_v5  ;;  %v5015_v14 = vmul.f32 %v17654_v38, %v17612_v23 }
 0x5f5   :  { %v5016_v53 = vmul.f32 %v17654_v38, %v17620_v28  ;;  %v5017_v52 = vmul.f32 %v17654_v38, %v17625_v46  ;;  %v4999_v40 = vmul.f32 %v17654_v38, %v17355_v48  ;;  %v5000_v3 = vmul.f32 %v17654_v38, %v17474_v33 }
 0x5f6   :  { %v17673_v26 = vsub.f32 %v4996_v21, %v4997_v32  ;;  %v5001_v5 = vmul.f32 %v17654_v38, %v17368_v8  ;;  %v5013_v23 = vmul.f32 %v17654_v38, %v17591_v27  ;;  %v5019_v28 = vmul.f32 %v17654_v38, %v17637_v12 }
 0x5f7   :  { %v5012_v46 = vmul.f32 %v17654_v38, %v17582_v58  ;;  %v5018_v48 = vmul.f32 %v17654_v38, %v17630_v42  ;;  %v17687_v33 = vmul.f32 %v17654_v38, %v17573_v31  ;;  %v17691_v20 = vmul.f32 %v17654_v38, %v17562_v24 }
 0x5f8   :  { %v5042_v8 = vadd.f32 %v5020_v44, %v17673_v26  ;;  %v5036_v27 = vadd.f32 %v5014_v16, %v17673_v26  ;;  %v5037_v12 = vadd.f32 %v5015_v14, %v17673_v26  ;;  %v5038_v29 = vadd.f32 %v5016_v53, %v17673_v26 }
 0x5f9   :  { %v5039_v58 = vadd.f32 %v5017_v52, %v17673_v26  ;;  %v5021_v42 = vadd.f32 %v4999_v40, %v17673_v26  ;;  %v5022_v39 = vadd.f32 %v5000_v3, %v17673_v26  ;;  %v5023_v31 = vadd.f32 %v5001_v5, %v17673_v26 }
 0x5fa   :  { %v5064_v34 = vmul.f32 %v5042_v8, %v17651_v7  ;;  %v5058_v24 = vmul.f32 %v5036_v27, %v17596_v4  ;;  %v5059_v2 = vmul.f32 %v5037_v12, %v17606_v15  ;;  %v5060_v35 = vmul.f32 %v5038_v29, %v17614_v19 }
 0x5fb   :  { %v17706_v57 = vmul.f32 %v5039_v58, %v17632_v1  ;;  %v5043_v41 = vmul.f32 %v5021_v42, %v19222_v60  ;;  %v5044_v59 = vmul.f32 %v5022_v39, %v19223_v25  ;;  %v17711_v55 = vmul.f32 %v5023_v31, %v19224_v0 }
 0x5fc   :  { %v5128_v47 = vrot.slane %v5064_v34, 1  ;;  %v5116_v30 = vrot.slane %v5058_v24, 1  ;;  %v5118_v36 = vrot.slane %v5059_v2, 1  ;;  %v5120_v7 = vrot.slane %v5060_v35, 1 }
 0x5fd   :  { %v5122_v4 = vrot.slane %v17706_v57, 1  ;;  %v5087_v45 = vrot.slane %v5043_v41, 1  ;;  %v5088_v15 = vrot.slane %v5044_v59, 1  ;;  %v5090_v19 = vrot.slane %v17711_v55, 1 }
 0x5fe   :  { %v5119_v1 = vsel %vm291_vm0, %v5116_v30, %v5118_v36  ;;  %v5121_v21 = vsel %vm291_vm0, %v5118_v36, %v5120_v7  ;;  %v5035_v32 = vadd.f32 %v5013_v23, %v17673_v26  ;;  %v5041_v44 = vadd.f32 %v5019_v28, %v17673_v26 }
 0x5ff   :  { %v5123_v16 = vsel %vm291_vm0, %v5120_v7, %v5122_v4  ;;  %v5169_v14 = vmax.f32 %v5058_v24, %v5119_v1  ;;  %v17722_v53 = vmax.f32 %v5059_v2, %v5121_v21  ;;  %v5089_v52 = vsel %vm291_vm0, %v5087_v45, %v5088_v15 }
 0x600   :  { %v17725_v40 = vmax.f32 %v5060_v35, %v5123_v16  ;;  %v5091_v3 = vsel %vm291_vm0, %v5088_v15, %v5090_v19  ;;  %v5153_v5 = vsel %vm291_vm0, %v5128_v47, %v5087_v45  ;;  %v17731_v23 = vmax.f32 %v5043_v41, %v5089_v52 }
 0x601   :  { %v5226_v28 = vrot.slane %v17722_v53, 1  ;;  %v17734_v8 = vmax.f32 %v5044_v59, %v5091_v3  ;;  %v5175_v27 = vmax.f32 %v5064_v34, %v5153_v5  ;;  %v5057_v12 = vmul.f32 %v5035_v32, %v17567_v62 }
 0x602   :  { %v5228_v29 = vrot.slane %v17725_v40, 1  ;;  %v5260_v58 = vrot.slane %v17731_v23, 1  ;;  %v5224_v42 = vrot.slane %v5169_v14, 1  ;;  %v5063_v39 = vmul.f32 %v5041_v44, %v17644_v6 }
 0x603   :  { %v5197_v31 = vrot.slane %v17734_v8, 1  ;;  %v5114_v24 = vrot.slane %v5057_v12, 1  ;;  %v5236_v2 = vrot.slane %v5175_v27, 1  ;;  %v5034_v35 = vadd.f32 %v5012_v46, %v17673_v26 }
 0x604   :  { %v5229_v60 = vsel %vm291_vm0, %v5226_v28, %v5228_v29  ;;  %v5227_v34 = vsel %vm291_vm0, %v5224_v42, %v5226_v28  ;;  %v5126_v62 = vrot.slane %v5063_v39, 1  ;;  %v5040_v41 = vadd.f32 %v5018_v48, %v17673_v26 }
 0x605   :  { %v5280_v25 = vmax.f32 %v5169_v14, %v5229_v60  ;;  %v5261_v6 = vsel %vm291_vm0, %v5260_v58, %v5197_v31  ;;  %v5117_v59 = vsel %vm291_vm0, %v5114_v24, %v5116_v30  ;;  %v5264_v0 = vsel %vm291_vm0, %v5236_v2, %v5260_v58 }
 0x606   :  { %v5286_v36 = vmax.f32 %v5175_v27, %v5261_v6  ;;  %v5168_v46 = vmax.f32 %v5057_v12, %v5117_v59  ;;  %v5129_v7 = vsel %vm291_vm0, %v5126_v62, %v5128_v47  ;;  %v5056_v45 = vmul.f32 %v5034_v35, %v17559_v63 }
 0x607   :  { %5323 = vmatpush.msra.mxu0 %v5280_v25  ;;  %v5174_v15 = vmax.f32 %v5063_v39, %v5129_v7  ;;  %v5062_v1 = vmul.f32 %v5040_v41, %v17639_v11  ;;  %v5033_v48 = vadd.f32 %v17687_v33, %v17673_v26  ;;  %v5032_v21 = vadd.f32 %v17691_v20, %v17673_v26 }
 0x608   :  { %5371 = vmatpush.msra.mxu1 %v5286_v36  ;;  %v5222_v30 = vrot.slane %v5168_v46, 1  ;;  %v5279_v32 = vmax.f32 %v5168_v46, %v5227_v34  ;;  %v5112_v44 = vrot.slane %v5056_v45, 1  ;;  %v5009_v16 = vmul.f32 %v17654_v38, %v17414_v43 }
 0x609   :  { %v5234_v47 = vrot.slane %v5174_v15, 1  ;;  %v5285_v14 = vmax.f32 %v5174_v15, %v5264_v0  ;;  %v5124_v63 = vrot.slane %v5062_v1, 1  ;;  %v5055_v52 = vmul.f32 %v5033_v48, %v17551_v50 }
 0x60a   :  { %5324 = vmatpush.msra.mxu0 %v5279_v32  ;;  %v5115_v11 = vsel %vm291_vm0, %v5112_v44, %v5114_v24  ;;  %v5225_v33 = vsel %vm291_vm0, %v5222_v30, %v5224_v42  ;;  %v5054_v3 = vmul.f32 %v5032_v21, %v17518_v22  ;;  %v5031_v20 = vadd.f32 %v5009_v16, %v17673_v26 }
 0x60b   :  { %5372 = vmatpush.msra.mxu1 %v5285_v14  ;;  %v5167_v5 = vmax.f32 %v5056_v45, %v5115_v11  ;;  %v5127_v28 = vsel %vm291_vm0, %v5124_v63, %v5126_v62  ;;  %v5237_v43 = vsel %vm291_vm0, %v5234_v47, %v5236_v2  ;;  %v5110_v27 = vrot.slane %v5055_v52, 1 }
 0x60c   :  { %v5173_v12 = vmax.f32 %v5062_v1, %v5127_v28  ;;  %v5125_v50 = vsel %vm291_vm0, %v5122_v4, %v5124_v63  ;;  %v5108_v58 = vrot.slane %v5054_v3, 1  ;;  %v5053_v39 = vmul.f32 %v5031_v20, %v17516_v10 }
 0x60d   :  { %v5220_v42 = vrot.slane %v5167_v5, 1  ;;  %v5278_v24 = vmax.f32 %v5167_v5, %v5225_v33  ;;  %v5113_v22 = vsel %vm291_vm0, %v5110_v27, %v5112_v44  ;;  %v5172_v35 = vmax.f32 %v17706_v57, %v5125_v50 }
 0x60e   :  { %v5232_v60 = vrot.slane %v5173_v12, 1  ;;  %v5284_v34 = vmax.f32 %v5173_v12, %v5237_v43  ;;  %v5166_v62 = vmax.f32 %v5055_v52, %v5113_v22  ;;  %v5111_v2 = vsel %vm291_vm0, %v5108_v58, %v5110_v27  ;;  %v5288_v52 = vld [vmem:[#allocation17 + $0x8] sm:$0xff] }
 0x60f   :  { %5325 = vmatpush.msra.mxu0 %v5278_v24  ;;  %v5223_v41 = vsel %vm291_vm0, %v5220_v42, %v5222_v30  ;;  %v5230_v25 = vrot.slane %v5172_v35, 1  ;;  %v5165_v6 = vmax.f32 %v5054_v3, %v5111_v2  ;;  %v5106_v4 = vrot.slane %v5053_v39, 1  ;;  %v19226_v12 = vld [vmem:[#allocation34_spill] sm:$0xff]  ;;  %v19227_v24 = vld [vmem:[#allocation32_spill] sm:$0xff] }
 0x610   :  { %5373 = vmatpush.msra.mxu1 %v5284_v34  ;;  %v5218_v59 = vrot.slane %v5166_v62, 1  ;;  %v5277_v10 = vmax.f32 %v5166_v62, %v5223_v41  ;;  %v5235_v0 = vsel %vm291_vm0, %v5232_v60, %v5234_v47  ;;  %v5008_v36 = vmul.f32 %v17654_v38, %v17543_v56 }
 0x611   :  { %v5283_v57 = vmax.f32 %v5172_v35, %v5235_v0  ;;  %v5216_v46 = vrot.slane %v5165_v6, 1  ;;  %v5233_v7 = vsel %vm291_vm0, %v5230_v25, %v5232_v60  ;;  %v5109_v45 = vsel %vm291_vm0, %v5106_v4, %v5108_v58 }
 0x612   :  { %5326 = vmatpush.msra.mxu0 %v5277_v10  ;;  %v5221_v15 = vsel %vm291_vm0, %v5218_v59, %v5220_v42  ;;  %v5282_v1 = vmax.f32 %v17725_v40, %v5233_v7  ;;  %v5164_v48 = vmax.f32 %v5053_v39, %v5109_v45  ;;  %v5231_v21 = vsel %vm291_vm0, %v5228_v29, %v5230_v25 }
 0x613   :  { %5374 = vmatpush.msra.mxu1 %v5283_v57  ;;  %v5276_v30 = vmax.f32 %v5165_v6, %v5221_v15  ;;  %v5219_v56 = vsel %vm291_vm0, %v5216_v46, %v5218_v59  ;;  %v5281_v32 = vmax.f32 %v17722_v53, %v5231_v21  ;;  %v5030_v44 = vadd.f32 %v5008_v36, %v17673_v26 }
 0x614   :  { %v5214_v16 = vrot.slane %v5164_v48, 1  ;;  %v5275_v47 = vmax.f32 %v5164_v48, %v5219_v56  ;;  %v5007_v14 = vmul.f32 %v17654_v38, %v17402_v54  ;;  %v5006_v63 = vmul.f32 %v17654_v38, %v17524_v17 }
 0x615   :  { %5327 = vmatpush.msra.mxu0 %v5276_v30  ;;  %5375 = vmatpush.msra.mxu1 %v5282_v1  ;;  %v5052_v40 = vmul.f32 %v5030_v44, %v17510_v51  ;;  %v5005_v29 = vmul.f32 %v17654_v38, %v17394_v13  ;;  %v5004_v53 = vmul.f32 %v17654_v38, %v17506_v61  ;;  %v19225_v13 = vld [vmem:[#allocation38_spill] sm:$0xff] }
 0x616   :  { %v5029_v11 = vadd.f32 %v5007_v14, %v17673_v26  ;;  %v5028_v33 = vadd.f32 %v5006_v63, %v17673_v26  ;;  %v5003_v54 = vmul.f32 %v17654_v38, %v17386_v9  ;;  %v5002_v20 = vmul.f32 %v17654_v38, %v19225_v13 }
 0x617   :  { %5328 = vmatpush.msra.mxu0 %v5275_v47  ;;  %5376 = vmatpush.msra.mxu1 %v5281_v32  ;;  %v5104_v17 = vrot.slane %v5052_v40, 1  ;;  %v5027_v51 = vadd.f32 %v5005_v29, %v17673_v26  ;;  %v5026_v3 = vadd.f32 %v5004_v53, %v17673_v26  ;;  %v5217_v61 = vsel %vm291_vm0, %v5214_v16, %v5216_v46 }
 0x618   :  { %v5051_v5 = vmul.f32 %v5029_v11, %v17481_v18  ;;  %v5050_v28 = vmul.f32 %v5028_v33, %v17479_v49  ;;  %v5025_v43 = vadd.f32 %v5003_v54, %v17673_v26  ;;  %11742 = vmatmul.msk.f32.vlgmr.msra.gmra.mxu1 %vm5301_vm14, %v5288_v52  ;;  %v5024_v58 = vadd.f32 %v5002_v20, %v17673_v26  ;;  %v19228_v49 = vld [vmem:[#allocation35_spill] sm:$0xff]  ;;  %v5292_v11 = vld [vmem:[#allocation17 + $0x28] sm:$0xff] }
 0x619   :  { %v5107_v9 = vsel %vm291_vm0, %v5104_v17, %v5106_v4  ;;  %v5049_v27 = vmul.f32 %v5027_v51, %v17471_v37  ;;  %v5048_v50 = vmul.f32 %v5026_v3, %v19226_v12  ;;  %v5290_v4 = vld [vmem:[#allocation17 + $0x18] sm:$0xff] }
 0x61a   :  { %v5163_v39 = vmax.f32 %v5052_v40, %v5107_v9  ;;  %v5102_v38 = vrot.slane %v5051_v5, 1  ;;  %v5100_v42 = vrot.slane %v5050_v28, 1  ;;  %v5047_v22 = vmul.f32 %v5025_v43, %v19227_v24  ;;  %v5287_v43 = vld [vmem:[#allocation17] sm:$0xff]  ;;  %v5296_v9 = vld [vmem:[#allocation17 + $0x48] sm:$0xff]  ;;  %v5298_v12 = vld [vmem:[#allocation17 + $0x58] sm:$0xff] }
 0x61b   :  { %v5098_v18 = vrot.slane %v5049_v27, 1  ;;  %v5096_v35 = vrot.slane %v5048_v50, 1  ;;  %v5046_v60 = vmul.f32 %v5024_v58, %v19228_v49  ;;  %v5300_v58 = vld [vmem:[#allocation17 + $0x68] sm:$0xff]  ;;  %v5297_v24 = vld [vmem:[#allocation17 + $0x50] sm:$0xff]  ;;  %v13600_v49 = vld [vmem:[#allocation9 + $0xb8] sm:$0xff] }
 0x61c   :  { %v5212_v34 = vrot.slane %v5163_v39, 1  ;;  %v5274_v62 = vmax.f32 %v5163_v39, %v5217_v61  ;;  %v5105_v2 = vsel %vm291_vm0, %v5102_v38, %v5104_v17  ;;  %v5103_v41 = vsel %vm291_vm0, %v5100_v42, %v5102_v38  ;;  %v5294_v61 = vld [vmem:[#allocation17 + $0x38] sm:$0xff]  ;;  %v13591_v39 = vld [vmem:[#allocation9 + $0x70] sm:$0xff] }
 0x61d   :  { %v5162_v37 = vmax.f32 %v5051_v5, %v5105_v2  ;;  %v5161_v25 = vmax.f32 %v5050_v28, %v5103_v41  ;;  %v5101_v6 = vsel %vm291_vm0, %v5098_v18, %v5100_v42  ;;  %v5099_v26 = vsel %vm291_vm0, %v5096_v35, %v5098_v18  ;;  %v5293_v38 = vld [vmem:[#allocation17 + $0x30] sm:$0xff]  ;;  %v5295_v42 = vld [vmem:[#allocation17 + $0x40] sm:$0xff]  ;;  %v13582_v18 = vld [vmem:[#allocation9 + $0x28] sm:$0xff] }
 0x61e   :  { %5329 = vmatpush.msra.mxu0 %v5274_v62  ;;  %v5215_v59 = vsel %vm291_vm0, %v5212_v34, %v5214_v16  ;;  %v5160_v10 = vmax.f32 %v5049_v27, %v5101_v6  ;;  %v5159_v0 = vmax.f32 %v5048_v50, %v5099_v26  ;;  %v5094_v36 = vrot.slane %v5047_v22, 1  ;;  %v5289_v27 = vld [vmem:[#allocation17 + $0x10] sm:$0xff]  ;;  %v5291_v50 = vld [vmem:[#allocation17 + $0x20] sm:$0xff]  ;;  %v13598_v6 = vld [vmem:[#allocation9 + $0xa8] sm:$0xff] }
 0x61f   :  { %v5210_v57 = vrot.slane %v5162_v37, 1  ;;  %v5273_v46 = vmax.f32 %v5162_v37, %v5215_v59  ;;  %v5208_v7 = vrot.slane %v5161_v25, 1  ;;  %v5092_v45 = vrot.slane %v5046_v60, 1  ;;  %v13589_v62 = vld [vmem:[#allocation9 + $0x60] sm:$0xff]  ;;  %v13599_v2 = vld [vmem:[#allocation9 + $0xb0] sm:$0xff]  ;;  %v13580_v37 = vld [vmem:[#allocation9 + $0x18] sm:$0xff] }
 0x620   :  { %v5206_v15 = vrot.slane %v5160_v10, 1  ;;  %v5204_v1 = vrot.slane %v5159_v0, 1  ;;  %v5097_v48 = vsel %vm291_vm0, %v5094_v36, %v5096_v35  ;;  %11743 = vmatmul.msk.f32.gmra.mxu1 %vm5301_vm14, %v5290_v4  ;;  %v13590_v35 = vld [vmem:[#allocation9 + $0x68] sm:$0xff]  ;;  %v13607_v41 = vld [vmem:[#allocation9 + $0xf0] sm:$0xff] }
 0x621   :  { %5330 = vmatpush.msra.mxu0 %v5273_v46  ;;  %v5213_v21 = vsel %vm291_vm0, %v5210_v57, %v5212_v34  ;;  %v5211_v30 = vsel %vm291_vm0, %v5208_v7, %v5210_v57  ;;  %v5158_v56 = vmax.f32 %v5047_v22, %v5097_v48  ;;  %v5095_v32 = vsel %vm291_vm0, %v5092_v45, %v5094_v36  ;;  %v5299_v22 = vld [vmem:[#allocation17 + $0x60] sm:$0xff]  ;;  %v13606_v26 = vld [vmem:[#allocation9 + $0xe8] sm:$0xff]  ;;  %v13579_v4 = vld [vmem:[#allocation9 + $0x10] sm:$0xff] }
 0x622   :  { %v5272_v44 = vmax.f32 %v5161_v25, %v5213_v21  ;;  %v5209_v16 = vsel %vm291_vm0, %v5206_v15, %v5208_v7  ;;  %v5157_v14 = vmax.f32 %v5046_v60, %v5095_v32  ;;  %v5271_v63 = vmax.f32 %v5160_v10, %v5211_v30  ;;  %v13608_v60 = vld [vmem:[#allocation9 + $0xf8] sm:$0xff]  ;;  %v13581_v34 = vld [vmem:[#allocation9 + $0x20] sm:$0xff]  ;;  %v13587_v59 = vld [vmem:[#allocation9 + $0x50] sm:$0xff] }
 0x623   :  { %v5202_v47 = vrot.slane %v5158_v56, 1  ;;  %v5093_v40 = vsel %vm291_vm0, %v5090_v19, %v5092_v45  ;;  %v5207_v29 = vsel %vm291_vm0, %v5204_v1, %v5206_v15  ;;  %v5270_v33 = vmax.f32 %v5159_v0, %v5209_v16  ;;  %5886 = vmatpush.bf16.msrb.mxu1 %v13608_v60  ;;  %v13588_v25 = vld [vmem:[#allocation9 + $0x58] sm:$0xff]  ;;  %v13597_v10 = vld [vmem:[#allocation9 + $0xa0] sm:$0xff]  ;;  %v13578_v57 = vld [vmem:[#allocation9 + $0x8] sm:$0xff] }
 0x624   :  { %5331 = vmatpush.msra.mxu0 %v5272_v44  ;;  %v5200_v53 = vrot.slane %v5157_v14, 1  ;;  %v5156_v52 = vmax.f32 %v17711_v55, %v5093_v40  ;;  %v5269_v51 = vmax.f32 %v5158_v56, %v5207_v29  ;;  %v13605_v0 = vld [vmem:[#allocation9 + $0xe0] sm:$0xff]  ;;  %v13586_v46 = vld [vmem:[#allocation9 + $0x48] sm:$0xff]  ;;  %v13596_v7 = vld [vmem:[#allocation9 + $0x98] sm:$0xff] }
 0x625   :  { %v5205_v54 = vsel %vm291_vm0, %v5202_v47, %v5204_v1  ;;  %v13604_v45 = vld [vmem:[#allocation9 + $0xd8] sm:$0xff]  ;;  %v13577_v15 = vld [vmem:[#allocation9] sm:$0xff]  ;;  %v13595_v48 = vld [vmem:[#allocation9 + $0x90] sm:$0xff] }
 0x626   :  { %5332 = vmatpush.msra.mxu0 %v5271_v63  ;;  %v5198_v17 = vrot.slane %v5156_v52, 1  ;;  %v5203_v3 = vsel %vm291_vm0, %v5200_v53, %v5202_v47  ;;  %v5268_v13 = vmax.f32 %v5157_v14, %v5205_v54  ;;  %v13585_v1 = vld [vmem:[#allocation9 + $0x40] sm:$0xff]  ;;  %v13603_v21 = vld [vmem:[#allocation9 + $0xd0] sm:$0xff]  ;;  %v13594_v30 = vld [vmem:[#allocation9 + $0x88] sm:$0xff] }
 0x627   :  { %v5267_v20 = vmax.f32 %v5156_v52, %v5203_v3  ;;  %5887 = vmatpush.bf16.msrb.mxu1 %v13607_v41  ;;  %v13602_v56 = vld [vmem:[#allocation9 + $0xc8] sm:$0xff]  ;;  %v13593_v44 = vld [vmem:[#allocation9 + $0x80] sm:$0xff] }
 0x628   :  { %5333 = vmatpush.msra.mxu0 %v5270_v33  ;;  %11744 = vmatmul.msk.f32.gmra.mxu1 %vm5301_vm14, %v5292_v11  ;;  %v5201_v19 = vsel %vm291_vm0, %v5198_v17, %v5200_v53  ;;  %v5199_v55 = vsel %vm291_vm0, %v5197_v31, %v5198_v17  ;;  %v13584_v31 = vld [vmem:[#allocation9 + $0x38] sm:$0xff]  ;;  %v13601_v16 = vld [vmem:[#allocation9 + $0xc0] sm:$0xff] }
 0x629   :  { %v5266_v5 = vmax.f32 %v17734_v8, %v5201_v19  ;;  %v5265_v28 = vmax.f32 %v17731_v23, %v5199_v55  ;;  %v13592_v8 = vld [vmem:[#allocation9 + $0x78] sm:$0xff]  ;;  %5802 = vmatpush.bf16.msra.mxu2 %v13584_v31  ;;  %v13583_v23 = vld [vmem:[#allocation9 + $0x30] sm:$0xff] }
 0x62a   :  { %5334 = vmatpush.msra.mxu0 %v5269_v51  ;;  %5830 = vmatpush.bf16.msra.mxu3 %v13592_v8 }
 0x62b   :  { %5888 = vmatpush.bf16.msrb.mxu1 %v13606_v26 }
 0x62c   :  { %5335 = vmatpush.msra.mxu0 %v5268_v13 }
 0x62d   :  { %5803 = vmatpush.bf16.msra.mxu2 %v13583_v23 }
 0x62e   :  { %5336 = vmatpush.msra.mxu0 %v5267_v20  ;;  %5831 = vmatpush.bf16.msra.mxu3 %v13591_v39 }
 0x62f   :  { %5889 = vmatpush.bf16.msrb.mxu1 %v13605_v0 }
 0x630   :  { %5337 = vmatpush.msra.mxu0 %v5266_v5  ;;  %11745 = vmatmul.msk.f32.gmra.mxu1 %vm5301_vm14, %v5294_v61 }
 0x631   :  { %5804 = vmatpush.bf16.msra.mxu2 %v13582_v18 }
 0x632   :  { %5338 = vmatpush.msra.mxu0 %v5265_v28  ;;  %5832 = vmatpush.bf16.msra.mxu3 %v13590_v35 }
 0x633   :  { %5339 = vmatmul.f32.vlgmr.msra.gmra.mxu0 %v5287_v43  ;;  %5890 = vmatpush.bf16.msrb.mxu1 %v13604_v45 }
 0x634   :  { %5858 = vmatpush.bf16.msrb.mxu0 %v13600_v49 }
 0x635   :  { %5805 = vmatpush.bf16.msra.mxu2 %v13581_v34 }
 0x636   :  { %5833 = vmatpush.bf16.msra.mxu3 %v13589_v62 }
 0x637   :  { %5891 = vmatpush.bf16.msrb.mxu1 %v13603_v21 }
 0x638   :  { %11746 = vmatmul.msk.f32.gmra.mxu1 %vm5301_vm14, %v5296_v9  ;;  %5859 = vmatpush.bf16.msrb.mxu0 %v13599_v2 }
 0x639   :  { %5806 = vmatpush.bf16.msra.mxu2 %v13580_v37 }
 0x63a   :  { %5834 = vmatpush.bf16.msra.mxu3 %v13588_v25 }
 0x63b   :  { %5342 = vmatmul.f32.gmra.mxu0 %v5289_v27  ;;  %5892 = vmatpush.bf16.msrb.mxu1 %v13602_v56 }
 0x63c   :  { %5860 = vmatpush.bf16.msrb.mxu0 %v13598_v6 }
 0x63d   :  { %5807 = vmatpush.bf16.msra.mxu2 %v13579_v4 }
 0x63e   :  { %5835 = vmatpush.bf16.msra.mxu3 %v13587_v59 }
 0x63f   :  { %5893 = vmatpush.bf16.msrb.mxu1 %v13601_v16 }
 0x640   :  { %11747 = vmatmul.msk.f32.gmra.mxu1 %vm5301_vm14, %v5298_v12  ;;  %5861 = vmatpush.bf16.msrb.mxu0 %v13597_v10 }
 0x641   :  { %5808 = vmatpush.bf16.msra.mxu2 %v13578_v57 }
 0x642   :  { %5836 = vmatpush.bf16.msra.mxu3 %v13586_v46 }
 0x643   :  { %5345 = vmatmul.f32.gmra.mxu0 %v5291_v50 }
 0x644   :  { %5862 = vmatpush.bf16.msrb.mxu0 %v13596_v7 }
 0x645   :  { %5809 = vmatpush.bf16.msra.mxu2 %v13577_v15 }
 0x646   :  { %5837 = vmatpush.bf16.msra.mxu3 %v13585_v1 }
 0x648   :  { %11748 = vmatmul.msk.f32.gmra.mxu1 %vm5301_vm14, %v5300_v58  ;;  %5863 = vmatpush.bf16.msrb.mxu0 %v13595_v48 }
 0x64b   :  { %5348 = vmatmul.f32.gmra.mxu0 %v5293_v38 }
 0x64c   :  { %5864 = vmatpush.bf16.msrb.mxu0 %v13594_v30 }
 0x650   :  { %5865 = vmatpush.bf16.msrb.mxu0 %v13593_v44 }
 0x653   :  { %5351 = vmatmul.f32.gmra.mxu0 %v5295_v42 }
 0x65b   :  { %5354 = vmatmul.f32.gmra.mxu0 %v5297_v24 }
 0x663   :  { %5357 = vmatmul.f32.gmra.mxu0 %v5299_v22 }
 0x695   :  { %v5378_v36 = vpop.f32.mrf.mxu1 }
 0x69d   :  { %v5381_v32 = vpop.f32.mrf.mxu1 }
 0x6a5   :  { %v5384_v14 = vpop.f32.mrf.mxu1 }
 0x6ad   :  { %v5387_v54 = vpop.f32.mrf.mxu1 }
 0x6b0   :  { %v5340_v47 = vpop.f32.mrf.mxu0 }
 0x6b1   :  { %v17846_v40 = vadd.f32 %v5378_v36, %v5340_v47 }
 0x6b3   :  { %v5413_v3 = vrot.slane %v17846_v40, 1  ;;  %v5443_v13 = vrot.slane %v17846_v40, 5  ;;  %v5473_v19 = vrot.slane %v17846_v40, 6 }
 0x6b5   :  { %v5390_v39 = vpop.f32.mrf.mxu1 }
 0x6b8   :  { %v5343_v63 = vpop.f32.mrf.mxu0 }
 0x6b9   :  { %v5382_v29 = vadd.f32 %v5381_v32, %v5343_v63 }
 0x6bb   :  { %v5530_v53 = vpack.c.bf16 %v5382_v29, %v17846_v40  ;;  %v5414_v52 = vrot.slane %v5382_v29, 1  ;;  %v5444_v11 = vrot.slane %v5382_v29, 5  ;;  %v5474_v17 = vrot.slane %v5382_v29, 6 }
 0x6bd   :  { %5810 = vmatmul.bf16.vlgmr.msra.gmra.mxu2 %v5530_v53  ;;  %v5415_v5 = vsel %vm291_vm0, %v5413_v3, %v5414_v52  ;;  %v5445_v28 = vsel %vm5442_vm15, %v5443_v13, %v5444_v11  ;;  %v5475_v27 = vsel %vm5472_vm1, %v5473_v19, %v5474_v17  ;;  %v5393_v62 = vpop.f32.mrf.mxu1 }
 0x6c0   :  { %v5346_v33 = vpop.f32.mrf.mxu0 }
 0x6c1   :  { %v5385_v51 = vadd.f32 %v5384_v14, %v5346_v33 }
 0x6c3   :  { %v5416_v20 = vrot.slane %v5385_v51, 1  ;;  %v5446_v55 = vrot.slane %v5385_v51, 5  ;;  %v5476_v61 = vrot.slane %v5385_v51, 6 }
 0x6c5   :  { %v5417_v43 = vsel %vm291_vm0, %v5414_v52, %v5416_v20  ;;  %v5447_v9 = vsel %vm5442_vm15, %v5444_v11, %v5446_v55  ;;  %v5477_v12 = vsel %vm5472_vm1, %v5474_v17, %v5476_v61  ;;  %v5396_v46 = vpop.f32.mrf.mxu1 }
 0x6c6   :  { %v5531_v50 = vpack.c.bf16 %v5417_v43, %v5415_v5  ;;  %v5532_v31 = vpack.c.bf16 %v5447_v9, %v5445_v28  ;;  %v5533_v8 = vpack.c.bf16 %v5477_v12, %v5475_v27 }
 0x6c8   :  { %v5349_v58 = vpop.f32.mrf.mxu0  ;;  %5838 = vmatmul.bf16.vlgmr.msra.gmra.mxu3 %v5531_v50  ;;  %5866 = vmatmul.bf16.vlgmr.msrb.gmra.mxu0 %v5532_v31 }
 0x6c9   :  { %v5388_v23 = vadd.f32 %v5387_v54, %v5349_v58  ;;  %5894 = vmatmul.bf16.vlgmr.msrb.gmra.mxu1 %v5533_v8 }
 0x6cb   :  { %v5534_v38 = vpack.c.bf16 %v5388_v23, %v5385_v51  ;;  %v5418_v42 = vrot.slane %v5388_v23, 1  ;;  %v5448_v24 = vrot.slane %v5388_v23, 5  ;;  %v5478_v18 = vrot.slane %v5388_v23, 6 }
 0x6cd   :  { %5815 = vmatmul.bf16.gmra.mxu2 %v5534_v38  ;;  %v5419_v2 = vsel %vm291_vm0, %v5416_v20, %v5418_v42  ;;  %v5449_v41 = vsel %vm5442_vm15, %v5446_v55, %v5448_v24  ;;  %v5479_v6 = vsel %vm5472_vm1, %v5476_v61, %v5478_v18 }
 0x6d0   :  { %v5352_v22 = vpop.f32.mrf.mxu0 }
 0x6d1   :  { %v5391_v35 = vadd.f32 %v5390_v39, %v5352_v22 }
 0x6d3   :  { %v5420_v49 = vrot.slane %v5391_v35, 1  ;;  %v5450_v60 = vrot.slane %v5391_v35, 5  ;;  %v5480_v34 = vrot.slane %v5391_v35, 6 }
 0x6d5   :  { %v5421_v37 = vsel %vm291_vm0, %v5418_v42, %v5420_v49  ;;  %v5451_v25 = vsel %vm5442_vm15, %v5448_v24, %v5450_v60  ;;  %v5481_v26 = vsel %vm5472_vm1, %v5478_v18, %v5480_v34 }
 0x6d6   :  { %v5535_v4 = vpack.c.bf16 %v5421_v37, %v5419_v2  ;;  %v5536_v59 = vpack.c.bf16 %v5451_v25, %v5449_v41  ;;  %v5537_v10 = vpack.c.bf16 %v5481_v26, %v5479_v6  ;;  %v17887_v26 = vpop.permute.xlu2 %5928 }
 0x6d8   :  { %v5355_v0 = vpop.f32.mrf.mxu0  ;;  %5843 = vmatmul.bf16.gmra.mxu3 %v5535_v4  ;;  %5871 = vmatmul.bf16.gmra.mxu0 %v5536_v59 }
 0x6d9   :  { %v5394_v36 = vadd.f32 %v5393_v62, %v5355_v0  ;;  %5899 = vmatmul.bf16.gmra.mxu1 %v5537_v10  ;;  %v17885_v62 = vpop.permute.xlu1 %5923  ;;  %v17891_v0 = vpop.permute.xlu0 %5933 }
 0x6db   :  { %v5538_v57 = vpack.c.bf16 %v5394_v36, %v5391_v35  ;;  %v5422_v7 = vrot.slane %v5394_v36, 1  ;;  %v5452_v45 = vrot.slane %v5394_v36, 5  ;;  %v5482_v1 = vrot.slane %v5394_v36, 6 }
 0x6dd   :  { %5820 = vmatmul.bf16.gmra.mxu2 %v5538_v57  ;;  %v5423_v32 = vsel %vm291_vm0, %v5420_v49, %v5422_v7  ;;  %v5453_v44 = vsel %vm5442_vm15, %v5450_v60, %v5452_v45  ;;  %v5483_v14 = vsel %vm5472_vm1, %v5480_v34, %v5482_v1 }
 0x6e0   :  { %v5358_v15 = vpop.f32.mrf.mxu0 }
 0x6e1   :  { %v5397_v48 = vadd.f32 %v5396_v46, %v5358_v15 }
 0x6e3   :  { %v5424_v21 = vrot.slane %v5397_v48, 1  ;;  %v5454_v30 = vrot.slane %v5397_v48, 5  ;;  %v5484_v56 = vrot.slane %v5397_v48, 6  ;;  %v5542_v11 = vpack.c.bf16 %v5397_v48, %v5397_v48 }
 0x6e5   :  { %v5425_v16 = vsel %vm291_vm0, %v5422_v7, %v5424_v21  ;;  %v5455_v47 = vsel %vm5442_vm15, %v5452_v45, %v5454_v30  ;;  %v5485_v63 = vsel %vm5472_vm1, %v5482_v1, %v5484_v56  ;;  %v5434_v33 = vsel %vm291_vm0, %v5424_v21, %v5413_v3 }
 0x6e6   :  { %v5539_v29 = vpack.c.bf16 %v5425_v16, %v5423_v32  ;;  %v5540_v53 = vpack.c.bf16 %v5455_v47, %v5453_v44  ;;  %v5541_v52 = vpack.c.bf16 %v5485_v63, %v5483_v14  ;;  %v5464_v54 = vsel %vm5442_vm15, %v5454_v30, %v5443_v13  ;;  %v17907_v16 = vpop.permute.xlu1 %5938 }
 0x6e7   :  { %v5494_v17 = vsel %vm5472_vm1, %v5484_v56, %v5473_v19  ;;  %v5543_v51 = vpack.c.bf16 %v5434_v33, %v5434_v33  ;;  %v5544_v20 = vpack.c.bf16 %v5464_v54, %v5464_v54 }
 0x6e8   :  { %5848 = vmatmul.bf16.gmra.mxu3 %v5539_v29  ;;  %5876 = vmatmul.bf16.gmra.mxu0 %v5540_v53  ;;  %v5545_v55 = vpack.c.bf16 %v5494_v17, %v5494_v17  ;;  %v17914_v53 = vpop.permute.xlu2 %5943  ;;  %v17920_v17 = vpop.permute.xlu0 %5948 }
 0x6e9   :  { %5904 = vmatmul.bf16.gmra.mxu1 %v5541_v52 }
 0x6ed   :  { %5825 = vmatmul.bf16.gmra.mxu2 %v5542_v11 }
 0x6f8   :  { %5853 = vmatmul.bf16.gmra.mxu3 %v5543_v51  ;;  %5881 = vmatmul.bf16.gmra.mxu0 %v5544_v20 }
 0x6f9   :  { %5909 = vmatmul.bf16.gmra.mxu1 %v5545_v55 }
 0x740   :  { %v5811_v61 = vpop.f32.mrf.mxu2 }
 0x745   :  { %v5867_v5 = vpop.f32.mrf.mxu0 }
 0x746   :  { %v5895_v28 = vpop.f32.mrf.mxu1 }
 0x748   :  { %v5813_v43 = vpop.f32.mrf.mxu2 }
 0x74b   :  { %v5839_v9 = vpop.f32.mrf.mxu3 }
 0x74c   :  { %v5840_v18 = vadd.f32 %v5839_v9, %v5811_v61 }
 0x74d   :  { %v5869_v3 = vpop.f32.mrf.mxu0 }
 0x74e   :  { %v5897_v27 = vpop.f32.mrf.mxu1  ;;  %v5868_v2 = vadd.f32 %v5867_v5, %v5840_v18 }
 0x750   :  { %v5816_v12 = vpop.f32.mrf.mxu2  ;;  %v17893_v36 = vadd.f32 %v5895_v28, %v5868_v2 }
 0x752   :  { %v5956_v48 = vmul.f32 %v17885_v62, %v17893_v36 }
 0x753   :  { %v5841_v50 = vpop.f32.mrf.mxu3 }
 0x754   :  { %v5842_v24 = vadd.f32 %v5841_v50, %v5813_v43  ;;  %v5976_v52 = vmul.f32 %v5956_v48, %v17893_v36 }
 0x755   :  { %v5872_v13 = vpop.f32.mrf.mxu0 }
 0x756   :  { %v5900_v31 = vpop.f32.mrf.mxu1  ;;  %v5870_v49 = vadd.f32 %v5869_v3, %v5842_v24 }
 0x758   :  { %v5818_v40 = vpop.f32.mrf.mxu2  ;;  %v17889_v4 = vadd.f32 %v5897_v27, %v5870_v49 }
 0x75a   :  { %v5957_v7 = vmul.f32 %v17887_v26, %v17889_v4 }
 0x75b   :  { %v5844_v8 = vpop.f32.mrf.mxu3 }
 0x75c   :  { %v5845_v35 = vadd.f32 %v5844_v8, %v5816_v12  ;;  %v5977_v47 = vmul.f32 %v5957_v7, %v17889_v4  ;;  %v5963_v11 = vadd.f32 %v5957_v7, %v5956_v48 }
 0x75d   :  { %v5874_v19 = vpop.f32.mrf.mxu0 }
 0x75e   :  { %v5902_v58 = vpop.f32.mrf.mxu1  ;;  %v5873_v37 = vadd.f32 %v5872_v13, %v5845_v35  ;;  %v5983_v51 = vadd.f32 %v5977_v47, %v5976_v52  ;;  %v13639_v52 = vld [vmem:[#allocation11 + $0xf0] sm:$0xff] }
 0x760   :  { %v5821_v23 = vpop.f32.mrf.mxu2  ;;  %v17895_v57 = vadd.f32 %v5900_v31, %v5873_v37 }
 0x762   :  { %v5958_v30 = vmul.f32 %v17891_v0, %v17895_v57 }
 0x763   :  { %v5846_v39 = vpop.f32.mrf.mxu3 }
 0x764   :  { %v5847_v34 = vadd.f32 %v5846_v39, %v5818_v40  ;;  %v5978_v33 = vmul.f32 %v5958_v30, %v17895_v57  ;;  %v5964_v55 = vadd.f32 %v5963_v11, %v5958_v30  ;;  %v13632_v30 = vld [vmem:[#allocation11 + $0xb8] sm:$0xff]  ;;  %v13614_v11 = vld [vmem:[#allocation11 + $0x28] sm:$0xff] }
 0x765   :  { %v5877_v38 = vpop.f32.mrf.mxu0  ;;  %6492 = vmatpush.bf16.msra.mxu0 %v13632_v30 }
 0x766   :  { %v5905_v42 = vpop.f32.mrf.mxu1  ;;  %v5875_v59 = vadd.f32 %v5874_v19, %v5847_v34  ;;  %v5984_v9 = vadd.f32 %v5983_v51, %v5978_v33  ;;  %v17929_v19 = vpop.permute.xlu1 %5953  ;;  %v13630_v51 = vld [vmem:[#allocation11 + $0xa8] sm:$0xff] }
 0x768   :  { %v5823_v22 = vpop.f32.mrf.mxu2  ;;  %v17899_v15 = vadd.f32 %v5902_v58, %v5875_v59 }
 0x76a   :  { %v5959_v14 = vmul.f32 %v17907_v16, %v17899_v15 }
 0x76b   :  { %v5849_v60 = vpop.f32.mrf.mxu3 }
 0x76c   :  { %v5850_v25 = vadd.f32 %v5849_v60, %v5821_v23  ;;  %v5979_v61 = vmul.f32 %v5959_v14, %v17899_v15  ;;  %v5965_v3 = vadd.f32 %v5964_v55, %v5959_v14  ;;  %v13623_v14 = vld [vmem:[#allocation11 + $0x70] sm:$0xff]  ;;  %v13613_v55 = vld [vmem:[#allocation11 + $0x20] sm:$0xff] }
 0x76d   :  { %v5879_v41 = vpop.f32.mrf.mxu0 }
 0x76e   :  { %v5907_v6 = vpop.f32.mrf.mxu1  ;;  %v5878_v46 = vadd.f32 %v5877_v38, %v5850_v25  ;;  %v5985_v13 = vadd.f32 %v5984_v9, %v5979_v61  ;;  %v13621_v61 = vld [vmem:[#allocation11 + $0x60] sm:$0xff] }
 0x770   :  { %v5826_v10 = vpop.f32.mrf.mxu2  ;;  %v17905_v56 = vadd.f32 %v5905_v42, %v5878_v46  ;;  %v13616_v46 = vld [vmem:[#allocation11 + $0x38] sm:$0xff] }
 0x771   :  { %6436 = vmatpush.bf16.msrb.mxu2 %v13616_v46 }
 0x772   :  { %v5960_v54 = vmul.f32 %v17914_v53, %v17905_v56 }
 0x773   :  { %v5851_v45 = vpop.f32.mrf.mxu3 }
 0x774   :  { %v5852_v1 = vadd.f32 %v5851_v45, %v5823_v22  ;;  %v5980_v27 = vmul.f32 %v5960_v54, %v17905_v56  ;;  %v5966_v31 = vadd.f32 %v5965_v3, %v5960_v54  ;;  %v13622_v54 = vld [vmem:[#allocation11 + $0x68] sm:$0xff] }
 0x775   :  { %v5882_v21 = vpop.f32.mrf.mxu0 }
 0x776   :  { %v5880_v32 = vadd.f32 %v5879_v41, %v5852_v1  ;;  %v5910_v44 = vpop.f32.mrf.mxu1  ;;  %v5986_v58 = vadd.f32 %v5985_v13, %v5980_v27  ;;  %v13620_v27 = vld [vmem:[#allocation11 + $0x58] sm:$0xff] }
 0x777   :  { %v13636_v13 = vld [vmem:[#allocation11 + $0xd8] sm:$0xff] }
 0x778   :  { %v17912_v63 = vadd.f32 %v5907_v6, %v5880_v32  ;;  %v5828_v29 = vpop.f32.mrf.mxu2  ;;  %v13640_v32 = vld [vmem:[#allocation11 + $0xf8] sm:$0xff] }
 0x779   :  { %v13631_v29 = vld [vmem:[#allocation11 + $0xb0] sm:$0xff]  ;;  %6520 = vmatpush.bf16.msra.mxu1 %v13640_v32 }
 0x77a   :  { %v5961_v5 = vmul.f32 %v17920_v17, %v17912_v63  ;;  %6493 = vmatpush.bf16.msra.mxu0 %v13631_v29 }
 0x77b   :  { %v5854_v20 = vpop.f32.mrf.mxu3 }
 0x77c   :  { %v5855_v28 = vadd.f32 %v5854_v20, %v5826_v10  ;;  %v5981_v40 = vmul.f32 %v5961_v5, %v17912_v63  ;;  %v5967_v23 = vadd.f32 %v5966_v31, %v5961_v5  ;;  %v13638_v20 = vld [vmem:[#allocation11 + $0xe8] sm:$0xff]  ;;  %v13629_v5 = vld [vmem:[#allocation11 + $0xa0] sm:$0xff]  ;;  %v13611_v31 = vld [vmem:[#allocation11 + $0x10] sm:$0xff] }
 0x77d   :  { %v5884_v43 = vpop.f32.mrf.mxu0  ;;  %6521 = vmatpush.bf16.msra.mxu1 %v13639_v52 }
 0x77e   :  { %v5883_v12 = vadd.f32 %v5882_v21, %v5855_v28  ;;  %v5912_v50 = vpop.f32.mrf.mxu1  ;;  %v5987_v42 = vadd.f32 %v5986_v58, %v5981_v40  ;;  %v13624_v21 = vld [vmem:[#allocation11 + $0x78] sm:$0xff]  ;;  %6494 = vmatpush.bf16.msra.mxu0 %v13630_v51  ;;  %v13637_v28 = vld [vmem:[#allocation11 + $0xe0] sm:$0xff]  ;;  %v13619_v58 = vld [vmem:[#allocation11 + $0x50] sm:$0xff] }
 0x77f   :  { %6464 = vmatpush.bf16.msrb.mxu3 %v13624_v21  ;;  %v13612_v43 = vld [vmem:[#allocation11 + $0x18] sm:$0xff] }
 0x780   :  { %v17927_v8 = vadd.f32 %v5910_v44, %v5883_v12  ;;  %v13615_v44 = vld [vmem:[#allocation11 + $0x30] sm:$0xff]  ;;  %v13628_v12 = vld [vmem:[#allocation11 + $0x98] sm:$0xff] }
 0x781   :  { %6437 = vmatpush.bf16.msrb.mxu2 %v13615_v44  ;;  %6522 = vmatpush.bf16.msra.mxu1 %v13638_v20 }
 0x782   :  { %v5962_v39 = vmul.f32 %v17929_v19, %v17927_v8  ;;  %6495 = vmatpush.bf16.msra.mxu0 %v13629_v5 }
 0x783   :  { %v5856_v38 = vpop.f32.mrf.mxu3  ;;  %6465 = vmatpush.bf16.msrb.mxu3 %v13623_v14 }
 0x784   :  { %v5968_v24 = vadd.f32 %v5967_v23, %v5962_v39  ;;  %v5982_v22 = vmul.f32 %v5962_v39, %v17927_v8  ;;  %v13627_v23 = vld [vmem:[#allocation11 + $0x90] sm:$0xff] }
 0x785   :  { %6438 = vmatpush.bf16.msrb.mxu2 %v13614_v11  ;;  %6523 = vmatpush.bf16.msra.mxu1 %v13637_v28  ;;  %v13635_v38 = vld [vmem:[#allocation11 + $0xd0] sm:$0xff] }
 0x786   :  { %v5969_v18 = vrot.slane %v5968_v24, 4  ;;  %v5988_v35 = vadd.f32 %v5987_v42, %v5982_v22  ;;  %6496 = vmatpush.bf16.msra.mxu0 %v13628_v12  ;;  %v13610_v42 = vld [vmem:[#allocation11 + $0x8] sm:$0xff] }
 0x787   :  { %6466 = vmatpush.bf16.msrb.mxu3 %v13622_v54 }
 0x788   :  { %v5970_v49 = vadd.f32 %v5969_v18, %v5968_v24  ;;  %v5989_v60 = vrot.slane %v5988_v35, 4  ;;  %v5998_v24 = vld [vmem:[#allocation14 + $0x4] ss:$0 sm:$0xff]  ;;  %v13618_v18 = vld [vmem:[#allocation11 + $0x48] sm:$0xff] }
 0x789   :  { %6439 = vmatpush.bf16.msrb.mxu2 %v13613_v55  ;;  %6524 = vmatpush.bf16.msra.mxu1 %v13636_v13 }
 0x78a   :  { %v5971_v34 = vrot.slane %v5970_v49, 2  ;;  %v5990_v2 = vadd.f32 %v5989_v60, %v5988_v35  ;;  %6497 = vmatpush.bf16.msra.mxu0 %v13627_v23  ;;  %v13626_v35 = vld [vmem:[#allocation11 + $0x88] sm:$0xff] }
 0x78b   :  { %6467 = vmatpush.bf16.msrb.mxu3 %v13621_v61  ;;  %v13634_v60 = vld [vmem:[#allocation11 + $0xc8] sm:$0xff] }
 0x78c   :  { %v5972_v41 = vadd.f32 %v5971_v34, %v5970_v49  ;;  %v5991_v37 = vrot.slane %v5990_v2, 2  ;;  %v13609_v34 = vld [vmem:[#allocation11] sm:$0xff] }
 0x78d   :  { %6440 = vmatpush.bf16.msrb.mxu2 %v13612_v43  ;;  %6525 = vmatpush.bf16.msra.mxu1 %v13635_v38 }
 0x78e   :  { %v5973_v25 = vrot.slane %v5972_v41, 1  ;;  %v5992_v6 = vadd.f32 %v5991_v37, %v5990_v2  ;;  %6498 = vmatpush.bf16.msra.mxu0 %v13626_v35 }
 0x78f   :  { %6468 = vmatpush.bf16.msrb.mxu3 %v13620_v27 }
 0x790   :  { %v5974_v59 = vadd.f32 %v5973_v25, %v5972_v41  ;;  %v5993_v10 = vrot.slane %v5992_v6, 1  ;;  %v6011_v41 = vld [vmem:[%s19054_s11 + $0x4] ss:$0 sm:$0xff] }
 0x791   :  { %6441 = vmatpush.bf16.msrb.mxu2 %v13611_v31  ;;  %v13617_v25 = vld [vmem:[#allocation11 + $0x40] sm:$0xff]  ;;  %6526 = vmatpush.bf16.msra.mxu1 %v13634_v60 }
 0x792   :  { %v17934_v7 = vmul.f32 0.03125, %v5974_v59  ;;  %v5994_v45 = vadd.f32 %v5993_v10, %v5992_v6  ;;  %v13625_v6 = vld [vmem:[#allocation11 + $0x80] sm:$0xff] }
 0x793   :  { %6469 = vmatpush.bf16.msrb.mxu3 %v13619_v58  ;;  %v13633_v59 = vld [vmem:[#allocation11 + $0xc0] sm:$0xff]  ;;  %6499 = vmatpush.bf16.msra.mxu0 %v13625_v6 }
 0x794   :  { %v5995_v1 = vmul.f32 0.03125, %v5994_v45  ;;  %v5996_v48 = vmul.f32 %v17934_v7, %v17934_v7 }
 0x795   :  { %6442 = vmatpush.bf16.msrb.mxu2 %v13610_v42  ;;  %6527 = vmatpush.bf16.msra.mxu1 %v13633_v59 }
 0x796   :  { %v5997_v47 = vsub.f32 %v5995_v1, %v5996_v48 }
 0x797   :  { %6470 = vmatpush.bf16.msrb.mxu3 %v13618_v18 }
 0x798   :  { %v5999_v33 = vadd.f32 1e-05, %v5997_v47 }
 0x799   :  { %6443 = vmatpush.bf16.msrb.mxu2 %v13609_v34 }
 0x79a   :  { %14021 = vrsqrt.f32 %v5999_v33  ;;  %vm6006_vm3 = vweird.f32 %v5999_v33 }
 0x79b   :  { %6471 = vmatpush.bf16.msrb.mxu3 %v13617_v25 }
 0x7a0   :  { %v14022_v9 = vpop.eup %14021 }
 0x7a1   :  { %v6001_v3 = vmul.f32 %v14022_v9, %v5999_v33  ;;  %vm6007_vm2 = vweird.f32 %v14022_v9 }
 0x7a2   :  { %vm6008_vm4 = vmor %vm6006_vm3, %vm6007_vm2  ;;  %vm8291_vm3 = vcmask 457728  }
 0x7a3   :  { %v6002_v50 = vmul.f32 %v14022_v9, %v6001_v3 }
 0x7a5   :  { %v6003_v40 = vmul.f32 0.5, %v6002_v50 }
 0x7a7   :  { %v6004_v39 = vsub.f32 1.5, %v6003_v40 }
 0x7a9   :  { %v6005_v22 = vmul.f32 %v14022_v9, %v6004_v39 }
 0x7ab   :  { %v6009_v49 = vsel %vm6008_vm4, %v14022_v9, %v6005_v22 }
 0x7ac   :  { %v6010_v2 = vmul.f32 %v6009_v49, %v5998_v24 }
 0x7ae   :  { %v6012_v37 = vmul.f32 %v6010_v2, %v17934_v7  ;;  %v6014_v46 = vmul.f32 %v6010_v2, %v17893_v36  ;;  %v6015_v45 = vmul.f32 %v6010_v2, %v17889_v4  ;;  %v6016_v1 = vmul.f32 %v6010_v2, %v17895_v57 }
 0x7af   :  { %v6018_v48 = vmul.f32 %v6010_v2, %v17905_v56  ;;  %v6019_v7 = vmul.f32 %v6010_v2, %v17912_v63  ;;  %v6020_v32 = vmul.f32 %v6010_v2, %v17927_v8  ;;  %v6017_v47 = vmul.f32 %v6010_v2, %v17899_v15 }
 0x7b0   :  { %v6013_v10 = vsub.f32 %v6011_v41, %v6012_v37 }
 0x7b2   :  { %v6021_v21 = vadd.f32 %v6014_v46, %v6013_v10  ;;  %v6022_v30 = vadd.f32 %v6015_v45, %v6013_v10  ;;  %v6023_v44 = vadd.f32 %v6016_v1, %v6013_v10  ;;  %v6025_v14 = vadd.f32 %v6018_v48, %v6013_v10 }
 0x7b3   :  { %v6026_v57 = vadd.f32 %v6019_v7, %v6013_v10  ;;  %v6027_v29 = vadd.f32 %v6020_v32, %v6013_v10  ;;  %v6024_v52 = vadd.f32 %v6017_v47, %v6013_v10 }
 0x7b4   :  { %v6028_v36 = vmul.f32 %v6021_v21, %v17885_v62  ;;  %v6029_v4 = vmul.f32 %v6022_v30, %v17887_v26  ;;  %v6030_v56 = vmul.f32 %v6023_v44, %v17891_v0  ;;  %v17953_v11 = vmul.f32 %v6025_v14, %v17914_v53 }
 0x7b5   :  { %v6033_v5 = vmul.f32 %v6026_v57, %v17920_v17  ;;  %v6034_v0 = vmul.f32 %v6027_v29, %v17929_v19  ;;  %v6031_v19 = vmul.f32 %v6024_v52, %v17907_v16 }
 0x7b6   :  { %v6164_v63 = vpack.c.bf16 %v6029_v4, %v6028_v36  ;;  %v6049_v33 = vrot.slane %v6028_v36, 1  ;;  %v6050_v8 = vrot.slane %v6029_v4, 1  ;;  %v6078_v54 = vrot.slane %v6028_v36, 5 }
 0x7b7   :  { %v6052_v51 = vrot.slane %v6030_v56, 1  ;;  %v6079_v20 = vrot.slane %v6029_v4, 5  ;;  %v6081_v15 = vrot.slane %v6030_v56, 5  ;;  %v6107_v55 = vrot.slane %v6028_v36, 6 }
 0x7b8   :  { %6444 = vmatmul.bf16.vlgmr.msrb.gmra.mxu2 %v6164_v63  ;;  %v6051_v62 = vsel %vm291_vm0, %v6049_v33, %v6050_v8  ;;  %v6108_v26 = vrot.slane %v6029_v4, 6  ;;  %v6110_v61 = vrot.slane %v6030_v56, 6  ;;  %v6056_v13 = vrot.slane %v17953_v11, 1 }
 0x7b9   :  { %v6053_v53 = vsel %vm291_vm0, %v6050_v8, %v6052_v51  ;;  %v6080_v28 = vsel %vm5442_vm15, %v6078_v54, %v6079_v20  ;;  %v6082_v43 = vsel %vm5442_vm15, %v6079_v20, %v6081_v15  ;;  %v6172_v17 = vpack.c.bf16 %v6033_v5, %v17953_v11 }
 0x7ba   :  { %v6165_v9 = vpack.c.bf16 %v6053_v53, %v6051_v62  ;;  %v6166_v3 = vpack.c.bf16 %v6082_v43, %v6080_v28  ;;  %v6109_v27 = vsel %vm5472_vm1, %v6107_v55, %v6108_v26  ;;  %v6111_v12 = vsel %vm5472_vm1, %v6108_v26, %v6110_v61 }
 0x7bb   :  { %v6167_v50 = vpack.c.bf16 %v6111_v12, %v6109_v27  ;;  %v6058_v31 = vrot.slane %v6033_v5, 1  ;;  %v6060_v40 = vrot.slane %v6034_v0, 1  ;;  %v6085_v58 = vrot.slane %v17953_v11, 5 }
 0x7bc   :  { %6472 = vmatmul.bf16.vlgmr.msrb.gmra.mxu3 %v6165_v9  ;;  %6500 = vmatmul.bf16.vlgmr.msra.gmra.mxu0 %v6166_v3  ;;  %v6114_v23 = vrot.slane %v17953_v11, 6  ;;  %v6087_v24 = vrot.slane %v6033_v5, 5  ;;  %v6089_v22 = vrot.slane %v6034_v0, 5  ;;  %v6116_v18 = vrot.slane %v6033_v5, 6 }
 0x7bd   :  { %6528 = vmatmul.bf16.vlgmr.msra.gmra.mxu1 %v6167_v50  ;;  %v6059_v39 = vsel %vm291_vm0, %v6056_v13, %v6058_v31  ;;  %v6061_v38 = vsel %vm291_vm0, %v6058_v31, %v6060_v40  ;;  %v6054_v35 = vrot.slane %v6031_v19, 1  ;;  %v6118_v49 = vrot.slane %v6034_v0, 6 }
 0x7be   :  { %v6173_v42 = vpack.c.bf16 %v6061_v38, %v6059_v39  ;;  %v6070_v60 = vsel %vm291_vm0, %v6060_v40, %v6049_v33  ;;  %v6083_v34 = vrot.slane %v6031_v19, 5  ;;  %v6088_v16 = vsel %vm5442_vm15, %v6085_v58, %v6087_v24  ;;  %v17985_v39 = vpop.permute.xlu0 %6562 }
 0x7bf   :  { %v6090_v2 = vsel %vm5442_vm15, %v6087_v24, %v6089_v22  ;;  %v6117_v41 = vsel %vm5472_vm1, %v6114_v23, %v6116_v18  ;;  %v6119_v25 = vsel %vm5472_vm1, %v6116_v18, %v6118_v49  ;;  %v6099_v6 = vsel %vm5442_vm15, %v6089_v22, %v6078_v54  ;;  %v17989_v22 = vpop.permute.xlu1 %6567 }
 0x7c0   :  { %v6174_v37 = vpack.c.bf16 %v6090_v2, %v6088_v16  ;;  %v6128_v59 = vsel %vm5472_vm1, %v6118_v49, %v6107_v55  ;;  %v6112_v10 = vrot.slane %v6031_v19, 6  ;;  %v6175_v46 = vpack.c.bf16 %v6119_v25, %v6117_v41 }
 0x7c1   :  { %v6168_v45 = vpack.c.bf16 %v6031_v19, %v6030_v56  ;;  %v6055_v1 = vsel %vm291_vm0, %v6052_v51, %v6054_v35  ;;  %v6057_v48 = vsel %vm291_vm0, %v6054_v35, %v6056_v13  ;;  %v6084_v21 = vsel %vm5442_vm15, %v6081_v15, %v6083_v34 }
 0x7c2   :  { %v6086_v30 = vsel %vm5442_vm15, %v6083_v34, %v6085_v58  ;;  %v6113_v7 = vsel %vm5472_vm1, %v6110_v61, %v6112_v10  ;;  %v6115_v32 = vsel %vm5472_vm1, %v6112_v10, %v6114_v23  ;;  %v6169_v44 = vpack.c.bf16 %v6057_v48, %v6055_v1 }
 0x7c3   :  { %v6170_v47 = vpack.c.bf16 %v6086_v30, %v6084_v21  ;;  %v6171_v14 = vpack.c.bf16 %v6115_v32, %v6113_v7  ;;  %v6176_v36 = vpack.c.bf16 %v6034_v0, %v6034_v0  ;;  %v6177_v4 = vpack.c.bf16 %v6070_v60, %v6070_v60 }
 0x7c4   :  { %v6178_v57 = vpack.c.bf16 %v6099_v6, %v6099_v6  ;;  %v6179_v29 = vpack.c.bf16 %v6128_v59, %v6128_v59 }
 0x7c6   :  { %v18012_v30 = vpop.permute.xlu0 %6577 }
 0x7c8   :  { %6449 = vmatmul.bf16.gmra.mxu2 %v6168_v45 }
 0x7cc   :  { %6477 = vmatmul.bf16.gmra.mxu3 %v6169_v44  ;;  %6505 = vmatmul.bf16.gmra.mxu0 %v6170_v47 }
 0x7cd   :  { %6533 = vmatmul.bf16.gmra.mxu1 %v6171_v14  ;;  %v18018_v14 = vpop.permute.xlu1 %6582 }
 0x7d8   :  { %6454 = vmatmul.bf16.gmra.mxu2 %v6172_v17  ;;  %v17983_v17 = vpop.permute.xlu2 %6557 }
 0x7dc   :  { %6482 = vmatmul.bf16.gmra.mxu3 %v6173_v42  ;;  %6510 = vmatmul.bf16.gmra.mxu0 %v6174_v37 }
 0x7dd   :  { %6538 = vmatmul.bf16.gmra.mxu1 %v6175_v46 }
 0x7e0   :  { %v18005_v46 = vpop.permute.xlu2 %6572 }
 0x7e8   :  { %6459 = vmatmul.bf16.gmra.mxu2 %v6176_v36 }
 0x7ec   :  { %6487 = vmatmul.bf16.gmra.mxu3 %v6177_v4  ;;  %6515 = vmatmul.bf16.gmra.mxu0 %v6178_v57 }
 0x7ed   :  { %6543 = vmatmul.bf16.gmra.mxu1 %v6179_v29 }
 0x839   :  { %v6501_v56 = vpop.f32.mrf.mxu0 }
 0x83a   :  { %v6529_v52 = vpop.f32.mrf.mxu1 }
 0x83b   :  { %v6445_v11 = vpop.f32.mrf.mxu2 }
 0x83f   :  { %v6473_v63 = vpop.f32.mrf.mxu3 }
 0x840   :  { %v6474_v3 = vadd.f32 %v6473_v63, %v6445_v11 }
 0x841   :  { %v6503_v33 = vpop.f32.mrf.mxu0 }
 0x842   :  { %v6531_v8 = vpop.f32.mrf.mxu1  ;;  %v6502_v19 = vadd.f32 %v6501_v56, %v6474_v3 }
 0x843   :  { %v6447_v54 = vpop.f32.mrf.mxu2 }
 0x844   :  { %v17991_v18 = vadd.f32 %v6529_v52, %v6502_v19 }
 0x846   :  { %v6590_v41 = vmul.f32 %v17983_v17, %v17991_v18 }
 0x847   :  { %v6475_v51 = vpop.f32.mrf.mxu3 }
 0x848   :  { %v6476_v43 = vadd.f32 %v6475_v51, %v6447_v54  ;;  %v6610_v7 = vmul.f32 %v6590_v41, %v17991_v18 }
 0x849   :  { %v6506_v20 = vpop.f32.mrf.mxu0 }
 0x84a   :  { %v6534_v15 = vpop.f32.mrf.mxu1  ;;  %v6504_v12 = vadd.f32 %v6503_v33, %v6476_v43 }
 0x84b   :  { %v6450_v55 = vpop.f32.mrf.mxu2 }
 0x84c   :  { %v17987_v38 = vadd.f32 %v6531_v8, %v6504_v12 }
 0x84e   :  { %v6591_v60 = vmul.f32 %v17985_v39, %v17987_v38 }
 0x84f   :  { %v6478_v62 = vpop.f32.mrf.mxu3 }
 0x850   :  { %v6479_v27 = vadd.f32 %v6478_v62, %v6450_v55  ;;  %v6611_v45 = vmul.f32 %v6591_v60, %v17987_v38  ;;  %v6597_v32 = vadd.f32 %v6591_v60, %v6590_v41  ;;  %v13648_v60 = vld [vmem:[#allocation12 + $0x38] sm:$0xff] }
 0x851   :  { %v6508_v26 = vpop.f32.mrf.mxu0  ;;  %7070 = vmatpush.bf16.msra.mxu2 %v13648_v60  ;;  %v13656_v41 = vld [vmem:[#allocation12 + $0x78] sm:$0xff] }
 0x852   :  { %v6536_v61 = vpop.f32.mrf.mxu1  ;;  %v6507_v40 = vadd.f32 %v6506_v20, %v6479_v27  ;;  %v6617_v36 = vadd.f32 %v6611_v45, %v6610_v7  ;;  %v13647_v45 = vld [vmem:[#allocation12 + $0x30] sm:$0xff]  ;;  %7098 = vmatpush.bf16.msra.mxu3 %v13656_v41 }
 0x853   :  { %v6452_v5 = vpop.f32.mrf.mxu2 }
 0x854   :  { %v17993_v35 = vadd.f32 %v6534_v15, %v6507_v40 }
 0x855   :  { %7071 = vmatpush.bf16.msra.mxu2 %v13647_v45 }
 0x856   :  { %v6592_v25 = vmul.f32 %v17989_v22, %v17993_v35 }
 0x857   :  { %v6480_v0 = vpop.f32.mrf.mxu3 }
 0x858   :  { %v6481_v13 = vadd.f32 %v6480_v0, %v6452_v5  ;;  %v6612_v44 = vmul.f32 %v6592_v25, %v17993_v35  ;;  %v6598_v57 = vadd.f32 %v6597_v32, %v6592_v25  ;;  %v13672_v25 = vld [vmem:[#allocation12 + $0xf8] sm:$0xff]  ;;  %v13671_v32 = vld [vmem:[#allocation12 + $0xf0] sm:$0xff] }
 0x859   :  { %v6511_v53 = vpop.f32.mrf.mxu0  ;;  %7154 = vmatpush.bf16.msrb.mxu1 %v13672_v25 }
 0x85a   :  { %v6539_v28 = vpop.f32.mrf.mxu1  ;;  %v6509_v24 = vadd.f32 %v6508_v26, %v6481_v13  ;;  %v6618_v63 = vadd.f32 %v6617_v36, %v6612_v44  ;;  %v13646_v44 = vld [vmem:[#allocation12 + $0x28] sm:$0xff] }
 0x85b   :  { %v6455_v9 = vpop.f32.mrf.mxu2  ;;  %v13654_v36 = vld [vmem:[#allocation12 + $0x68] sm:$0xff]  ;;  %7072 = vmatpush.bf16.msra.mxu2 %v13646_v44 }
 0x85c   :  { %v17997_v16 = vadd.f32 %v6536_v61, %v6509_v24  ;;  %v18027_v61 = vpop.permute.xlu2 %6587 }
 0x85d   :  { %7155 = vmatpush.bf16.msrb.mxu1 %v13671_v32 }
 0x85e   :  { %v6593_v48 = vmul.f32 %v18005_v46, %v17997_v16 }
 0x85f   :  { %v6483_v50 = vpop.f32.mrf.mxu3 }
 0x860   :  { %v6484_v58 = vadd.f32 %v6483_v50, %v6455_v9  ;;  %v6613_v29 = vmul.f32 %v6593_v48, %v17997_v16  ;;  %v6599_v33 = vadd.f32 %v6598_v57, %v6593_v48  ;;  %v13663_v48 = vld [vmem:[#allocation12 + $0xb0] sm:$0xff]  ;;  %v13670_v57 = vld [vmem:[#allocation12 + $0xe8] sm:$0xff] }
 0x861   :  { %v6513_v31 = vpop.f32.mrf.mxu0  ;;  %7156 = vmatpush.bf16.msrb.mxu1 %v13670_v57 }
 0x862   :  { %v6541_v23 = vpop.f32.mrf.mxu1  ;;  %v6512_v49 = vadd.f32 %v6511_v53, %v6484_v58  ;;  %v6619_v15 = vadd.f32 %v6618_v63, %v6613_v29  ;;  %v13645_v29 = vld [vmem:[#allocation12 + $0x20] sm:$0xff]  ;;  %v13644_v63 = vld [vmem:[#allocation12 + $0x18] sm:$0xff] }
 0x863   :  { %v6457_v42 = vpop.f32.mrf.mxu2  ;;  %7073 = vmatpush.bf16.msra.mxu2 %v13645_v29 }
 0x864   :  { %v18003_v6 = vadd.f32 %v6539_v28, %v6512_v49 }
 0x866   :  { %v6594_v47 = vmul.f32 %v18012_v30, %v18003_v6 }
 0x867   :  { %v6485_v34 = vpop.f32.mrf.mxu3  ;;  %7074 = vmatpush.bf16.msra.mxu2 %v13644_v63 }
 0x868   :  { %v6486_v2 = vadd.f32 %v6485_v34, %v6457_v42  ;;  %v6614_v8 = vmul.f32 %v6594_v47, %v18003_v6  ;;  %v6600_v55 = vadd.f32 %v6599_v33, %v6594_v47 }
 0x869   :  { %v6516_v37 = vpop.f32.mrf.mxu0 }
 0x86a   :  { %v6514_v59 = vadd.f32 %v6513_v31, %v6486_v2  ;;  %v6544_v10 = vpop.f32.mrf.mxu1  ;;  %v6620_v5 = vadd.f32 %v6619_v15, %v6614_v8  ;;  %v13643_v15 = vld [vmem:[#allocation12 + $0x10] sm:$0xff] }
 0x86b   :  { %v6460_v1 = vpop.f32.mrf.mxu2  ;;  %7075 = vmatpush.bf16.msra.mxu2 %v13643_v15 }
 0x86c   :  { %v18010_v21 = vadd.f32 %v6541_v23, %v6514_v59 }
 0x86e   :  { %v6595_v56 = vmul.f32 %v18018_v14, %v18010_v21 }
 0x86f   :  { %v6488_v4 = vpop.f32.mrf.mxu3 }
 0x870   :  { %v6489_v52 = vadd.f32 %v6488_v4, %v6460_v1  ;;  %v6615_v62 = vmul.f32 %v6595_v56, %v18010_v21  ;;  %v6601_v0 = vadd.f32 %v6600_v55, %v6595_v56  ;;  %v13655_v1 = vld [vmem:[#allocation12 + $0x70] sm:$0xff]  ;;  %v13662_v4 = vld [vmem:[#allocation12 + $0xa8] sm:$0xff]  ;;  %v13653_v56 = vld [vmem:[#allocation12 + $0x60] sm:$0xff] }
 0x871   :  { %v6518_v11 = vpop.f32.mrf.mxu0  ;;  %7099 = vmatpush.bf16.msra.mxu3 %v13655_v1 }
 0x872   :  { %v6517_v54 = vadd.f32 %v6516_v37, %v6489_v52  ;;  %v6546_v51 = vpop.f32.mrf.mxu1  ;;  %v6621_v43 = vadd.f32 %v6620_v5, %v6615_v62  ;;  %v13664_v37 = vld [vmem:[#allocation12 + $0xb8] sm:$0xff]  ;;  %v13661_v52 = vld [vmem:[#allocation12 + $0xa0] sm:$0xff]  ;;  %v13651_v5 = vld [vmem:[#allocation12 + $0x50] sm:$0xff] }
 0x873   :  { %v6462_v20 = vpop.f32.mrf.mxu2  ;;  %7126 = vmatpush.bf16.msrb.mxu0 %v13664_v37  ;;  %v13669_v11 = vld [vmem:[#allocation12 + $0xe0] sm:$0xff]  ;;  %v13660_v51 = vld [vmem:[#allocation12 + $0x98] sm:$0xff] }
 0x874   :  { %v18025_v26 = vadd.f32 %v6544_v10, %v6517_v54  ;;  %v13652_v54 = vld [vmem:[#allocation12 + $0x58] sm:$0xff]  ;;  %7157 = vmatpush.bf16.msrb.mxu1 %v13669_v11 }
 0x875   :  { %7100 = vmatpush.bf16.msra.mxu3 %v13654_v36  ;;  %v13668_v20 = vld [vmem:[#allocation12 + $0xd8] sm:$0xff] }
 0x876   :  { %v6596_v53 = vmul.f32 %v18027_v61, %v18025_v26 }
 0x877   :  { %v6490_v28 = vpop.f32.mrf.mxu3  ;;  %7127 = vmatpush.bf16.msrb.mxu0 %v13663_v48 }
 0x878   :  { %v6602_v9 = vadd.f32 %v6601_v0, %v6596_v53  ;;  %v6616_v3 = vmul.f32 %v6596_v53, %v18025_v26  ;;  %v13659_v0 = vld [vmem:[#allocation12 + $0x90] sm:$0xff]  ;;  %7158 = vmatpush.bf16.msrb.mxu1 %v13668_v20  ;;  %v13642_v28 = vld [vmem:[#allocation12 + $0x8] sm:$0xff] }
 0x879   :  { %7101 = vmatpush.bf16.msra.mxu3 %v13653_v56  ;;  %v13667_v53 = vld [vmem:[#allocation12 + $0xd0] sm:$0xff]  ;;  %7076 = vmatpush.bf16.msra.mxu2 %v13642_v28 }
 0x87a   :  { %v6603_v27 = vrot.slane %v6602_v9, 4  ;;  %v6622_v12 = vadd.f32 %v6621_v43, %v6616_v3 }
 0x87b   :  { %7128 = vmatpush.bf16.msrb.mxu0 %v13662_v4 }
 0x87c   :  { %v6604_v50 = vadd.f32 %v6603_v27, %v6602_v9  ;;  %v6623_v13 = vrot.slane %v6622_v12, 4  ;;  %v6632_v9 = vld [vmem:[#allocation14 + $0x5] ss:$0 sm:$0xff]  ;;  %v13650_v27 = vld [vmem:[#allocation12 + $0x48] sm:$0xff]  ;;  %7159 = vmatpush.bf16.msrb.mxu1 %v13667_v53 }
 0x87d   :  { %7102 = vmatpush.bf16.msra.mxu3 %v13652_v54 }
 0x87e   :  { %v6605_v19 = vrot.slane %v6604_v50, 2  ;;  %v6624_v31 = vadd.f32 %v6623_v13, %v6622_v12  ;;  %v13658_v12 = vld [vmem:[#allocation12 + $0x88] sm:$0xff]  ;;  %v13641_v13 = vld [vmem:[#allocation12] sm:$0xff] }
 0x87f   :  { %7129 = vmatpush.bf16.msrb.mxu0 %v13661_v52  ;;  %7077 = vmatpush.bf16.msra.mxu2 %v13641_v13 }
 0x880   :  { %v6606_v40 = vadd.f32 %v6605_v19, %v6604_v50  ;;  %v6625_v58 = vrot.slane %v6624_v31, 2  ;;  %v13666_v50 = vld [vmem:[#allocation12 + $0xc8] sm:$0xff] }
 0x881   :  { %7103 = vmatpush.bf16.msra.mxu3 %v13651_v5  ;;  %7160 = vmatpush.bf16.msrb.mxu1 %v13666_v50 }
 0x882   :  { %v6607_v23 = vrot.slane %v6606_v40, 1  ;;  %v6626_v42 = vadd.f32 %v6625_v58, %v6624_v31  ;;  %v13649_v58 = vld [vmem:[#allocation12 + $0x40] sm:$0xff] }
 0x883   :  { %7130 = vmatpush.bf16.msrb.mxu0 %v13660_v51 }
 0x884   :  { %v6608_v24 = vadd.f32 %v6607_v23, %v6606_v40  ;;  %v6627_v49 = vrot.slane %v6626_v42, 1  ;;  %v6645_v40 = vld [vmem:[%s19054_s11 + $0x5] ss:$0 sm:$0xff] }
 0x885   :  { %7104 = vmatpush.bf16.msra.mxu3 %v13650_v27  ;;  %v13657_v23 = vld [vmem:[#allocation12 + $0x80] sm:$0xff] }
 0x886   :  { %v18032_v34 = vmul.f32 0.03125, %v6608_v24  ;;  %v6628_v2 = vadd.f32 %v6627_v49, %v6626_v42  ;;  %v13665_v24 = vld [vmem:[#allocation12 + $0xc0] sm:$0xff] }
 0x887   :  { %7131 = vmatpush.bf16.msrb.mxu0 %v13659_v0  ;;  %7161 = vmatpush.bf16.msrb.mxu1 %v13665_v24 }
 0x888   :  { %v6629_v59 = vmul.f32 0.03125, %v6628_v2  ;;  %v6630_v10 = vmul.f32 %v18032_v34, %v18032_v34 }
 0x889   :  { %7105 = vmatpush.bf16.msra.mxu3 %v13649_v58 }
 0x88a   :  { %v6631_v7 = vsub.f32 %v6629_v59, %v6630_v10 }
 0x88b   :  { %7132 = vmatpush.bf16.msrb.mxu0 %v13658_v12 }
 0x88c   :  { %v6633_v47 = vadd.f32 1e-05, %v6631_v7 }
 0x88e   :  { %14023 = vrsqrt.f32 %v6633_v47  ;;  %vm6640_vm6 = vweird.f32 %v6633_v47 }
 0x88f   :  { %7133 = vmatpush.bf16.msrb.mxu0 %v13657_v23 }
 0x894   :  { %v14024_v33 = vpop.eup %14023 }
 0x895   :  { %v6635_v8 = vmul.f32 %v14024_v33, %v6633_v47  ;;  %vm6641_vm5 = vweird.f32 %v14024_v33 }
 0x896   :  { %vm6642_vm7 = vmor %vm6640_vm6, %vm6641_vm5 }
 0x897   :  { %v6636_v55 = vmul.f32 %v14024_v33, %v6635_v8 }
 0x899   :  { %v6637_v62 = vmul.f32 0.5, %v6636_v55 }
 0x89b   :  { %v6638_v43 = vsub.f32 1.5, %v6637_v62 }
 0x89d   :  { %v6639_v3 = vmul.f32 %v14024_v33, %v6638_v43 }
 0x89f   :  { %v6643_v19 = vsel %vm6642_vm7, %v14024_v33, %v6639_v3 }
 0x8a0   :  { %v6644_v31 = vmul.f32 %v6643_v19, %v6632_v9 }
 0x8a2   :  { %v6646_v42 = vmul.f32 %v6644_v31, %v18032_v34  ;;  %v6648_v60 = vmul.f32 %v6644_v31, %v17991_v18  ;;  %v6649_v2 = vmul.f32 %v6644_v31, %v17987_v38  ;;  %v6650_v41 = vmul.f32 %v6644_v31, %v17993_v35 }
 0x8a3   :  { %v6652_v37 = vmul.f32 %v6644_v31, %v18003_v6  ;;  %v6653_v25 = vmul.f32 %v6644_v31, %v18010_v21  ;;  %v6654_v45 = vmul.f32 %v6644_v31, %v18025_v26  ;;  %v6651_v6 = vmul.f32 %v6644_v31, %v17997_v16 }
 0x8a4   :  { %v6647_v49 = vsub.f32 %v6645_v40, %v6646_v42 }
 0x8a6   :  { %v6655_v59 = vadd.f32 %v6648_v60, %v6647_v49  ;;  %v6656_v10 = vadd.f32 %v6649_v2, %v6647_v49  ;;  %v6657_v34 = vadd.f32 %v6650_v41, %v6647_v49  ;;  %v6659_v1 = vadd.f32 %v6652_v37, %v6647_v49 }
 0x8a7   :  { %v6660_v48 = vadd.f32 %v6653_v25, %v6647_v49  ;;  %v6661_v7 = vadd.f32 %v6654_v45, %v6647_v49  ;;  %v6658_v11 = vadd.f32 %v6651_v6, %v6647_v49 }
 0x8a8   :  { %v6662_v18 = vmul.f32 %v6655_v59, %v17983_v17  ;;  %v6663_v38 = vmul.f32 %v6656_v10, %v17985_v39  ;;  %v18049_v35 = vmul.f32 %v6657_v34, %v17989_v22  ;;  %v18053_v21 = vmul.f32 %v6659_v1, %v18012_v30 }
 0x8a9   :  { %v18056_v32 = vmul.f32 %v6660_v48, %v18018_v14  ;;  %v6668_v54 = vmul.f32 %v6661_v7, %v18027_v61  ;;  %v6665_v55 = vmul.f32 %v6658_v11, %v18005_v46 }
 0x8aa   :  { %v6798_v44 = vpack.c.bf16 %v6663_v38, %v6662_v18  ;;  %v6683_v26 = vrot.slane %v6662_v18, 1  ;;  %v6684_v47 = vrot.slane %v6663_v38, 1  ;;  %v6686_v36 = vrot.slane %v18049_v35, 1 }
 0x8ab   :  { %v6712_v17 = vrot.slane %v6662_v18, 5  ;;  %v6713_v4 = vrot.slane %v6663_v38, 5  ;;  %v6715_v39 = vrot.slane %v18049_v35, 5  ;;  %v6741_v22 = vrot.slane %v6662_v18, 6 }
 0x8ac   :  { %7078 = vmatmul.bf16.vlgmr.msra.gmra.mxu2 %v6798_v44  ;;  %v6685_v57 = vsel %vm291_vm0, %v6683_v26, %v6684_v47  ;;  %v6687_v16 = vsel %vm291_vm0, %v6684_v47, %v6686_v36  ;;  %v6742_v30 = vrot.slane %v6663_v38, 6  ;;  %v6744_v29 = vrot.slane %v18049_v35, 6 }
 0x8ad   :  { %v6799_v14 = vpack.c.bf16 %v6687_v16, %v6685_v57  ;;  %v6714_v56 = vsel %vm5442_vm15, %v6712_v17, %v6713_v4  ;;  %v6716_v52 = vsel %vm5442_vm15, %v6713_v4, %v6715_v39  ;;  %v6690_v20 = vrot.slane %v18053_v21, 1 }
 0x8ae   :  { %v6800_v63 = vpack.c.bf16 %v6716_v52, %v6714_v56  ;;  %v6743_v33 = vsel %vm5472_vm1, %v6741_v22, %v6742_v30  ;;  %v6745_v8 = vsel %vm5472_vm1, %v6742_v30, %v6744_v29  ;;  %v6806_v15 = vpack.c.bf16 %v18056_v32, %v18053_v21 }
 0x8af   :  { %7106 = vmatmul.bf16.vlgmr.msra.gmra.mxu3 %v6799_v14  ;;  %v6801_v51 = vpack.c.bf16 %v6745_v8, %v6743_v33  ;;  %v6719_v62 = vrot.slane %v18053_v21, 5  ;;  %v6692_v5 = vrot.slane %v18056_v32, 1  ;;  %v6748_v0 = vrot.slane %v18053_v21, 6 }
 0x8b0   :  { %7134 = vmatmul.bf16.vlgmr.msrb.gmra.mxu0 %v6800_v63  ;;  %v6694_v61 = vrot.slane %v6668_v54, 1  ;;  %v6721_v28 = vrot.slane %v18056_v32, 5  ;;  %v6723_v43 = vrot.slane %v6668_v54, 5  ;;  %v6750_v9 = vrot.slane %v18056_v32, 6 }
 0x8b1   :  { %7162 = vmatmul.bf16.vlgmr.msrb.gmra.mxu1 %v6801_v51  ;;  %v6693_v53 = vsel %vm291_vm0, %v6690_v20, %v6692_v5  ;;  %v6752_v3 = vrot.slane %v6668_v54, 6  ;;  %v6688_v27 = vrot.slane %v6665_v55, 1  ;;  %v6717_v58 = vrot.slane %v6665_v55, 5 }
 0x8b2   :  { %v6695_v12 = vsel %vm291_vm0, %v6692_v5, %v6694_v61  ;;  %v6722_v46 = vsel %vm5442_vm15, %v6719_v62, %v6721_v28  ;;  %v6704_v50 = vsel %vm291_vm0, %v6694_v61, %v6683_v26  ;;  %v6724_v19 = vsel %vm5442_vm15, %v6721_v28, %v6723_v43 }
 0x8b3   :  { %v6807_v13 = vpack.c.bf16 %v6695_v12, %v6693_v53  ;;  %v6751_v31 = vsel %vm5472_vm1, %v6748_v0, %v6750_v9  ;;  %v6753_v40 = vsel %vm5472_vm1, %v6750_v9, %v6752_v3  ;;  %v6808_v23 = vpack.c.bf16 %v6724_v19, %v6722_v46  ;;  %v18095_v53 = vpop.permute.xlu1 %7196 }
 0x8b4   :  { %v6809_v42 = vpack.c.bf16 %v6753_v40, %v6751_v31  ;;  %v6733_v24 = vsel %vm5442_vm15, %v6723_v43, %v6712_v17  ;;  %v6746_v49 = vrot.slane %v6665_v55, 6  ;;  %v6762_v60 = vsel %vm5472_vm1, %v6752_v3, %v6741_v22  ;;  %v18099_v3 = vpop.permute.xlu2 %7201 }
 0x8b5   :  { %v6802_v2 = vpack.c.bf16 %v6665_v55, %v18049_v35  ;;  %v6689_v41 = vsel %vm291_vm0, %v6686_v36, %v6688_v27  ;;  %v6691_v37 = vsel %vm291_vm0, %v6688_v27, %v6690_v20  ;;  %v6718_v25 = vsel %vm5442_vm15, %v6715_v39, %v6717_v58 }
 0x8b6   :  { %v6720_v59 = vsel %vm5442_vm15, %v6717_v58, %v6719_v62  ;;  %v6747_v10 = vsel %vm5472_vm1, %v6744_v29, %v6746_v49  ;;  %v6749_v34 = vsel %vm5472_vm1, %v6746_v49, %v6748_v0  ;;  %v6803_v45 = vpack.c.bf16 %v6691_v37, %v6689_v41 }
 0x8b7   :  { %v6804_v1 = vpack.c.bf16 %v6720_v59, %v6718_v25  ;;  %v6805_v48 = vpack.c.bf16 %v6749_v34, %v6747_v10  ;;  %v6810_v18 = vpack.c.bf16 %v6668_v54, %v6668_v54  ;;  %v6811_v38 = vpack.c.bf16 %v6704_v50, %v6704_v50 }
 0x8b8   :  { %v6812_v35 = vpack.c.bf16 %v6733_v24, %v6733_v24  ;;  %v6813_v7 = vpack.c.bf16 %v6762_v60, %v6762_v60 }
 0x8bb   :  { %v18122_v59 = vpop.permute.xlu1 %7211 }
 0x8bc   :  { %7083 = vmatmul.bf16.gmra.mxu2 %v6802_v2 }
 0x8bf   :  { %7111 = vmatmul.bf16.gmra.mxu3 %v6803_v45 }
 0x8c0   :  { %7139 = vmatmul.bf16.gmra.mxu0 %v6804_v1 }
 0x8c1   :  { %7167 = vmatmul.bf16.gmra.mxu1 %v6805_v48  ;;  %v18128_v48 = vpop.permute.xlu2 %7216 }
 0x8cc   :  { %7088 = vmatmul.bf16.gmra.mxu2 %v6806_v15  ;;  %v18093_v15 = vpop.permute.xlu0 %7191 }
 0x8cf   :  { %7116 = vmatmul.bf16.gmra.mxu3 %v6807_v13 }
 0x8d0   :  { %7144 = vmatmul.bf16.gmra.mxu0 %v6808_v23 }
 0x8d1   :  { %7172 = vmatmul.bf16.gmra.mxu1 %v6809_v42 }
 0x8d4   :  { %v18115_v49 = vpop.permute.xlu0 %7206 }
 0x8dc   :  { %7093 = vmatmul.bf16.gmra.mxu2 %v6810_v18 }
 0x8df   :  { %7121 = vmatmul.bf16.gmra.mxu3 %v6811_v38 }
 0x8e0   :  { %7149 = vmatmul.bf16.gmra.mxu0 %v6812_v35 }
 0x8e1   :  { %7177 = vmatmul.bf16.gmra.mxu1 %v6813_v7 }
 0x92d   :  { %v7135_v6 = vpop.f32.mrf.mxu0 }
 0x92e   :  { %v7163_v21 = vpop.f32.mrf.mxu1 }
 0x92f   :  { %v7079_v32 = vpop.f32.mrf.mxu2 }
 0x932   :  { %v7107_v44 = vpop.f32.mrf.mxu3 }
 0x933   :  { %v7108_v33 = vadd.f32 %v7107_v44, %v7079_v32 }
 0x935   :  { %v7137_v26 = vpop.f32.mrf.mxu0  ;;  %v7136_v55 = vadd.f32 %v7135_v6, %v7108_v33 }
 0x936   :  { %v7165_v47 = vpop.f32.mrf.mxu1 }
 0x937   :  { %v7081_v36 = vpop.f32.mrf.mxu2  ;;  %v18101_v27 = vadd.f32 %v7163_v21, %v7136_v55 }
 0x939   :  { %v7224_v40 = vmul.f32 %v18093_v15, %v18101_v27 }
 0x93a   :  { %v7109_v17 = vpop.f32.mrf.mxu3 }
 0x93b   :  { %v7110_v52 = vadd.f32 %v7109_v17, %v7081_v36  ;;  %v7244_v10 = vmul.f32 %v7224_v40, %v18101_v27 }
 0x93d   :  { %v7140_v4 = vpop.f32.mrf.mxu0  ;;  %v7138_v54 = vadd.f32 %v7137_v26, %v7110_v52 }
 0x93e   :  { %v7168_v39 = vpop.f32.mrf.mxu1 }
 0x93f   :  { %v7084_v22 = vpop.f32.mrf.mxu2  ;;  %v18097_v61 = vadd.f32 %v7165_v47, %v7138_v54 }
 0x941   :  { %v7225_v50 = vmul.f32 %v18095_v53, %v18097_v61 }
 0x942   :  { %v7112_v57 = vpop.f32.mrf.mxu3 }
 0x943   :  { %v7113_v8 = vadd.f32 %v7112_v57, %v7084_v22  ;;  %v7245_v60 = vmul.f32 %v7225_v50, %v18097_v61  ;;  %v7231_v34 = vadd.f32 %v7225_v50, %v7224_v40 }
 0x945   :  { %v7142_v16 = vpop.f32.mrf.mxu0  ;;  %v7141_v62 = vadd.f32 %v7140_v4, %v7113_v8  ;;  %v7251_v18 = vadd.f32 %v7245_v60, %v7244_v10 }
 0x946   :  { %v7170_v30 = vpop.f32.mrf.mxu1 }
 0x947   :  { %v7086_v29 = vpop.f32.mrf.mxu2  ;;  %v18103_v12 = vadd.f32 %v7168_v39, %v7141_v62 }
 0x949   :  { %v7226_v58 = vmul.f32 %v18099_v3, %v18103_v12 }
 0x94a   :  { %v7114_v14 = vpop.f32.mrf.mxu3 }
 0x94b   :  { %v7115_v20 = vadd.f32 %v7114_v14, %v7086_v29  ;;  %v7246_v45 = vmul.f32 %v7226_v58, %v18103_v12  ;;  %v7232_v35 = vadd.f32 %v7231_v34, %v7226_v58 }
 0x94d   :  { %v7145_v56 = vpop.f32.mrf.mxu0  ;;  %v7143_v43 = vadd.f32 %v7142_v16, %v7115_v20  ;;  %v7252_v32 = vadd.f32 %v7251_v18, %v7246_v45  ;;  %v12183_v18 = vld [vmem:[%s19052_s9 + $0x60] sm:$0xf] }
 0x94e   :  { %v7173_v11 = vpop.f32.mrf.mxu1 }
 0x94f   :  { %v7089_v63 = vpop.f32.mrf.mxu2  ;;  %v18107_v19 = vadd.f32 %v7170_v30, %v7143_v43  ;;  %v18137_v30 = vpop.permute.xlu0 %7221 }
 0x951   :  { %v7227_v41 = vmul.f32 %v18115_v49, %v18107_v19 }
 0x952   :  { %v7117_v51 = vpop.f32.mrf.mxu3 }
 0x953   :  { %v7118_v5 = vadd.f32 %v7117_v51, %v7089_v63  ;;  %v7247_v7 = vmul.f32 %v7227_v41, %v18107_v19  ;;  %v7233_v44 = vadd.f32 %v7232_v35, %v7227_v41  ;;  %v13720_v41 = vld [vmem:[%s19052_s9 + $0x174] sm:$0xf0]  ;;  %v13686_v35 = vld [vmem:[%s19052_s9 + $0x64] sm:$0xf0] }
 0x955   :  { %v7147_v0 = vpop.f32.mrf.mxu0  ;;  %v7146_v46 = vadd.f32 %v7145_v56, %v7118_v5  ;;  %v7253_v4 = vadd.f32 %v7252_v32, %v7247_v7  ;;  %v12247_v7 = vld [vmem:[%s19052_s9 + $0xe0] sm:$0xf]  ;;  %v12184_v32 = vor.u32 %v13686_v35, %v12183_v18 }
 0x956   :  { %v7175_v28 = vpop.f32.mrf.mxu1  ;;  %v12151_v35 = vld [vmem:[%s19052_s9 + $0x20] sm:$0xf] }
 0x957   :  { %v7091_v9 = vpop.f32.mrf.mxu2  ;;  %v18113_v23 = vadd.f32 %v7173_v11, %v7146_v46  ;;  %v13688_v46 = vld [vmem:[%s19052_s9 + $0x74] sm:$0xf0] }
 0x959   :  { %v7228_v1 = vmul.f32 %v18122_v59, %v18113_v23 }
 0x95a   :  { %v7119_v13 = vpop.f32.mrf.mxu3 }
 0x95b   :  { %v7120_v31 = vadd.f32 %v7119_v13, %v7091_v9  ;;  %v7248_v26 = vmul.f32 %v7228_v1, %v18113_v23  ;;  %v7234_v39 = vadd.f32 %v7233_v44, %v7228_v1  ;;  %v12191_v9 = vld [vmem:[%s19052_s9 + $0x70] sm:$0xf]  ;;  %v13736_v1 = vld [vmem:[%s19052_s9 + $0x1f4] sm:$0xf0] }
 0x95d   :  { %v7148_v42 = vadd.f32 %v7147_v0, %v7120_v31  ;;  %v7150_v24 = vpop.f32.mrf.mxu0  ;;  %v7254_v29 = vadd.f32 %v7253_v4, %v7248_v26  ;;  %v12192_v31 = vor.u32 %v13688_v46, %v12191_v9  ;;  %v12311_v26 = vld [vmem:[%s19052_s9 + $0x160] sm:$0xf]  ;;  %v13734_v4 = vld [vmem:[%s19052_s9 + $0x1e4] sm:$0xf0] }
 0x95e   :  { %v7178_v2 = vpop.f32.mrf.mxu1  ;;  %v13714_v9 = vld [vmem:[%s19052_s9 + $0x144] sm:$0xf0]  ;;  %v12359_v46 = vld [vmem:[%s19052_s9 + $0x1c0] sm:$0xf] }
 0x95f   :  { %v18120_v37 = vadd.f32 %v7175_v28, %v7148_v42  ;;  %v7094_v25 = vpop.f32.mrf.mxu2  ;;  %7832 = vmatpush.bf16.msrb.mxu2 %v12192_v31  ;;  %v12255_v42 = vld [vmem:[%s19052_s9 + $0xf0] sm:$0xf] }
 0x960   :  { %v12159_v31 = vld [vmem:[%s19052_s9 + $0x30] sm:$0xf] }
 0x961   :  { %v7229_v6 = vmul.f32 %v18128_v48, %v18120_v37 }
 0x962   :  { %v7122_v38 = vpop.f32.mrf.mxu3 }
 0x963   :  { %v7123_v21 = vadd.f32 %v7122_v38, %v7094_v25  ;;  %v7249_v22 = vmul.f32 %v7229_v6, %v18120_v37  ;;  %v7235_v14 = vadd.f32 %v7234_v39, %v7229_v6  ;;  %v12383_v25 = vld [vmem:[%s19052_s9 + $0x1f0] sm:$0xf]  ;;  %v13702_v6 = vld [vmem:[%s19052_s9 + $0xe4] sm:$0xf0]  ;;  %7833 = vmatpush.bf16.msrb.mxu2 %v12184_v32 }
 0x964   :  { %v12384_v38 = vor.u32 %v13736_v1, %v12383_v25  ;;  %v12248_v44 = vor.u32 %v13702_v6, %v12247_v7  ;;  %v12175_v39 = vld [vmem:[%s19052_s9 + $0x50] sm:$0xf]  ;;  %v13712_v25 = vld [vmem:[%s19052_s9 + $0x134] sm:$0xf0]  ;;  %v13678_v7 = vld [vmem:[%s19052_s9 + $0x24] sm:$0xf0] }
 0x965   :  { %v7151_v47 = vadd.f32 %v7150_v24, %v7123_v21  ;;  %v7152_v36 = vpop.f32.mrf.mxu0  ;;  %v7255_v11 = vadd.f32 %v7254_v29, %v7249_v22  ;;  %v13704_v24 = vld [vmem:[%s19052_s9 + $0xf4] sm:$0xf0]  ;;  %v13694_v32 = vld [vmem:[%s19052_s9 + $0xa4] sm:$0xf0] }
 0x966   :  { %v7180_v17 = vpop.f32.mrf.mxu1  ;;  %v12256_v60 = vor.u32 %v13704_v24, %v12255_v42  ;;  %v12375_v36 = vld [vmem:[%s19052_s9 + $0x1e0] sm:$0xf]  ;;  %7916 = vmatpush.bf16.msra.mxu1 %v12384_v38  ;;  %v13684_v22 = vld [vmem:[%s19052_s9 + $0x54] sm:$0xf0]  ;;  %v12223_v24 = vld [vmem:[%s19052_s9 + $0xb0] sm:$0xf] }
 0x967   :  { %v18135_v57 = vadd.f32 %v7178_v2, %v7151_v47  ;;  %v7096_v16 = vpop.f32.mrf.mxu2  ;;  %v12319_v2 = vld [vmem:[%s19052_s9 + $0x170] sm:$0xf]  ;;  %v13718_v47 = vld [vmem:[%s19052_s9 + $0x164] sm:$0xf0]  ;;  %v12376_v29 = vor.u32 %v13734_v4, %v12375_v36  ;;  %v13728_v1 = vld [vmem:[%s19052_s9 + $0x1b4] sm:$0xf0] }
 0x968   :  { %v12320_v45 = vor.u32 %v13720_v41, %v12319_v2  ;;  %7860 = vmatpush.bf16.msrb.mxu3 %v12256_v60  ;;  %v12312_v17 = vor.u32 %v13718_v47, %v12311_v26  ;;  %v13696_v60 = vld [vmem:[%s19052_s9 + $0xb4] sm:$0xf0]  ;;  %v12287_v41 = vld [vmem:[%s19052_s9 + $0x130] sm:$0xf]  ;;  %v12279_v47 = vld [vmem:[%s19052_s9 + $0x120] sm:$0xf] }
 0x969   :  { %v7230_v56 = vmul.f32 %v18137_v30, %v18135_v57  ;;  %v12224_v38 = vor.u32 %v13696_v60, %v12223_v24  ;;  %v12288_v6 = vor.u32 %v13712_v25, %v12287_v41  ;;  %v13710_v36 = vld [vmem:[%s19052_s9 + $0x124] sm:$0xf0]  ;;  %v12343_v4 = vld [vmem:[%s19052_s9 + $0x1a0] sm:$0xf]  ;;  %v7279_v25 = vld [vmem:[%s19054_s11 + $0x6] ss:$0 sm:$0xff] }
 0x96a   :  { %v7124_v52 = vpop.f32.mrf.mxu3  ;;  %7888 = vmatpush.bf16.msra.mxu0 %v12320_v45  ;;  %7917 = vmatpush.bf16.msra.mxu1 %v12376_v29  ;;  %v12351_v45 = vld [vmem:[%s19052_s9 + $0x1b0] sm:$0xf]  ;;  %v13722_v41 = vld [vmem:[%s19052_s9 + $0x184] sm:$0xf0] }
 0x96b   :  { %v7236_v63 = vadd.f32 %v7235_v14, %v7230_v56  ;;  %v7250_v33 = vmul.f32 %v7230_v56, %v18135_v57  ;;  %v12176_v14 = vor.u32 %v13684_v22, %v12175_v39  ;;  %v12239_v56 = vld [vmem:[%s19052_s9 + $0xd0] sm:$0xf]  ;;  %v13700_v52 = vld [vmem:[%s19052_s9 + $0xd4] sm:$0xf0]  ;;  %v12352_v26 = vor.u32 %v13728_v1, %v12351_v45  ;;  %v13726_v39 = vld [vmem:[%s19052_s9 + $0x1a4] sm:$0xf0] }
 0x96c   :  { %7861 = vmatpush.bf16.msrb.mxu3 %v12248_v44 }
 0x96d   :  { %v7237_v8 = vrot.slane %v7236_v63, 4  ;;  %v7256_v54 = vadd.f32 %v7255_v11, %v7250_v33  ;;  %v12240_v11 = vor.u32 %v13700_v52, %v12239_v56  ;;  %v13716_v33 = vld [vmem:[%s19052_s9 + $0x154] sm:$0xf0]  ;;  %7834 = vmatpush.bf16.msrb.mxu2 %v12176_v14  ;;  %v12143_v14 = vld [vmem:[%s19052_s9 + $0x10] sm:$0xf]  ;;  %v12280_v52 = vor.u32 %v13710_v36, %v12279_v47 }
 0x96e   :  { %7889 = vmatpush.bf16.msra.mxu0 %v12312_v17  ;;  %v12152_v17 = vor.u32 %v13678_v7, %v12151_v35  ;;  %v13676_v56 = vld [vmem:[%s19052_s9 + $0x14] sm:$0xf0] }
 0x96f   :  { %v7238_v51 = vadd.f32 %v7237_v8, %v7236_v63  ;;  %v7257_v20 = vrot.slane %v7256_v54, 4  ;;  %v12303_v63 = vld [vmem:[%s19052_s9 + $0x150] sm:$0xf] }
 0x970   :  { %v12367_v8 = vld [vmem:[%s19052_s9 + $0x1d0] sm:$0xf]  ;;  %7862 = vmatpush.bf16.msrb.mxu3 %v12240_v11 }
 0x971   :  { %v7239_v55 = vrot.slane %v7238_v51, 2  ;;  %v7258_v62 = vadd.f32 %v7257_v20, %v7256_v54  ;;  %v12304_v54 = vor.u32 %v13716_v33, %v12303_v63  ;;  %v12167_v20 = vld [vmem:[%s19052_s9 + $0x40] sm:$0xf]  ;;  %v12207_v11 = vld [vmem:[%s19052_s9 + $0x90] sm:$0xf] }
 0x972   :  { %v13692_v63 = vld [vmem:[%s19052_s9 + $0x94] sm:$0xf0] }
 0x973   :  { %v7240_v5 = vadd.f32 %v7239_v55, %v7238_v51  ;;  %v7259_v0 = vrot.slane %v7258_v62, 2  ;;  %v13732_v51 = vld [vmem:[%s19052_s9 + $0x1d4] sm:$0xf0]  ;;  %v13682_v55 = vld [vmem:[%s19052_s9 + $0x44] sm:$0xf0]  ;;  %7890 = vmatpush.bf16.msra.mxu0 %v12304_v54 }
 0x974   :  { %v12271_v54 = vld [vmem:[%s19052_s9 + $0x110] sm:$0xf] }
 0x975   :  { %v7241_v28 = vrot.slane %v7240_v5, 1  ;;  %v7260_v43 = vadd.f32 %v7259_v0, %v7258_v62  ;;  %v12368_v62 = vor.u32 %v13732_v51, %v12367_v8  ;;  %v13698_v0 = vld [vmem:[%s19052_s9 + $0xc4] sm:$0xf0]  ;;  %v12344_v8 = vor.u32 %v13726_v39, %v12343_v4  ;;  %v13708_v51 = vld [vmem:[%s19052_s9 + $0x114] sm:$0xf0] }
 0x977   :  { %v7242_v50 = vadd.f32 %v7241_v28, %v7240_v5  ;;  %v7261_v13 = vrot.slane %v7260_v43, 1  ;;  %v12231_v5 = vld [vmem:[%s19052_s9 + $0xc0] sm:$0xf]  ;;  %7918 = vmatpush.bf16.msra.mxu1 %v12368_v62  ;;  %v13724_v62 = vld [vmem:[%s19052_s9 + $0x194] sm:$0xf0] }
 0x978   :  { %v12295_v28 = vld [vmem:[%s19052_s9 + $0x140] sm:$0xf] }
 0x979   :  { %v18148_v40 = vmul.f32 0.03125, %v7242_v50  ;;  %v7262_v58 = vadd.f32 %v7261_v13, %v7260_v43  ;;  %v12168_v43 = vor.u32 %v13682_v55, %v12167_v20  ;;  %v13730_v50 = vld [vmem:[%s19052_s9 + $0x1c4] sm:$0xf0]  ;;  %v12232_v13 = vor.u32 %v13698_v0, %v12231_v5  ;;  %v12335_v55 = vld [vmem:[%s19052_s9 + $0x190] sm:$0xf] }
 0x97a   :  { %v12296_v42 = vor.u32 %v13714_v9, %v12295_v28  ;;  %v12360_v2 = vor.u32 %v13730_v50, %v12359_v46  ;;  %v12144_v20 = vor.u32 %v13676_v56, %v12143_v14  ;;  %v7266_v5 = vld [vmem:[#allocation14 + $0x6] ss:$0 sm:$0xff]  ;;  %v12208_v28 = vor.u32 %v13692_v63, %v12207_v11  ;;  %v13674_v9 = vld [vmem:[%s19052_s9 + $0x4] sm:$0xf0]  ;;  %v12199_v50 = vld [vmem:[%s19052_s9 + $0x80] sm:$0xf] }
 0x97b   :  { %v7263_v10 = vmul.f32 0.03125, %v7262_v58  ;;  %v7264_v34 = vmul.f32 %v18148_v40, %v18148_v40  ;;  %v13680_v58 = vld [vmem:[%s19052_s9 + $0x34] sm:$0xf0]  ;;  %7835 = vmatpush.bf16.msrb.mxu2 %v12168_v43  ;;  %7863 = vmatpush.bf16.msrb.mxu3 %v12232_v13  ;;  %v12135_v43 = vld [vmem:[%s19052_s9] sm:$0xf]  ;;  %v12272_v46 = vor.u32 %v13708_v51, %v12271_v54 }
 0x97c   :  { %7891 = vmatpush.bf16.msra.mxu0 %v12296_v42  ;;  %7919 = vmatpush.bf16.msra.mxu1 %v12360_v2  ;;  %v13706_v42 = vld [vmem:[%s19052_s9 + $0x104] sm:$0xf0]  ;;  %v12136_v60 = vor.u32 %v13674_v9, %v12135_v43  ;;  %v12327_v2 = vld [vmem:[%s19052_s9 + $0x180] sm:$0xf] }
 0x97d   :  { %v7265_v21 = vsub.f32 %v7263_v10, %v7264_v34  ;;  %v12160_v34 = vor.u32 %v13680_v58, %v12159_v31  ;;  %v12336_v31 = vor.u32 %v13724_v62, %v12335_v55  ;;  %v12263_v58 = vld [vmem:[%s19052_s9 + $0x100] sm:$0xf]  ;;  %v12328_v1 = vor.u32 %v13722_v41, %v12327_v2  ;;  %v12193_v55 = vld [vmem:[%s19052_s9 + $0x78] sm:$0xf0] }
 0x97e   :  { %v12264_v45 = vor.u32 %v13706_v42, %v12263_v58  ;;  %v12321_v58 = vld [vmem:[%s19052_s9 + $0x178] sm:$0xf0]  ;;  %v13735_v42 = vld [vmem:[%s19052_s9 + $0x1f4] sm:$0xf] }
 0x97f   :  { %v18200_v16 = vadd.f32 1e-05, %v7265_v21  ;;  %v12215_v21 = vld [vmem:[%s19052_s9 + $0xa0] sm:$0xf]  ;;  %7836 = vmatpush.bf16.msrb.mxu2 %v12160_v34  ;;  %7864 = vmatpush.bf16.msrb.mxu3 %v12224_v38 }
 0x980   :  { %v12216_v29 = vor.u32 %v13694_v32, %v12215_v21  ;;  %7892 = vmatpush.bf16.msra.mxu0 %v12288_v6  ;;  %7920 = vmatpush.bf16.msra.mxu1 %v12352_v26 }
 0x981   :  { %14025 = vrsqrt.f32 %v18200_v16  ;;  %vm7274_vm9 = vweird.f32 %v18200_v16 }
 0x983   :  { %7837 = vmatpush.bf16.msrb.mxu2 %v12152_v17  ;;  %7865 = vmatpush.bf16.msrb.mxu3 %v12216_v29 }
 0x984   :  { %7893 = vmatpush.bf16.msra.mxu0 %v12280_v52  ;;  %7921 = vmatpush.bf16.msra.mxu1 %v12344_v8 }
 0x987   :  { %v14026_v10 = vpop.eup %14025  ;;  %7838 = vmatpush.bf16.msrb.mxu2 %v12144_v20  ;;  %7866 = vmatpush.bf16.msrb.mxu3 %v12208_v28  ;;  %v13687_v20 = vld [vmem:[%s19052_s9 + $0x74] sm:$0xf] }
 0x988   :  { %v7269_v18 = vmul.f32 %v14026_v10, %v18200_v16  ;;  %vm7275_vm8 = vweird.f32 %v14026_v10  ;;  %v13690_v16 = vld [vmem:[%s19052_s9 + $0x84] sm:$0xf0]  ;;  %7894 = vmatpush.bf16.msra.mxu0 %v12272_v46  ;;  %7922 = vmatpush.bf16.msra.mxu1 %v12336_v31  ;;  %v13719_v31 = vld [vmem:[%s19052_s9 + $0x174] sm:$0xf] }
 0x989   :  { %vm7276_vm10 = vmor %vm7274_vm9, %vm7275_vm8 }
 0x98a   :  { %v7270_v44 = vmul.f32 %v14026_v10, %v7269_v18 }
 0x98b   :  { %7839 = vmatpush.bf16.msrb.mxu2 %v12136_v60 }
 0x98c   :  { %v7271_v22 = vmul.f32 0.5, %v7270_v44  ;;  %7895 = vmatpush.bf16.msra.mxu0 %v12264_v45  ;;  %7923 = vmatpush.bf16.msra.mxu1 %v12328_v1 }
 0x98e   :  { %v7272_v33 = vsub.f32 1.5, %v7271_v22 }
 0x990   :  { %v7273_v0 = vmul.f32 %v14026_v10, %v7272_v33 }
 0x992   :  { %v7277_v13 = vsel %vm7276_vm10, %v14026_v10, %v7273_v0  ;;  %v12200_v10 = vor.u32 %v13690_v16, %v12199_v50  ;;  %v12196_v50 = vor.u32 %v13687_v20, %v12193_v55  ;;  %v13703_v16 = vld [vmem:[%s19052_s9 + $0xf4] sm:$0xf]  ;;  %v12241_v55 = vld [vmem:[%s19052_s9 + $0xd8] sm:$0xf0] }
 0x993   :  { %v7278_v24 = vmul.f32 %v7277_v13, %v7266_v5  ;;  %v12257_v13 = vld [vmem:[%s19052_s9 + $0xf8] sm:$0xf0] }
 0x994   :  { %7867 = vmatpush.bf16.msrb.mxu3 %v12200_v10  ;;  %7944 = vmatpush.bf16.msra.mxu2 %v12196_v50  ;;  %v13685_v10 = vld [vmem:[%s19052_s9 + $0x64] sm:$0xf]  ;;  %v13715_v50 = vld [vmem:[%s19052_s9 + $0x154] sm:$0xf] }
 0x995   :  { %v7280_v34 = vmul.f32 %v7278_v24, %v18148_v40  ;;  %v7282_v38 = vmul.f32 %v7278_v24, %v18101_v27  ;;  %v7283_v35 = vmul.f32 %v7278_v24, %v18097_v61  ;;  %v7284_v7 = vmul.f32 %v7278_v24, %v18103_v12 }
 0x996   :  { %v7285_v6 = vmul.f32 %v7278_v24, %v18107_v19  ;;  %v7286_v21 = vmul.f32 %v7278_v24, %v18113_v23  ;;  %v7287_v32 = vmul.f32 %v7278_v24, %v18120_v37  ;;  %v7288_v47 = vmul.f32 %v7278_v24, %v18135_v57  ;;  %v12385_v24 = vld [vmem:[%s19052_s9 + $0x1f8] sm:$0xf0] }
 0x997   :  { %v7281_v18 = vsub.f32 %v7279_v25, %v7280_v34 }
 0x999   :  { %v7289_v40 = vadd.f32 %v7282_v38, %v7281_v18  ;;  %v7290_v44 = vadd.f32 %v7283_v35, %v7281_v18  ;;  %v7291_v26 = vadd.f32 %v7284_v7, %v7281_v18  ;;  %v7292_v36 = vadd.f32 %v7285_v6, %v7281_v18  ;;  %v12185_v38 = vld [vmem:[%s19052_s9 + $0x68] sm:$0xf0] }
 0x99a   :  { %v7293_v27 = vadd.f32 %v7286_v21, %v7281_v18  ;;  %v7294_v17 = vadd.f32 %v7287_v32, %v7281_v18  ;;  %v7295_v23 = vadd.f32 %v7288_v47, %v7281_v18  ;;  %v12260_v18 = vor.u32 %v13703_v16, %v12257_v13  ;;  %v13701_v32 = vld [vmem:[%s19052_s9 + $0xe4] sm:$0xf]  ;;  %v12305_v16 = vld [vmem:[%s19052_s9 + $0x158] sm:$0xf0] }
 0x99b   :  { %v18356_v61 = vmul.f32 %v7289_v40, %v18093_v15  ;;  %v7297_v12 = vmul.f32 %v7290_v44, %v18095_v53  ;;  %v18360_v19 = vmul.f32 %v7291_v26, %v18099_v3  ;;  %v18363_v37 = vmul.f32 %v7292_v36, %v18115_v49  ;;  %v12249_v40 = vld [vmem:[%s19052_s9 + $0xe8] sm:$0xf0]  ;;  %v13717_v44 = vld [vmem:[%s19052_s9 + $0x164] sm:$0xf] }
 0x99c   :  { %v18366_v4 = vmul.f32 %v7293_v27, %v18122_v59  ;;  %v18369_v57 = vmul.f32 %v7294_v17, %v18128_v48  ;;  %v18410_v62 = vmul.f32 %v7295_v23, %v18137_v30  ;;  %v12324_v21 = vor.u32 %v13719_v31, %v12321_v58  ;;  %7972 = vmatpush.bf16.msra.mxu3 %v12260_v18  ;;  %v12313_v17 = vld [vmem:[%s19052_s9 + $0x168] sm:$0xf0] }
 0x99d   :  { %v18372_v39 = vpack.c.bf16 %v7297_v12, %v18356_v61  ;;  %v7317_v15 = vrot.slane %v18356_v61, 1  ;;  %v7318_v22 = vrot.slane %v7297_v12, 1  ;;  %v7320_v53 = vrot.slane %v18360_v19, 1  ;;  %v12377_v23 = vld [vmem:[%s19052_s9 + $0x1e8] sm:$0xf0] }
 0x99e   :  { %v7346_v3 = vrot.slane %v18356_v61, 5  ;;  %v7347_v29 = vrot.slane %v7297_v12, 5  ;;  %v7349_v49 = vrot.slane %v18360_v19, 5  ;;  %v7375_v14 = vrot.slane %v18356_v61, 6  ;;  %8000 = vmatpush.bf16.msrb.mxu0 %v12324_v21  ;;  %v13731_v61 = vld [vmem:[%s19052_s9 + $0x1d4] sm:$0xf] }
 0x99f   :  { %7840 = vmatmul.bf16.vlgmr.msrb.gmra.mxu2 %v18372_v39  ;;  %v7319_v59 = vsel %vm291_vm0, %v7317_v15, %v7318_v22  ;;  %v7321_v48 = vsel %vm291_vm0, %v7318_v22, %v7320_v53  ;;  %v7376_v56 = vrot.slane %v7297_v12, 6  ;;  %v7378_v52 = vrot.slane %v18360_v19, 6  ;;  %v13733_v12 = vld [vmem:[%s19052_s9 + $0x1e4] sm:$0xf]  ;;  %v12225_v21 = vld [vmem:[%s19052_s9 + $0xb8] sm:$0xf0] }
 0x9a0   :  { %v18387_v11 = vpack.c.bf16 %v7321_v48, %v7319_v59  ;;  %v7348_v63 = vsel %vm5442_vm15, %v7346_v3, %v7347_v29  ;;  %v7350_v33 = vsel %vm5442_vm15, %v7347_v29, %v7349_v49  ;;  %v7322_v0 = vrot.slane %v18363_v37, 1  ;;  %v13683_v48 = vld [vmem:[%s19052_s9 + $0x54] sm:$0xf] }
 0x9a1   :  { %v18395_v8 = vpack.c.bf16 %v7350_v33, %v7348_v63  ;;  %v7377_v54 = vsel %vm5472_vm1, %v7375_v14, %v7376_v56  ;;  %v7379_v51 = vsel %vm5472_vm1, %v7376_v56, %v7378_v52  ;;  %v7324_v28 = vrot.slane %v18366_v4, 1  ;;  %v12177_v56 = vld [vmem:[%s19052_s9 + $0x58] sm:$0xf0]  ;;  %v13699_v63 = vld [vmem:[%s19052_s9 + $0xd4] sm:$0xf] }
 0x9a2   :  { %7868 = vmatmul.bf16.vlgmr.msrb.gmra.mxu3 %v18387_v11  ;;  %v18413_v5 = vpack.c.bf16 %v7379_v51, %v7377_v54  ;;  %v7351_v43 = vrot.slane %v18363_v37, 5  ;;  %v7353_v9 = vrot.slane %v18366_v4, 5  ;;  %v7382_v46 = vrot.slane %v18366_v4, 6 }
 0x9a3   :  { %7896 = vmatmul.bf16.vlgmr.msra.gmra.mxu0 %v18395_v8  ;;  %v18423_v30 = vpack.c.bf16 %v18369_v57, %v18366_v4  ;;  %v7380_v60 = vrot.slane %v18363_v37, 6  ;;  %v7326_v2 = vrot.slane %v18369_v57, 1  ;;  %v7328_v41 = vrot.slane %v18410_v62, 1  ;;  %v12297_v4 = vld [vmem:[%s19052_s9 + $0x148] sm:$0xf0] }
 0x9a4   :  { %7924 = vmatmul.bf16.vlgmr.msra.gmra.mxu1 %v18413_v5  ;;  %v7355_v25 = vrot.slane %v18369_v57, 5  ;;  %v7357_v34 = vrot.slane %v18410_v62, 5  ;;  %v7384_v45 = vrot.slane %v18369_v57, 6  ;;  %v7386_v1 = vrot.slane %v18410_v62, 6 }
 0x9a5   :  { %v7327_v35 = vsel %vm291_vm0, %v7324_v28, %v7326_v2  ;;  %v7329_v7 = vsel %vm291_vm0, %v7326_v2, %v7328_v41  ;;  %v12388_v29 = vor.u32 %v13735_v42, %v12385_v24  ;;  %v12188_v59 = vor.u32 %v13685_v10, %v12185_v38  ;;  %v13681_v42 = vld [vmem:[%s19052_s9 + $0x44] sm:$0xf]  ;;  %v12169_v24 = vld [vmem:[%s19052_s9 + $0x48] sm:$0xf0] }
 0x9a6   :  { %v7356_v6 = vsel %vm5442_vm15, %v7353_v9, %v7355_v25  ;;  %v18471_v26 = vpack.c.bf16 %v7329_v7, %v7327_v35  ;;  %v7358_v47 = vsel %vm5442_vm15, %v7355_v25, %v7357_v34  ;;  %v7385_v36 = vsel %vm5472_vm1, %v7382_v46, %v7384_v45  ;;  %v13729_v38 = vld [vmem:[%s19052_s9 + $0x1c4] sm:$0xf]  ;;  %v12361_v35 = vld [vmem:[%s19052_s9 + $0x1c8] sm:$0xf0] }
 0x9a7   :  { %v7387_v27 = vsel %vm5472_vm1, %v7384_v45, %v7386_v1  ;;  %v18487_v57 = vpack.c.bf16 %v7358_v47, %v7356_v6  ;;  %v18502_v33 = vpack.c.bf16 %v18363_v37, %v18360_v19  ;;  %v7323_v54 = vsel %vm291_vm0, %v7320_v53, %v7322_v0  ;;  %8028 = vmatpush.bf16.msrb.mxu1 %v12388_v29  ;;  %v12161_v45 = vld [vmem:[%s19052_s9 + $0x38] sm:$0xf0]  ;;  %v13695_v6 = vld [vmem:[%s19052_s9 + $0xb4] sm:$0xf]  ;;  %v13693_v29 = vld [vmem:[%s19052_s9 + $0xa4] sm:$0xf] }
 0x9a8   :  { %v18489_v22 = vpack.c.bf16 %v7387_v27, %v7385_v36  ;;  %v12252_v51 = vor.u32 %v13701_v32, %v12249_v40  ;;  %v12316_v20 = vor.u32 %v13717_v44, %v12313_v17  ;;  %v7325_v13 = vsel %vm291_vm0, %v7322_v0, %v7324_v28  ;;  %7945 = vmatpush.bf16.msra.mxu2 %v12188_v59  ;;  %v13711_v32 = vld [vmem:[%s19052_s9 + $0x134] sm:$0xf]  ;;  %v12289_v47 = vld [vmem:[%s19052_s9 + $0x138] sm:$0xf0]  ;;  %v12217_v59 = vld [vmem:[%s19052_s9 + $0xa8] sm:$0xf0] }
 0x9a9   :  { %v12380_v31 = vor.u32 %v13733_v12, %v12377_v23  ;;  %v12180_v53 = vor.u32 %v13683_v48, %v12177_v56  ;;  %v12244_v58 = vor.u32 %v13699_v63, %v12241_v55  ;;  %v18526_v2 = vsel %vm291_vm0, %v7328_v41, %v7317_v15  ;;  %v13713_v41 = vld [vmem:[%s19052_s9 + $0x144] sm:$0xf]  ;;  %v13727_v36 = vld [vmem:[%s19052_s9 + $0x1b4] sm:$0xf]  ;;  %v12353_v27 = vld [vmem:[%s19052_s9 + $0x1b8] sm:$0xf0] }
 0x9aa   :  { %7973 = vmatpush.bf16.msra.mxu3 %v12252_v51  ;;  %v18531_v0 = vsel %vm5442_vm15, %v7357_v34, %v7346_v3  ;;  %v18536_v28 = vsel %vm5472_vm1, %v7386_v1, %v7375_v14  ;;  %v7352_v25 = vsel %vm5442_vm15, %v7349_v49, %v7351_v43  ;;  %v7354_v15 = vsel %vm5442_vm15, %v7351_v43, %v7353_v9  ;;  %v12369_v14 = vld [vmem:[%s19052_s9 + $0x1d8] sm:$0xf0]  ;;  %v13697_v43 = vld [vmem:[%s19052_s9 + $0xc4] sm:$0xf]  ;;  %v12233_v9 = vld [vmem:[%s19052_s9 + $0xc8] sm:$0xf0] }
 0x9ab   :  { %8001 = vmatpush.bf16.msrb.mxu0 %v12316_v20  ;;  %v12308_v3 = vor.u32 %v13715_v50, %v12305_v16  ;;  %v7381_v49 = vsel %vm5472_vm1, %v7378_v52, %v7380_v60  ;;  %v7383_v37 = vsel %vm5472_vm1, %v7380_v60, %v7382_v46  ;;  %v18570_v10 = vpack.c.bf16 %v7325_v13, %v7323_v54  ;;  %v13679_v34 = vld [vmem:[%s19052_s9 + $0x34] sm:$0xf]  ;;  %v13677_v12 = vld [vmem:[%s19052_s9 + $0x24] sm:$0xf]  ;;  %v12153_v23 = vld [vmem:[%s19052_s9 + $0x28] sm:$0xf0] }
 0x9ac   :  { %8029 = vmatpush.bf16.msrb.mxu1 %v12380_v31  ;;  %7946 = vmatpush.bf16.msra.mxu2 %v12180_v53  ;;  %v12172_v19 = vor.u32 %v13681_v42, %v12169_v24  ;;  %v18575_v52 = vpack.c.bf16 %v7354_v15, %v7352_v25  ;;  %v12372_v46 = vor.u32 %v13731_v61, %v12369_v14  ;;  %v13709_v48 = vld [vmem:[%s19052_s9 + $0x124] sm:$0xf]  ;;  %v12281_v56 = vld [vmem:[%s19052_s9 + $0x128] sm:$0xf0]  ;;  %v13675_v55 = vld [vmem:[%s19052_s9 + $0x14] sm:$0xf] }
 0x9ad   :  { %v12236_v60 = vor.u32 %v13697_v43, %v12233_v9  ;;  %v18584_v1 = vpack.c.bf16 %v7383_v37, %v7381_v49  ;;  %v12300_v18 = vor.u32 %v13713_v41, %v12297_v4  ;;  %v12164_v7 = vor.u32 %v13679_v34, %v12161_v45  ;;  %v13725_v20 = vld [vmem:[%s19052_s9 + $0x1a4] sm:$0xf]  ;;  %v12145_v50 = vld [vmem:[%s19052_s9 + $0x18] sm:$0xf0]  ;;  %v12345_v13 = vld [vmem:[%s19052_s9 + $0x1a8] sm:$0xf0] }
 0x9ae   :  { %7974 = vmatpush.bf16.msra.mxu3 %v12244_v58  ;;  %v12364_v40 = vor.u32 %v13729_v38, %v12361_v35  ;;  %v12228_v44 = vor.u32 %v13695_v6, %v12225_v21  ;;  %v12292_v17 = vor.u32 %v13711_v32, %v12289_v47  ;;  %v12156_v63 = vor.u32 %v13677_v12, %v12153_v23  ;;  %v13691_v31 = vld [vmem:[%s19052_s9 + $0x94] sm:$0xf]  ;;  %v12209_v53 = vld [vmem:[%s19052_s9 + $0x98] sm:$0xf0]  ;;  %v12137_v61 = vld [vmem:[%s19052_s9 + $0x8] sm:$0xf0] }
 0x9af   :  { %7845 = vmatmul.bf16.gmra.mxu2 %v18502_v33  ;;  %8002 = vmatpush.bf16.msrb.mxu0 %v12308_v3  ;;  %v12356_v54 = vor.u32 %v13727_v36, %v12353_v27  ;;  %v12220_v51 = vor.u32 %v13693_v29, %v12217_v59  ;;  %v12284_v16 = vor.u32 %v13709_v48, %v12281_v56  ;;  %v13707_v58 = vld [vmem:[%s19052_s9 + $0x114] sm:$0xf]  ;;  %v12273_v42 = vld [vmem:[%s19052_s9 + $0x118] sm:$0xf0]  ;;  %v13673_v3 = vld [vmem:[%s19052_s9 + $0x4] sm:$0xf]  ;;  %v18714_v56 = vpop.permute.xlu1 %8065 }
 0x9b0   :  { %7947 = vmatpush.bf16.msra.mxu2 %v12172_v19  ;;  %8030 = vmatpush.bf16.msrb.mxu1 %v12372_v46  ;;  %v12148_v24 = vor.u32 %v13675_v55, %v12145_v50  ;;  %v12348_v25 = vor.u32 %v13725_v20, %v12345_v13  ;;  %v12212_v15 = vor.u32 %v13691_v31, %v12209_v53  ;;  %v13723_v49 = vld [vmem:[%s19052_s9 + $0x194] sm:$0xf]  ;;  %v12337_v37 = vld [vmem:[%s19052_s9 + $0x198] sm:$0xf0]  ;;  %v13689_v43 = vld [vmem:[%s19052_s9 + $0x84] sm:$0xf]  ;;  %v18718_v20 = vpop.permute.xlu2 %8070  ;;  %v18722_v53 = vpop.permute.xlu0 %8075 }
 0x9b1   :  { %v12276_v14 = vor.u32 %v13707_v58, %v12273_v42  ;;  %v12201_v9 = vld [vmem:[%s19052_s9 + $0x88] sm:$0xf0]  ;;  %v13705_v41 = vld [vmem:[%s19052_s9 + $0x104] sm:$0xf]  ;;  %v12140_v19 = vor.u32 %v13673_v3, %v12137_v61  ;;  %v12340_v46 = vor.u32 %v13723_v49, %v12337_v37  ;;  %v7444_v35 = vpack.c.bf16 %v18410_v62, %v18410_v62 }
 0x9b2   :  { %7873 = vmatmul.bf16.gmra.mxu3 %v18570_v10  ;;  %v12265_v4 = vld [vmem:[%s19052_s9 + $0x108] sm:$0xf0]  ;;  %v13721_v45 = vld [vmem:[%s19052_s9 + $0x184] sm:$0xf]  ;;  %v7446_v6 = vpack.c.bf16 %v18531_v0, %v18531_v0  ;;  %v7447_v21 = vpack.c.bf16 %v18536_v28, %v18536_v28  ;;  %vm8209_vm1 = vcmask 1040384  }
 0x9b3   :  { %7901 = vmatmul.bf16.gmra.mxu0 %v18575_v52  ;;  %7975 = vmatpush.bf16.msra.mxu3 %v12236_v60  ;;  %v12204_v60 = vor.u32 %v13689_v43, %v12201_v9  ;;  %v12268_v34 = vor.u32 %v13705_v41, %v12265_v4 }
 0x9b4   :  { %7929 = vmatmul.bf16.gmra.mxu1 %v18584_v1  ;;  %8003 = vmatpush.bf16.msrb.mxu0 %v12300_v18  ;;  %v12329_v18 = vld [vmem:[%s19052_s9 + $0x188] sm:$0xf0] }
 0x9b5   :  { %7948 = vmatpush.bf16.msra.mxu2 %v12164_v7  ;;  %8031 = vmatpush.bf16.msrb.mxu1 %v12364_v40  ;;  %v12332_v38 = vor.u32 %v13721_v45, %v12329_v18  ;;  %v7445_v7 = vpack.c.bf16 %v18526_v2, %v18526_v2 }
 0x9b7   :  { %7976 = vmatpush.bf16.msra.mxu3 %v12228_v44  ;;  %v18730_v3 = vpop.permute.xlu1 %8080 }
 0x9b8   :  { %8004 = vmatpush.bf16.msrb.mxu0 %v12292_v17  ;;  %v18735_v49 = vpop.permute.xlu2 %8085 }
 0x9b9   :  { %7949 = vmatpush.bf16.msra.mxu2 %v12156_v63  ;;  %8032 = vmatpush.bf16.msrb.mxu1 %v12356_v54 }
 0x9bb   :  { %7977 = vmatpush.bf16.msra.mxu3 %v12220_v51 }
 0x9bc   :  { %8005 = vmatpush.bf16.msrb.mxu0 %v12284_v16 }
 0x9bd   :  { %7950 = vmatpush.bf16.msra.mxu2 %v12148_v24  ;;  %8033 = vmatpush.bf16.msrb.mxu1 %v12348_v25 }
 0x9bf   :  { %7850 = vmatmul.bf16.gmra.mxu2 %v18423_v30  ;;  %7978 = vmatpush.bf16.msra.mxu3 %v12212_v15 }
 0x9c0   :  { %8006 = vmatpush.bf16.msrb.mxu0 %v12276_v14 }
 0x9c1   :  { %7951 = vmatpush.bf16.msra.mxu2 %v12140_v19  ;;  %8034 = vmatpush.bf16.msrb.mxu1 %v12340_v46 }
 0x9c2   :  { %7878 = vmatmul.bf16.gmra.mxu3 %v18471_v26 }
 0x9c3   :  { %7906 = vmatmul.bf16.gmra.mxu0 %v18487_v57  ;;  %7979 = vmatpush.bf16.msra.mxu3 %v12204_v60 }
 0x9c4   :  { %7934 = vmatmul.bf16.gmra.mxu1 %v18489_v22  ;;  %8007 = vmatpush.bf16.msrb.mxu0 %v12268_v34 }
 0x9c5   :  { %8035 = vmatpush.bf16.msrb.mxu1 %v12332_v38 }
 0x9cf   :  { %7855 = vmatmul.bf16.gmra.mxu2 %v7444_v35 }
 0x9d2   :  { %7883 = vmatmul.bf16.gmra.mxu3 %v7445_v7 }
 0x9d3   :  { %7911 = vmatmul.bf16.gmra.mxu0 %v7446_v6 }
 0x9d4   :  { %7939 = vmatmul.bf16.gmra.mxu1 %v7447_v21 }
 0x9df   :  { %7952 = vmatmul.bf16.vlgmr.msra.gmra.mxu2 %v18372_v39 }
 0x9e2   :  { %7980 = vmatmul.bf16.vlgmr.msra.gmra.mxu3 %v18387_v11 }
 0x9e3   :  { %8008 = vmatmul.bf16.vlgmr.msrb.gmra.mxu0 %v18395_v8 }
 0x9e4   :  { %8036 = vmatmul.bf16.vlgmr.msrb.gmra.mxu1 %v18413_v5 }
 0x9ef   :  { %7957 = vmatmul.bf16.gmra.mxu2 %v18502_v33 }
 0x9f2   :  { %7985 = vmatmul.bf16.gmra.mxu3 %v18570_v10 }
 0x9f3   :  { %8013 = vmatmul.bf16.gmra.mxu0 %v18575_v52 }
 0x9f4   :  { %8041 = vmatmul.bf16.gmra.mxu1 %v18584_v1 }
 0x9ff   :  { %7962 = vmatmul.bf16.gmra.mxu2 %v18423_v30 }
 0xa02   :  { %7990 = vmatmul.bf16.gmra.mxu3 %v18471_v26 }
 0xa03   :  { %8018 = vmatmul.bf16.gmra.mxu0 %v18487_v57 }
 0xa04   :  { %8046 = vmatmul.bf16.gmra.mxu1 %v18489_v22 }
 0xa0f   :  { %7967 = vmatmul.bf16.gmra.mxu2 %v7444_v35 }
 0xa12   :  { %7995 = vmatmul.bf16.gmra.mxu3 %v7445_v7 }
 0xa13   :  { %8023 = vmatmul.bf16.gmra.mxu0 %v7446_v6 }
 0xa14   :  { %8051 = vmatmul.bf16.gmra.mxu1 %v7447_v21 }
 0xa20   :  { %v7897_v39 = vpop.f32.mrf.mxu0 }
 0xa21   :  { %v7925_v11 = vpop.f32.mrf.mxu1 }
 0xa22   :  { %v7841_v8 = vpop.f32.mrf.mxu2 }
 0xa25   :  { %v7869_v62 = vpop.f32.mrf.mxu3 }
 0xa26   :  { %v7870_v5 = vadd.f32 %v7869_v62, %v7841_v8 }
 0xa28   :  { %v7898_v33 = vadd.f32 %v7897_v39, %v7870_v5  ;;  %v7899_v2 = vpop.f32.mrf.mxu0 }
 0xa29   :  { %v7927_v0 = vpop.f32.mrf.mxu1 }
 0xa2a   :  { %v18708_v28 = vadd.f32 %v7925_v11, %v7898_v33  ;;  %v7843_v30 = vpop.f32.mrf.mxu2  ;;  %v18745_v11 = vpop.permute.xlu0 %8090 }
 0xa2c   :  { %v8098_v58 = vmul.f32 %v18714_v56, %v18708_v28 }
 0xa2d   :  { %v7871_v26 = vpop.f32.mrf.mxu3 }
 0xa2e   :  { %v7872_v10 = vadd.f32 %v7871_v26, %v7843_v30  ;;  %v8138_v37 = vmul.f32 %v8098_v58, %v18708_v28 }
 0xa30   :  { %v7900_v57 = vadd.f32 %v7899_v2, %v7872_v10  ;;  %v7902_v52 = vpop.f32.mrf.mxu0 }
 0xa31   :  { %v7930_v22 = vpop.f32.mrf.mxu1 }
 0xa32   :  { %v18710_v1 = vadd.f32 %v7927_v0, %v7900_v57  ;;  %v7846_v32 = vpop.f32.mrf.mxu2 }
 0xa34   :  { %v8100_v16 = vmul.f32 %v18718_v20, %v18710_v1 }
 0xa35   :  { %v7874_v40 = vpop.f32.mrf.mxu3 }
 0xa36   :  { %v7875_v44 = vadd.f32 %v7874_v40, %v7846_v32  ;;  %v8140_v61 = vmul.f32 %v8100_v16, %v18710_v1  ;;  %v8112_v9 = vadd.f32 %v8100_v16, %v8098_v58 }
 0xa38   :  { %v7903_v47 = vadd.f32 %v7902_v52, %v7875_v44  ;;  %v7904_v36 = vpop.f32.mrf.mxu0  ;;  %v8152_v46 = vadd.f32 %v8140_v61, %v8138_v37  ;;  %v18752_v44 = vpop.permute.xlu1 %8095 }
 0xa39   :  { %v7932_v27 = vpop.f32.mrf.mxu1 }
 0xa3a   :  { %v18712_v17 = vadd.f32 %v7930_v22, %v7903_v47  ;;  %v7848_v12 = vpop.f32.mrf.mxu2 }
 0xa3c   :  { %v8102_v24 = vmul.f32 %v18722_v53, %v18712_v17 }
 0xa3d   :  { %v7876_v23 = vpop.f32.mrf.mxu3 }
 0xa3e   :  { %v7877_v29 = vadd.f32 %v7876_v23, %v7848_v12  ;;  %v8142_v41 = vmul.f32 %v8102_v24, %v18712_v17  ;;  %v8113_v60 = vadd.f32 %v8112_v9, %v8102_v24 }
 0xa40   :  { %v7905_v59 = vadd.f32 %v7904_v36, %v7877_v29  ;;  %v7907_v48 = vpop.f32.mrf.mxu0  ;;  %v8153_v35 = vadd.f32 %v8152_v46, %v8142_v41 }
 0xa41   :  { %v7935_v63 = vpop.f32.mrf.mxu1 }
 0xa42   :  { %v18716_v54 = vadd.f32 %v7932_v27, %v7905_v59  ;;  %v7851_v51 = vpop.f32.mrf.mxu2 }
 0xa44   :  { %v8104_v14 = vmul.f32 %v18730_v3, %v18716_v54 }
 0xa45   :  { %v7879_v55 = vpop.f32.mrf.mxu3 }
 0xa46   :  { %v7880_v50 = vadd.f32 %v7879_v55, %v7851_v51  ;;  %v8144_v34 = vmul.f32 %v8104_v14, %v18716_v54  ;;  %v8114_v7 = vadd.f32 %v8113_v60, %v8104_v14 }
 0xa48   :  { %v7908_v13 = vadd.f32 %v7907_v48, %v7880_v50  ;;  %v7909_v31 = vpop.f32.mrf.mxu0  ;;  %v8154_v8 = vadd.f32 %v8153_v35, %v8144_v34 }
 0xa49   :  { %v7937_v42 = vpop.f32.mrf.mxu1 }
 0xa4a   :  { %v18728_v25 = vadd.f32 %v7935_v63, %v7908_v13  ;;  %v7853_v15 = vpop.f32.mrf.mxu2 }
 0xa4c   :  { %v8106_v19 = vmul.f32 %v18735_v49, %v18728_v25 }
 0xa4d   :  { %v7881_v43 = vpop.f32.mrf.mxu3 }
 0xa4e   :  { %v7882_v4 = vadd.f32 %v7881_v43, %v7853_v15  ;;  %v8146_v6 = vmul.f32 %v8106_v19, %v18728_v25  ;;  %v8115_v62 = vadd.f32 %v8114_v7, %v8106_v19 }
 0xa50   :  { %v7910_v45 = vadd.f32 %v7909_v31, %v7882_v4  ;;  %v7912_v18 = vpop.f32.mrf.mxu0  ;;  %v8155_v2 = vadd.f32 %v8154_v8, %v8146_v6 }
 0xa51   :  { %v7940_v38 = vpop.f32.mrf.mxu1 }
 0xa52   :  { %v18743_v21 = vadd.f32 %v7937_v42, %v7910_v45  ;;  %v7856_v39 = vpop.f32.mrf.mxu2 }
 0xa54   :  { %v8108_v5 = vmul.f32 %v18745_v11, %v18743_v21 }
 0xa55   :  { %v7884_v33 = vpop.f32.mrf.mxu3 }
 0xa56   :  { %v8116_v0 = vadd.f32 %v8115_v62, %v8108_v5  ;;  %v8148_v30 = vmul.f32 %v8108_v5, %v18743_v21  ;;  %v7885_v26 = vadd.f32 %v7884_v33, %v7856_v39 }
 0xa58   :  { %v8156_v10 = vadd.f32 %v8155_v2, %v8148_v30  ;;  %v7913_v57 = vadd.f32 %v7912_v18, %v7885_v26  ;;  %v7914_v52 = vpop.f32.mrf.mxu0 }
 0xa59   :  { %v7942_v22 = vpop.f32.mrf.mxu1 }
 0xa5a   :  { %v18750_v32 = vadd.f32 %v7940_v38, %v7913_v57  ;;  %v7858_v40 = vpop.f32.mrf.mxu2 }
 0xa5c   :  { %v8110_v47 = vmul.f32 %v18752_v44, %v18750_v32 }
 0xa5d   :  { %v7886_v36 = vpop.f32.mrf.mxu3 }
 0xa5e   :  { %v8117_v27 = vadd.f32 %v8116_v0, %v8110_v47  ;;  %v8150_v12 = vmul.f32 %v8110_v47, %v18750_v32 }
 0xa60   :  { %v8118_v23 = vrot.slane %v8117_v27, 4  ;;  %v8157_v29 = vadd.f32 %v8156_v10, %v8150_v12  ;;  %v8009_v59 = vpop.f32.mrf.mxu0 }
 0xa61   :  { %v8037_v48 = vpop.f32.mrf.mxu1 }
 0xa62   :  { %v8119_v63 = vadd.f32 %v8118_v23, %v8117_v27  ;;  %v8158_v51 = vrot.slane %v8157_v29, 4  ;;  %v7953_v55 = vpop.f32.mrf.mxu2 }
 0xa64   :  { %v8120_v50 = vrot.slane %v8119_v63, 2  ;;  %v8159_v16 = vadd.f32 %v8158_v51, %v8157_v29 }
 0xa65   :  { %v7981_v13 = vpop.f32.mrf.mxu3 }
 0xa66   :  { %v8121_v31 = vadd.f32 %v8120_v50, %v8119_v63  ;;  %v8160_v58 = vrot.slane %v8159_v16, 2  ;;  %v7982_v2 = vadd.f32 %v7981_v13, %v7953_v55 }
 0xa68   :  { %v8122_v42 = vrot.slane %v8121_v31, 1  ;;  %v8161_v24 = vadd.f32 %v8160_v58, %v8159_v16  ;;  %v8011_v15 = vpop.f32.mrf.mxu0  ;;  %v8010_v57 = vadd.f32 %v8009_v59, %v7982_v2 }
 0xa69   :  { %v8039_v61 = vpop.f32.mrf.mxu1 }
 0xa6a   :  { %v8123_v14 = vadd.f32 %v8122_v42, %v8121_v31  ;;  %v8162_v37 = vrot.slane %v8161_v24, 1  ;;  %v7955_v43 = vpop.f32.mrf.mxu2  ;;  %v18769_v23 = vadd.f32 %v8037_v48, %v8010_v57 }
 0xa6c   :  { %v18757_v9 = vmul.f32 0.03125, %v8123_v14  ;;  %v8163_v41 = vadd.f32 %v8162_v37, %v8161_v24  ;;  %v8099_v16 = vmul.f32 %v18714_v56, %v18769_v23 }
 0xa6d   :  { %v7983_v19 = vpop.f32.mrf.mxu3 }
 0xa6e   :  { %v18759_v4 = vmul.f32 0.03125, %v8163_v41  ;;  %v18763_v46 = vmul.f32 %v18757_v9, %v18757_v9  ;;  %v7984_v62 = vadd.f32 %v7983_v19, %v7955_v43  ;;  %v8139_v37 = vmul.f32 %v8099_v16, %v18769_v23 }
 0xa70   :  { %v8180_v60 = vsub.f32 %v18759_v4, %v18763_v46  ;;  %v8014_v34 = vpop.f32.mrf.mxu0  ;;  %v8012_v30 = vadd.f32 %v8011_v15, %v7984_v62 }
 0xa71   :  { %v8042_v45 = vpop.f32.mrf.mxu1 }
 0xa72   :  { %v7958_v18 = vpop.f32.mrf.mxu2  ;;  %v18767_v47 = vadd.f32 %v8039_v61, %v8012_v30 }
 0xa74   :  { %v8101_v51 = vmul.f32 %v18718_v20, %v18767_v47 }
 0xa75   :  { %v7986_v38 = vpop.f32.mrf.mxu3 }
 0xa76   :  { %v7987_v0 = vadd.f32 %v7986_v38, %v7958_v18  ;;  %v8141_v42 = vmul.f32 %v8101_v51, %v18767_v47  ;;  %v8124_v43 = vadd.f32 %v8101_v51, %v8099_v16 }
 0xa78   :  { %v8016_v35 = vpop.f32.mrf.mxu0  ;;  %v8015_v52 = vadd.f32 %v8014_v34, %v7987_v0  ;;  %v8164_v34 = vadd.f32 %v8141_v42, %v8139_v37 }
 0xa79   :  { %v8044_v7 = vpop.f32.mrf.mxu1 }
 0xa7a   :  { %v7960_v6 = vpop.f32.mrf.mxu2  ;;  %v18771_v29 = vadd.f32 %v8042_v45, %v8015_v52 }
 0xa7c   :  { %v8103_v13 = vmul.f32 %v18722_v53, %v18771_v29 }
 0xa7d   :  { %v7988_v39 = vpop.f32.mrf.mxu3 }
 0xa7e   :  { %v7989_v10 = vadd.f32 %v7988_v39, %v7960_v6  ;;  %v8143_v41 = vmul.f32 %v8103_v13, %v18771_v29  ;;  %v8125_v18 = vadd.f32 %v8124_v43, %v8103_v13 }
 0xa80   :  { %v8019_v8 = vpop.f32.mrf.mxu0  ;;  %v8017_v27 = vadd.f32 %v8016_v35, %v7989_v10  ;;  %v8165_v6 = vadd.f32 %v8164_v34, %v8143_v41 }
 0xa81   :  { %v8047_v5 = vpop.f32.mrf.mxu1 }
 0xa82   :  { %v7963_v33 = vpop.f32.mrf.mxu2  ;;  %v18775_v50 = vadd.f32 %v8044_v7, %v8017_v27 }
 0xa84   :  { %v8105_v15 = vmul.f32 %v18730_v3, %v18775_v50 }
 0xa85   :  { %v7991_v26 = vpop.f32.mrf.mxu3 }
 0xa86   :  { %v7992_v22 = vadd.f32 %v7991_v26, %v7963_v33  ;;  %v8145_v38 = vmul.f32 %v8105_v15, %v18775_v50  ;;  %v8126_v39 = vadd.f32 %v8125_v18, %v8105_v15 }
 0xa88   :  { %v8021_v40 = vpop.f32.mrf.mxu0  ;;  %v8020_v63 = vadd.f32 %v8019_v8, %v7992_v22  ;;  %v8166_v2 = vadd.f32 %v8165_v6, %v8145_v38 }
 0xa89   :  { %v8049_v36 = vpop.f32.mrf.mxu1 }
 0xa8a   :  { %v7965_v12 = vpop.f32.mrf.mxu2  ;;  %v18781_v31 = vadd.f32 %v8047_v5, %v8020_v63 }
 0xa8c   :  { %v8107_v19 = vmul.f32 %v18735_v49, %v18781_v31 }
 0xa8d   :  { %v7993_v55 = vpop.f32.mrf.mxu3 }
 0xa8e   :  { %v7994_v59 = vadd.f32 %v7993_v55, %v7965_v12  ;;  %v8147_v8 = vmul.f32 %v8107_v19, %v18781_v31  ;;  %v8127_v0 = vadd.f32 %v8126_v39, %v8107_v19 }
 0xa90   :  { %v8022_v48 = vadd.f32 %v8021_v40, %v7994_v59  ;;  %v8024_v58 = vpop.f32.mrf.mxu0  ;;  %v8167_v57 = vadd.f32 %v8166_v2, %v8147_v8 }
 0xa91   :  { %v8052_v24 = vpop.f32.mrf.mxu1 }
 0xa92   :  { %v18786_v61 = vadd.f32 %v8049_v36, %v8022_v48  ;;  %v7968_v14 = vpop.f32.mrf.mxu2  ;;  %v8184_v48 = vadd.f32 1e-05, %v8180_v60 }
 0xa94   :  { %v8109_v35 = vmul.f32 %v18745_v11, %v18786_v61  ;;  %14027 = vrsqrt.f32 %v8184_v48  ;;  %vm8192_vm14 = vweird.f32 %v8184_v48 }
 0xa95   :  { %v7996_v45 = vpop.f32.mrf.mxu3 }
 0xa96   :  { %v7997_v7 = vadd.f32 %v7996_v45, %v7968_v14  ;;  %v8149_v30 = vmul.f32 %v8109_v35, %v18786_v61  ;;  %v8128_v52 = vadd.f32 %v8127_v0, %v8109_v35  ;;  %v8183_v0 = vld [vmem:[#allocation14 + $0x7] ss:$8 sm:$0x3] }
 0xa98   :  { %v8025_v62 = vadd.f32 %v8024_v58, %v7997_v7  ;;  %v8026_v5 = vpop.f32.mrf.mxu0  ;;  %v8168_v36 = vadd.f32 %v8167_v57, %v8149_v30 }
 0xa99   :  { %v8054_v33 = vpop.f32.mrf.mxu1 }
 0xa9a   :  { %v18797_v26 = vadd.f32 %v8052_v24, %v8025_v62  ;;  %v7970_v10 = vpop.f32.mrf.mxu2  ;;  %v14028_v45 = vpop.eup %14027 }
 0xa9b   :  { %v8187_v35 = vmul.f32 %v14028_v45, %v8184_v48  ;;  %vm8193_vm11 = vweird.f32 %v14028_v45 }
 0xa9c   :  { %v8111_v22 = vmul.f32 %v18752_v44, %v18797_v26  ;;  %vm8194_vm2 = vmor %vm8192_vm14, %vm8193_vm11 }
 0xa9d   :  { %v7998_v40 = vpop.f32.mrf.mxu3  ;;  %v8188_v7 = vmul.f32 %v14028_v45, %v8187_v35 }
 0xa9e   :  { %v8129_v27 = vadd.f32 %v8128_v52, %v8111_v22  ;;  %v8151_v12 = vmul.f32 %v8111_v22, %v18797_v26 }
 0xa9f   :  { %v8189_v4 = vmul.f32 0.5, %v8188_v7 }
 0xaa0   :  { %v8130_v63 = vrot.slane %v8129_v27, 4  ;;  %v8169_v51 = vadd.f32 %v8168_v36, %v8151_v12 }
 0xaa1   :  { %v8190_v39 = vsub.f32 1.5, %v8189_v4 }
 0xaa2   :  { %v8131_v55 = vadd.f32 %v8130_v63, %v8129_v27  ;;  %v8170_v59 = vrot.slane %v8169_v51, 4 }
 0xaa3   :  { %v8191_v5 = vmul.f32 %v14028_v45, %v8190_v39 }
 0xaa4   :  { %v8132_v16 = vrot.slane %v8131_v55, 2  ;;  %v8171_v13 = vadd.f32 %v8170_v59, %v8169_v51  ;;  %v12389_v59 = vld [vmem:[%s19054_s11 + $0x7] ss:$8 sm:$0x3] }
 0xaa5   :  { %v8195_v10 = vsel %vm8194_vm2, %v14028_v45, %v8191_v5  ;;  %v8275_v5 = vld [vmem:[#allocation18] sm:$0xff] }
 0xaa6   :  { %v8133_v58 = vadd.f32 %v8132_v16, %v8131_v55  ;;  %v8172_v42 = vrot.slane %v8171_v13, 2 }
 0xaa8   :  { %v8134_v24 = vrot.slane %v8133_v58, 1  ;;  %v8173_v15 = vadd.f32 %v8172_v42, %v8171_v13 }
 0xaaa   :  { %v8135_v14 = vadd.f32 %v8134_v24, %v8133_v58  ;;  %v8174_v37 = vrot.slane %v8173_v15, 1 }
 0xaac   :  { %v8137_v43 = vmul.f32 0.03125, %v8135_v14  ;;  %v8175_v41 = vadd.f32 %v8174_v37, %v8173_v15 }
 0xaae   :  { %v8177_v19 = vmul.f32 0.03125, %v8175_v41  ;;  %v8179_v34 = vmul.f32 %v8137_v43, %v8137_v43 }
 0xab0   :  { %v8181_v18 = vsub.f32 %v8177_v19, %v8179_v34 }
 0xab2   :  { %v8185_v38 = vadd.f32 1e-05, %v8181_v18 }
 0xab4   :  { %14029 = vrsqrt.f32 %v8185_v38  ;;  %vm8202_vm12 = vweird.f32 %v8185_v38 }
 0xaba   :  { %v14030_v6 = vpop.eup %14029 }
 0xabb   :  { %v8197_v46 = vmul.f32 %v14030_v6, %v8185_v38  ;;  %vm8203_vm0 = vweird.f32 %v14030_v6 }
 0xabc   :  { %vm8204_vm13 = vmor %vm8202_vm12, %vm8203_vm0 }
 0xabd   :  { %v8198_v60 = vmul.f32 %v14030_v6, %v8197_v46 }
 0xabf   :  { %v8199_v8 = vmul.f32 0.5, %v8198_v60 }
 0xac1   :  { %v8200_v62 = vsub.f32 1.5, %v8199_v8 }
 0xac3   :  { %v8201_v33 = vmul.f32 %v14030_v6, %v8200_v62 }
 0xac5   :  { %v8205_v2 = vsel %vm8204_vm13, %v14030_v6, %v8201_v33  ;;  %v8280_v33 = vld [vmem:[#allocation18 + $0x28] sm:$0xff] }
 0xac6   :  { %v8208_v30 = vrot.slane %v8205_v2, 7  ;;  %v8281_v2 = vld [vmem:[#allocation18 + $0x30] sm:$0xff] }
 0xac8   :  { %v8210_v57 = vsel %vm8209_vm1, %v8195_v10, %v8208_v30  ;;  %v8283_v30 = vld [vmem:[#allocation18 + $0x40] sm:$0xff]  ;;  %v8284_v10 = vld [vmem:[#allocation18 + $0x48] sm:$0xff] }
 0xac9   :  { %v8212_v52 = vmul.f32 %v8210_v57, %v8183_v0  ;;  %v8282_v0 = vld [vmem:[#allocation18 + $0x38] sm:$0xff]  ;;  %v8285_v57 = vld [vmem:[#allocation18 + $0x50] sm:$0xff] }
 0xacb   :  { %v8216_v22 = vperm.slane %v8212_v52, 0  ;;  %v8217_v40 = vperm.slane %v8212_v52, 1  ;;  %v8286_v52 = vld [vmem:[#allocation18 + $0x58] sm:$0xff] }
 0xacd   :  { %v8220_v36 = vmul.f32 %v8216_v22, %v18757_v9  ;;  %v8221_v27 = vmul.f32 %v8217_v40, %v8137_v43  ;;  %v8240_v12 = vmul.f32 %v8216_v22, %v18750_v32  ;;  %v8238_v63 = vmul.f32 %v8216_v22, %v18743_v21 }
 0xace   :  { %v8236_v51 = vmul.f32 %v8216_v22, %v18728_v25  ;;  %v8237_v55 = vmul.f32 %v8217_v40, %v18781_v31  ;;  %v8241_v58 = vmul.f32 %v8217_v40, %v18797_v26  ;;  %v8239_v32 = vmul.f32 %v8217_v40, %v18786_v61 }
 0xacf   :  { %v8224_v16 = vrot.slane %v8221_v27, 7  ;;  %v8234_v21 = vmul.f32 %v8216_v22, %v18716_v54  ;;  %v8235_v25 = vmul.f32 %v8217_v40, %v18775_v50  ;;  %v8232_v31 = vmul.f32 %v8216_v22, %v18712_v17  ;;  %v8290_v27 = vld [vmem:[#allocation18 + $0x78] sm:$0xff] }
 0xad0   :  { %v8233_v24 = vmul.f32 %v8217_v40, %v18771_v29  ;;  %v8230_v15 = vmul.f32 %v8216_v22, %v18710_v1  ;;  %v8231_v29 = vmul.f32 %v8217_v40, %v18767_v47  ;;  %v8228_v1 = vmul.f32 %v8216_v22, %v18708_v28  ;;  %v8287_v22 = vld [vmem:[#allocation18 + $0x60] sm:$0xff] }
 0xad1   :  { %v8225_v13 = vsel %vm8209_vm1, %v8220_v36, %v8224_v16  ;;  %v8229_v18 = vmul.f32 %v8217_v40, %v18769_v23  ;;  %v8288_v40 = vld [vmem:[#allocation18 + $0x68] sm:$0xff]  ;;  %v8289_v36 = vld [vmem:[#allocation18 + $0x70] sm:$0xff] }
 0xad2   :  { %v8227_v48 = vsub.f32 %v12389_v59, %v8225_v13 }
 0xad4   :  { %v8243_v9 = vperm.slane %v8227_v48, 0  ;;  %v8244_v42 = vperm.slane %v8227_v48, 1 }
 0xad6   :  { %v8259_v14 = vadd.f32 %v8243_v9, %v8240_v12  ;;  %v8260_v37 = vadd.f32 %v8244_v42, %v8241_v58  ;;  %v8257_v43 = vadd.f32 %v8243_v9, %v8238_v63  ;;  %v8258_v41 = vadd.f32 %v8244_v42, %v8239_v32 }
 0xad7   :  { %v8255_v19 = vadd.f32 %v8243_v9, %v8236_v51  ;;  %v8256_v26 = vadd.f32 %v8244_v42, %v8237_v55  ;;  %v8253_v34 = vadd.f32 %v8243_v9, %v8234_v21  ;;  %v8254_v45 = vadd.f32 %v8244_v42, %v8235_v25 }
 0xad8   :  { %v8273_v61 = vmul.f32 %v8259_v14, %v18752_v44  ;;  %v8274_v54 = vmul.f32 %v8260_v37, %v18752_v44  ;;  %v8271_v50 = vmul.f32 %v8257_v43, %v18745_v11  ;;  %v8272_v17 = vmul.f32 %v8258_v41, %v18745_v11 }
 0xad9   :  { %v8251_v38 = vadd.f32 %v8243_v9, %v8232_v31  ;;  %v8252_v35 = vadd.f32 %v8244_v42, %v8233_v24  ;;  %v8249_v7 = vadd.f32 %v8243_v9, %v8230_v15  ;;  %v8250_v6 = vadd.f32 %v8244_v42, %v8231_v29 }
 0xada   :  { %8349 = vmatpush.msrb.mxu2 %v8273_v61  ;;  %8414 = vmatpush.msrb.mxu3 %v8274_v54  ;;  %v8247_v4 = vadd.f32 %v8243_v9, %v8228_v1  ;;  %v8248_v46 = vadd.f32 %v8244_v42, %v8229_v18  ;;  %v8269_v44 = vmul.f32 %v8255_v19, %v18735_v49 }
 0xadb   :  { %v8270_v11 = vmul.f32 %v8256_v26, %v18735_v49  ;;  %v8267_v28 = vmul.f32 %v8253_v34, %v18730_v3  ;;  %v8268_v47 = vmul.f32 %v8254_v45, %v18730_v3  ;;  %v8265_v23 = vmul.f32 %v8251_v38, %v18722_v53  ;;  %v8278_v3 = vld [vmem:[#allocation18 + $0x18] sm:$0xff] }
 0xadc   :  { %8350 = vmatpush.msrb.mxu2 %v8271_v50  ;;  %8415 = vmatpush.msrb.mxu3 %v8272_v17  ;;  %v8266_v60 = vmul.f32 %v8252_v35, %v18722_v53  ;;  %v8263_v39 = vmul.f32 %v8249_v7, %v18718_v20  ;;  %v8264_v8 = vmul.f32 %v8250_v6, %v18718_v20  ;;  %v8276_v53 = vld [vmem:[#allocation18 + $0x8] sm:$0xff]  ;;  %v8277_v20 = vld [vmem:[#allocation18 + $0x10] sm:$0xff] }
 0xadd   :  { %v8261_v49 = vmul.f32 %v8247_v4, %v18714_v56  ;;  %v8262_v62 = vmul.f32 %v8248_v46, %v18714_v56  ;;  %v8279_v56 = vld [vmem:[#allocation18 + $0x20] sm:$0xff] }
 0xade   :  { %8351 = vmatpush.msrb.mxu2 %v8269_v44  ;;  %8416 = vmatpush.msrb.mxu3 %v8270_v11 }
 0xae0   :  { %8352 = vmatpush.msrb.mxu2 %v8267_v28  ;;  %8417 = vmatpush.msrb.mxu3 %v8268_v47 }
 0xae2   :  { %8353 = vmatpush.msrb.mxu2 %v8265_v23  ;;  %8418 = vmatpush.msrb.mxu3 %v8266_v60 }
 0xae4   :  { %8354 = vmatpush.msrb.mxu2 %v8263_v39  ;;  %8419 = vmatpush.msrb.mxu3 %v8264_v8 }
 0xae6   :  { %8355 = vmatpush.msrb.mxu2 %v8261_v49  ;;  %8420 = vmatpush.msrb.mxu3 %v8262_v62 }
 0xae7   :  { %12390 = vmatmul.msk.f32.vlgmr.msrb.gmra.mxu2 %vm8291_vm3, %v8275_v5  ;;  %12406 = vmatmul.msk.f32.vlgmr.msrb.gmra.mxu3 %vm8291_vm3, %v8275_v5 }
 0xaef   :  { %12391 = vmatmul.msk.f32.gmra.mxu2 %vm8291_vm3, %v8276_v53  ;;  %12407 = vmatmul.msk.f32.gmra.mxu3 %vm8291_vm3, %v8276_v53 }
 0xaf7   :  { %12392 = vmatmul.msk.f32.gmra.mxu2 %vm8291_vm3, %v8277_v20  ;;  %12408 = vmatmul.msk.f32.gmra.mxu3 %vm8291_vm3, %v8277_v20 }
 0xaff   :  { %12393 = vmatmul.msk.f32.gmra.mxu2 %vm8291_vm3, %v8278_v3  ;;  %12409 = vmatmul.msk.f32.gmra.mxu3 %vm8291_vm3, %v8278_v3 }
 0xb07   :  { %12394 = vmatmul.msk.f32.gmra.mxu2 %vm8291_vm3, %v8279_v56  ;;  %12410 = vmatmul.msk.f32.gmra.mxu3 %vm8291_vm3, %v8279_v56 }
 0xb0f   :  { %12395 = vmatmul.msk.f32.gmra.mxu2 %vm8291_vm3, %v8280_v33  ;;  %12411 = vmatmul.msk.f32.gmra.mxu3 %vm8291_vm3, %v8280_v33 }
 0xb17   :  { %12396 = vmatmul.msk.f32.gmra.mxu2 %vm8291_vm3, %v8281_v2  ;;  %12412 = vmatmul.msk.f32.gmra.mxu3 %vm8291_vm3, %v8281_v2 }
 0xb1f   :  { %12397 = vmatmul.msk.f32.gmra.mxu2 %vm8291_vm3, %v8282_v0  ;;  %12413 = vmatmul.msk.f32.gmra.mxu3 %vm8291_vm3, %v8282_v0 }
 0xb27   :  { %12398 = vmatmul.msk.f32.gmra.mxu2 %vm8291_vm3, %v8283_v30  ;;  %12414 = vmatmul.msk.f32.gmra.mxu3 %vm8291_vm3, %v8283_v30 }
 0xb2f   :  { %12399 = vmatmul.msk.f32.gmra.mxu2 %vm8291_vm3, %v8284_v10  ;;  %12415 = vmatmul.msk.f32.gmra.mxu3 %vm8291_vm3, %v8284_v10 }
 0xb37   :  { %12400 = vmatmul.msk.f32.gmra.mxu2 %vm8291_vm3, %v8285_v57  ;;  %12416 = vmatmul.msk.f32.gmra.mxu3 %vm8291_vm3, %v8285_v57 }
 0xb3f   :  { %12401 = vmatmul.msk.f32.gmra.mxu2 %vm8291_vm3, %v8286_v52  ;;  %12417 = vmatmul.msk.f32.gmra.mxu3 %vm8291_vm3, %v8286_v52 }
 0xb47   :  { %12402 = vmatmul.msk.f32.gmra.mxu2 %vm8291_vm3, %v8287_v22  ;;  %12418 = vmatmul.msk.f32.gmra.mxu3 %vm8291_vm3, %v8287_v22 }
 0xb4f   :  { %12403 = vmatmul.msk.f32.gmra.mxu2 %vm8291_vm3, %v8288_v40  ;;  %12419 = vmatmul.msk.f32.gmra.mxu3 %vm8291_vm3, %v8288_v40 }
 0xb57   :  { %12404 = vmatmul.msk.f32.gmra.mxu2 %vm8291_vm3, %v8289_v36  ;;  %12420 = vmatmul.msk.f32.gmra.mxu3 %vm8291_vm3, %v8289_v36 }
 0xb5f   :  { %12405 = vmatmul.msk.f32.gmra.mxu2 %vm8291_vm3, %v8290_v27  ;;  %12421 = vmatmul.msk.f32.gmra.mxu3 %vm8291_vm3, %v8290_v27 }
 0xb6a   :  { %v18874_v12 = vpop.f32.mrf.mxu2  ;;  %v18876_v63 = vpop.f32.mrf.mxu3 }
 0xb72   :  { %v8360_v51 = vpop.f32.mrf.mxu2  ;;  %v8425_v55 = vpop.f32.mrf.mxu3 }
 0xb7a   :  { %v18878_v59 = vpop.f32.mrf.mxu2  ;;  %v18880_v16 = vpop.f32.mrf.mxu3 }
 0xb82   :  { %v18882_v13 = vpop.f32.mrf.mxu2  ;;  %v18884_v48 = vpop.f32.mrf.mxu3 }
 0xb8a   :  { %v18886_v58 = vpop.f32.mrf.mxu2  ;;  %v18888_v9 = vpop.f32.mrf.mxu3 }
 0xb92   :  { %v18890_v42 = vpop.f32.mrf.mxu2  ;;  %v18892_v32 = vpop.f32.mrf.mxu3 }
 0xb9a   :  { %v18894_v21 = vpop.f32.mrf.mxu2  ;;  %v18896_v25 = vpop.f32.mrf.mxu3 }
 0xba2   :  { %v18898_v31 = vpop.f32.mrf.mxu2  ;;  %v18900_v24 = vpop.f32.mrf.mxu3 }
 0xbaa   :  { %v18902_v15 = vpop.f32.mrf.mxu2  ;;  %v18904_v14 = vpop.f32.mrf.mxu3 }
 0xbb2   :  { %v18906_v37 = vpop.f32.mrf.mxu2  ;;  %v18908_v43 = vpop.f32.mrf.mxu3 }
 0xbba   :  { %v18910_v41 = vpop.f32.mrf.mxu2  ;;  %v18912_v19 = vpop.f32.mrf.mxu3 }
 0xbc2   :  { %v18914_v26 = vpop.f32.mrf.mxu2  ;;  %v18916_v34 = vpop.f32.mrf.mxu3 }
 0xbca   :  { %v18918_v45 = vpop.f32.mrf.mxu2  ;;  %v18920_v61 = vpop.f32.mrf.mxu3 }
 0xbd2   :  { %v18922_v54 = vpop.f32.mrf.mxu2  ;;  %v18924_v50 = vpop.f32.mrf.mxu3 }
 0xbda   :  { %v18926_v17 = vpop.f32.mrf.mxu2  ;;  %v18928_v29 = vpop.f32.mrf.mxu3 }
 0xbe2   :  { %v18930_v1 = vpop.f32.mrf.mxu2  ;;  %v18932_v18 = vpop.f32.mrf.mxu3 }
 0xbe3   :  { %14284 = dma.done.wait [#allocation5], 32768 }
 0xbe4   :  { %14285 = vsyncadd [#allocation5], 4294934528  ;;  %v13760_v38 = vld [vmem:[#allocation4 + $0xb8] sm:$0xff]  ;;  %v13759_v7 = vld [vmem:[#allocation4 + $0xb0] sm:$0xff]  ;;  %v8476_v8 = vpack.c.bf16 %v8425_v55, %v8360_v51  ;;  %s19229_s10 = sld [smem:[#allocation41_spill]]  ;;  %vm11098_vm4 = vcmask 23552  }
 0xbe5   :  { %v13768_v35 = vld [vmem:[#allocation4 + $0xf8] sm:$0xff]  ;;  %8659 = vmatpush.bf16.msra.mxu0 %v13760_v38  ;;  %v13767_v6 = vld [vmem:[#allocation4 + $0xf0] sm:$0xff]  ;;  %v13758_v4 = vld [vmem:[#allocation4 + $0xa8] sm:$0xff] }
 0xbe6   :  { %8672 = vmatpush.bf16.msra.mxu1 %v13768_v35  ;;  %v13766_v46 = vld [vmem:[#allocation4 + $0xe8] sm:$0xff]  ;;  %v13757_v44 = vld [vmem:[#allocation4 + $0xa0] sm:$0xff]  ;;  %v13756_v28 = vld [vmem:[#allocation4 + $0x98] sm:$0xff]  ;;  %v8557_v53 = vunpack.c.l.b16 %v8476_v8  ;;  %v8558_v20 = vunpack.c.h.b16 %v8476_v8  ;;  %v8478_v8 = vpack.c.bf16 %v18884_v48, %v18882_v13 }
 0xbe7   :  { %v13765_v11 = vld [vmem:[#allocation4 + $0xe0] sm:$0xff]  ;;  %v13764_v47 = vld [vmem:[#allocation4 + $0xd8] sm:$0xff]  ;;  %v13755_v23 = vld [vmem:[#allocation4 + $0x90] sm:$0xff] }
 0xbe8   :  { %v13763_v60 = vld [vmem:[#allocation4 + $0xd0] sm:$0xff]  ;;  %v13754_v39 = vld [vmem:[#allocation4 + $0x88] sm:$0xff]  ;;  %v13792_v62 = vld [vmem:[#allocation4 + $0x1b8] sm:$0xff]  ;;  %v8559_v10 = vpack.c.b16 %v8557_v53, %v8557_v53  ;;  %v8560_v57 = vpack.c.b16 %v8558_v20, %v8558_v20 }
 0xbe9   :  { %8660 = vmatpush.bf16.msra.mxu0 %v13759_v7  ;;  %v13762_v49 = vld [vmem:[#allocation4 + $0xc8] sm:$0xff]  ;;  %v13800_v5 = vld [vmem:[#allocation4 + $0x1f8] sm:$0xff]  ;;  %9113 = vmatpush.bf16.msra.mxu2 %v13792_v62  ;;  %v13753_v3 = vld [vmem:[#allocation4 + $0x80] sm:$0xff] }
 0xbea   :  { %8673 = vmatpush.bf16.msra.mxu1 %v13767_v6  ;;  %9126 = vmatpush.bf16.msra.mxu3 %v13800_v5  ;;  %v13761_v56 = vld [vmem:[#allocation4 + $0xc0] sm:$0xff]  ;;  %v13791_v33 = vld [vmem:[#allocation4 + $0x1b0] sm:$0xff]  ;;  %v13744_v2 = vld [vmem:[#allocation4 + $0x38] sm:$0xff] }
 0xbeb   :  { %v13752_v0 = vld [vmem:[#allocation4 + $0x78] sm:$0xff]  ;;  %v13799_v30 = vld [vmem:[#allocation4 + $0x1f0] sm:$0xff]  ;;  %v13790_v52 = vld [vmem:[#allocation4 + $0x1a8] sm:$0xff] }
 0xbec   :  { %v13743_v22 = vld [vmem:[#allocation4 + $0x30] sm:$0xff]  ;;  %v13798_v36 = vld [vmem:[#allocation4 + $0x1e8] sm:$0xff]  ;;  %v13789_v27 = vld [vmem:[#allocation4 + $0x1a0] sm:$0xff] }
 0xbed   :  { %8661 = vmatpush.bf16.msra.mxu0 %v13758_v4  ;;  %9114 = vmatpush.bf16.msra.mxu2 %v13791_v33  ;;  %v13751_v40 = vld [vmem:[#allocation4 + $0x70] sm:$0xff]  ;;  %v13797_v51 = vld [vmem:[#allocation4 + $0x1e0] sm:$0xff]  ;;  %v13742_v55 = vld [vmem:[#allocation4 + $0x28] sm:$0xff]  ;;  %v9012_v33 = vunpack.c.h.b16 %v8478_v8 }
 0xbee   :  { %8674 = vmatpush.bf16.msra.mxu1 %v13766_v46  ;;  %9127 = vmatpush.bf16.msra.mxu3 %v13799_v30  ;;  %v13750_v38 = vld [vmem:[#allocation4 + $0x68] sm:$0xff]  ;;  %v13788_v35 = vld [vmem:[#allocation4 + $0x198] sm:$0xff]  ;;  %v13741_v6 = vld [vmem:[#allocation4 + $0x20] sm:$0xff] }
 0xbef   :  { %v13796_v7 = vld [vmem:[#allocation4 + $0x1d8] sm:$0xff]  ;;  %v13749_v4 = vld [vmem:[#allocation4 + $0x60] sm:$0xff]  ;;  %v13787_v46 = vld [vmem:[#allocation4 + $0x190] sm:$0xff]  ;;  %v9014_v30 = vpack.c.b16 %v9012_v33, %v9012_v33 }
 0xbf0   :  { %v13785_v62 = vld [vmem:[#allocation4 + $0x180] sm:$0xff]  ;;  %v13738_v53 = vld [vmem:[#allocation4 + $0x8] sm:$0xff]  ;;  %v13823_v48 = vld [vmem:[#allocation4 + $0x2b0] sm:$0xff] }
 0xbf1   :  { %8662 = vmatpush.bf16.msra.mxu0 %v13757_v44  ;;  %9115 = vmatpush.bf16.msra.mxu2 %v13790_v52  ;;  %v13795_v44 = vld [vmem:[#allocation4 + $0x1d0] sm:$0xff]  ;;  %v13793_v5 = vld [vmem:[#allocation4 + $0x1c0] sm:$0xff]  ;;  %v13746_v20 = vld [vmem:[#allocation4 + $0x48] sm:$0xff] }
 0xbf2   :  { %8675 = vmatpush.bf16.msra.mxu1 %v13765_v11  ;;  %9128 = vmatpush.bf16.msra.mxu3 %v13798_v36  ;;  %v13740_v11 = vld [vmem:[#allocation4 + $0x18] sm:$0xff]  ;;  %v13778_v33 = vld [vmem:[#allocation4 + $0x148] sm:$0xff] }
 0xbf3   :  { %v13784_v52 = vld [vmem:[#allocation4 + $0x178] sm:$0xff] }
 0xbf5   :  { %8663 = vmatpush.bf16.msra.mxu0 %v13756_v28  ;;  %9116 = vmatpush.bf16.msra.mxu2 %v13789_v27  ;;  %v13748_v28 = vld [vmem:[#allocation4 + $0x58] sm:$0xff]  ;;  %v13822_v27 = vld [vmem:[#allocation4 + $0x2a8] sm:$0xff] }
 0xbf6   :  { %8676 = vmatpush.bf16.msra.mxu1 %v13764_v47  ;;  %9129 = vmatpush.bf16.msra.mxu3 %v13797_v51  ;;  %v13786_v47 = vld [vmem:[#allocation4 + $0x188] sm:$0xff]  ;;  %v13775_v51 = vld [vmem:[#allocation4 + $0x130] sm:$0xff] }
 0xbf9   :  { %8664 = vmatpush.bf16.msra.mxu0 %v13755_v23  ;;  %9117 = vmatpush.bf16.msra.mxu2 %v13788_v35  ;;  %v13794_v23 = vld [vmem:[#allocation4 + $0x1c8] sm:$0xff]  ;;  %v13821_v35 = vld [vmem:[#allocation4 + $0x2a0] sm:$0xff] }
 0xbfa   :  { %8677 = vmatpush.bf16.msra.mxu1 %v13763_v60  ;;  %9130 = vmatpush.bf16.msra.mxu3 %v13796_v7  ;;  %v13739_v60 = vld [vmem:[#allocation4 + $0x10] sm:$0xff]  ;;  %v13774_v7 = vld [vmem:[#allocation4 + $0x128] sm:$0xff] }
 0xbfd   :  { %8665 = vmatpush.bf16.msra.mxu0 %v13754_v39  ;;  %9118 = vmatpush.bf16.msra.mxu2 %v13787_v46  ;;  %v13747_v39 = vld [vmem:[#allocation4 + $0x50] sm:$0xff]  ;;  %v13820_v46 = vld [vmem:[#allocation4 + $0x298] sm:$0xff] }
 0xbfe   :  { %8678 = vmatpush.bf16.msra.mxu1 %v13762_v49  ;;  %9131 = vmatpush.bf16.msra.mxu3 %v13795_v44  ;;  %v8475_v49 = vpack.c.bf16 %v18876_v63, %v18874_v12  ;;  %v13737_v12 = vld [vmem:[#allocation4] sm:$0xff] }
 0xbff   :  { %v13745_v63 = vld [vmem:[#allocation4 + $0x40] sm:$0xff] }
 0xc00   :  { %v8687_v13 = vunpack.c.h.b16 %v8475_v49  ;;  %v13773_v44 = vld [vmem:[#allocation4 + $0x120] sm:$0xff] }
 0xc01   :  { %8666 = vmatpush.bf16.msra.mxu0 %v13753_v3  ;;  %9119 = vmatpush.bf16.msra.mxu2 %v13786_v47  ;;  %v13824_v3 = vld [vmem:[#allocation4 + $0x2b8] sm:$0xff]  ;;  %v13819_v47 = vld [vmem:[#allocation4 + $0x290] sm:$0xff] }
 0xc02   :  { %8679 = vmatpush.bf16.msra.mxu1 %v13761_v56  ;;  %9132 = vmatpush.bf16.msra.mxu3 %v13794_v23  ;;  %v9011_v56 = vunpack.c.l.b16 %v8478_v8  ;;  %v8689_v36 = vpack.c.b16 %v8687_v13, %v8687_v13  ;;  %v13772_v23 = vld [vmem:[#allocation4 + $0x118] sm:$0xff]  ;;  %v13818_v8 = vld [vmem:[#allocation4 + $0x288] sm:$0xff] }
 0xc04   :  { %8667 = vmatmul.bf16.vlgmr.msra.gmra.mxu0 %v8559_v10  ;;  %v8686_v10 = vunpack.c.l.b16 %v8475_v49  ;;  %v13771_v49 = vld [vmem:[#allocation4 + $0x110] sm:$0xff] }
 0xc05   :  { %8788 = vmatpush.bf16.msrb.mxu0 %v13744_v2  ;;  %8680 = vmatmul.bf16.vlgmr.msra.gmra.mxu1 %v8560_v57  ;;  %v13832_v2 = vld [vmem:[#allocation4 + $0x2f8] sm:$0xff] }
 0xc06   :  { %8801 = vmatpush.bf16.msrb.mxu1 %v13752_v0  ;;  %9120 = vmatpush.bf16.msra.mxu2 %v13785_v62  ;;  %v9013_v0 = vpack.c.b16 %v9011_v56, %v9011_v56  ;;  %v13776_v57 = vld [vmem:[#allocation4 + $0x138] sm:$0xff]  ;;  %v13779_v62 = vld [vmem:[#allocation4 + $0x150] sm:$0xff]  ;;  %v13770_v56 = vld [vmem:[#allocation4 + $0x108] sm:$0xff] }
 0xc07   :  { %9133 = vmatpush.bf16.msra.mxu3 %v13793_v5  ;;  %v13826_v5 = vld [vmem:[#allocation4 + $0x2c8] sm:$0xff] }
 0xc09   :  { %8789 = vmatpush.bf16.msrb.mxu0 %v13743_v22  ;;  %9121 = vmatmul.bf16.vlgmr.msra.gmra.mxu2 %v9013_v0  ;;  %v13831_v22 = vld [vmem:[#allocation4 + $0x2f0] sm:$0xff] }
 0xc0a   :  { %8802 = vmatpush.bf16.msrb.mxu1 %v13751_v40  ;;  %9439 = vmatpush.bf16.msrb.mxu2 %v13824_v3  ;;  %v8688_v40 = vpack.c.b16 %v8686_v10, %v8686_v10  ;;  %v13817_v3 = vld [vmem:[#allocation4 + $0x280] sm:$0xff]  ;;  %v13864_v10 = vld [vmem:[#allocation4 + $0x3f8] sm:$0xff] }
 0xc0b   :  { %9452 = vmatpush.bf16.msrb.mxu3 %v13832_v2  ;;  %v13856_v2 = vld [vmem:[#allocation4 + $0x3b8] sm:$0xff] }
 0xc0c   :  { %9134 = vmatmul.bf16.vlgmr.msra.gmra.mxu3 %v9014_v30  ;;  %v13825_v30 = vld [vmem:[#allocation4 + $0x2c0] sm:$0xff] }
 0xc0d   :  { %8790 = vmatpush.bf16.msrb.mxu0 %v13742_v55  ;;  %v13783_v55 = vld [vmem:[#allocation4 + $0x170] sm:$0xff] }
 0xc0e   :  { %8803 = vmatpush.bf16.msrb.mxu1 %v13750_v38  ;;  %9440 = vmatpush.bf16.msrb.mxu2 %v13823_v48  ;;  %v13830_v38 = vld [vmem:[#allocation4 + $0x2e8] sm:$0xff] }
 0xc0f   :  { %9453 = vmatpush.bf16.msrb.mxu3 %v13831_v22 }
 0xc11   :  { %8791 = vmatpush.bf16.msrb.mxu0 %v13741_v6  ;;  %v13782_v6 = vld [vmem:[#allocation4 + $0x168] sm:$0xff] }
 0xc12   :  { %8804 = vmatpush.bf16.msrb.mxu1 %v13749_v4  ;;  %9441 = vmatpush.bf16.msrb.mxu2 %v13822_v27  ;;  %v13829_v4 = vld [vmem:[#allocation4 + $0x2e0] sm:$0xff]  ;;  %v13854_v27 = vld [vmem:[#allocation4 + $0x3a8] sm:$0xff] }
 0xc13   :  { %9454 = vmatpush.bf16.msrb.mxu3 %v13830_v38  ;;  %v13862_v38 = vld [vmem:[#allocation4 + $0x3e8] sm:$0xff] }
 0xc15   :  { %8792 = vmatpush.bf16.msrb.mxu0 %v13740_v11  ;;  %v13781_v11 = vld [vmem:[#allocation4 + $0x160] sm:$0xff] }
 0xc16   :  { %8805 = vmatpush.bf16.msrb.mxu1 %v13748_v28  ;;  %9442 = vmatpush.bf16.msrb.mxu2 %v13821_v35  ;;  %v13828_v28 = vld [vmem:[#allocation4 + $0x2d8] sm:$0xff]  ;;  %v13853_v35 = vld [vmem:[#allocation4 + $0x3a0] sm:$0xff] }
 0xc17   :  { %9455 = vmatpush.bf16.msrb.mxu3 %v13829_v4  ;;  %v13861_v4 = vld [vmem:[#allocation4 + $0x3e0] sm:$0xff] }
 0xc19   :  { %8793 = vmatpush.bf16.msrb.mxu0 %v13739_v60  ;;  %v13780_v60 = vld [vmem:[#allocation4 + $0x158] sm:$0xff] }
 0xc1a   :  { %8806 = vmatpush.bf16.msrb.mxu1 %v13747_v39  ;;  %9443 = vmatpush.bf16.msrb.mxu2 %v13820_v46  ;;  %v13827_v39 = vld [vmem:[#allocation4 + $0x2d0] sm:$0xff]  ;;  %v13852_v46 = vld [vmem:[#allocation4 + $0x398] sm:$0xff] }
 0xc1b   :  { %9456 = vmatpush.bf16.msrb.mxu3 %v13828_v28  ;;  %v13860_v28 = vld [vmem:[#allocation4 + $0x3d8] sm:$0xff] }
 0xc1d   :  { %8794 = vmatpush.bf16.msrb.mxu0 %v13738_v53  ;;  %v8480_v53 = vpack.c.bf16 %v18892_v32, %v18890_v42  ;;  %v13769_v42 = vld [vmem:[#allocation4 + $0x100] sm:$0xff]  ;;  %v13808_v32 = vld [vmem:[#allocation4 + $0x238] sm:$0xff] }
 0xc1e   :  { %8807 = vmatpush.bf16.msrb.mxu1 %v13746_v20  ;;  %9444 = vmatpush.bf16.msrb.mxu2 %v13819_v47  ;;  %v8477_v20 = vpack.c.bf16 %v18880_v16, %v18878_v59  ;;  %v13777_v59 = vld [vmem:[#allocation4 + $0x140] sm:$0xff]  ;;  %v13855_v16 = vld [vmem:[#allocation4 + $0x3b0] sm:$0xff] }
 0xc1f   :  { %9457 = vmatpush.bf16.msrb.mxu3 %v13827_v39  ;;  %v9337_v0 = vunpack.c.l.b16 %v8480_v53  ;;  %v13851_v47 = vld [vmem:[#allocation4 + $0x390] sm:$0xff] }
 0xc20   :  { %v8849_v48 = vunpack.c.h.b16 %v8477_v20  ;;  %v13859_v39 = vld [vmem:[#allocation4 + $0x3d0] sm:$0xff] }
 0xc21   :  { %8795 = vmatpush.bf16.msrb.mxu0 %v13737_v12  ;;  %v9339_v13 = vpack.c.b16 %v9337_v0, %v9337_v0  ;;  %v9338_v12 = vunpack.c.h.b16 %v8480_v53  ;;  %v8479_v53 = vpack.c.bf16 %v18888_v9, %v18886_v58  ;;  %v13809_v58 = vld [vmem:[#allocation4 + $0x240] sm:$0xff] }
 0xc22   :  { %8808 = vmatpush.bf16.msrb.mxu1 %v13745_v63  ;;  %9445 = vmatpush.bf16.msrb.mxu2 %v13818_v8  ;;  %v8848_v63 = vunpack.c.l.b16 %v8477_v20  ;;  %v13850_v8 = vld [vmem:[#allocation4 + $0x388] sm:$0xff] }
 0xc23   :  { %9458 = vmatpush.bf16.msrb.mxu3 %v13826_v5  ;;  %v8482_v5 = vpack.c.bf16 %v18900_v24, %v18898_v31  ;;  %v13858_v20 = vld [vmem:[#allocation4 + $0x3c8] sm:$0xff]  ;;  %v13801_v31 = vld [vmem:[#allocation4 + $0x200] sm:$0xff]  ;;  %v13887_v24 = vld [vmem:[#allocation4 + $0x4b0] sm:$0xff] }
 0xc24   :  { %8796 = vmatmul.bf16.vlgmr.msrb.gmra.mxu0 %v8688_v40  ;;  %v8850_v22 = vpack.c.b16 %v8848_v63, %v8848_v63  ;;  %v8851_v40 = vpack.c.b16 %v8849_v48, %v8849_v48  ;;  %v13840_v63 = vld [vmem:[#allocation4 + $0x338] sm:$0xff] }
 0xc25   :  { %8950 = vmatpush.bf16.msra.mxu0 %v13776_v57  ;;  %8809 = vmatmul.bf16.vlgmr.msrb.gmra.mxu1 %v8689_v36  ;;  %v13816_v57 = vld [vmem:[#allocation4 + $0x278] sm:$0xff]  ;;  %v13863_v36 = vld [vmem:[#allocation4 + $0x3f0] sm:$0xff]  ;;  %v9663_v0 = vunpack.c.l.b16 %v8482_v5  ;;  %v9664_v9 = vunpack.c.h.b16 %v8482_v5  ;;  %v13842_v5 = vld [vmem:[#allocation4 + $0x348] sm:$0xff] }
 0xc26   :  { %8963 = vmatpush.bf16.msra.mxu1 %v13784_v52  ;;  %9446 = vmatpush.bf16.msrb.mxu2 %v13817_v3  ;;  %v9340_v52 = vpack.c.b16 %v9338_v12, %v9338_v12  ;;  %v13849_v3 = vld [vmem:[#allocation4 + $0x380] sm:$0xff]  ;;  %v13848_v48 = vld [vmem:[#allocation4 + $0x378] sm:$0xff] }
 0xc27   :  { %9459 = vmatpush.bf16.msrb.mxu3 %v13825_v30  ;;  %v9665_v30 = vpack.c.b16 %v9663_v0, %v9663_v0  ;;  %v13857_v12 = vld [vmem:[#allocation4 + $0x3c0] sm:$0xff]  ;;  %v13919_v0 = vld [vmem:[#allocation4 + $0x5b0] sm:$0xff] }
 0xc29   :  { %8951 = vmatpush.bf16.msra.mxu0 %v13775_v51  ;;  %9447 = vmatmul.bf16.vlgmr.msrb.gmra.mxu2 %v9339_v13  ;;  %v13807_v51 = vld [vmem:[#allocation4 + $0x230] sm:$0xff]  ;;  %v9175_v13 = vunpack.c.h.b16 %v8479_v53 }
 0xc2a   :  { %8964 = vmatpush.bf16.msra.mxu1 %v13783_v55  ;;  %9765 = vmatpush.bf16.msra.mxu2 %v13856_v2  ;;  %v13815_v55 = vld [vmem:[#allocation4 + $0x270] sm:$0xff]  ;;  %v13888_v2 = vld [vmem:[#allocation4 + $0x4b8] sm:$0xff] }
 0xc2b   :  { %9778 = vmatpush.bf16.msra.mxu3 %v13864_v10  ;;  %v9174_v10 = vunpack.c.l.b16 %v8479_v53  ;;  %v13920_v53 = vld [vmem:[#allocation4 + $0x5b8] sm:$0xff] }
 0xc2c   :  { %9460 = vmatmul.bf16.vlgmr.msrb.gmra.mxu3 %v9340_v52  ;;  %v13839_v52 = vld [vmem:[#allocation4 + $0x330] sm:$0xff] }
 0xc2d   :  { %8952 = vmatpush.bf16.msra.mxu0 %v13774_v7  ;;  %v13806_v7 = vld [vmem:[#allocation4 + $0x228] sm:$0xff] }
 0xc2e   :  { %8965 = vmatpush.bf16.msra.mxu1 %v13782_v6  ;;  %9766 = vmatpush.bf16.msra.mxu2 %v13855_v16  ;;  %v13814_v6 = vld [vmem:[#allocation4 + $0x268] sm:$0xff]  ;;  %v9177_v16 = vpack.c.b16 %v9175_v13, %v9175_v13 }
 0xc2f   :  { %9779 = vmatpush.bf16.msra.mxu3 %v13863_v36  ;;  %v13885_v36 = vld [vmem:[#allocation4 + $0x4a0] sm:$0xff] }
 0xc31   :  { %8953 = vmatpush.bf16.msra.mxu0 %v13773_v44  ;;  %v13805_v44 = vld [vmem:[#allocation4 + $0x220] sm:$0xff] }
 0xc32   :  { %8966 = vmatpush.bf16.msra.mxu1 %v13781_v11  ;;  %9767 = vmatpush.bf16.msra.mxu2 %v13854_v27  ;;  %v13813_v11 = vld [vmem:[#allocation4 + $0x260] sm:$0xff]  ;;  %v13838_v27 = vld [vmem:[#allocation4 + $0x328] sm:$0xff] }
 0xc33   :  { %9780 = vmatpush.bf16.msra.mxu3 %v13862_v38  ;;  %v13884_v38 = vld [vmem:[#allocation4 + $0x498] sm:$0xff] }
 0xc35   :  { %8954 = vmatpush.bf16.msra.mxu0 %v13772_v23  ;;  %v13804_v23 = vld [vmem:[#allocation4 + $0x218] sm:$0xff] }
 0xc36   :  { %8967 = vmatpush.bf16.msra.mxu1 %v13780_v60  ;;  %9768 = vmatpush.bf16.msra.mxu2 %v13853_v35  ;;  %v13812_v60 = vld [vmem:[#allocation4 + $0x258] sm:$0xff]  ;;  %v13837_v35 = vld [vmem:[#allocation4 + $0x320] sm:$0xff] }
 0xc37   :  { %9781 = vmatpush.bf16.msra.mxu3 %v13861_v4  ;;  %v13883_v4 = vld [vmem:[#allocation4 + $0x490] sm:$0xff] }
 0xc39   :  { %8955 = vmatpush.bf16.msra.mxu0 %v13771_v49  ;;  %v13803_v49 = vld [vmem:[#allocation4 + $0x210] sm:$0xff] }
 0xc3a   :  { %8968 = vmatpush.bf16.msra.mxu1 %v13779_v62  ;;  %9769 = vmatpush.bf16.msra.mxu2 %v13852_v46  ;;  %v13811_v62 = vld [vmem:[#allocation4 + $0x250] sm:$0xff]  ;;  %v13836_v46 = vld [vmem:[#allocation4 + $0x318] sm:$0xff] }
 0xc3b   :  { %9782 = vmatpush.bf16.msra.mxu3 %v13860_v28  ;;  %v13882_v28 = vld [vmem:[#allocation4 + $0x488] sm:$0xff] }
 0xc3d   :  { %8956 = vmatpush.bf16.msra.mxu0 %v13770_v56  ;;  %v13802_v56 = vld [vmem:[#allocation4 + $0x208] sm:$0xff] }
 0xc3e   :  { %8969 = vmatpush.bf16.msra.mxu1 %v13778_v33  ;;  %9770 = vmatpush.bf16.msra.mxu2 %v13851_v47  ;;  %v13810_v33 = vld [vmem:[#allocation4 + $0x248] sm:$0xff]  ;;  %v13835_v47 = vld [vmem:[#allocation4 + $0x310] sm:$0xff] }
 0xc3f   :  { %9783 = vmatpush.bf16.msra.mxu3 %v13859_v39  ;;  %v8484_v39 = vpack.c.bf16 %v18908_v43, %v18906_v37  ;;  %v13833_v37 = vld [vmem:[#allocation4 + $0x300] sm:$0xff] }
 0xc40   :  { %v13841_v43 = vld [vmem:[#allocation4 + $0x340] sm:$0xff] }
 0xc41   :  { %8957 = vmatpush.bf16.msra.mxu0 %v13769_v42  ;;  %v13896_v42 = vld [vmem:[#allocation4 + $0x4f8] sm:$0xff] }
 0xc42   :  { %8970 = vmatpush.bf16.msra.mxu1 %v13777_v59  ;;  %9771 = vmatpush.bf16.msra.mxu2 %v13850_v8  ;;  %v9176_v59 = vpack.c.b16 %v9174_v10, %v9174_v10  ;;  %v8481_v8 = vpack.c.bf16 %v18896_v25, %v18894_v21  ;;  %v13872_v21 = vld [vmem:[#allocation4 + $0x438] sm:$0xff]  ;;  %v9990_v10 = vunpack.c.h.b16 %v8484_v39 }
 0xc43   :  { %9784 = vmatpush.bf16.msra.mxu3 %v13858_v20  ;;  %v9989_v20 = vunpack.c.l.b16 %v8484_v39  ;;  %v13880_v25 = vld [vmem:[#allocation4 + $0x478] sm:$0xff]  ;;  %v13866_v39 = vld [vmem:[#allocation4 + $0x408] sm:$0xff] }
 0xc44   :  { %8958 = vmatmul.bf16.vlgmr.msra.gmra.mxu0 %v8850_v22  ;;  %v13847_v22 = vld [vmem:[#allocation4 + $0x370] sm:$0xff] }
 0xc45   :  { %9276 = vmatpush.bf16.msrb.mxu0 %v13808_v32  ;;  %8971 = vmatmul.bf16.vlgmr.msra.gmra.mxu1 %v8851_v40  ;;  %v9666_v32 = vpack.c.b16 %v9664_v9, %v9664_v9  ;;  %v13895_v40 = vld [vmem:[#allocation4 + $0x4f0] sm:$0xff] }
 0xc46   :  { %9289 = vmatpush.bf16.msrb.mxu1 %v13816_v57  ;;  %9772 = vmatpush.bf16.msra.mxu2 %v13849_v3  ;;  %v13886_v57 = vld [vmem:[#allocation4 + $0x4a8] sm:$0xff]  ;;  %v13871_v9 = vld [vmem:[#allocation4 + $0x430] sm:$0xff] }
 0xc47   :  { %9785 = vmatpush.bf16.msra.mxu3 %v13857_v12  ;;  %v13890_v3 = vld [vmem:[#allocation4 + $0x4c8] sm:$0xff] }
 0xc49   :  { %9277 = vmatpush.bf16.msrb.mxu0 %v13807_v51  ;;  %9773 = vmatmul.bf16.vlgmr.msra.gmra.mxu2 %v9665_v30  ;;  %v13846_v51 = vld [vmem:[#allocation4 + $0x368] sm:$0xff]  ;;  %v13889_v30 = vld [vmem:[#allocation4 + $0x4c0] sm:$0xff] }
 0xc4a   :  { %9290 = vmatpush.bf16.msrb.mxu1 %v13815_v55  ;;  %10091 = vmatpush.bf16.msrb.mxu2 %v13888_v2  ;;  %v13894_v55 = vld [vmem:[#allocation4 + $0x4e8] sm:$0xff]  ;;  %v9501_v2 = vunpack.c.h.b16 %v8481_v8 }
 0xc4b   :  { %10104 = vmatpush.bf16.msrb.mxu3 %v13896_v42  ;;  %v13917_v42 = vld [vmem:[#allocation4 + $0x5a0] sm:$0xff] }
 0xc4c   :  { %9786 = vmatmul.bf16.vlgmr.msra.gmra.mxu3 %v9666_v32  ;;  %v9503_v12 = vpack.c.b16 %v9501_v2, %v9501_v2  ;;  %v13926_v32 = vld [vmem:[#allocation4 + $0x5e8] sm:$0xff] }
 0xc4d   :  { %9278 = vmatpush.bf16.msrb.mxu0 %v13806_v7  ;;  %v13845_v7 = vld [vmem:[#allocation4 + $0x360] sm:$0xff] }
 0xc4e   :  { %9291 = vmatpush.bf16.msrb.mxu1 %v13814_v6  ;;  %10092 = vmatpush.bf16.msrb.mxu2 %v13887_v24  ;;  %v13893_v6 = vld [vmem:[#allocation4 + $0x4e0] sm:$0xff]  ;;  %v13879_v24 = vld [vmem:[#allocation4 + $0x470] sm:$0xff] }
 0xc4f   :  { %10105 = vmatpush.bf16.msrb.mxu3 %v13895_v40 }
 0xc51   :  { %9279 = vmatpush.bf16.msrb.mxu0 %v13805_v44  ;;  %v13844_v44 = vld [vmem:[#allocation4 + $0x358] sm:$0xff] }
 0xc52   :  { %9292 = vmatpush.bf16.msrb.mxu1 %v13813_v11  ;;  %10093 = vmatpush.bf16.msrb.mxu2 %v13886_v57  ;;  %v13892_v11 = vld [vmem:[#allocation4 + $0x4d8] sm:$0xff] }
 0xc53   :  { %10106 = vmatpush.bf16.msrb.mxu3 %v13894_v55  ;;  %v13916_v57 = vld [vmem:[#allocation4 + $0x598] sm:$0xff] }
 0xc54   :  { %v13868_v55 = vld [vmem:[#allocation4 + $0x418] sm:$0xff] }
 0xc55   :  { %9280 = vmatpush.bf16.msrb.mxu0 %v13804_v23  ;;  %v13843_v23 = vld [vmem:[#allocation4 + $0x350] sm:$0xff] }
 0xc56   :  { %9293 = vmatpush.bf16.msrb.mxu1 %v13812_v60  ;;  %10094 = vmatpush.bf16.msrb.mxu2 %v13885_v36  ;;  %v13891_v60 = vld [vmem:[#allocation4 + $0x4d0] sm:$0xff] }
 0xc57   :  { %10107 = vmatpush.bf16.msrb.mxu3 %v13893_v6  ;;  %v13914_v6 = vld [vmem:[#allocation4 + $0x588] sm:$0xff] }
 0xc59   :  { %9281 = vmatpush.bf16.msrb.mxu0 %v13803_v49  ;;  %v13881_v49 = vld [vmem:[#allocation4 + $0x480] sm:$0xff] }
 0xc5a   :  { %9294 = vmatpush.bf16.msrb.mxu1 %v13811_v62  ;;  %10095 = vmatpush.bf16.msrb.mxu2 %v13884_v38  ;;  %v13834_v62 = vld [vmem:[#allocation4 + $0x308] sm:$0xff]  ;;  %v13876_v38 = vld [vmem:[#allocation4 + $0x458] sm:$0xff] }
 0xc5b   :  { %10108 = vmatpush.bf16.msrb.mxu3 %v13892_v11  ;;  %v8483_v11 = vpack.c.bf16 %v18904_v14, %v18902_v15  ;;  %v13865_v15 = vld [vmem:[#allocation4 + $0x400] sm:$0xff] }
 0xc5c   :  { %v13873_v14 = vld [vmem:[#allocation4 + $0x440] sm:$0xff] }
 0xc5d   :  { %9282 = vmatpush.bf16.msrb.mxu0 %v13802_v56  ;;  %v9991_v56 = vpack.c.b16 %v9989_v20, %v9989_v20  ;;  %v9827_v20 = vunpack.c.h.b16 %v8483_v11 }
 0xc5e   :  { %9295 = vmatpush.bf16.msrb.mxu1 %v13810_v33  ;;  %10096 = vmatpush.bf16.msrb.mxu2 %v13883_v4  ;;  %v9500_v33 = vunpack.c.l.b16 %v8481_v8  ;;  %v13867_v4 = vld [vmem:[#allocation4 + $0x410] sm:$0xff]  ;;  %v13874_v8 = vld [vmem:[#allocation4 + $0x448] sm:$0xff] }
 0xc5f   :  { %10109 = vmatpush.bf16.msrb.mxu3 %v13891_v60  ;;  %v13913_v60 = vld [vmem:[#allocation4 + $0x580] sm:$0xff]  ;;  %v9829_v2 = vpack.c.b16 %v9827_v20, %v9827_v20  ;;  %v13944_v20 = vld [vmem:[#allocation4 + $0x678] sm:$0xff] }
 0xc60   :  { %v9502_v13 = vpack.c.b16 %v9500_v33, %v9500_v33 }
 0xc61   :  { %9283 = vmatpush.bf16.msrb.mxu0 %v13801_v31  ;;  %v13928_v31 = vld [vmem:[#allocation4 + $0x5f8] sm:$0xff] }
 0xc62   :  { %9296 = vmatpush.bf16.msrb.mxu1 %v13809_v58  ;;  %10097 = vmatpush.bf16.msrb.mxu2 %v13882_v28  ;;  %v13918_v58 = vld [vmem:[#allocation4 + $0x5a8] sm:$0xff] }
 0xc63   :  { %10110 = vmatpush.bf16.msrb.mxu3 %v13890_v3  ;;  %v13904_v3 = vld [vmem:[#allocation4 + $0x538] sm:$0xff] }
 0xc64   :  { %9284 = vmatmul.bf16.vlgmr.msrb.gmra.mxu0 %v9176_v59  ;;  %v13870_v59 = vld [vmem:[#allocation4 + $0x428] sm:$0xff] }
 0xc65   :  { %9602 = vmatpush.bf16.msra.mxu0 %v13840_v63  ;;  %9297 = vmatmul.bf16.vlgmr.msrb.gmra.mxu1 %v9177_v16  ;;  %v9992_v63 = vpack.c.b16 %v9990_v10, %v9990_v10  ;;  %v13878_v16 = vld [vmem:[#allocation4 + $0x468] sm:$0xff] }
 0xc66   :  { %9615 = vmatpush.bf16.msra.mxu1 %v13848_v48  ;;  %10098 = vmatpush.bf16.msrb.mxu2 %v13881_v49  ;;  %v13927_v48 = vld [vmem:[#allocation4 + $0x5f0] sm:$0xff]  ;;  %v13952_v49 = vld [vmem:[#allocation4 + $0x6b8] sm:$0xff] }
 0xc67   :  { %10111 = vmatpush.bf16.msrb.mxu3 %v13889_v30  ;;  %v13960_v30 = vld [vmem:[#allocation4 + $0x6f8] sm:$0xff] }
 0xc69   :  { %9603 = vmatpush.bf16.msra.mxu0 %v13839_v52  ;;  %10099 = vmatmul.bf16.vlgmr.msrb.gmra.mxu2 %v9991_v56  ;;  %v13869_v52 = vld [vmem:[#allocation4 + $0x420] sm:$0xff]  ;;  %v13912_v56 = vld [vmem:[#allocation4 + $0x578] sm:$0xff] }
 0xc6a   :  { %9616 = vmatpush.bf16.msra.mxu1 %v13847_v22  ;;  %10417 = vmatpush.bf16.msra.mxu2 %v13920_v53  ;;  %v13877_v22 = vld [vmem:[#allocation4 + $0x460] sm:$0xff]  ;;  %v9826_v53 = vunpack.c.l.b16 %v8483_v11 }
 0xc6b   :  { %10430 = vmatpush.bf16.msra.mxu3 %v13928_v31  ;;  %v13910_v31 = vld [vmem:[#allocation4 + $0x568] sm:$0xff]  ;;  %v13945_v11 = vld [vmem:[#allocation4 + $0x680] sm:$0xff] }
 0xc6c   :  { %10112 = vmatmul.bf16.vlgmr.msrb.gmra.mxu3 %v9992_v63  ;;  %v9828_v33 = vpack.c.b16 %v9826_v53, %v9826_v53  ;;  %v13909_v63 = vld [vmem:[#allocation4 + $0x560] sm:$0xff]  ;;  %v13936_v53 = vld [vmem:[#allocation4 + $0x638] sm:$0xff] }
 0xc6d   :  { %9604 = vmatpush.bf16.msra.mxu0 %v13838_v27  ;;  %v13925_v27 = vld [vmem:[#allocation4 + $0x5e0] sm:$0xff] }
 0xc6e   :  { %9617 = vmatpush.bf16.msra.mxu1 %v13846_v51  ;;  %10418 = vmatpush.bf16.msra.mxu2 %v13919_v0  ;;  %v13915_v51 = vld [vmem:[#allocation4 + $0x590] sm:$0xff]  ;;  %v13950_v0 = vld [vmem:[#allocation4 + $0x6a8] sm:$0xff] }
 0xc6f   :  { %10431 = vmatpush.bf16.msra.mxu3 %v13927_v48  ;;  %v13958_v48 = vld [vmem:[#allocation4 + $0x6e8] sm:$0xff] }
 0xc71   :  { %9605 = vmatpush.bf16.msra.mxu0 %v13837_v35 }
 0xc72   :  { %9618 = vmatpush.bf16.msra.mxu1 %v13845_v7  ;;  %10419 = vmatpush.bf16.msra.mxu2 %v13918_v58  ;;  %v13924_v7 = vld [vmem:[#allocation4 + $0x5d8] sm:$0xff]  ;;  %v13959_v58 = vld [vmem:[#allocation4 + $0x6f0] sm:$0xff] }
 0xc73   :  { %10432 = vmatpush.bf16.msra.mxu3 %v13926_v32 }
 0xc75   :  { %9606 = vmatpush.bf16.msra.mxu0 %v13836_v46  ;;  %v13875_v46 = vld [vmem:[#allocation4 + $0x450] sm:$0xff] }
 0xc76   :  { %9619 = vmatpush.bf16.msra.mxu1 %v13844_v44  ;;  %10420 = vmatpush.bf16.msra.mxu2 %v13917_v42  ;;  %v8486_v44 = vpack.c.bf16 %v18916_v34, %v18914_v26  ;;  %v13922_v26 = vld [vmem:[#allocation4 + $0x5c8] sm:$0xff]  ;;  %v13951_v34 = vld [vmem:[#allocation4 + $0x6b0] sm:$0xff] }
 0xc77   :  { %10433 = vmatpush.bf16.msra.mxu3 %v13925_v27 }
 0xc79   :  { %9607 = vmatpush.bf16.msra.mxu0 %v13835_v47 }
 0xc7a   :  { %9620 = vmatpush.bf16.msra.mxu1 %v13843_v23  ;;  %10421 = vmatpush.bf16.msra.mxu2 %v13916_v57  ;;  %v13923_v23 = vld [vmem:[#allocation4 + $0x5d0] sm:$0xff]  ;;  %v13900_v57 = vld [vmem:[#allocation4 + $0x518] sm:$0xff] }
 0xc7b   :  { %10434 = vmatpush.bf16.msra.mxu3 %v13924_v7  ;;  %v13907_v7 = vld [vmem:[#allocation4 + $0x550] sm:$0xff] }
 0xc7d   :  { %9608 = vmatpush.bf16.msra.mxu0 %v13834_v62  ;;  %v10315_v62 = vunpack.c.l.b16 %v8486_v44 }
 0xc7e   :  { %9621 = vmatpush.bf16.msra.mxu1 %v13842_v5  ;;  %10422 = vmatpush.bf16.msra.mxu2 %v13915_v51 }
 0xc7f   :  { %v10317_v5 = vpack.c.b16 %v10315_v62, %v10315_v62  ;;  %10435 = vmatpush.bf16.msra.mxu3 %v13923_v23  ;;  %v13984_v23 = vld [vmem:[#allocation4 + $0x7b8] sm:$0xff] }
 0xc81   :  { %9609 = vmatpush.bf16.msra.mxu0 %v13833_v37  ;;  %v8668_v40 = vpop.f32.mrf.mxu0  ;;  %v10316_v37 = vunpack.c.h.b16 %v8486_v44 }
 0xc82   :  { %9622 = vmatpush.bf16.msra.mxu1 %v13841_v43  ;;  %v8681_v36 = vpop.f32.mrf.mxu1  ;;  %10423 = vmatpush.bf16.msra.mxu2 %v13914_v6  ;;  %v13921_v43 = vld [vmem:[#allocation4 + $0x5c0] sm:$0xff]  ;;  %v8488_v6 = vpack.c.bf16 %v18924_v50, %v18922_v54 }
 0xc83   :  { %v18950_v35 = vadd.f32 %v8681_v36, %v8668_v40  ;;  %10436 = vmatpush.bf16.msra.mxu3 %v13922_v26  ;;  %v10318_v10 = vpack.c.b16 %v10316_v37, %v10316_v37  ;;  %v13957_v36 = vld [vmem:[#allocation4 + $0x6e0] sm:$0xff]  ;;  %v13954_v26 = vld [vmem:[#allocation4 + $0x6c8] sm:$0xff]  ;;  %v13992_v37 = vld [vmem:[#allocation4 + $0x7f8] sm:$0xff] }
 0xc84   :  { %9610 = vmatmul.bf16.vlgmr.msra.gmra.mxu0 %v9502_v13  ;;  %v13949_v13 = vld [vmem:[#allocation4 + $0x6a0] sm:$0xff] }
 0xc85   :  { %9928 = vmatpush.bf16.msrb.mxu0 %v13872_v21  ;;  %9623 = vmatmul.bf16.vlgmr.msra.gmra.mxu1 %v9503_v12  ;;  %v13903_v21 = vld [vmem:[#allocation4 + $0x530] sm:$0xff]  ;;  %v13902_v12 = vld [vmem:[#allocation4 + $0x528] sm:$0xff] }
 0xc86   :  { %9941 = vmatpush.bf16.msrb.mxu1 %v13880_v25  ;;  %10424 = vmatpush.bf16.msra.mxu2 %v13913_v60  ;;  %v13911_v25 = vld [vmem:[#allocation4 + $0x570] sm:$0xff]  ;;  %v10641_v60 = vunpack.c.l.b16 %v8488_v6 }
 0xc87   :  { %10437 = vmatpush.bf16.msra.mxu3 %v13921_v43  ;;  %v13981_v43 = vld [vmem:[#allocation4 + $0x7a0] sm:$0xff] }
 0xc88   :  { %v10643_v62 = vpack.c.b16 %v10641_v60, %v10641_v60 }
 0xc89   :  { %9929 = vmatpush.bf16.msrb.mxu0 %v13871_v9  ;;  %v8670_v28 = vpop.f32.mrf.mxu0  ;;  %10425 = vmatmul.bf16.vlgmr.msra.gmra.mxu2 %v10317_v5  ;;  %v13948_v9 = vld [vmem:[#allocation4 + $0x698] sm:$0xff]  ;;  %v13983_v5 = vld [vmem:[#allocation4 + $0x7b0] sm:$0xff] }
 0xc8a   :  { %9942 = vmatpush.bf16.msrb.mxu1 %v13879_v24  ;;  %v8683_v47 = vpop.f32.mrf.mxu1  ;;  %10743 = vmatpush.bf16.msrb.mxu2 %v13952_v49  ;;  %v13901_v24 = vld [vmem:[#allocation4 + $0x520] sm:$0xff]  ;;  %v13898_v28 = vld [vmem:[#allocation4 + $0x508] sm:$0xff]  ;;  %v13955_v49 = vld [vmem:[#allocation4 + $0x6d0] sm:$0xff] }
 0xc8b   :  { %10756 = vmatpush.bf16.msrb.mxu3 %v13960_v30  ;;  %v13906_v47 = vld [vmem:[#allocation4 + $0x548] sm:$0xff]  ;;  %v13991_v30 = vld [vmem:[#allocation4 + $0x7f0] sm:$0xff] }
 0xc8c   :  { %10438 = vmatmul.bf16.vlgmr.msra.gmra.mxu3 %v10318_v10  ;;  %v13980_v10 = vld [vmem:[#allocation4 + $0x798] sm:$0xff] }
 0xc8d   :  { %9930 = vmatpush.bf16.msrb.mxu0 %v13870_v59 }
 0xc8e   :  { %9943 = vmatpush.bf16.msrb.mxu1 %v13878_v16  ;;  %10744 = vmatpush.bf16.msrb.mxu2 %v13951_v34  ;;  %v13947_v16 = vld [vmem:[#allocation4 + $0x690] sm:$0xff]  ;;  %v13982_v34 = vld [vmem:[#allocation4 + $0x7a8] sm:$0xff] }
 0xc8f   :  { %10757 = vmatpush.bf16.msrb.mxu3 %v13959_v58  ;;  %v9135_v40 = vpop.f32.mrf.mxu3 }
 0xc91   :  { %9931 = vmatpush.bf16.msrb.mxu0 %v13869_v52  ;;  %v13908_v52 = vld [vmem:[#allocation4 + $0x558] sm:$0xff] }
 0xc92   :  { %9944 = vmatpush.bf16.msrb.mxu1 %v13877_v22  ;;  %10745 = vmatpush.bf16.msrb.mxu2 %v13950_v0  ;;  %v9122_v22 = vpop.f32.mrf.mxu2  ;;  %v13934_v0 = vld [vmem:[#allocation4 + $0x628] sm:$0xff] }
 0xc93   :  { %10758 = vmatpush.bf16.msrb.mxu3 %v13958_v48  ;;  %v18957_v27 = vadd.f32 %v9135_v40, %v9122_v22  ;;  %v13932_v48 = vld [vmem:[#allocation4 + $0x618] sm:$0xff]  ;;  %v13931_v22 = vld [vmem:[#allocation4 + $0x610] sm:$0xff] }
 0xc94   :  { %v13939_v40 = vld [vmem:[#allocation4 + $0x650] sm:$0xff] }
 0xc95   :  { %9932 = vmatpush.bf16.msrb.mxu0 %v13868_v55  ;;  %v13946_v55 = vld [vmem:[#allocation4 + $0x688] sm:$0xff] }
 0xc96   :  { %9945 = vmatpush.bf16.msrb.mxu1 %v13876_v38  ;;  %10746 = vmatpush.bf16.msrb.mxu2 %v13949_v13  ;;  %v13899_v38 = vld [vmem:[#allocation4 + $0x510] sm:$0xff]  ;;  %v13933_v13 = vld [vmem:[#allocation4 + $0x620] sm:$0xff] }
 0xc97   :  { %10759 = vmatpush.bf16.msrb.mxu3 %v13957_v36 }
 0xc99   :  { %9933 = vmatpush.bf16.msrb.mxu0 %v13867_v4  ;;  %v8485_v4 = vpack.c.bf16 %v18912_v19, %v18910_v41  ;;  %v13897_v41 = vld [vmem:[#allocation4 + $0x500] sm:$0xff] }
 0xc9a   :  { %9946 = vmatpush.bf16.msrb.mxu1 %v13875_v46  ;;  %10747 = vmatpush.bf16.msrb.mxu2 %v13948_v9  ;;  %v13905_v19 = vld [vmem:[#allocation4 + $0x540] sm:$0xff] }
 0xc9b   :  { %v10152_v54 = vunpack.c.l.b16 %v8485_v4  ;;  %v10153_v50 = vunpack.c.h.b16 %v8485_v4  ;;  %v13930_v4 = vld [vmem:[#allocation4 + $0x608] sm:$0xff] }
 0xc9d   :  { %9934 = vmatpush.bf16.msrb.mxu0 %v13866_v39  ;;  %v9124_v39 = vpop.f32.mrf.mxu2 }
 0xc9e   :  { %9947 = vmatpush.bf16.msrb.mxu1 %v13874_v8  ;;  %10748 = vmatpush.bf16.msrb.mxu2 %v13947_v16  ;;  %v9137_v8 = vpop.f32.mrf.mxu3  ;;  %v13976_v39 = vld [vmem:[#allocation4 + $0x778] sm:$0xff] }
 0xc9f   :  { %v13986_v8 = vld [vmem:[#allocation4 + $0x7c8] sm:$0xff] }
 0xca1   :  { %9935 = vmatpush.bf16.msrb.mxu0 %v13865_v15  ;;  %v8797_v42 = vpop.f32.mrf.mxu0  ;;  %v10154_v15 = vpack.c.b16 %v10152_v54, %v10152_v54  ;;  %v13967_v54 = vld [vmem:[#allocation4 + $0x730] sm:$0xff] }
 0xca2   :  { %9948 = vmatpush.bf16.msrb.mxu1 %v13873_v14  ;;  %v8810_v59 = vpop.f32.mrf.mxu1  ;;  %v8798_v32 = vadd.f32 %v8797_v42, %v18950_v35  ;;  %v13956_v35 = vld [vmem:[#allocation4 + $0x6d8] sm:$0xff]  ;;  %10749 = vmatpush.bf16.msrb.mxu2 %v13946_v55  ;;  %v10155_v14 = vpack.c.b16 %v10153_v50, %v10153_v50  ;;  %v13975_v50 = vld [vmem:[#allocation4 + $0x770] sm:$0xff] }
 0xca3   :  { %10760 = vmatpush.bf16.msrb.mxu3 %v13956_v35  ;;  %v13940_v42 = vld [vmem:[#allocation4 + $0x658] sm:$0xff] }
 0xca4   :  { %9936 = vmatmul.bf16.vlgmr.msrb.gmra.mxu0 %v9828_v33  ;;  %v18959_v51 = vadd.f32 %v8810_v59, %v8798_v32  ;;  %v13953_v33 = vld [vmem:[#allocation4 + $0x6c0] sm:$0xff] }
 0xca5   :  { %10254 = vmatpush.bf16.msra.mxu0 %v13904_v3  ;;  %9949 = vmatmul.bf16.vlgmr.msrb.gmra.mxu1 %v9829_v2  ;;  %v13935_v3 = vld [vmem:[#allocation4 + $0x630] sm:$0xff]  ;;  %v10642_v2 = vunpack.c.h.b16 %v8488_v6  ;;  %v13989_v32 = vld [vmem:[#allocation4 + $0x7e0] sm:$0xff] }
 0xca6   :  { %10267 = vmatpush.bf16.msra.mxu1 %v13912_v56  ;;  %10750 = vmatpush.bf16.msrb.mxu2 %v13945_v11  ;;  %v13943_v56 = vld [vmem:[#allocation4 + $0x670] sm:$0xff] }
 0xca7   :  { %10761 = vmatpush.bf16.msrb.mxu3 %v13955_v49 }
 0xca9   :  { %10255 = vmatpush.bf16.msra.mxu0 %v13903_v21  ;;  %v8799_v46 = vpop.f32.mrf.mxu0  ;;  %10751 = vmatmul.bf16.vlgmr.msrb.gmra.mxu2 %v10643_v62  ;;  %v13942_v21 = vld [vmem:[#allocation4 + $0x668] sm:$0xff] }
 0xcaa   :  { %10268 = vmatpush.bf16.msra.mxu1 %v13911_v25  ;;  %v8812_v44 = vpop.f32.mrf.mxu1  ;;  %11069 = vmatpush.bf16.msra.mxu2 %v13984_v23  ;;  %v10644_v25 = vpack.c.b16 %v10642_v2, %v10642_v2  ;;  %v13938_v46 = vld [vmem:[#allocation4 + $0x648] sm:$0xff] }
 0xcab   :  { %10762 = vmatpush.bf16.msrb.mxu3 %v13954_v26  ;;  %v13965_v26 = vld [vmem:[#allocation4 + $0x720] sm:$0xff] }
 0xcac   :  { %v9448_v59 = vpop.f32.mrf.mxu2 }
 0xcad   :  { %10256 = vmatpush.bf16.msra.mxu0 %v13902_v12  ;;  %v13941_v12 = vld [vmem:[#allocation4 + $0x660] sm:$0xff] }
 0xcae   :  { %10269 = vmatpush.bf16.msra.mxu1 %v13910_v31  ;;  %11070 = vmatpush.bf16.msra.mxu2 %v13983_v5  ;;  %v13990_v31 = vld [vmem:[#allocation4 + $0x7e8] sm:$0xff] }
 0xcaf   :  { %10763 = vmatpush.bf16.msrb.mxu3 %v13953_v33  ;;  %v9461_v36 = vpop.f32.mrf.mxu3  ;;  %v13966_v5 = vld [vmem:[#allocation4 + $0x728] sm:$0xff]  ;;  %v13972_v33 = vld [vmem:[#allocation4 + $0x758] sm:$0xff] }
 0xcb0   :  { %v18969_v55 = vadd.f32 %v9461_v36, %v9448_v59  ;;  %v11097_v59 = vld [vmem:[%s19060_s17] sm:$0x7] }
 0xcb1   :  { %10257 = vmatpush.bf16.msra.mxu0 %v13901_v24  ;;  %v13979_v24 = vld [vmem:[#allocation4 + $0x790] sm:$0xff]  ;;  %v11096_v36 = vld [vmem:[%s19229_s10] sm:$0x3] }
 0xcb2   :  { %10270 = vmatpush.bf16.msra.mxu1 %v13909_v63  ;;  %11071 = vmatpush.bf16.msra.mxu2 %v13982_v34 }
 0xcb3   :  { %11082 = vmatpush.bf16.msra.mxu3 %v13992_v37 }
 0xcb4   :  { %10764 = vmatmul.bf16.vlgmr.msrb.gmra.mxu3 %v10644_v25  ;;  %v9450_v11 = vpop.f32.mrf.mxu2 }
 0xcb5   :  { %10258 = vmatpush.bf16.msra.mxu0 %v13900_v57  ;;  %v13978_v57 = vld [vmem:[#allocation4 + $0x788] sm:$0xff] }
 0xcb6   :  { %10271 = vmatpush.bf16.msra.mxu1 %v13908_v52  ;;  %11072 = vmatpush.bf16.msra.mxu2 %v13981_v43 }
 0xcb7   :  { %11083 = vmatpush.bf16.msra.mxu3 %v13991_v30  ;;  %v8489_v30 = vpack.c.bf16 %v18928_v29, %v18926_v17 }
 0xcb9   :  { %10259 = vmatpush.bf16.msra.mxu0 %v13899_v38  ;;  %v13988_v38 = vld [vmem:[#allocation4 + $0x7d8] sm:$0xff] }
 0xcba   :  { %10272 = vmatpush.bf16.msra.mxu1 %v13907_v7  ;;  %11073 = vmatpush.bf16.msra.mxu2 %v13980_v10  ;;  %v8490_v7 = vpack.c.bf16 %v18932_v18, %v18930_v1  ;;  %v13929_v1 = vld [vmem:[#allocation4 + $0x600] sm:$0xff] }
 0xcbb   :  { %11084 = vmatpush.bf16.msra.mxu3 %v13990_v31  ;;  %v13937_v18 = vld [vmem:[#allocation4 + $0x640] sm:$0xff]  ;;  %v13962_v31 = vld [vmem:[#allocation4 + $0x708] sm:$0xff] }
 0xcbc   :  { %v10967_v44 = vunpack.c.l.b16 %v8490_v7 }
 0xcbd   :  { %10260 = vmatpush.bf16.msra.mxu0 %v13898_v28  ;;  %v13987_v28 = vld [vmem:[#allocation4 + $0x7d0] sm:$0xff] }
 0xcbe   :  { %10273 = vmatpush.bf16.msra.mxu1 %v13906_v47  ;;  %11074 = vmatpush.bf16.msra.mxu2 %v13979_v24  ;;  %v10969_v47 = vpack.c.b16 %v10967_v44, %v10967_v44  ;;  %v10804_v24 = vunpack.c.l.b16 %v8489_v30 }
 0xcbf   :  { %11085 = vmatpush.bf16.msra.mxu3 %v13989_v32 }
 0xcc0   :  { %v10806_v17 = vpack.c.b16 %v10804_v24, %v10804_v24  ;;  %v11136_v24 = vld [vmem:[#allocation20 + $0x20] sm:$0xff] }
 0xcc1   :  { %10261 = vmatpush.bf16.msra.mxu0 %v13897_v41  ;;  %v8959_v58 = vpop.f32.mrf.mxu0  ;;  %v13985_v41 = vld [vmem:[#allocation4 + $0x7c0] sm:$0xff] }
 0xcc2   :  { %10274 = vmatpush.bf16.msra.mxu1 %v13905_v19  ;;  %v8972_v9 = vpop.f32.mrf.mxu1  ;;  %11075 = vmatpush.bf16.msra.mxu2 %v13978_v57  ;;  %v10968_v19 = vunpack.c.h.b16 %v8490_v7 }
 0xcc3   :  { %v8973_v63 = vadd.f32 %v8972_v9, %v8959_v58  ;;  %11086 = vmatpush.bf16.msra.mxu3 %v13988_v38  ;;  %v13970_v58 = vld [vmem:[#allocation4 + $0x748] sm:$0xff] }
 0xcc4   :  { %10262 = vmatmul.bf16.vlgmr.msra.gmra.mxu0 %v10154_v15  ;;  %v13973_v15 = vld [vmem:[#allocation4 + $0x760] sm:$0xff] }
 0xcc5   :  { %10580 = vmatpush.bf16.msrb.mxu0 %v13936_v53  ;;  %10275 = vmatmul.bf16.vlgmr.msra.gmra.mxu1 %v10155_v14  ;;  %v8976_v16 = vadd.f32 %v8973_v63, %v18959_v51  ;;  %v8487_v51 = vpack.c.bf16 %v18920_v61, %v18918_v45  ;;  %v9463_v45 = vpop.f32.mrf.mxu3  ;;  %v13968_v61 = vld [vmem:[#allocation4 + $0x738] sm:$0xff]  ;;  %v13974_v53 = vld [vmem:[#allocation4 + $0x768] sm:$0xff]  ;;  %v10805_v63 = vunpack.c.h.b16 %v8489_v30 }
 0xcc6   :  { %10593 = vmatpush.bf16.msrb.mxu1 %v13944_v20  ;;  %v10970_v20 = vpack.c.b16 %v10968_v19, %v10968_v19  ;;  %v11146_v19 = vld [vmem:[#allocation20 + $0x70] sm:$0xff] }
 0xcc7   :  { %v18967_v52 = vadd.f32 %v18957_v27, %v8976_v16  ;;  %v13977_v27 = vld [vmem:[#allocation4 + $0x780] sm:$0xff]  ;;  %v10478_v23 = vunpack.c.l.b16 %v8487_v51  ;;  %v10479_v60 = vunpack.c.h.b16 %v8487_v51  ;;  %11087 = vmatpush.bf16.msra.mxu3 %v13987_v28  ;;  %v10807_v29 = vpack.c.b16 %v10805_v63, %v10805_v63 }
 0xcc8   :  { %11076 = vmatpush.bf16.msra.mxu2 %v13977_v27 }
 0xcc9   :  { %10581 = vmatpush.bf16.msrb.mxu0 %v13935_v3  ;;  %v8961_v35 = vpop.f32.mrf.mxu0  ;;  %v10480_v49 = vpack.c.b16 %v10478_v23, %v10478_v23  ;;  %v10481_v62 = vpack.c.b16 %v10479_v60, %v10479_v60 }
 0xcca   :  { %10594 = vmatpush.bf16.msrb.mxu1 %v13943_v56  ;;  %v8974_v6 = vpop.f32.mrf.mxu1  ;;  %v13964_v56 = vld [vmem:[#allocation4 + $0x718] sm:$0xff] }
 0xccb   :  { %11077 = vmatmul.bf16.vlgmr.msra.gmra.mxu2 %v10969_v47  ;;  %11088 = vmatpush.bf16.msra.mxu3 %v13986_v8 }
 0xccc   :  { %v9774_v2 = vpop.f32.mrf.mxu2 }
 0xccd   :  { %10582 = vmatpush.bf16.msrb.mxu0 %v13934_v0  ;;  %v13963_v0 = vld [vmem:[#allocation4 + $0x710] sm:$0xff] }
 0xcce   :  { %10595 = vmatpush.bf16.msrb.mxu1 %v13942_v21  ;;  %v13971_v21 = vld [vmem:[#allocation4 + $0x750] sm:$0xff] }
 0xccf   :  { %11089 = vmatpush.bf16.msra.mxu3 %v13985_v41  ;;  %v9787_v25 = vpop.f32.mrf.mxu3  ;;  %v11147_v41 = vld [vmem:[#allocation20 + $0x78] sm:$0xff] }
 0xcd1   :  { %10583 = vmatpush.bf16.msrb.mxu0 %v13933_v13 }
 0xcd2   :  { %10596 = vmatpush.bf16.msrb.mxu1 %v13941_v12  ;;  %11090 = vmatmul.bf16.vlgmr.msra.gmra.mxu3 %v10970_v20  ;;  %v9788_v12 = vadd.f32 %v9787_v25, %v9774_v2 }
 0xcd4   :  { %v9776_v9 = vpop.f32.mrf.mxu2 }
 0xcd5   :  { %10584 = vmatpush.bf16.msrb.mxu0 %v13932_v48  ;;  %v13961_v48 = vld [vmem:[#allocation4 + $0x700] sm:$0xff] }
 0xcd6   :  { %10597 = vmatpush.bf16.msrb.mxu1 %v13940_v42  ;;  %v13969_v42 = vld [vmem:[#allocation4 + $0x740] sm:$0xff] }
 0xcd7   :  { %v9789_v16 = vpop.f32.mrf.mxu3 }
 0xcd8   :  { %v11133_v16 = vld [vmem:[#allocation20 + $0x8] sm:$0xff] }
 0xcd9   :  { %10585 = vmatpush.bf16.msrb.mxu0 %v13931_v22 }
 0xcda   :  { %10598 = vmatpush.bf16.msrb.mxu1 %v13939_v40 }
 0xcdd   :  { %10586 = vmatpush.bf16.msrb.mxu0 %v13930_v4 }
 0xcde   :  { %10599 = vmatpush.bf16.msrb.mxu1 %v13938_v46 }
 0xce1   :  { %10587 = vmatpush.bf16.msrb.mxu0 %v13929_v1  ;;  %v9285_v14 = vpop.f32.mrf.mxu0 }
 0xce2   :  { %10600 = vmatpush.bf16.msrb.mxu1 %v13937_v18  ;;  %v9298_v34 = vpop.f32.mrf.mxu1 }
 0xce3   :  { %v9299_v3 = vadd.f32 %v9298_v34, %v9285_v14 }
 0xce4   :  { %10588 = vmatmul.bf16.vlgmr.msrb.gmra.mxu0 %v10480_v49 }
 0xce5   :  { %10906 = vmatpush.bf16.msra.mxu0 %v13968_v61  ;;  %10601 = vmatmul.bf16.vlgmr.msrb.gmra.mxu1 %v10481_v62  ;;  %v9302_v37 = vadd.f32 %v9299_v3, %v18967_v52  ;;  %v11143_v3 = vld [vmem:[#allocation20 + $0x58] sm:$0xff] }
 0xce6   :  { %10919 = vmatpush.bf16.msra.mxu1 %v13976_v39 }
 0xce7   :  { %v9465_v43 = vadd.f32 %v18969_v55, %v9302_v37  ;;  %v11141_v37 = vld [vmem:[#allocation20 + $0x48] sm:$0xff] }
 0xce9   :  { %10907 = vmatpush.bf16.msra.mxu0 %v13967_v54  ;;  %v9287_v10 = vpop.f32.mrf.mxu0 }
 0xcea   :  { %10920 = vmatpush.bf16.msra.mxu1 %v13975_v50  ;;  %v9300_v13 = vpop.f32.mrf.mxu1  ;;  %v11139_v10 = vld [vmem:[#allocation20 + $0x38] sm:$0xff] }
 0xcec   :  { %v10100_v22 = vpop.f32.mrf.mxu2 }
 0xced   :  { %10908 = vmatpush.bf16.msra.mxu0 %v13966_v5  ;;  %v11145_v5 = vld [vmem:[#allocation20 + $0x68] sm:$0xff] }
 0xcee   :  { %10921 = vmatpush.bf16.msra.mxu1 %v13974_v53 }
 0xcef   :  { %v10113_v51 = vpop.f32.mrf.mxu3 }
 0xcf0   :  { %v10114_v6 = vadd.f32 %v10113_v51, %v10100_v22  ;;  %v11185_v22 = vld [vmem:[%s19064_s21 + $0x60] sm:$0xff] }
 0xcf1   :  { %10909 = vmatpush.bf16.msra.mxu0 %v13965_v26  ;;  %v11181_v51 = vld [vmem:[%s19064_s21 + $0x40] sm:$0xff] }
 0xcf2   :  { %10922 = vmatpush.bf16.msra.mxu1 %v13973_v15  ;;  %v11144_v15 = vld [vmem:[#allocation20 + $0x60] sm:$0xff] }
 0xcf4   :  { %v10102_v35 = vpop.f32.mrf.mxu2 }
 0xcf5   :  { %10910 = vmatpush.bf16.msra.mxu0 %v13964_v56  ;;  %v11142_v56 = vld [vmem:[#allocation20 + $0x50] sm:$0xff]  ;;  %v11180_v35 = vld [vmem:[%s19064_s21 + $0x38] sm:$0xff] }
 0xcf6   :  { %10923 = vmatpush.bf16.msra.mxu1 %v13972_v33 }
 0xcf7   :  { %v10115_v27 = vpop.f32.mrf.mxu3 }
 0xcf8   :  { %v11179_v27 = vld [vmem:[%s19064_s21 + $0x30] sm:$0xff] }
 0xcf9   :  { %10911 = vmatpush.bf16.msra.mxu0 %v13963_v0 }
 0xcfa   :  { %10924 = vmatpush.bf16.msra.mxu1 %v13971_v21 }
 0xcfd   :  { %10912 = vmatpush.bf16.msra.mxu0 %v13962_v31  ;;  %v11137_v31 = vld [vmem:[#allocation20 + $0x28] sm:$0xff] }
 0xcfe   :  { %10925 = vmatpush.bf16.msra.mxu1 %v13970_v58 }
 0xd01   :  { %10913 = vmatpush.bf16.msra.mxu0 %v13961_v48  ;;  %v9611_v32 = vpop.f32.mrf.mxu0  ;;  %v11135_v48 = vld [vmem:[#allocation20 + $0x18] sm:$0xff] }
 0xd02   :  { %10926 = vmatpush.bf16.msra.mxu1 %v13969_v42  ;;  %v9624_v57 = vpop.f32.mrf.mxu1 }
 0xd03   :  { %v9625_v52 = vadd.f32 %v9624_v57, %v9611_v32  ;;  %v11187_v32 = vld [vmem:[%s19064_s21 + $0x70] sm:$0xff] }
 0xd04   :  { %10914 = vmatmul.bf16.vlgmr.msra.gmra.mxu0 %v10806_v17  ;;  %v11132_v17 = vld [vmem:[#allocation20] sm:$0xff] }
 0xd05   :  { %13446 = vmatpush.msk.msrb.mxu0 %vm5442_vm15, %v11097_v59  ;;  %10927 = vmatmul.bf16.vlgmr.msra.gmra.mxu1 %v10807_v29  ;;  %v9628_v40 = vadd.f32 %v9625_v52, %v9465_v43  ;;  %v11140_v43 = vld [vmem:[#allocation20 + $0x40] sm:$0xff]  ;;  %v11134_v59 = vld [vmem:[#allocation20 + $0x10] sm:$0xff]  ;;  %vm11213_vm15 = vcmask 1024  }
 0xd06   :  { %11152 = vmatpush.msrb.mxu1 %v11147_v41  ;;  %v11188_v29 = vld [vmem:[%s19064_s21 + $0x78] sm:$0xff]  ;;  %v11186_v52 = vld [vmem:[%s19064_s21 + $0x68] sm:$0xff] }
 0xd07   :  { %v9791_v55 = vadd.f32 %v9788_v12, %v9628_v40  ;;  %v11138_v12 = vld [vmem:[#allocation20 + $0x30] sm:$0xff]  ;;  %11193 = vmatpush.msrb.mxu2 %v11188_v29  ;;  %v11184_v40 = vld [vmem:[%s19064_s21 + $0x58] sm:$0xff] }
 0xd08   :  { %11153 = vmatpush.msrb.mxu1 %v11146_v19 }
 0xd09   :  { %v9613_v38 = vpop.f32.mrf.mxu0  ;;  %11194 = vmatpush.msrb.mxu2 %v11187_v32 }
 0xd0a   :  { %v9626_v7 = vpop.f32.mrf.mxu1  ;;  %11154 = vmatpush.msrb.mxu1 %v11145_v5  ;;  %v14033_v5 = vld [vmem:[#allocation6] ss:$0 sm:$0xff] }
 0xd0b   :  { %11195 = vmatpush.msrb.mxu2 %v11186_v52  ;;  %v11182_v7 = vld [vmem:[%s19064_s21 + $0x48] sm:$0xff] }
 0xd0c   :  { %v10426_v11 = vpop.f32.mrf.mxu2  ;;  %11155 = vmatpush.msrb.mxu1 %v11144_v15 }
 0xd0d   :  { %11196 = vmatpush.msrb.mxu2 %v11185_v22 }
 0xd0e   :  { %11156 = vmatpush.msrb.mxu1 %v11143_v3 }
 0xd0f   :  { %v10439_v18 = vpop.f32.mrf.mxu3  ;;  %11197 = vmatpush.msrb.mxu2 %v11184_v40 }
 0xd10   :  { %v10440_v45 = vadd.f32 %v10439_v18, %v10426_v11  ;;  %11157 = vmatpush.msrb.mxu1 %v11142_v56 }
 0xd12   :  { %11158 = vmatpush.msrb.mxu1 %v11141_v37 }
 0xd14   :  { %13447 = vmatmul.msk.f32.vlgmr.msrb.gmra.mxu0 %vm11098_vm4, %v11096_v36  ;;  %v10428_v1 = vpop.f32.mrf.mxu2  ;;  %11159 = vmatpush.msrb.mxu1 %v11140_v43  ;;  %v11183_v36 = vld [vmem:[%s19064_s21 + $0x50] sm:$0xff] }
 0xd15   :  { %11198 = vmatpush.msrb.mxu2 %v11183_v36  ;;  %v14031_v1 = vld [vmem:[%s19061_s18] ss:$0 sm:$0xff] }
 0xd16   :  { %11160 = vmatpush.msrb.mxu1 %v11139_v10 }
 0xd17   :  { %v10441_v61 = vpop.f32.mrf.mxu3  ;;  %11199 = vmatpush.msrb.mxu2 %v11182_v7 }
 0xd18   :  { %11161 = vmatpush.msrb.mxu1 %v11138_v12 }
 0xd19   :  { %11200 = vmatpush.msrb.mxu2 %v11181_v51 }
 0xd1a   :  { %11162 = vmatpush.msrb.mxu1 %v11137_v31 }
 0xd1b   :  { %11201 = vmatpush.msrb.mxu2 %v11180_v35 }
 0xd1c   :  { %11163 = vmatpush.msrb.mxu1 %v11136_v24 }
 0xd1d   :  { %11202 = vmatpush.msrb.mxu2 %v11179_v27 }
 0xd1e   :  { %11164 = vmatpush.msrb.mxu1 %v11135_v48 }
 0xd20   :  { %11165 = vmatpush.msrb.mxu1 %v11134_v59 }
 0xd21   :  { %v9937_v4 = vpop.f32.mrf.mxu0 }
 0xd22   :  { %v9950_v46 = vpop.f32.mrf.mxu1  ;;  %11166 = vmatpush.msrb.mxu1 %v11133_v16 }
 0xd23   :  { %v9951_v44 = vadd.f32 %v9950_v46, %v9937_v4 }
 0xd24   :  { %11167 = vmatpush.msrb.mxu1 %v11132_v17 }
 0xd25   :  { %v9954_v28 = vadd.f32 %v9951_v44, %v9791_v55  ;;  %v11178_v44 = vld [vmem:[%s19064_s21 + $0x28] sm:$0xff] }
 0xd26   :  { %11203 = vmatpush.msrb.mxu2 %v11178_v44 }
 0xd27   :  { %v10117_v47 = vadd.f32 %v10114_v6, %v9954_v28 }
 0xd29   :  { %v9939_v23 = vpop.f32.mrf.mxu0 }
 0xd2a   :  { %v9952_v60 = vpop.f32.mrf.mxu1  ;;  %v11176_v23 = vld [vmem:[%s19064_s21 + $0x18] sm:$0xff] }
 0xd2c   :  { %v10752_v62 = vpop.f32.mrf.mxu2 }
 0xd34   :  { %v10754_v26 = vpop.f32.mrf.mxu2 }
 0xd37   :  { %v10765_v14 = vpop.f32.mrf.mxu3 }
 0xd38   :  { %v10766_v21 = vadd.f32 %v10765_v14, %v10752_v62  ;;  %v11173_v62 = vld [vmem:[%s19064_s21] sm:$0xff] }
 0xd3f   :  { %v10767_v34 = vpop.f32.mrf.mxu3 }
 0xd41   :  { %v10263_v39 = vpop.f32.mrf.mxu0 }
 0xd42   :  { %v10276_v8 = vpop.f32.mrf.mxu1 }
 0xd43   :  { %v10277_v49 = vadd.f32 %v10276_v8, %v10263_v39  ;;  %v11175_v8 = vld [vmem:[%s19064_s21 + $0x10] sm:$0xff] }
 0xd45   :  { %v10280_v54 = vadd.f32 %v10277_v49, %v10117_v47  ;;  %v11177_v47 = vld [vmem:[%s19064_s21 + $0x20] sm:$0xff]  ;;  %v11174_v49 = vld [vmem:[%s19064_s21 + $0x8] sm:$0xff] }
 0xd46   :  { %11204 = vmatpush.msrb.mxu2 %v11177_v47 }
 0xd47   :  { %v10443_v50 = vadd.f32 %v10440_v45, %v10280_v54  ;;  %v14032_v54 = vld [vmem:[%s19063_s20] ss:$0 sm:$0xff] }
 0xd48   :  { %11205 = vmatpush.msrb.mxu2 %v11176_v23 }
 0xd49   :  { %v10265_v53 = vpop.f32.mrf.mxu0 }
 0xd4a   :  { %v10278_v20 = vpop.f32.mrf.mxu1  ;;  %11206 = vmatpush.msrb.mxu2 %v11175_v8 }
 0xd4c   :  { %11207 = vmatpush.msrb.mxu2 %v11174_v49 }
 0xd4e   :  { %v11078_v25 = vpop.f32.mrf.mxu2  ;;  %11208 = vmatpush.msrb.mxu2 %v11173_v62 }
 0xd55   :  { %v11091_v42 = vpop.f32.mrf.mxu3 }
 0xd56   :  { %v11080_v63 = vpop.f32.mrf.mxu2  ;;  %v11092_v28 = vadd.f32 %v11091_v42, %v11078_v25 }
 0xd5d   :  { %v11093_v57 = vpop.f32.mrf.mxu3 }
 0xd61   :  { %v10589_v33 = vpop.f32.mrf.mxu0 }
 0xd62   :  { %v10602_v2 = vpop.f32.mrf.mxu1 }
 0xd63   :  { %v10603_v0 = vadd.f32 %v10602_v2, %v10589_v33 }
 0xd65   :  { %v10606_v30 = vadd.f32 %v10603_v0, %v10443_v50 }
 0xd67   :  { %v10769_v13 = vadd.f32 %v10766_v21, %v10606_v30 }
 0xd69   :  { %v10591_v58 = vpop.f32.mrf.mxu0 }
 0xd6a   :  { %v10604_v9 = vpop.f32.mrf.mxu1 }
 0xd81   :  { %v10915_v55 = vpop.f32.mrf.mxu0 }
 0xd82   :  { %v10928_v38 = vpop.f32.mrf.mxu1 }
 0xd83   :  { %v10929_v6 = vadd.f32 %v10928_v38, %v10915_v55 }
 0xd85   :  { %v10932_v11 = vadd.f32 %v10929_v6, %v10769_v13 }
 0xd87   :  { %v11095_v60 = vadd.f32 %v11092_v28, %v10932_v11 }
 0xd89   :  { %v10917_v4 = vpop.f32.mrf.mxu0 }
 0xd8a   :  { %v10930_v46 = vpop.f32.mrf.mxu1 }
 0xd91   :  { %v11122_v18 = vpop.f32.mrf.mxu0 }
 0xd92   :  { %v11125_v45 = vadd.f32 %v11122_v18, %v11095_v60 }
 0xd94   :  { %v11130_v61 = vadd.f32 %v14031_v1, %v11125_v45 }
 0xd96   :  { %v11131_v39 = vmax.f32 %v11130_v61, 0.0 }
 0xd98   :  { %11168 = vmatmul.f32.vlgmr.msrb.gmra.mxu1 %v11131_v39 }
 0xe15   :  { %v11169_v50 = vpop.f32.mrf.mxu1 }
 0xe16   :  { %v11170_v41 = vadd.f32 %v14032_v54, %v11169_v50 }
 0xe18   :  { %v11172_v19 = vmax.f32 %v11170_v41, 0.0 }
 0xe1a   :  { %11209 = vmatmul.f32.vlgmr.msrb.gmra.mxu2 %v11172_v19 }
 0xe9d   :  { %v11210_v53 = vpop.f32.mrf.mxu2 }
 0xe9e   :  { %v11211_v20 = vadd.f32 %v14033_v5, %v11210_v53 }
 0xea0   :  { %11214 = vst.msk [vmem:[%s19066_s23] sm:$0x3] %vm11213_vm15, %v11211_v20 }
 0xea1   :  { %11219 = vsyncpa [#allocation8], 1 }
 0xea2   :  { %11220 = vsyncpa [#allocation10], 1 }
 0xea3   :  { %11221 = vsyncpa [#allocation13], 1 }
 0xea4   :  { %11222 = vsyncpa [#allocation16], 1 }
 0xea5   :  { %11223 = vsyncpa [#allocation19], 1 }
 0xea6   :  { %11224 = vsyncmov [#allocation5] }
 0xea9   :  { %s11225_s21 = vpop.sfrf %11224 }
 0xeaa   :  { %p13448_p0 = scmp.ne.s32.totalorder %s11225_s21, 0 }
 0xeac   :  { %11229 = shalt.err (%p13448_p0)  }

</bundles_post_ra>
